<compile_context>
chip_gen: v7x
topology: tpu7x:2x2x1
jax: 0.10.0
libtpu: 0.0.40
codegen_flags: <defaults>
</compile_context>

<pallas_src>
import functools
import math

import jax
import jax.numpy as jnp
from jax.experimental import pallas as pl
from jax.experimental.pallas import tpu as pltpu


def _largest_divisor_leq(n, cap):
    cap = max(1, min(n, cap))
    for d in range(cap, 0, -1):
        if n % d == 0:
            return d
    return 1


# -----------------------------------------------------------------------------
# Pallas kernel: processes TI rows of the pair representation per grid step.
# -----------------------------------------------------------------------------
def _tri_att_kernel(
    x_ref,       # (TI, L, C)   raw pair_embed rows (LayerNorm done in-kernel)
    bias_ref,    # (H, L, L)    pair bias (f32 or bf16)
    ln_w_ref,    # (1, C)
    ln_b_ref,    # (1, C)
    wqkvg_ref,   # (C, 4*HD)    [Wq*norm_factor | Wk | Wv | Wg]
    bg_ref,      # (1, HD)
    wo_ref,      # (HD, C)
    bo_ref,      # (1, C)
    out_ref,     # (TI, L, C)
    qkv_ref,     # scratch (M, 3*HD) mm_dtype
    g_ref,       # scratch (M, HD)   f32
    og_ref,      # scratch (M, HD)   f32 — per-head (ungated) outputs, lane-concat
    *,
    no_heads: int,
    hidden_dim: int,
    mm_dtype,
):
    TI, L, C = x_ref.shape
    D = hidden_dim
    HD = no_heads * D
    M = TI * L

    # ---- LayerNorm (f32). Leading-dim merge reshape is layout-free. --------
    x = x_ref[...].reshape(M, C)
    mu = jnp.mean(x, axis=-1, keepdims=True)
    xc = x - mu
    var = jnp.mean(xc * xc, axis=-1, keepdims=True)
    zn = xc * jax.lax.rsqrt(var + 1e-5) * ln_w_ref[...] + ln_b_ref[...]

    # ---- Fused QKVG projection: one (M, C) x (C, 4*HD) MXU matmul ----------
    proj = jnp.dot(zn.astype(mm_dtype), wqkvg_ref[...],
                   preferred_element_type=jnp.float32)
    qkv_ref[...] = proj[:, :3 * HD].astype(mm_dtype)
    g_ref[...] = jax.nn.sigmoid(proj[:, 3 * HD:] + bg_ref[...])   # f32 epilogue

    # ---- Per-head attention, batched over the TI rows of this block. -------
    # Static loop: per-head lane offsets into the scratch refs must be static;
    # H is small, so this is the fully-unrolled fori_loop anyway, and per-head
    # temporaries die at the og_ref store below.
    for h in range(no_heads):
        lo, hi = h * D, (h + 1) * D
        qh = qkv_ref[:, lo:hi].reshape(TI, L, D)                 # nf folded in Wq
        kh = qkv_ref[:, HD + lo:HD + hi].reshape(TI, L, D)
        vh = qkv_ref[:, 2 * HD + lo:2 * HD + hi].reshape(TI, L, D)

        # logits[t, j, k] = q[t, j] . k[t, k] + pair_bias[h, j, k]
        logits = jnp.einsum("tjd,tkd->tjk", qh, kh,
                            preferred_element_type=jnp.float32)
        logits = logits + bias_ref[h][None, :, :].astype(jnp.float32)

        # Stable softmax over k: exp in the matmul dtype, f32 row-sum,
        # normalization applied after the PV matmul, reciprocal on the EUP.
        m = jnp.max(logits, axis=-1, keepdims=True)
        p = jnp.exp((logits - m).astype(mm_dtype))
        denom = jnp.sum(p.astype(jnp.float32), axis=-1, keepdims=True)
        oh = jnp.einsum("tjk,tkd->tjd", p, vh,
                        preferred_element_type=jnp.float32)
        oh = oh * pl.reciprocal(denom, approx=True)
        og_ref[:, lo:hi] = oh.reshape(M, D)

    # ---- Gate + concat-then-project: ONE (M, HD) x (HD, C) matmul ----------
    gated = (og_ref[...] * g_ref[...]).astype(mm_dtype)
    out = jnp.dot(gated, wo_ref[...], preferred_element_type=jnp.float32)
    out_ref[...] = (out + bo_ref[...]).reshape(TI, L, C)


# -----------------------------------------------------------------------------
# Wrapper
# -----------------------------------------------------------------------------
@functools.partial(
    jax.jit,
    static_argnames=("no_heads", "hidden_dim", "row_tile", "use_bf16_matmul",
                     "vmem_budget_bytes"))
def triangle_att_start(pair_embed, params, *, no_heads, hidden_dim,
                       row_tile=None, use_bf16_matmul=True,
                       vmem_budget_bytes=48 * 1024 * 1024):
    """pair_embed: (L, L, C) float32 -> (L, L, C) float32."""
    L, L2, C = pair_embed.shape
    assert L2 == L
    HD = no_heads * hidden_dim
    norm_factor = 1.0 / math.sqrt(hidden_dim)

    mm_dtype = jnp.bfloat16 if use_bf16_matmul else jnp.float32
    bias_dtype = jnp.bfloat16 if use_bf16_matmul else jnp.float32
    mm_isz = jnp.dtype(mm_dtype).itemsize
    bias_isz = jnp.dtype(bias_dtype).itemsize

    x = pair_embed.astype(jnp.float32)

    # ---- pair bias (needs the FULL LayerNormed (L, L) rep, so it cannot be
    # computed inside the row-blocked kernel; f32 compute, reduced store). ---
    mu = jnp.mean(x, axis=-1, keepdims=True)
    var = jnp.mean((x - mu) ** 2, axis=-1, keepdims=True)
    zn_full = (x - mu) * jax.lax.rsqrt(var + 1e-5) * params["ln_w"] + params["ln_b"]
    pair_bias = jnp.einsum("jkc,ch->hjk", zn_full, params["wb"],
                           precision=jax.lax.Precision.HIGHEST
                           ).astype(bias_dtype)                       # (H, L, L)

    # ---- fused projection weight [Wq*norm_factor | Wk | Wv | Wg] -----------
    wqkvg = jnp.concatenate(
        [params["wq"] * norm_factor, params["wk"], params["wv"], params["wg"]],
        axis=1).astype(mm_dtype)                                      # (C, 4*HD)
    wo = params["wo"].astype(mm_dtype)                                # (HD, C)

    # ---- row tile: target TI*L >= 256 rows per step within the VMEM budget -
    def _est(t):
        m = t * L
        io = 2 * 2 * t * L * C * 4                        # x + out, double-buffered
        resident = (no_heads * L * L * bias_isz           # bias, single-buffered
                    + (C * 4 * HD + HD * C) * mm_isz      # weights, single-buffered
                    + (3 * C + HD) * 4)
        scratch = m * (3 * HD * mm_isz + 2 * HD * 4)      # qkv + gate + per-head out
        interm = m * (C + 4 * HD) * 4 + m * L * (4 + 4 + mm_isz)  # zn/proj, logits/p
        return io + resident + scratch + interm

    if row_tile is None:
        target_rows = 256                                 # fills the 256-wide MXU
        ti = _largest_divisor_leq(L, max(1, -(-target_rows // L)))
        while ti > 1 and _est(ti) > (vmem_budget_bytes * 3) // 4:
            ti = _largest_divisor_leq(L, ti - 1)
        row_tile = ti
    TI = row_tile
    assert L % TI == 0
    M = TI * L

    def _const(shape):
        # Constant-index inputs: same block every grid step -> single-buffer.
        try:
            return pl.BlockSpec(shape, lambda i: (0,) * len(shape),
                                pipeline_mode=pl.Buffered(buffer_count=1))
        except Exception:   # older jax without pipeline_mode / Buffered(1)
            return pl.BlockSpec(shape, lambda i: (0,) * len(shape))

    grid_spec = pltpu.PrefetchScalarGridSpec(
        num_scalar_prefetch=0,
        grid=(L // TI,),
        in_specs=[
            pl.BlockSpec((TI, L, C), lambda i: (i, 0, 0)),   # pair rows (dbl-buffered)
            _const((no_heads, L, L)),                        # pair bias
            _const((1, C)),                                  # ln_w
            _const((1, C)),                                  # ln_b
            _const((C, 4 * HD)),                             # fused Wqkvg
            _const((1, HD)),                                 # bg
            _const((HD, C)),                                 # Wo
            _const((1, C)),                                  # bo
        ],
        out_specs=pl.BlockSpec((TI, L, C), lambda i: (i, 0, 0)),
        scratch_shapes=[
            pltpu.VMEM((M, 3 * HD), mm_dtype),               # q|k|v
            pltpu.VMEM((M, HD), jnp.float32),                # gate
            pltpu.VMEM((M, HD), jnp.float32),                # per-head outputs
        ],
    )

    flops = (2 * L * L * C * 4 * HD                       # fused projection
             + 2 * no_heads * 2 * L * L * L * hidden_dim  # QK^T + PV
             + 2 * L * L * HD * C)                        # output projection
    transcendentals = no_heads * L * L * L + L * L * (HD + no_heads + 1)
    bytes_accessed = (2 * L * L * C * 4                   # x in + out
                      + no_heads * L * L * bias_isz
                      + (C * 4 * HD + HD * C) * mm_isz)

    kernel = functools.partial(_tri_att_kernel, no_heads=no_heads,
                               hidden_dim=hidden_dim, mm_dtype=mm_dtype)

    out = pl.pallas_call(
        kernel,
        out_shape=jax.ShapeDtypeStruct((L, L, C), jnp.float32),
        grid_spec=grid_spec,
        compiler_params=pltpu.CompilerParams(
            dimension_semantics=("parallel",),
            vmem_limit_bytes=int(vmem_budget_bytes)),
        cost_estimate=pl.CostEstimate(flops=int(flops),
                                      transcendentals=int(transcendentals),
                                      bytes_accessed=int(bytes_accessed)),
    )(
        x,
        pair_bias,
        params["ln_w"].reshape(1, C).astype(jnp.float32),
        params["ln_b"].reshape(1, C).astype(jnp.float32),
        wqkvg,
        params["bg"].reshape(1, HD).astype(jnp.float32),
        wo,
        params["bo"].reshape(1, C).astype(jnp.float32),
    )
    return out


# -----------------------------------------------------------------------------
# Pure-JAX reference (mirrors the PyTorch forward).
# -----------------------------------------------------------------------------
def triangle_att_start_ref(pair_embed, params, *, no_heads, hidden_dim):
    L, _, C = pair_embed.shape
    norm_factor = 1.0 / math.sqrt(hidden_dim)
    hp = jax.lax.Precision.HIGHEST

    x = pair_embed.astype(jnp.float32)
    mu = jnp.mean(x, axis=-1, keepdims=True)
    var = jnp.mean((x - mu) ** 2, axis=-1, keepdims=True)
    zn = (x - mu) / jnp.sqrt(var + 1e-5) * params["ln_w"] + params["ln_b"]

    q = (zn @ params["wq"]).reshape(L, L, no_heads, hidden_dim) * norm_factor
    k = (zn @ params["wk"]).reshape(L, L, no_heads, hidden_dim)
    v = (zn @ params["wv"]).reshape(L, L, no_heads, hidden_dim)
    pair_bias = jnp.einsum("jkc,ch->hjk", zn, params["wb"], precision=hp)[:, None]
    attn = jnp.einsum("ijhd,ikhd->hijk", q, k, precision=hp) + pair_bias
    attn = jax.nn.softmax(attn, axis=-1)
    gate = jax.nn.sigmoid(zn @ params["wg"] + params["bg"]).reshape(
        L, L, no_heads, hidden_dim)
    out = jnp.einsum("hijk,ikhd->ijhd", attn, v, precision=hp) * gate
    out = out.reshape(L, L, no_heads * hidden_dim)
    return out @ params["wo"] + params["bo"]


# -----------------------------------------------------------------------------
# Main
# -----------------------------------------------------------------------------
if __name__ == "__main__":
    # Small, forward-consistent shapes.
    L = 16            # sequence length (pair rep is L x L)
    pair_dim = 32     # global_config['pair_dim']
    no_heads = 4      # tri_att_start_config['no_heads']
    hidden_dim = 16   # tri_att_start_config['hidden_dim']
    HD = no_heads * hidden_dim

    key = jax.random.PRNGKey(0)
    ks = jax.random.split(key, 9)
    scale = 0.05
    params = {
        "ln_w": jnp.ones((pair_dim,), jnp.float32),
        "ln_b": jnp.zeros((pair_dim,), jnp.float32),
        "wq": scale * jax.random.normal(ks[0], (pair_dim, HD), jnp.float32),
        "wk": scale * jax.random.normal(ks[1], (pair_dim, HD), jnp.float32),
        "wv": scale * jax.random.normal(ks[2], (pair_dim, HD), jnp.float32),
        "wb": scale * jax.random.normal(ks[3], (pair_dim, no_heads), jnp.float32),
        "wg": scale * jax.random.normal(ks[4], (pair_dim, HD), jnp.float32),
        "bg": scale * jax.random.normal(ks[5], (HD,), jnp.float32),
        "wo": scale * jax.random.normal(ks[6], (HD, pair_dim), jnp.float32),
        "bo": scale * jax.random.normal(ks[7], (pair_dim,), jnp.float32),
    }
    pair_embed = jax.random.normal(ks[8], (L, L, pair_dim), jnp.float32)

    ref = jax.block_until_ready(triangle_att_start_ref(
        pair_embed, params, no_heads=no_heads, hidden_dim=hidden_dim))

    # f32 MXU-operand path (tight tolerance).
    out_f32 = jax.block_until_ready(triangle_att_start(
        pair_embed, params, no_heads=no_heads, hidden_dim=hidden_dim,
        use_bf16_matmul=False))
    assert out_f32.shape == (L, L, pair_dim)
    assert jnp.allclose(out_f32, ref, rtol=1e-2, atol=5e-3), (
        float(jnp.max(jnp.abs(out_f32 - ref))))

    # bf16 MXU-operand path (default; v6e/v7x rates), f32 accumulation.
    out_bf16 = jax.block_until_ready(triangle_att_start(
        pair_embed, params, no_heads=no_heads, hidden_dim=hidden_dim,
        use_bf16_matmul=True))
    assert out_bf16.shape == (L, L, pair_dim)
    assert jnp.allclose(out_bf16, ref, rtol=2e-2, atol=2e-2), (
        float(jnp.max(jnp.abs(out_bf16 - ref))))

    print("KERNEL_OK")
</pallas_src>

<mosaic_0001>
module attributes {stable_mosaic.version = 11 : i64} {
  func.func @_tri_att_kernel(%arg0: i32, %arg1: memref<16x16x32xf32, #tpu.memory_space<vmem>>, %arg2: memref<4x16x16xf32, #tpu.memory_space<vmem>>, %arg3: memref<1x32xf32, #tpu.memory_space<vmem>>, %arg4: memref<1x32xf32, #tpu.memory_space<vmem>>, %arg5: memref<32x256xf32, #tpu.memory_space<vmem>>, %arg6: memref<1x64xf32, #tpu.memory_space<vmem>>, %arg7: memref<64x32xf32, #tpu.memory_space<vmem>>, %arg8: memref<1x32xf32, #tpu.memory_space<vmem>>, %arg9: memref<16x16x32xf32, #tpu.memory_space<vmem>>, %arg10: memref<256x192xf32, #tpu.memory_space<vmem>>, %arg11: memref<256x64xf32, #tpu.memory_space<vmem>>, %arg12: memref<256x64xf32, #tpu.memory_space<vmem>>) attributes {dimension_semantics = [#tpu.dimension_semantics<parallel>], iteration_bounds = array<i64: 1>, scalar_prefetch = 0 : i64, scratch_operands = 3 : i64, tpu.core_type = #tpu.core_type<tc>, window_params = [{transform_indices = @transform_0, window_bounds = array<i64: 16, 16, 32>}, {pipeline_mode = #tpu.pipeline_mode<synchronous>, transform_indices = @transform_1, window_bounds = array<i64: 4, 16, 16>}, {pipeline_mode = #tpu.pipeline_mode<synchronous>, transform_indices = @transform_2, window_bounds = array<i64: 1, 32>}, {pipeline_mode = #tpu.pipeline_mode<synchronous>, transform_indices = @transform_3, window_bounds = array<i64: 1, 32>}, {pipeline_mode = #tpu.pipeline_mode<synchronous>, transform_indices = @transform_4, window_bounds = array<i64: 32, 256>}, {pipeline_mode = #tpu.pipeline_mode<synchronous>, transform_indices = @transform_5, window_bounds = array<i64: 1, 64>}, {pipeline_mode = #tpu.pipeline_mode<synchronous>, transform_indices = @transform_6, window_bounds = array<i64: 64, 32>}, {pipeline_mode = #tpu.pipeline_mode<synchronous>, transform_indices = @transform_7, window_bounds = array<i64: 1, 32>}, {transform_indices = @transform_8, window_bounds = array<i64: 16, 16, 32>}]} {
    %c0 = arith.constant 0 : index
    %c0_0 = arith.constant 0 : index
    %c0_1 = arith.constant 0 : index
    %0 = vector.load %arg1[%c0, %c0_0, %c0_1] : memref<16x16x32xf32, #tpu.memory_space<vmem>>, vector<16x16x32xf32>
    %1 = vector.shape_cast %0 : vector<16x16x32xf32> to vector<256x32xf32>
    %cst = arith.constant dense<0.000000e+00> : vector<256xf32>
    %2 = vector.multi_reduction <add>, %1, %cst [1] : vector<256x32xf32> to vector<256xf32>
    %3 = vector.shape_cast %2 : vector<256xf32> to vector<256x1xf32>
    %cst_2 = arith.constant 3.200000e+01 : f32
    %4 = vector.broadcast %cst_2 : f32 to vector<256x1xf32>
    %5 = arith.divf %3, %4 : vector<256x1xf32>
    %6 = vector.broadcast %5 : vector<256x1xf32> to vector<256x32xf32>
    %7 = arith.subf %1, %6 : vector<256x32xf32>
    %8 = arith.mulf %7, %7 : vector<256x32xf32>
    %cst_3 = arith.constant dense<0.000000e+00> : vector<256xf32>
    %9 = vector.multi_reduction <add>, %8, %cst_3 [1] : vector<256x32xf32> to vector<256xf32>
    %10 = vector.shape_cast %9 : vector<256xf32> to vector<256x1xf32>
    %cst_4 = arith.constant 3.200000e+01 : f32
    %11 = vector.broadcast %cst_4 : f32 to vector<256x1xf32>
    %12 = arith.divf %10, %11 : vector<256x1xf32>
    %cst_5 = arith.constant 9.99999974E-6 : f32
    %13 = vector.broadcast %cst_5 : f32 to vector<256x1xf32>
    %14 = arith.addf %12, %13 : vector<256x1xf32>
    %15 = math.rsqrt %14 : vector<256x1xf32>
    %16 = vector.broadcast %15 : vector<256x1xf32> to vector<256x32xf32>
    %17 = arith.mulf %7, %16 : vector<256x32xf32>
    %c0_6 = arith.constant 0 : index
    %c0_7 = arith.constant 0 : index
    %18 = vector.load %arg3[%c0_6, %c0_7] : memref<1x32xf32, #tpu.memory_space<vmem>>, vector<1x32xf32>
    %19 = vector.broadcast %18 : vector<1x32xf32> to vector<256x32xf32>
    %20 = arith.mulf %17, %19 : vector<256x32xf32>
    %c0_8 = arith.constant 0 : index
    %c0_9 = arith.constant 0 : index
    %21 = vector.load %arg4[%c0_8, %c0_9] : memref<1x32xf32, #tpu.memory_space<vmem>>, vector<1x32xf32>
    %22 = vector.broadcast %21 : vector<1x32xf32> to vector<256x32xf32>
    %23 = arith.addf %20, %22 : vector<256x32xf32>
    %c0_10 = arith.constant 0 : index
    %c0_11 = arith.constant 0 : index
    %24 = vector.load %arg5[%c0_10, %c0_11] : memref<32x256xf32, #tpu.memory_space<vmem>>, vector<32x256xf32>
    %cst_12 = arith.constant dense<0.000000e+00> : vector<256x256xf32>
    %25 = tpu.matmul %23, %24, %cst_12 {dimension_numbers = #tpu.dot_dimension_numbers<[1], [0], [0], [1], [0, 0, 1, 1], [], []>} : vector<256x32xf32>, vector<32x256xf32>, vector<256x256xf32> -> vector<256x256xf32>
    %26 = vector.extract_strided_slice %25 {offsets = [0, 0], sizes = [256, 192], strides = [1, 1]} : vector<256x256xf32> to vector<256x192xf32>
    %c0_13 = arith.constant 0 : index
    %c0_14 = arith.constant 0 : index
    %27 = vector.load %arg10[%c0_13, %c0_14] : memref<256x192xf32, #tpu.memory_space<vmem>>, vector<256x192xf32>
    tpu.vector_store %arg10[%c0_13, %c0_14], %26 {strides = array<i32>} : memref<256x192xf32, #tpu.memory_space<vmem>>, vector<256x192xf32>,
    %28 = vector.extract_strided_slice %25 {offsets = [0, 192], sizes = [256, 64], strides = [1, 1]} : vector<256x256xf32> to vector<256x64xf32>
    %c0_15 = arith.constant 0 : index
    %c0_16 = arith.constant 0 : index
    %29 = vector.load %arg6[%c0_15, %c0_16] : memref<1x64xf32, #tpu.memory_space<vmem>>, vector<1x64xf32>
    %30 = vector.broadcast %29 : vector<1x64xf32> to vector<256x64xf32>
    %31 = arith.addf %28, %30 : vector<256x64xf32>
    %32 = arith.negf %31 : vector<256x64xf32>
    %33 = math.exp %32 : vector<256x64xf32>
    %cst_17 = arith.constant 1.000000e+00 : f32
    %34 = vector.broadcast %cst_17 : f32 to vector<256x64xf32>
    %35 = arith.addf %34, %33 : vector<256x64xf32>
    %36 = arith.divf %34, %35 : vector<256x64xf32>
    %c0_18 = arith.constant 0 : index
    %c0_19 = arith.constant 0 : index
    %37 = vector.load %arg11[%c0_18, %c0_19] : memref<256x64xf32, #tpu.memory_space<vmem>>, vector<256x64xf32>
    tpu.vector_store %arg11[%c0_18, %c0_19], %36 {strides = array<i32>} : memref<256x64xf32, #tpu.memory_space<vmem>>, vector<256x64xf32>,
    %c0_20 = arith.constant 0 : index
    %c0_21 = arith.constant 0 : index
    %38 = vector.load %arg10[%c0_20, %c0_21] : memref<256x192xf32, #tpu.memory_space<vmem>>, vector<256x16xf32>
    %39 = vector.shape_cast %38 : vector<256x16xf32> to vector<16x16x16xf32>
    %c0_22 = arith.constant 0 : index
    %c64 = arith.constant 64 : index
    %40 = vector.load %arg10[%c0_22, %c64] : memref<256x192xf32, #tpu.memory_space<vmem>>, vector<256x16xf32>
    %41 = vector.shape_cast %40 : vector<256x16xf32> to vector<16x16x16xf32>
    %c0_23 = arith.constant 0 : index
    %c128 = arith.constant 128 : index
    %42 = vector.load %arg10[%c0_23, %c128] : memref<256x192xf32, #tpu.memory_space<vmem>>, vector<256x16xf32>
    %43 = vector.shape_cast %42 : vector<256x16xf32> to vector<16x16x16xf32>
    "tpu.trace_start"() <{level = 10 : i32, message = "tjd,tkd->tjk"}> : () -> ()
    %cst_24 = arith.constant dense<0.000000e+00> : vector<16x16x16xf32>
    %44 = tpu.matmul %39, %41, %cst_24 {dimension_numbers = #tpu.dot_dimension_numbers<[2], [2], [1], [1], [0, 0, 0, 1, 1, 1], [0], [0]>} : vector<16x16x16xf32>, vector<16x16x16xf32>, vector<16x16x16xf32> -> vector<16x16x16xf32>
    "tpu.trace_stop"() : () -> ()
    %c0_25 = arith.constant 0 : index
    %c0_26 = arith.constant 0 : index
    %c0_27 = arith.constant 0 : index
    %45 = vector.load %arg2[%c0_25, %c0_26, %c0_27] : memref<4x16x16xf32, #tpu.memory_space<vmem>>, vector<1x16x16xf32>
    %46 = vector.shape_cast %45 : vector<1x16x16xf32> to vector<16x16xf32>
    %47 = vector.shape_cast %46 : vector<16x16xf32> to vector<1x16x16xf32>
    %48 = vector.broadcast %47 : vector<1x16x16xf32> to vector<16x16x16xf32>
    %49 = arith.addf %44, %48 : vector<16x16x16xf32>
    %cst_28 = arith.constant dense<0xFF800000> : vector<16x16xf32>
    %50 = vector.multi_reduction <maximumf>, %49, %cst_28 [2] : vector<16x16x16xf32> to vector<16x16xf32>
    %51 = vector.shape_cast %50 : vector<16x16xf32> to vector<16x16x1xf32>
    %52 = vector.broadcast %51 : vector<16x16x1xf32> to vector<16x16x16xf32>
    %53 = arith.subf %49, %52 : vector<16x16x16xf32>
    %54 = math.exp %53 : vector<16x16x16xf32>
    %cst_29 = arith.constant dense<0.000000e+00> : vector<16x16xf32>
    %55 = vector.multi_reduction <add>, %54, %cst_29 [2] : vector<16x16x16xf32> to vector<16x16xf32>
    %56 = vector.shape_cast %55 : vector<16x16xf32> to vector<16x16x1xf32>
    "tpu.trace_start"() <{level = 10 : i32, message = "tjk,tkd->tjd"}> : () -> ()
    %cst_30 = arith.constant dense<0.000000e+00> : vector<16x16x16xf32>
    %57 = tpu.matmul %54, %43, %cst_30 {dimension_numbers = #tpu.dot_dimension_numbers<[2], [1], [1], [2], [0, 0, 0, 1, 1, 2], [0], [0]>} : vector<16x16x16xf32>, vector<16x16x16xf32>, vector<16x16x16xf32> -> vector<16x16x16xf32>
    "tpu.trace_stop"() : () -> ()
    %58 = tpu.reciprocal %56 {approx = true} : vector<16x16x1xf32> -> vector<16x16x1xf32>
    %59 = vector.broadcast %58 : vector<16x16x1xf32> to vector<16x16x16xf32>
    %60 = arith.mulf %57, %59 : vector<16x16x16xf32>
    %61 = vector.shape_cast %60 : vector<16x16x16xf32> to vector<256x16xf32>
    %c0_31 = arith.constant 0 : index
    %c0_32 = arith.constant 0 : index
    %62 = vector.load %arg12[%c0_31, %c0_32] : memref<256x64xf32, #tpu.memory_space<vmem>>, vector<256x16xf32>
    tpu.vector_store %arg12[%c0_31, %c0_32], %61 {strides = array<i32>} : memref<256x64xf32, #tpu.memory_space<vmem>>, vector<256x16xf32>,
    %c0_33 = arith.constant 0 : index
    %c16 = arith.constant 16 : index
    %63 = vector.load %arg10[%c0_33, %c16] : memref<256x192xf32, #tpu.memory_space<vmem>>, vector<256x16xf32>
    %64 = vector.shape_cast %63 : vector<256x16xf32> to vector<16x16x16xf32>
    %c0_34 = arith.constant 0 : index
    %c80 = arith.constant 80 : index
    %65 = vector.load %arg10[%c0_34, %c80] : memref<256x192xf32, #tpu.memory_space<vmem>>, vector<256x16xf32>
    %66 = vector.shape_cast %65 : vector<256x16xf32> to vector<16x16x16xf32>
    %c0_35 = arith.constant 0 : index
    %c144 = arith.constant 144 : index
    %67 = vector.load %arg10[%c0_35, %c144] : memref<256x192xf32, #tpu.memory_space<vmem>>, vector<256x16xf32>
    %68 = vector.shape_cast %67 : vector<256x16xf32> to vector<16x16x16xf32>
    "tpu.trace_start"() <{level = 10 : i32, message = "tjd,tkd->tjk"}> : () -> ()
    %cst_36 = arith.constant dense<0.000000e+00> : vector<16x16x16xf32>
    %69 = tpu.matmul %64, %66, %cst_36 {dimension_numbers = #tpu.dot_dimension_numbers<[2], [2], [1], [1], [0, 0, 0, 1, 1, 1], [0], [0]>} : vector<16x16x16xf32>, vector<16x16x16xf32>, vector<16x16x16xf32> -> vector<16x16x16xf32>
    "tpu.trace_stop"() : () -> ()
    %c1 = arith.constant 1 : index
    %c0_37 = arith.constant 0 : index
    %c0_38 = arith.constant 0 : index
    %70 = vector.load %arg2[%c1, %c0_37, %c0_38] : memref<4x16x16xf32, #tpu.memory_space<vmem>>, vector<1x16x16xf32>
    %71 = vector.shape_cast %70 : vector<1x16x16xf32> to vector<16x16xf32>
    %72 = vector.shape_cast %71 : vector<16x16xf32> to vector<1x16x16xf32>
    %73 = vector.broadcast %72 : vector<1x16x16xf32> to vector<16x16x16xf32>
    %74 = arith.addf %69, %73 : vector<16x16x16xf32>
    %cst_39 = arith.constant dense<0xFF800000> : vector<16x16xf32>
    %75 = vector.multi_reduction <maximumf>, %74, %cst_39 [2] : vector<16x16x16xf32> to vector<16x16xf32>
    %76 = vector.shape_cast %75 : vector<16x16xf32> to vector<16x16x1xf32>
    %77 = vector.broadcast %76 : vector<16x16x1xf32> to vector<16x16x16xf32>
    %78 = arith.subf %74, %77 : vector<16x16x16xf32>
    %79 = math.exp %78 : vector<16x16x16xf32>
    %cst_40 = arith.constant dense<0.000000e+00> : vector<16x16xf32>
    %80 = vector.multi_reduction <add>, %79, %cst_40 [2] : vector<16x16x16xf32> to vector<16x16xf32>
    %81 = vector.shape_cast %80 : vector<16x16xf32> to vector<16x16x1xf32>
    "tpu.trace_start"() <{level = 10 : i32, message = "tjk,tkd->tjd"}> : () -> ()
    %cst_41 = arith.constant dense<0.000000e+00> : vector<16x16x16xf32>
    %82 = tpu.matmul %79, %68, %cst_41 {dimension_numbers = #tpu.dot_dimension_numbers<[2], [1], [1], [2], [0, 0, 0, 1, 1, 2], [0], [0]>} : vector<16x16x16xf32>, vector<16x16x16xf32>, vector<16x16x16xf32> -> vector<16x16x16xf32>
    "tpu.trace_stop"() : () -> ()
    %83 = tpu.reciprocal %81 {approx = true} : vector<16x16x1xf32> -> vector<16x16x1xf32>
    %84 = vector.broadcast %83 : vector<16x16x1xf32> to vector<16x16x16xf32>
    %85 = arith.mulf %82, %84 : vector<16x16x16xf32>
    %86 = vector.shape_cast %85 : vector<16x16x16xf32> to vector<256x16xf32>
    %c0_42 = arith.constant 0 : index
    %c16_43 = arith.constant 16 : index
    %87 = vector.load %arg12[%c0_42, %c16_43] : memref<256x64xf32, #tpu.memory_space<vmem>>, vector<256x16xf32>
    tpu.vector_store %arg12[%c0_42, %c16_43], %86 {strides = array<i32>} : memref<256x64xf32, #tpu.memory_space<vmem>>, vector<256x16xf32>,
    %c0_44 = arith.constant 0 : index
    %c32 = arith.constant 32 : index
    %88 = vector.load %arg10[%c0_44, %c32] : memref<256x192xf32, #tpu.memory_space<vmem>>, vector<256x16xf32>
    %89 = vector.shape_cast %88 : vector<256x16xf32> to vector<16x16x16xf32>
    %c0_45 = arith.constant 0 : index
    %c96 = arith.constant 96 : index
    %90 = vector.load %arg10[%c0_45, %c96] : memref<256x192xf32, #tpu.memory_space<vmem>>, vector<256x16xf32>
    %91 = vector.shape_cast %90 : vector<256x16xf32> to vector<16x16x16xf32>
    %c0_46 = arith.constant 0 : index
    %c160 = arith.constant 160 : index
    %92 = vector.load %arg10[%c0_46, %c160] : memref<256x192xf32, #tpu.memory_space<vmem>>, vector<256x16xf32>
    %93 = vector.shape_cast %92 : vector<256x16xf32> to vector<16x16x16xf32>
    "tpu.trace_start"() <{level = 10 : i32, message = "tjd,tkd->tjk"}> : () -> ()
    %cst_47 = arith.constant dense<0.000000e+00> : vector<16x16x16xf32>
    %94 = tpu.matmul %89, %91, %cst_47 {dimension_numbers = #tpu.dot_dimension_numbers<[2], [2], [1], [1], [0, 0, 0, 1, 1, 1], [0], [0]>} : vector<16x16x16xf32>, vector<16x16x16xf32>, vector<16x16x16xf32> -> vector<16x16x16xf32>
    "tpu.trace_stop"() : () -> ()
    %c2 = arith.constant 2 : index
    %c0_48 = arith.constant 0 : index
    %c0_49 = arith.constant 0 : index
    %95 = vector.load %arg2[%c2, %c0_48, %c0_49] : memref<4x16x16xf32, #tpu.memory_space<vmem>>, vector<1x16x16xf32>
    %96 = vector.shape_cast %95 : vector<1x16x16xf32> to vector<16x16xf32>
    %97 = vector.shape_cast %96 : vector<16x16xf32> to vector<1x16x16xf32>
    %98 = vector.broadcast %97 : vector<1x16x16xf32> to vector<16x16x16xf32>
    %99 = arith.addf %94, %98 : vector<16x16x16xf32>
    %cst_50 = arith.constant dense<0xFF800000> : vector<16x16xf32>
    %100 = vector.multi_reduction <maximumf>, %99, %cst_50 [2] : vector<16x16x16xf32> to vector<16x16xf32>
    %101 = vector.shape_cast %100 : vector<16x16xf32> to vector<16x16x1xf32>
    %102 = vector.broadcast %101 : vector<16x16x1xf32> to vector<16x16x16xf32>
    %103 = arith.subf %99, %102 : vector<16x16x16xf32>
    %104 = math.exp %103 : vector<16x16x16xf32>
    %cst_51 = arith.constant dense<0.000000e+00> : vector<16x16xf32>
    %105 = vector.multi_reduction <add>, %104, %cst_51 [2] : vector<16x16x16xf32> to vector<16x16xf32>
    %106 = vector.shape_cast %105 : vector<16x16xf32> to vector<16x16x1xf32>
    "tpu.trace_start"() <{level = 10 : i32, message = "tjk,tkd->tjd"}> : () -> ()
    %cst_52 = arith.constant dense<0.000000e+00> : vector<16x16x16xf32>
    %107 = tpu.matmul %104, %93, %cst_52 {dimension_numbers = #tpu.dot_dimension_numbers<[2], [1], [1], [2], [0, 0, 0, 1, 1, 2], [0], [0]>} : vector<16x16x16xf32>, vector<16x16x16xf32>, vector<16x16x16xf32> -> vector<16x16x16xf32>
    "tpu.trace_stop"() : () -> ()
    %108 = tpu.reciprocal %106 {approx = true} : vector<16x16x1xf32> -> vector<16x16x1xf32>
    %109 = vector.broadcast %108 : vector<16x16x1xf32> to vector<16x16x16xf32>
    %110 = arith.mulf %107, %109 : vector<16x16x16xf32>
    %111 = vector.shape_cast %110 : vector<16x16x16xf32> to vector<256x16xf32>
    %c0_53 = arith.constant 0 : index
    %c32_54 = arith.constant 32 : index
    %112 = vector.load %arg12[%c0_53, %c32_54] : memref<256x64xf32, #tpu.memory_space<vmem>>, vector<256x16xf32>
    tpu.vector_store %arg12[%c0_53, %c32_54], %111 {strides = array<i32>} : memref<256x64xf32, #tpu.memory_space<vmem>>, vector<256x16xf32>,
    %c0_55 = arith.constant 0 : index
    %c48 = arith.constant 48 : index
    %113 = vector.load %arg10[%c0_55, %c48] : memref<256x192xf32, #tpu.memory_space<vmem>>, vector<256x16xf32>
    %114 = vector.shape_cast %113 : vector<256x16xf32> to vector<16x16x16xf32>
    %c0_56 = arith.constant 0 : index
    %c112 = arith.constant 112 : index
    %115 = vector.load %arg10[%c0_56, %c112] : memref<256x192xf32, #tpu.memory_space<vmem>>, vector<256x16xf32>
    %116 = vector.shape_cast %115 : vector<256x16xf32> to vector<16x16x16xf32>
    %c0_57 = arith.constant 0 : index
    %c176 = arith.constant 176 : index
    %117 = vector.load %arg10[%c0_57, %c176] : memref<256x192xf32, #tpu.memory_space<vmem>>, vector<256x16xf32>
    %118 = vector.shape_cast %117 : vector<256x16xf32> to vector<16x16x16xf32>
    "tpu.trace_start"() <{level = 10 : i32, message = "tjd,tkd->tjk"}> : () -> ()
    %cst_58 = arith.constant dense<0.000000e+00> : vector<16x16x16xf32>
    %119 = tpu.matmul %114, %116, %cst_58 {dimension_numbers = #tpu.dot_dimension_numbers<[2], [2], [1], [1], [0, 0, 0, 1, 1, 1], [0], [0]>} : vector<16x16x16xf32>, vector<16x16x16xf32>, vector<16x16x16xf32> -> vector<16x16x16xf32>
    "tpu.trace_stop"() : () -> ()
    %c3 = arith.constant 3 : index
    %c0_59 = arith.constant 0 : index
    %c0_60 = arith.constant 0 : index
    %120 = vector.load %arg2[%c3, %c0_59, %c0_60] : memref<4x16x16xf32, #tpu.memory_space<vmem>>, vector<1x16x16xf32>
    %121 = vector.shape_cast %120 : vector<1x16x16xf32> to vector<16x16xf32>
    %122 = vector.shape_cast %121 : vector<16x16xf32> to vector<1x16x16xf32>
    %123 = vector.broadcast %122 : vector<1x16x16xf32> to vector<16x16x16xf32>
    %124 = arith.addf %119, %123 : vector<16x16x16xf32>
    %cst_61 = arith.constant dense<0xFF800000> : vector<16x16xf32>
    %125 = vector.multi_reduction <maximumf>, %124, %cst_61 [2] : vector<16x16x16xf32> to vector<16x16xf32>
    %126 = vector.shape_cast %125 : vector<16x16xf32> to vector<16x16x1xf32>
    %127 = vector.broadcast %126 : vector<16x16x1xf32> to vector<16x16x16xf32>
    %128 = arith.subf %124, %127 : vector<16x16x16xf32>
    %129 = math.exp %128 : vector<16x16x16xf32>
    %cst_62 = arith.constant dense<0.000000e+00> : vector<16x16xf32>
    %130 = vector.multi_reduction <add>, %129, %cst_62 [2] : vector<16x16x16xf32> to vector<16x16xf32>
    %131 = vector.shape_cast %130 : vector<16x16xf32> to vector<16x16x1xf32>
    "tpu.trace_start"() <{level = 10 : i32, message = "tjk,tkd->tjd"}> : () -> ()
    %cst_63 = arith.constant dense<0.000000e+00> : vector<16x16x16xf32>
    %132 = tpu.matmul %129, %118, %cst_63 {dimension_numbers = #tpu.dot_dimension_numbers<[2], [1], [1], [2], [0, 0, 0, 1, 1, 2], [0], [0]>} : vector<16x16x16xf32>, vector<16x16x16xf32>, vector<16x16x16xf32> -> vector<16x16x16xf32>
    "tpu.trace_stop"() : () -> ()
    %133 = tpu.reciprocal %131 {approx = true} : vector<16x16x1xf32> -> vector<16x16x1xf32>
    %134 = vector.broadcast %133 : vector<16x16x1xf32> to vector<16x16x16xf32>
    %135 = arith.mulf %132, %134 : vector<16x16x16xf32>
    %136 = vector.shape_cast %135 : vector<16x16x16xf32> to vector<256x16xf32>
    %c0_64 = arith.constant 0 : index
    %c48_65 = arith.constant 48 : index
    %137 = vector.load %arg12[%c0_64, %c48_65] : memref<256x64xf32, #tpu.memory_space<vmem>>, vector<256x16xf32>
    tpu.vector_store %arg12[%c0_64, %c48_65], %136 {strides = array<i32>} : memref<256x64xf32, #tpu.memory_space<vmem>>, vector<256x16xf32>,
    %c0_66 = arith.constant 0 : index
    %c0_67 = arith.constant 0 : index
    %138 = vector.load %arg12[%c0_66, %c0_67] : memref<256x64xf32, #tpu.memory_space<vmem>>, vector<256x64xf32>
    %c0_68 = arith.constant 0 : index
    %c0_69 = arith.constant 0 : index
    %139 = vector.load %arg11[%c0_68, %c0_69] : memref<256x64xf32, #tpu.memory_space<vmem>>, vector<256x64xf32>
    %140 = arith.mulf %138, %139 : vector<256x64xf32>
    %c0_70 = arith.constant 0 : index
    %c0_71 = arith.constant 0 : index
    %141 = vector.load %arg7[%c0_70, %c0_71] : memref<64x32xf32, #tpu.memory_space<vmem>>, vector<64x32xf32>
    %cst_72 = arith.constant dense<0.000000e+00> : vector<256x32xf32>
    %142 = tpu.matmul %140, %141, %cst_72 {dimension_numbers = #tpu.dot_dimension_numbers<[1], [0], [0], [1], [0, 0, 1, 1], [], []>} : vector<256x64xf32>, vector<64x32xf32>, vector<256x32xf32> -> vector<256x32xf32>
    %c0_73 = arith.constant 0 : index
    %c0_74 = arith.constant 0 : index
    %143 = vector.load %arg8[%c0_73, %c0_74] : memref<1x32xf32, #tpu.memory_space<vmem>>, vector<1x32xf32>
    %144 = vector.broadcast %143 : vector<1x32xf32> to vector<256x32xf32>
    %145 = arith.addf %142, %144 : vector<256x32xf32>
    %146 = vector.shape_cast %145 : vector<256x32xf32> to vector<16x16x32xf32>
    %c0_75 = arith.constant 0 : index
    %c0_76 = arith.constant 0 : index
    %c0_77 = arith.constant 0 : index
    %147 = vector.load %arg9[%c0_75, %c0_76, %c0_77] : memref<16x16x32xf32, #tpu.memory_space<vmem>>, vector<16x16x32xf32>
    tpu.vector_store %arg9[%c0_75, %c0_76, %c0_77], %146 {strides = array<i32>} : memref<16x16x32xf32, #tpu.memory_space<vmem>>, vector<16x16x32xf32>,
    return
  }
  func.func @transform_0(%arg0: i32) -> (i32, i32, i32) {
    %c0_i32 = arith.constant 0 : i32
    %c0_i32_0 = arith.constant 0 : i32
    %c0_i32_1 = arith.constant 0 : i32
    return %arg0, %c0_i32, %c0_i32_0 : i32, i32, i32
  }
  func.func @transform_1(%arg0: i32) -> (i32, i32, i32) {
    %c0_i32 = arith.constant 0 : i32
    %c0_i32_0 = arith.constant 0 : i32
    %c0_i32_1 = arith.constant 0 : i32
    %c0_i32_2 = arith.constant 0 : i32
    return %c0_i32, %c0_i32_0, %c0_i32_1 : i32, i32, i32
  }
  func.func @transform_2(%arg0: i32) -> (i32, i32) {
    %c0_i32 = arith.constant 0 : i32
    %c0_i32_0 = arith.constant 0 : i32
    %c0_i32_1 = arith.constant 0 : i32
    return %c0_i32, %c0_i32_0 : i32, i32
  }
  func.func @transform_3(%arg0: i32) -> (i32, i32) {
    %c0_i32 = arith.constant 0 : i32
    %c0_i32_0 = arith.constant 0 : i32
    %c0_i32_1 = arith.constant 0 : i32
    return %c0_i32, %c0_i32_0 : i32, i32
  }
  func.func @transform_4(%arg0: i32) -> (i32, i32) {
    %c0_i32 = arith.constant 0 : i32
    %c0_i32_0 = arith.constant 0 : i32
    %c0_i32_1 = arith.constant 0 : i32
    return %c0_i32, %c0_i32_0 : i32, i32
  }
  func.func @transform_5(%arg0: i32) -> (i32, i32) {
    %c0_i32 = arith.constant 0 : i32
    %c0_i32_0 = arith.constant 0 : i32
    %c0_i32_1 = arith.constant 0 : i32
    return %c0_i32, %c0_i32_0 : i32, i32
  }
  func.func @transform_6(%arg0: i32) -> (i32, i32) {
    %c0_i32 = arith.constant 0 : i32
    %c0_i32_0 = arith.constant 0 : i32
    %c0_i32_1 = arith.constant 0 : i32
    return %c0_i32, %c0_i32_0 : i32, i32
  }
  func.func @transform_7(%arg0: i32) -> (i32, i32) {
    %c0_i32 = arith.constant 0 : i32
    %c0_i32_0 = arith.constant 0 : i32
    %c0_i32_1 = arith.constant 0 : i32
    return %c0_i32, %c0_i32_0 : i32, i32
  }
  func.func @transform_8(%arg0: i32) -> (i32, i32, i32) {
    %c0_i32 = arith.constant 0 : i32
    %c0_i32_0 = arith.constant 0 : i32
    %c0_i32_1 = arith.constant 0 : i32
    return %arg0, %c0_i32, %c0_i32_0 : i32, i32, i32
  }
}

</mosaic_0001>

<bundles_post_ra>
// kernel: triangle_att_start.1
= control target key start
LH: loop header
LB: loop body
LE: loop exit
PB: predicated region body
PF: predicated region fallthrough
CT: control target
= control target key end

     0   :  { %vm62_vm0 = vcmask 261120   ;;  %s24804_s0 = inlined_call_operand.vmem [shape: f32[16,16,32], index: 0, kind: input, shape index: {}]   ;;  %s24805_s1 = inlined_call_operand.vmem [shape: f32[4,16,16], index: 1, kind: input, shape index: {}]   ;;  %s24806_s2 = inlined_call_operand.vmem [shape: f32[1,32], index: 2, kind: input, shape index: {}]   ;;  %s24807_s3 = inlined_call_operand.vmem [shape: f32[1,32], index: 3, kind: input, shape index: {}]   ;;  %s24808_s4 = inlined_call_operand.vmem [shape: f32[32,256], index: 4, kind: input, shape index: {}]   ;;  %s24809_s5 = inlined_call_operand.vmem [shape: f32[1,64], index: 5, kind: input, shape index: {}]   ;;  %s24810_s6 = inlined_call_operand.vmem [shape: f32[64,32], index: 6, kind: input, shape index: {}]   ;;  %s24811_s7 = inlined_call_operand.vmem [shape: f32[1,32], index: 7, kind: input, shape index: {}]   ;;  %s24812_s8 = inlined_call_operand.hbm [shape: f32[16,16,32], index: 8, kind: output, shape index: {}]  }
   0x1   :  { %v19539_v0 = vld [vmem:[%s24804_s0 + $0x10] sm:$0xff]  ;;  %v19544_v1 = vld [vmem:[%s24804_s0] sm:$0xff]  ;;  %v19549_v2 = vld [vmem:[%s24804_s0 + $0x18] sm:$0xff] }
   0x2   :  { %v69_v3 = vsel %vm62_vm0, %v19539_v0, 0.0  ;;  %v63_v4 = vsel %vm62_vm0, %v19544_v1, 0.0  ;;  %v19558_v5 = vld [vmem:[%s24804_s0 + $0x8] sm:$0xff]  ;;  %v72_v6 = vsel %vm62_vm0, %v19549_v2, 0.0  ;;  %v19572_v9 = vld [vmem:[%s24804_s0 + $0x20] sm:$0xff]  ;;  %v19581_v12 = vld [vmem:[%s24804_s0 + $0x38] sm:$0xff] }
   0x3   :  { %70 = vadd.xlane.f32.xlu1 %v69_v3  ;;  %64 = vadd.xlane.f32.xlu0 %v63_v4  ;;  %v66_v7 = vsel %vm62_vm0, %v19558_v5, 0.0  ;;  %v19567_v8 = vld [vmem:[%s24804_s0 + $0x28] sm:$0xff]  ;;  %v75_v11 = vsel %vm62_vm0, %v19572_v9, 0.0  ;;  %v19586_v13 = vld [vmem:[%s24804_s0 + $0x30] sm:$0xff]  ;;  %v84_v14 = vsel %vm62_vm0, %v19581_v12, 0.0 }
   0x4   :  { %v78_v10 = vsel %vm62_vm0, %v19567_v8, 0.0  ;;  %v81_v15 = vsel %vm62_vm0, %v19586_v13, 0.0 }
   0x7   :  { %73 = vadd.xlane.f32.xlu1 %v72_v6  ;;  %67 = vadd.xlane.f32.xlu0 %v66_v7 }
   0xb   :  { %79 = vadd.xlane.f32.xlu1 %v78_v10  ;;  %76 = vadd.xlane.f32.xlu0 %v75_v11 }
   0xc   :  { %13 = vsyncpa [#allocation6], 0  ;;  %v19595_v16 = vld [vmem:[%s24804_s0 + $0x48] sm:$0xff]  ;;  %v19600_v17 = vld [vmem:[%s24804_s0 + $0x40] sm:$0xff]  ;;  %vm1449_vm1 = vcmask 130048   ;;  %vm920_vm2 = vcmask 523264  }
   0xd   :  { %v90_v18 = vsel %vm62_vm0, %v19595_v16, 0.0  ;;  %v87_v19 = vsel %vm62_vm0, %v19600_v17, 0.0  ;;  %v19609_v20 = vld [vmem:[%s24804_s0 + $0x58] sm:$0xff]  ;;  %v19614_v21 = vld [vmem:[%s24804_s0 + $0x50] sm:$0xff]  ;;  %v19623_v24 = vld [vmem:[%s24804_s0 + $0x68] sm:$0xff]  ;;  %s19483_s21 = smov 112  }
   0xe   :  { %v96_v22 = vsel %vm62_vm0, %v19609_v20, 0.0  ;;  %v93_v23 = vsel %vm62_vm0, %v19614_v21, 0.0  ;;  %v19628_v25 = vld [vmem:[%s24804_s0 + $0x60] sm:$0xff]  ;;  %v102_v26 = vsel %vm62_vm0, %v19623_v24, 0.0  ;;  %v19637_v28 = vld [vmem:[%s24804_s0 + $0x78] sm:$0xff]  ;;  %v19642_v29 = vld [vmem:[%s24804_s0 + $0x70] sm:$0xff] }
   0xf   :  { %85 = vadd.xlane.f32.xlu1 %v84_v14  ;;  %82 = vadd.xlane.f32.xlu0 %v81_v15  ;;  %v99_v27 = vsel %vm62_vm0, %v19628_v25, 0.0  ;;  %v108_v30 = vsel %vm62_vm0, %v19637_v28, 0.0  ;;  %v105_v31 = vsel %vm62_vm0, %v19642_v29, 0.0  ;;  %v19651_v32 = vld [vmem:[%s24804_s0 + $0x88] sm:$0xff]  ;;  %v19656_v33 = vld [vmem:[%s24804_s0 + $0x80] sm:$0xff]  ;;  %v19665_v36 = vld [vmem:[%s24804_s0 + $0x98] sm:$0xff] }
  0x10   :  { %v114_v34 = vsel %vm62_vm0, %v19651_v32, 0.0  ;;  %v111_v35 = vsel %vm62_vm0, %v19656_v33, 0.0  ;;  %v19670_v37 = vld [vmem:[%s24804_s0 + $0x90] sm:$0xff]  ;;  %v120_v38 = vsel %vm62_vm0, %v19665_v36, 0.0  ;;  %v19679_v40 = vld [vmem:[%s24804_s0 + $0xa0] sm:$0xff]  ;;  %v19686_v42 = vld [vmem:[%s24804_s0 + $0xa8] sm:$0xff] }
  0x11   :  { %v117_v39 = vsel %vm62_vm0, %v19670_v37, 0.0  ;;  %v123_v41 = vsel %vm62_vm0, %v19679_v40, 0.0  ;;  %v126_v43 = vsel %vm62_vm0, %v19686_v42, 0.0  ;;  %v19693_v44 = vld [vmem:[%s24804_s0 + $0xb0] sm:$0xff]  ;;  %v19700_v46 = vld [vmem:[%s24804_s0 + $0xb8] sm:$0xff]  ;;  %v19707_v48 = vld [vmem:[%s24804_s0 + $0xc0] sm:$0xff] }
  0x12   :  { %v129_v45 = vsel %vm62_vm0, %v19693_v44, 0.0  ;;  %v132_v47 = vsel %vm62_vm0, %v19700_v46, 0.0  ;;  %v135_v49 = vsel %vm62_vm0, %v19707_v48, 0.0  ;;  %v19714_v50 = vld [vmem:[%s24804_s0 + $0xc8] sm:$0xff]  ;;  %v19721_v52 = vld [vmem:[%s24804_s0 + $0xd0] sm:$0xff]  ;;  %v19728_v54 = vld [vmem:[%s24804_s0 + $0xd8] sm:$0xff] }
  0x13   :  { %91 = vadd.xlane.f32.xlu1 %v90_v18  ;;  %88 = vadd.xlane.f32.xlu0 %v87_v19  ;;  %v138_v51 = vsel %vm62_vm0, %v19714_v50, 0.0  ;;  %v141_v53 = vsel %vm62_vm0, %v19721_v52, 0.0  ;;  %v144_v55 = vsel %vm62_vm0, %v19728_v54, 0.0  ;;  %v19735_v56 = vld [vmem:[%s24804_s0 + $0xe0] sm:$0xff]  ;;  %v19742_v58 = vld [vmem:[%s24804_s0 + $0xe8] sm:$0xff]  ;;  %v19749_v60 = vld [vmem:[%s24804_s0 + $0xf0] sm:$0xff] }
  0x14   :  { %v147_v57 = vsel %vm62_vm0, %v19735_v56, 0.0  ;;  %v150_v59 = vsel %vm62_vm0, %v19742_v58, 0.0  ;;  %v153_v61 = vsel %vm62_vm0, %v19749_v60, 0.0  ;;  %v19756_v62 = vld [vmem:[%s24804_s0 + $0xf8] sm:$0xff]  ;;  %vm20478_vm3 = vmpackc.low %vm1449_vm1, %vm1449_vm1  ;;  %s19484_s25 = smov 32   ;;  %s19485_s26 = smov 96  }
  0x15   :  { %v156_v63 = vsel %vm62_vm0, %v19756_v62, 0.0  ;;  %s19486_s27 = smov 16   ;;  %s19487_s28 = smov 80   ;;  %vm8007_vm4 = vcmask 261248   ;;  %vm11499_vm5 = vcmask 392448   ;;  %vm14991_vm6 = vcmask 523648  }
  0x17   :  { %97 = vadd.xlane.f32.xlu1 %v96_v22  ;;  %94 = vadd.xlane.f32.xlu0 %v93_v23 }
  0x1b   :  { %103 = vadd.xlane.f32.xlu1 %v102_v26  ;;  %100 = vadd.xlane.f32.xlu0 %v99_v27 }
  0x1f   :  { %109 = vadd.xlane.f32.xlu1 %v108_v30  ;;  %106 = vadd.xlane.f32.xlu0 %v105_v31 }
  0x23   :  { %115 = vadd.xlane.f32.xlu1 %v114_v34  ;;  %112 = vadd.xlane.f32.xlu0 %v111_v35 }
  0x27   :  { %121 = vadd.xlane.f32.xlu1 %v120_v38  ;;  %118 = vadd.xlane.f32.xlu0 %v117_v39 }
  0x2b   :  { %124 = vadd.xlane.f32.xlu1 %v123_v41 }
  0x2f   :  { %127 = vadd.xlane.f32.xlu1 %v126_v43 }
  0x33   :  { %130 = vadd.xlane.f32.xlu1 %v129_v45 }
  0x37   :  { %133 = vadd.xlane.f32.xlu1 %v132_v47 }
  0x3b   :  { %136 = vadd.xlane.f32.xlu1 %v135_v49 }
  0x3f   :  { %139 = vadd.xlane.f32.xlu1 %v138_v51 }
  0x43   :  { %142 = vadd.xlane.f32.xlu1 %v141_v53 }
  0x47   :  { %145 = vadd.xlane.f32.xlu1 %v144_v55 }
  0x4b   :  { %148 = vadd.xlane.f32.xlu1 %v147_v57 }
  0x4f   :  { %151 = vadd.xlane.f32.xlu1 %v150_v59 }
  0x53   :  { %154 = vadd.xlane.f32.xlu1 %v153_v61 }
  0x57   :  { %157 = vadd.xlane.f32.xlu1 %v156_v63 }
  0x90   :  { %v71_v3 = vpop.xlane.xlu1 %70  ;;  %v65_v4 = vpop.xlane.xlu0 %64 }
  0x91   :  { %v162_v6 = vmul.f32 0.03125, %v71_v3  ;;  %v160_v7 = vmul.f32 0.03125, %v65_v4 }
  0x93   :  { %v19761_v10 = vsub.f32 %v19544_v1, %v160_v7  ;;  %v19764_v15 = vsub.f32 %v19539_v0, %v162_v6 }
  0x94   :  { %v74_v11 = vpop.xlane.xlu1 %73  ;;  %v68_v14 = vpop.xlane.xlu0 %67 }
  0x95   :  { %v163_v18 = vmul.f32 0.03125, %v74_v11  ;;  %v161_v19 = vmul.f32 0.03125, %v68_v14  ;;  %v224_v22 = vmul.f32 %v19761_v10, %v19761_v10  ;;  %v226_v31 = vmul.f32 %v19764_v15, %v19764_v15 }
  0x97   :  { %v19769_v23 = vsub.f32 %v19558_v5, %v161_v19  ;;  %v256_v26 = vsel %vm62_vm0, %v224_v22, 0.0  ;;  %v19773_v1 = vsub.f32 %v19549_v2, %v163_v18  ;;  %v262_v39 = vsel %vm62_vm0, %v226_v31, 0.0 }
  0x98   :  { %v80_v27 = vpop.xlane.xlu1 %79  ;;  %257 = vadd.xlane.f32.xlu0 %v256_v26  ;;  %v77_v30 = vpop.xlane.xlu0 %76 }
  0x99   :  { %v225_v0 = vmul.f32 %v19769_v23, %v19769_v23  ;;  %v164_v34 = vmul.f32 0.03125, %v77_v30  ;;  %v165_v5 = vmul.f32 0.03125, %v80_v27  ;;  %v227_v2 = vmul.f32 %v19773_v1, %v19773_v1 }
  0x9b   :  { %v259_v35 = vsel %vm62_vm0, %v225_v0, 0.0  ;;  %v19782_v41 = vsub.f32 %v19572_v9, %v164_v34  ;;  %v19787_v47 = vsub.f32 %v19567_v8, %v165_v5  ;;  %v265_v49 = vsel %vm62_vm0, %v227_v2, 0.0  ;;  %v559_v5 = vld [vmem:[%s24808_s4 + $0x8] sm:$0xff] }
  0x9c   :  { %v86_v38 = vpop.xlane.xlu1 %85  ;;  %260 = vadd.xlane.f32.xlu0 %v259_v35  ;;  %v83_v43 = vpop.xlane.xlu0 %82 }
  0x9d   :  { %v228_v51 = vmul.f32 %v19782_v41, %v19782_v41  ;;  %v166_v53 = vmul.f32 0.03125, %v83_v43  ;;  %v167_v55 = vmul.f32 0.03125, %v86_v38  ;;  %v229_v61 = vmul.f32 %v19787_v47, %v19787_v47  ;;  %v558_v43 = vld [vmem:[%s24808_s4] sm:$0xff] }
  0x9f   :  { %v268_v9 = vsel %vm62_vm0, %v228_v51, 0.0  ;;  %v19794_v59 = vsub.f32 %v19586_v13, %v166_v53  ;;  %v19799_v8 = vsub.f32 %v19581_v12, %v167_v55  ;;  %v271_v6 = vsel %vm62_vm0, %v229_v61, 0.0 }
  0xa0   :  { %v92_v45 = vpop.xlane.xlu1 %91  ;;  %263 = vadd.xlane.f32.xlu0 %v262_v39  ;;  %v89_v63 = vpop.xlane.xlu0 %88 }
  0xa1   :  { %v230_v7 = vmul.f32 %v19794_v59, %v19794_v59  ;;  %v168_v11 = vmul.f32 0.03125, %v89_v63  ;;  %v169_v13 = vmul.f32 0.03125, %v92_v45  ;;  %v231_v19 = vmul.f32 %v19799_v8, %v19799_v8  ;;  %v560_v45 = vld [vmem:[%s24808_s4 + $0x10] sm:$0xff] }
  0xa2   :  { %v17508_v51 = vpack.c.bf16 %v560_v45, %v558_v43 }
  0xa3   :  { %v274_v27 = vsel %vm62_vm0, %v230_v7, 0.0  ;;  %v19813_v30 = vsub.f32 %v19600_v17, %v168_v11  ;;  %v19820_v31 = vsub.f32 %v19595_v16, %v169_v13  ;;  %v277_v35 = vsel %vm62_vm0, %v231_v19, 0.0  ;;  %v561_v17 = vld [vmem:[%s24808_s4 + $0x18] sm:$0xff]  ;;  %v562_v11 = vld [vmem:[%s24808_s4 + $0x20] sm:$0xff]  ;;  %v564_v13 = vld [vmem:[%s24808_s4 + $0x30] sm:$0xff] }
  0xa4   :  { %v98_v57 = vpop.xlane.xlu1 %97  ;;  %266 = vadd.xlane.f32.xlu0 %v265_v49  ;;  %v95_v12 = vpop.xlane.xlu0 %94  ;;  %v17506_v49 = vpack.c.bf16 %v561_v17, %v559_v5 }
  0xa5   :  { %v232_v16 = vmul.f32 %v19813_v30, %v19813_v30  ;;  %v170_v2 = vmul.f32 0.03125, %v95_v12  ;;  %v233_v63 = vmul.f32 %v19820_v31, %v19820_v31  ;;  %v17512_v12 = vpack.c.bf16 %v564_v13, %v562_v11 }
  0xa6   :  { %17507 = vmatprep.subr.bf16.mxu0 %v17506_v49 }
  0xa7   :  { %v19855_v7 = vsub.f32 %v19614_v21, %v170_v2  ;;  %17509 = vmatpush1.bf16.msra.mxu0 %v17508_v51 }
  0xa8   :  { %v104_v3 = vpop.xlane.xlu1 %103  ;;  %269 = vadd.xlane.f32.xlu0 %v268_v9  ;;  %v101_v38 = vpop.xlane.xlu0 %100  ;;  %v171_v9 = vmul.f32 0.03125, %v98_v57  ;;  %v280_v57 = vsel %vm62_vm0, %v232_v16, 0.0 }
  0xa9   :  { %v173_v4 = vmul.f32 0.03125, %v104_v3  ;;  %v563_v3 = vld [vmem:[%s24808_s4 + $0x28] sm:$0xff]  ;;  %v172_v5 = vmul.f32 0.03125, %v101_v38 }
  0xaa   :  { %v19868_v21 = vsub.f32 %v19609_v20, %v171_v9 }
  0xab   :  { %v19805_v14 = vsub.f32 %v19623_v24, %v173_v4  ;;  %v565_v4 = vld [vmem:[%s24808_s4 + $0x38] sm:$0xff]  ;;  %v19879_v43 = vsub.f32 %v19628_v25, %v172_v5 }
  0xac   :  { %v110_v18 = vpop.xlane.xlu1 %109  ;;  %272 = vadd.xlane.f32.xlu0 %v271_v6  ;;  %v17510_v19 = vpack.c.bf16 %v565_v4, %v563_v3  ;;  %v235_v38 = vmul.f32 %v19868_v21, %v19868_v21 }
  0xad   :  { %v175_v22 = vmul.f32 0.03125, %v110_v18  ;;  %v237_v26 = vmul.f32 %v19805_v14, %v19805_v14  ;;  %v107_v18 = vpop.xlane.xlu0 %106  ;;  %v236_v25 = vmul.f32 %v19879_v43, %v19879_v43 }
  0xae   :  { %17511 = vmatprep.subr.bf16.mxu0 %v17510_v19  ;;  %v289_v9 = vsel %vm62_vm0, %v235_v38, 0.0 }
  0xaf   :  { %v19816_v0 = vsub.f32 %v19637_v28, %v175_v22  ;;  %v295_v24 = vsel %vm62_vm0, %v237_v26, 0.0  ;;  %17513 = vmatpush1.bf16.msra.mxu0 %v17512_v12 }
  0xb0   :  { %296 = vadd.xlane.f32.xlu1 %v295_v24  ;;  %v116_v34 = vpop.xlane.xlu1 %115  ;;  %275 = vadd.xlane.f32.xlu0 %v274_v27  ;;  %v283_v24 = vsel %vm62_vm0, %v233_v63, 0.0 }
  0xb1   :  { %v177_v28 = vmul.f32 0.03125, %v116_v34  ;;  %v239_v39 = vmul.f32 %v19816_v0, %v19816_v0 }
  0xb3   :  { %v19840_v53 = vsub.f32 %v19651_v32, %v177_v28  ;;  %v301_v55 = vsel %vm62_vm0, %v239_v39, 0.0  ;;  %v174_v28 = vmul.f32 0.03125, %v107_v18  ;;  %v113_v39 = vpop.xlane.xlu0 %112 }
  0xb4   :  { %302 = vadd.xlane.f32.xlu1 %v301_v55  ;;  %v122_v61 = vpop.xlane.xlu1 %121  ;;  %278 = vadd.xlane.f32.xlu0 %v277_v35  ;;  %v234_v35 = vmul.f32 %v19855_v7, %v19855_v7 }
  0xb5   :  { %v179_v6 = vmul.f32 0.03125, %v122_v61  ;;  %v241_v32 = vmul.f32 %v19840_v53, %v19840_v53  ;;  %v19887_v51 = vsub.f32 %v19642_v29, %v174_v28  ;;  %v176_v61 = vmul.f32 0.03125, %v113_v39 }
  0xb6   :  { %v286_v2 = vsel %vm62_vm0, %v234_v35, 0.0 }
  0xb7   :  { %v19864_v22 = vsub.f32 %v19665_v36, %v179_v6  ;;  %v307_v26 = vsel %vm62_vm0, %v241_v32, 0.0  ;;  %v19480_v36 = vmov 0.0   ;;  %v119_v63 = vpop.xlane.xlu0 %118  ;;  %v238_v4 = vmul.f32 %v19887_v51, %v19887_v51 }
  0xb8   :  { %308 = vadd.xlane.f32.xlu1 %v307_v26  ;;  %v125_v27 = vpop.xlane.xlu1 %124  ;;  %281 = vadd.xlane.f32.xlu0 %v280_v57  ;;  %v292_v6 = vsel %vm62_vm0, %v236_v25, 0.0  ;;  %v19899_v32 = vsub.f32 %v19656_v33, %v176_v61  ;;  %v178_v57 = vmul.f32 0.03125, %v119_v63 }
  0xb9   :  { %v243_v34 = vmul.f32 %v19864_v22, %v19864_v22  ;;  %726 = vmatprep.mubr.f32.mxu0 %v19480_v36  ;;  %v298_v18 = vsel %vm62_vm0, %v238_v4, 0.0  ;;  %v180_v19 = vmul.f32 0.03125, %v125_v27 }
  0xba   :  { %v19908_v26 = vsub.f32 %v19670_v37, %v178_v57 }
  0xbb   :  { %v313_v20 = vsel %vm62_vm0, %v243_v34, 0.0  ;;  %v19914_v35 = vsub.f32 %v19679_v40, %v180_v19 }
  0xbc   :  { %314 = vadd.xlane.f32.xlu1 %v313_v20  ;;  %v128_v17 = vpop.xlane.xlu1 %127  ;;  %284 = vadd.xlane.f32.xlu0 %v283_v24  ;;  %v240_v24 = vmul.f32 %v19899_v32, %v19899_v32  ;;  %v242_v20 = vmul.f32 %v19908_v26, %v19908_v26 }
  0xbd   :  { %v181_v16 = vmul.f32 0.03125, %v128_v17 }
  0xbe   :  { %v304_v27 = vsel %vm62_vm0, %v240_v24, 0.0  ;;  %v310_v40 = vsel %vm62_vm0, %v242_v20, 0.0 }
  0xbf   :  { %v19884_v45 = vsub.f32 %v19686_v42, %v181_v16 }
  0xc0   :  { %v131_v49 = vpop.xlane.xlu1 %130  ;;  %287 = vadd.xlane.f32.xlu0 %v286_v2  ;;  %v244_v2 = vmul.f32 %v19914_v35, %v19914_v35 }
  0xc1   :  { %v245_v55 = vmul.f32 %v19884_v45, %v19884_v45  ;;  %v182_v34 = vmul.f32 0.03125, %v131_v49 }
  0xc2   :  { %v316_v25 = vsel %vm62_vm0, %v244_v2, 0.0 }
  0xc3   :  { %v319_v3 = vsel %vm62_vm0, %v245_v55, 0.0  ;;  %v19923_v17 = vsub.f32 %v19693_v44, %v182_v34 }
  0xc4   :  { %320 = vadd.xlane.f32.xlu1 %v319_v3  ;;  %v134_v42 = vpop.xlane.xlu1 %133  ;;  %290 = vadd.xlane.f32.xlu0 %v289_v9 }
  0xc5   :  { %v183_v29 = vmul.f32 0.03125, %v134_v42  ;;  %v246_v44 = vmul.f32 %v19923_v17, %v19923_v17 }
  0xc7   :  { %v19902_v11 = vsub.f32 %v19700_v46, %v183_v29  ;;  %v322_v3 = vsel %vm62_vm0, %v246_v44, 0.0 }
  0xc8   :  { %v137_v13 = vpop.xlane.xlu1 %136  ;;  %293 = vadd.xlane.f32.xlu0 %v292_v6 }
  0xc9   :  { %v247_v12 = vmul.f32 %v19902_v11, %v19902_v11  ;;  %v184_v39 = vmul.f32 0.03125, %v137_v13 }
  0xcb   :  { %v325_v33 = vsel %vm62_vm0, %v247_v12, 0.0 }
  0xcc   :  { %326 = vadd.xlane.f32.xlu1 %v325_v33  ;;  %v140_v46 = vpop.xlane.xlu1 %139  ;;  %299 = vadd.xlane.f32.xlu0 %v298_v18 }
  0xcd   :  { %v185_v5 = vmul.f32 0.03125, %v140_v46 }
  0xcf   :  { %v19920_v37 = vsub.f32 %v19714_v50, %v185_v5  ;;  %v19934_v50 = vsub.f32 %v19707_v48, %v184_v39 }
  0xd0   :  { %v143_v28 = vpop.xlane.xlu1 %142  ;;  %305 = vadd.xlane.f32.xlu0 %v304_v27 }
  0xd1   :  { %v249_v16 = vmul.f32 %v19920_v37, %v19920_v37  ;;  %v186_v55 = vmul.f32 0.03125, %v143_v28  ;;  %v248_v48 = vmul.f32 %v19934_v50, %v19934_v50 }
  0xd3   :  { %v331_v38 = vsel %vm62_vm0, %v249_v16, 0.0  ;;  %v19942_v42 = vsub.f32 %v19721_v52, %v186_v55  ;;  %v328_v18 = vsel %vm62_vm0, %v248_v48, 0.0 }
  0xd4   :  { %332 = vadd.xlane.f32.xlu1 %v331_v38  ;;  %v146_v49 = vpop.xlane.xlu1 %145  ;;  %311 = vadd.xlane.f32.xlu0 %v310_v40 }
  0xd5   :  { %v187_v9 = vmul.f32 0.03125, %v146_v49  ;;  %v250_v52 = vmul.f32 %v19942_v42, %v19942_v42 }
  0xd7   :  { %v19938_v61 = vsub.f32 %v19728_v54, %v187_v9  ;;  %v334_v34 = vsel %vm62_vm0, %v250_v52, 0.0  ;;  %v19986_v52 = vld [vmem:[%s24807_s3] ss:$0 sm:$0xff]  ;;  %s19482_s3 = smov 48  }
  0xd8   :  { %v149_v63 = vpop.xlane.xlu1 %148  ;;  %317 = vadd.xlane.f32.xlu0 %v316_v25 }
  0xd9   :  { %v188_v4 = vmul.f32 0.03125, %v149_v63  ;;  %v251_v29 = vmul.f32 %v19938_v61, %v19938_v61 }
  0xdb   :  { %v337_v6 = vsel %vm62_vm0, %v251_v29, 0.0  ;;  %v19950_v54 = vsub.f32 %v19735_v56, %v188_v4 }
  0xdc   :  { %338 = vadd.xlane.f32.xlu1 %v337_v6  ;;  %v152_v57 = vpop.xlane.xlu1 %151  ;;  %323 = vadd.xlane.f32.xlu0 %v322_v3  ;;  %v19980_v6 = vld [vmem:[%s24806_s2] ss:$0 sm:$0xff]  ;;  %s19481_s2 = smov 64  }
  0xdd   :  { %v189_v13 = vmul.f32 0.03125, %v152_v57  ;;  %v252_v56 = vmul.f32 %v19950_v54, %v19950_v54 }
  0xdf   :  { %v19956_v19 = vsub.f32 %v19742_v58, %v189_v13  ;;  %v340_v20 = vsel %vm62_vm0, %v252_v56, 0.0 }
  0xe0   :  { %v155_v12 = vpop.xlane.xlu1 %154  ;;  %329 = vadd.xlane.f32.xlu0 %v328_v18 }
  0xe1   :  { %v190_v24 = vmul.f32 0.03125, %v155_v12  ;;  %v253_v33 = vmul.f32 %v19956_v19, %v19956_v19 }
  0xe3   :  { %v19964_v46 = vsub.f32 %v19749_v60, %v190_v24  ;;  %v343_v5 = vsel %vm62_vm0, %v253_v33, 0.0 }
  0xe4   :  { %344 = vadd.xlane.f32.xlu1 %v343_v5  ;;  %v158_v27 = vpop.xlane.xlu1 %157  ;;  %335 = vadd.xlane.f32.xlu0 %v334_v34 }
  0xe5   :  { %v191_v58 = vmul.f32 0.03125, %v158_v27  ;;  %v254_v28 = vmul.f32 %v19964_v46, %v19964_v46 }
  0xe7   :  { %v19971_v39 = vsub.f32 %v19756_v62, %v191_v58  ;;  %v346_v60 = vsel %vm62_vm0, %v254_v28, 0.0 }
  0xe8   :  { %341 = vadd.xlane.f32.xlu0 %v340_v20 }
  0xe9   :  { %v255_v16 = vmul.f32 %v19971_v39, %v19971_v39 }
  0xeb   :  { %v349_v40 = vsel %vm62_vm0, %v255_v16, 0.0 }
  0xec   :  { %350 = vadd.xlane.f32.xlu1 %v349_v40  ;;  %347 = vadd.xlane.f32.xlu0 %v346_v60 }
 0x125   :  { %v258_v2 = vpop.xlane.xlu0 %257 }
 0x126   :  { %v352_v38 = vmul.f32 0.03125, %v258_v2 }
 0x128   :  { %v384_v49 = vadd.f32 1e-05, %v352_v38 }
 0x129   :  { %v261_v44 = vpop.xlane.xlu0 %260 }
 0x12a   :  { %18749 = vrsqrt.f32 %v384_v49  ;;  %v353_v55 = vmul.f32 0.03125, %v261_v44 }
 0x12c   :  { %v385_v9 = vadd.f32 1e-05, %v353_v55 }
 0x12d   :  { %v264_v25 = vpop.xlane.xlu0 %263 }
 0x12e   :  { %18751 = vrsqrt.f32 %v385_v9  ;;  %v354_v62 = vmul.f32 0.03125, %v264_v25 }
 0x130   :  { %v386_v63 = vadd.f32 1e-05, %v354_v62 }
 0x131   :  { %v267_v3 = vpop.xlane.xlu0 %266 }
 0x132   :  { %18753 = vrsqrt.f32 %v386_v63  ;;  %v355_v4 = vmul.f32 0.03125, %v267_v3 }
 0x134   :  { %v18750_v29 = vpop.eup %18749  ;;  %v387_v48 = vadd.f32 1e-05, %v355_v4 }
 0x135   :  { %v270_v57 = vpop.xlane.xlu0 %269  ;;  %v448_v13 = vmul.f32 %v18750_v29, %v19761_v10 }
 0x136   :  { %18755 = vrsqrt.f32 %v387_v48  ;;  %v356_v18 = vmul.f32 0.03125, %v270_v57 }
 0x137   :  { %v487_v12 = vmul.f32 %v19980_v6, %v448_v13 }
 0x138   :  { %v18752_v24 = vpop.eup %18751  ;;  %v388_v33 = vadd.f32 1e-05, %v356_v18 }
 0x139   :  { %v273_v34 = vpop.xlane.xlu0 %272  ;;  %v526_v56 = vadd.f32 %v19986_v52, %v487_v12  ;;  %v449_v5 = vmul.f32 %v18752_v24, %v19769_v23 }
 0x13a   :  { %18757 = vrsqrt.f32 %v388_v33  ;;  %v357_v27 = vmul.f32 0.03125, %v273_v34 }
 0x13b   :  { %15506 = vmatmul.mubr.msk.f32.vlgmr.msra.gmra.mrb[0].mxu0 %vm62_vm0, %v526_v56  ;;  %v488_v10 = vmul.f32 %v19980_v6, %v449_v5 }
 0x13c   :  { %v18754_v58 = vpop.eup %18753  ;;  %v389_v20 = vadd.f32 1e-05, %v357_v27  ;;  %732 = vmatprep.mubr.f32.mxu0 %v19480_v36 }
 0x13d   :  { %v276_v28 = vpop.xlane.xlu0 %275  ;;  %v527_v16 = vadd.f32 %v19986_v52, %v488_v10  ;;  %v450_v60 = vmul.f32 %v18754_v58, %v19764_v15  ;;  %v297_v27 = vpop.xlane.xlu1 %296 }
 0x13e   :  { %18759 = vrsqrt.f32 %v389_v20  ;;  %v358_v40 = vmul.f32 0.03125, %v276_v28 }
 0x13f   :  { %15507 = vmatmul.mubr.msk.f32.gmra.mrb[2].mxu0 %vm62_vm0, %v527_v16  ;;  %v489_v23 = vmul.f32 %v19980_v6, %v450_v60  ;;  %v365_v16 = vmul.f32 0.03125, %v297_v27 }
 0x140   :  { %v18756_v2 = vpop.eup %18755  ;;  %v390_v38 = vadd.f32 1e-05, %v358_v40  ;;  %738 = vmatprep.mubr.f32.mxu0 %v19480_v36 }
 0x141   :  { %v279_v49 = vpop.xlane.xlu0 %278  ;;  %v528_v44 = vadd.f32 %v19986_v52, %v489_v23  ;;  %v451_v55 = vmul.f32 %v18756_v2, %v19773_v1 }
 0x142   :  { %v359_v9 = vmul.f32 0.03125, %v279_v49  ;;  %18761 = vrsqrt.f32 %v390_v38  ;;  %v397_v49 = vadd.f32 1e-05, %v365_v16 }
 0x143   :  { %15508 = vmatmul.mubr.msk.f32.gmra.mrb[4].mxu0 %vm62_vm0, %v528_v44  ;;  %v490_v15 = vmul.f32 %v19980_v6, %v451_v55 }
 0x144   :  { %v18758_v25 = vpop.eup %18757  ;;  %v391_v62 = vadd.f32 1e-05, %v359_v9  ;;  %744 = vmatprep.mubr.f32.mxu0 %v19480_v36 }
 0x145   :  { %v282_v63 = vpop.xlane.xlu0 %281  ;;  %v529_v3 = vadd.f32 %v19986_v52, %v490_v15  ;;  %v452_v4 = vmul.f32 %v18758_v25, %v19782_v41  ;;  %v303_v25 = vpop.xlane.xlu1 %302 }
 0x146   :  { %v360_v29 = vmul.f32 0.03125, %v282_v63  ;;  %18763 = vrsqrt.f32 %v391_v62 }
 0x147   :  { %15509 = vmatmul.mubr.msk.f32.gmra.mrb[6].mxu0 %vm62_vm0, %v529_v3  ;;  %v491_v1 = vmul.f32 %v19980_v6, %v452_v4 }
 0x148   :  { %v18760_v48 = vpop.eup %18759  ;;  %v392_v57 = vadd.f32 1e-05, %v360_v29  ;;  %750 = vmatprep.mubr.f32.mxu0 %v19480_v36  ;;  %v367_v29 = vmul.f32 0.03125, %v303_v25 }
 0x149   :  { %v285_v13 = vpop.xlane.xlu0 %284  ;;  %v530_v18 = vadd.f32 %v19986_v52, %v491_v1  ;;  %v453_v12 = vmul.f32 %v18760_v48, %v19787_v47 }
 0x14a   :  { %v361_v24 = vmul.f32 0.03125, %v285_v13  ;;  %18765 = vrsqrt.f32 %v392_v57 }
 0x14b   :  { %15510 = vmatmul.mubr.msk.f32.gmra.mrb[8].mxu0 %vm62_vm0, %v530_v18  ;;  %v492_v41 = vmul.f32 %v19980_v6, %v453_v12 }
 0x14c   :  { %v393_v33 = vadd.f32 1e-05, %v361_v24  ;;  %756 = vmatprep.mubr.f32.mxu0 %v19480_v36  ;;  %v18762_v34 = vpop.eup %18761 }
 0x14d   :  { %v288_v56 = vpop.xlane.xlu0 %287  ;;  %v531_v5 = vadd.f32 %v19986_v52, %v492_v41  ;;  %v454_v58 = vmul.f32 %v18762_v34, %v19794_v59  ;;  %v399_v41 = vadd.f32 1e-05, %v367_v29  ;;  %v309_v34 = vpop.xlane.xlu1 %308 }
 0x14e   :  { %v362_v10 = vmul.f32 0.03125, %v288_v56  ;;  %18767 = vrsqrt.f32 %v393_v33 }
 0x14f   :  { %15511 = vmatmul.mubr.msk.f32.gmra.mrb[10].mxu0 %vm62_vm0, %v531_v5  ;;  %v493_v20 = vmul.f32 %v19980_v6, %v454_v58 }
 0x150   :  { %v394_v47 = vadd.f32 1e-05, %v362_v10  ;;  %762 = vmatprep.mubr.f32.mxu0 %v19480_v36  ;;  %v18764_v28 = vpop.eup %18763  ;;  %v369_v10 = vmul.f32 0.03125, %v309_v34 }
 0x151   :  { %v291_v60 = vpop.xlane.xlu0 %290  ;;  %v532_v23 = vadd.f32 %v19986_v52, %v493_v20  ;;  %v455_v2 = vmul.f32 %v18764_v28, %v19799_v8 }
 0x152   :  { %18769 = vrsqrt.f32 %v394_v47  ;;  %v363_v40 = vmul.f32 0.03125, %v291_v60 }
 0x153   :  { %15512 = vmatmul.mubr.msk.f32.gmra.mrb[12].mxu0 %vm62_vm0, %v532_v23  ;;  %v494_v55 = vmul.f32 %v19980_v6, %v455_v2 }
 0x154   :  { %v395_v38 = vadd.f32 1e-05, %v363_v40  ;;  %v18766_v59 = vpop.eup %18765  ;;  %768 = vmatprep.mubr.f32.mxu0 %v19480_v36  ;;  %v401_v40 = vadd.f32 1e-05, %v369_v10 }
 0x155   :  { %v294_v44 = vpop.xlane.xlu0 %293  ;;  %v456_v15 = vmul.f32 %v18766_v59, %v19813_v30  ;;  %v533_v62 = vadd.f32 %v19986_v52, %v494_v55 }
 0x156   :  { %v364_v9 = vmul.f32 0.03125, %v294_v44  ;;  %18771 = vrsqrt.f32 %v395_v38  ;;  %v315_v38 = vpop.xlane.xlu1 %314 }
 0x157   :  { %v495_v8 = vmul.f32 %v19980_v6, %v456_v15  ;;  %18773 = vrsqrt.f32 %v397_v49  ;;  %15513 = vmatmul.mubr.msk.f32.gmra.mrb[14].mxu0 %vm62_vm0, %v533_v62  ;;  %v371_v55 = vmul.f32 0.03125, %v315_v38 }
 0x158   :  { %v396_v63 = vadd.f32 1e-05, %v364_v9  ;;  %v18768_v3 = vpop.eup %18767  ;;  %774 = vmatprep.mubr.f32.mxu0 %v19480_v36 }
 0x159   :  { %v300_v4 = vpop.xlane.xlu0 %299  ;;  %v534_v48 = vadd.f32 %v19986_v52, %v495_v8  ;;  %v457_v30 = vmul.f32 %v18768_v3, %v19820_v31 }
 0x15a   :  { %18775 = vrsqrt.f32 %v396_v63  ;;  %v366_v1 = vmul.f32 0.03125, %v300_v4  ;;  %v403_v63 = vadd.f32 1e-05, %v371_v55  ;;  %v321_v8 = vpop.xlane.xlu1 %320 }
 0x15b   :  { %15514 = vmatmul.mubr.msk.f32.gmra.mrb[16].mxu0 %vm62_vm0, %v534_v48  ;;  %v496_v12 = vmul.f32 %v19980_v6, %v457_v30 }
 0x15c   :  { %v18770_v57 = vpop.eup %18769  ;;  %v398_v13 = vadd.f32 1e-05, %v366_v1  ;;  %780 = vmatprep.mubr.f32.mxu0 %v19480_v36 }
 0x15d   :  { %v306_v18 = vpop.xlane.xlu0 %305  ;;  %v458_v24 = vmul.f32 %v18770_v57, %v19855_v7  ;;  %v535_v56 = vadd.f32 %v19986_v52, %v496_v12 }
 0x15e   :  { %v368_v33 = vmul.f32 0.03125, %v306_v18  ;;  %18777 = vrsqrt.f32 %v398_v13 }
 0x15f   :  { %v497_v5 = vmul.f32 %v19980_v6, %v458_v24  ;;  %15515 = vmatmul.mubr.msk.f32.gmra.mrb[18].mxu0 %vm62_vm0, %v535_v56  ;;  %18779 = vrsqrt.f32 %v399_v41  ;;  %v327_v41 = vpop.xlane.xlu1 %326 }
 0x160   :  { %v18772_v31 = vpop.eup %18771  ;;  %v400_v58 = vadd.f32 1e-05, %v368_v33  ;;  %786 = vmatprep.mubr.f32.mxu0 %v19480_v36 }
 0x161   :  { %v536_v27 = vadd.f32 %v19986_v52, %v497_v5  ;;  %v459_v7 = vmul.f32 %v18772_v31, %v19868_v21  ;;  %v18774_v47 = vpop.eup %18773  ;;  %v312_v20 = vpop.xlane.xlu0 %311 }
 0x162   :  { %18781 = vrsqrt.f32 %v400_v58  ;;  %v370_v23 = vmul.f32 0.03125, %v312_v20  ;;  %v461_v21 = vmul.f32 %v18774_v47, %v19805_v14 }
 0x163   :  { %v498_v16 = vmul.f32 %v19980_v6, %v459_v7  ;;  %15516 = vmatmul.mubr.msk.f32.gmra.mrb[20].mxu0 %vm62_vm0, %v536_v27  ;;  %18783 = vrsqrt.f32 %v401_v40 }
 0x164   :  { %v18776_v28 = vpop.eup %18775  ;;  %792 = vmatprep.mubr.f32.mxu0 %v19480_v36  ;;  %v500_v15 = vmul.f32 %v19980_v6, %v461_v21 }
 0x165   :  { %v460_v60 = vmul.f32 %v18776_v28, %v19879_v43  ;;  %v537_v2 = vadd.f32 %v19986_v52, %v498_v16  ;;  %v402_v43 = vadd.f32 1e-05, %v370_v23  ;;  %v318_v9 = vpop.xlane.xlu0 %317  ;;  %v333_v28 = vpop.xlane.xlu1 %332 }
 0x166   :  { %v372_v14 = vmul.f32 0.03125, %v318_v9  ;;  %v539_v3 = vadd.f32 %v19986_v52, %v500_v15 }
 0x167   :  { %v499_v59 = vmul.f32 %v19980_v6, %v460_v60  ;;  %15517 = vmatmul.mubr.msk.f32.gmra.mrb[22].mxu0 %vm62_vm0, %v537_v2  ;;  %18785 = vrsqrt.f32 %v402_v43 }
 0x168   :  { %v18778_v49 = vpop.eup %18777  ;;  %798 = vmatprep.mubr.f32.mxu0 %v19480_v36  ;;  %18787 = vrsqrt.f32 %v403_v63  ;;  %v404_v48 = vadd.f32 1e-05, %v372_v14 }
 0x169   :  { %v538_v44 = vadd.f32 %v19986_v52, %v499_v59  ;;  %v462_v25 = vmul.f32 %v18778_v49, %v19887_v51  ;;  %v18780_v62 = vpop.eup %18779  ;;  %v373_v51 = vmul.f32 0.03125, %v321_v8  ;;  %v324_v30 = vpop.xlane.xlu0 %323 }
 0x16a   :  { %v463_v29 = vmul.f32 %v18780_v62, %v19816_v0  ;;  %18789 = vrsqrt.f32 %v404_v48  ;;  %v374_v0 = vmul.f32 0.03125, %v324_v30  ;;  %v339_v43 = vpop.xlane.xlu1 %338 }
 0x16b   :  { %15518 = vmatmul.mubr.msk.f32.gmra.mrb[24].mxu0 %vm62_vm0, %v538_v44  ;;  %v501_v4 = vmul.f32 %v19980_v6, %v462_v25  ;;  %v405_v24 = vadd.f32 1e-05, %v373_v51 }
 0x16c   :  { %804 = vmatprep.mubr.f32.mxu0 %v19480_v36  ;;  %v18782_v1 = vpop.eup %18781  ;;  %v502_v13 = vmul.f32 %v19980_v6, %v463_v29  ;;  %v406_v31 = vadd.f32 1e-05, %v374_v0 }
 0x16d   :  { %v540_v57 = vadd.f32 %v19986_v52, %v501_v4  ;;  %v464_v18 = vmul.f32 %v18782_v1, %v19899_v32  ;;  %v18784_v12 = vpop.eup %18783  ;;  %18791 = vrsqrt.f32 %v405_v24  ;;  %v375_v32 = vmul.f32 0.03125, %v327_v41  ;;  %v330_v27 = vpop.xlane.xlu0 %329 }
 0x16e   :  { %v541_v33 = vadd.f32 %v19986_v52, %v502_v13  ;;  %v465_v56 = vmul.f32 %v18784_v12, %v19840_v53  ;;  %18793 = vrsqrt.f32 %v406_v31  ;;  %v376_v53 = vmul.f32 0.03125, %v330_v27 }
 0x16f   :  { %15519 = vmatmul.mubr.msk.f32.gmra.mrb[26].mxu0 %vm62_vm0, %v539_v3  ;;  %v503_v34 = vmul.f32 %v19980_v6, %v464_v18  ;;  %v407_v20 = vadd.f32 1e-05, %v375_v32 }
 0x170   :  { %810 = vmatprep.mubr.f32.mxu0 %v19480_v36  ;;  %v504_v58 = vmul.f32 %v19980_v6, %v465_v56  ;;  %v408_v2 = vadd.f32 1e-05, %v376_v53 }
 0x171   :  { %v18786_v5 = vpop.eup %18785  ;;  %v542_v10 = vadd.f32 %v19986_v52, %v503_v34  ;;  %18795 = vrsqrt.f32 %v407_v20  ;;  %v336_v38 = vpop.xlane.xlu0 %335 }
 0x172   :  { %v466_v7 = vmul.f32 %v18786_v5, %v19908_v26  ;;  %v18788_v47 = vpop.eup %18787  ;;  %v543_v16 = vadd.f32 %v19986_v52, %v504_v58  ;;  %v377_v26 = vmul.f32 0.03125, %v333_v28  ;;  %18797 = vrsqrt.f32 %v408_v2  ;;  %v345_v51 = vpop.xlane.xlu1 %344 }
 0x173   :  { %15520 = vmatmul.mubr.msk.f32.gmra.mrb[28].mxu0 %vm62_vm0, %v540_v57  ;;  %v467_v40 = vmul.f32 %v18788_v47, %v19864_v22  ;;  %v378_v22 = vmul.f32 0.03125, %v336_v38 }
 0x174   :  { %816 = vmatprep.mubr.f32.mxu0 %v19480_v36  ;;  %v505_v60 = vmul.f32 %v19980_v6, %v466_v7  ;;  %v18790_v23 = vpop.eup %18789  ;;  %v409_v55 = vadd.f32 1e-05, %v377_v26 }
 0x175   :  { %v506_v21 = vmul.f32 %v19980_v6, %v467_v40  ;;  %v468_v49 = vmul.f32 %v18790_v23, %v19914_v35  ;;  %v379_v35 = vmul.f32 0.03125, %v339_v43  ;;  %v410_v63 = vadd.f32 1e-05, %v378_v22  ;;  %v342_v14 = vpop.xlane.xlu0 %341 }
 0x176   :  { %v544_v59 = vadd.f32 %v19986_v52, %v505_v60  ;;  %18799 = vrsqrt.f32 %v409_v55 }
 0x177   :  { %15521 = vmatmul.mubr.msk.f32.gmra.mrb[30].mxu0 %vm62_vm0, %v541_v33  ;;  %v18792_v44 = vpop.eup %18791  ;;  %v545_v9 = vadd.f32 %v19986_v52, %v506_v21  ;;  %v507_v15 = vmul.f32 %v19980_v6, %v468_v49  ;;  %v411_v1 = vadd.f32 1e-05, %v379_v35  ;;  %18801 = vrsqrt.f32 %v410_v63 }
 0x178   :  { %822 = vmatprep.mubr.f32.mxu0 %v19480_v36  ;;  %v469_v25 = vmul.f32 %v18792_v44, %v19884_v45  ;;  %v18794_v62 = vpop.eup %18793  ;;  %v380_v45 = vmul.f32 0.03125, %v342_v14 }
 0x179   :  { %v546_v8 = vadd.f32 %v19986_v52, %v507_v15  ;;  %v470_v4 = vmul.f32 %v18794_v62, %v19923_v17  ;;  %18803 = vrsqrt.f32 %v411_v1  ;;  %v381_v17 = vmul.f32 0.03125, %v345_v51  ;;  %v348_v12 = vpop.xlane.xlu0 %347  ;;  %v351_v56 = vpop.xlane.xlu1 %350 }
 0x17a   :  { %v508_v3 = vmul.f32 %v19980_v6, %v469_v25  ;;  %v412_v18 = vadd.f32 1e-05, %v380_v45 }
 0x17b   :  { %15522 = vmatmul.mubr.msk.f32.gmra.mrb[32].mxu0 %vm62_vm0, %v542_v10  ;;  %v18796_v29 = vpop.eup %18795  ;;  %v509_v30 = vmul.f32 %v19980_v6, %v470_v4  ;;  %v413_v34 = vadd.f32 1e-05, %v381_v17 }
 0x17c   :  { %828 = vmatprep.mubr.f32.mxu0 %v19480_v36  ;;  %v547_v48 = vadd.f32 %v19986_v52, %v508_v3  ;;  %v471_v57 = vmul.f32 %v18796_v29, %v19902_v11  ;;  %v18798_v13 = vpop.eup %18797  ;;  %18805 = vrsqrt.f32 %v412_v18  ;;  %v382_v11 = vmul.f32 0.03125, %v348_v12 }
 0x17d   :  { %v548_v24 = vadd.f32 %v19986_v52, %v509_v30  ;;  %v472_v41 = vmul.f32 %v18798_v13, %v19934_v50  ;;  %18807 = vrsqrt.f32 %v413_v34  ;;  %v383_v50 = vmul.f32 0.03125, %v351_v56 }
 0x17e   :  { %v510_v0 = vmul.f32 %v19980_v6, %v471_v57  ;;  %v414_v10 = vadd.f32 1e-05, %v382_v11 }
 0x17f   :  { %15523 = vmatmul.mubr.msk.f32.gmra.mrb[34].mxu0 %vm62_vm0, %v543_v16  ;;  %v511_v32 = vmul.f32 %v19980_v6, %v472_v41  ;;  %v415_v53 = vadd.f32 1e-05, %v383_v50 }
 0x180   :  { %834 = vmatprep.mubr.f32.mxu0 %v19480_v36  ;;  %v18800_v33 = vpop.eup %18799  ;;  %v549_v5 = vadd.f32 %v19986_v52, %v510_v0  ;;  %18809 = vrsqrt.f32 %v414_v10 }
 0x181   :  { %v473_v31 = vmul.f32 %v18800_v33, %v19920_v37  ;;  %v18802_v27 = vpop.eup %18801  ;;  %v550_v58 = vadd.f32 %v19986_v52, %v511_v32  ;;  %18811 = vrsqrt.f32 %v415_v53 }
 0x182   :  { %v474_v47 = vmul.f32 %v18802_v27, %v19942_v42 }
 0x183   :  { %15524 = vmatmul.mubr.msk.f32.gmra.mrb[36].mxu0 %vm62_vm0, %v544_v59  ;;  %v512_v7 = vmul.f32 %v19980_v6, %v473_v31  ;;  %v18804_v20 = vpop.eup %18803 }
 0x184   :  { %840 = vmatprep.mubr.f32.mxu0 %v19480_v36  ;;  %v513_v28 = vmul.f32 %v19980_v6, %v474_v47  ;;  %v475_v16 = vmul.f32 %v18804_v20, %v19938_v61 }
 0x185   :  { %v551_v37 = vadd.f32 %v19986_v52, %v512_v7 }
 0x186   :  { %v18806_v60 = vpop.eup %18805  ;;  %v552_v42 = vadd.f32 %v19986_v52, %v513_v28  ;;  %v514_v40 = vmul.f32 %v19980_v6, %v475_v16 }
 0x187   :  { %15525 = vmatmul.mubr.msk.f32.gmra.mrb[38].mxu0 %vm62_vm0, %v545_v9  ;;  %v476_v23 = vmul.f32 %v18806_v60, %v19950_v54  ;;  %v18808_v26 = vpop.eup %18807 }
 0x188   :  { %846 = vmatprep.mubr.f32.mxu0 %v19480_v36  ;;  %v553_v2 = vadd.f32 %v19986_v52, %v514_v40  ;;  %v477_v38 = vmul.f32 %v18808_v26, %v19956_v19 }
 0x189   :  { %v515_v61 = vmul.f32 %v19980_v6, %v476_v23 }
 0x18a   :  { %v18810_v59 = vpop.eup %18809  ;;  %v516_v54 = vmul.f32 %v19980_v6, %v477_v38 }
 0x18b   :  { %15526 = vmatmul.mubr.msk.f32.gmra.mrb[40].mxu0 %vm62_vm0, %v546_v8  ;;  %v554_v21 = vadd.f32 %v19986_v52, %v515_v61  ;;  %v478_v49 = vmul.f32 %v18810_v59, %v19964_v46  ;;  %v18812_v44 = vpop.eup %18811 }
 0x18c   :  { %852 = vmatprep.mubr.f32.mxu0 %v19480_v36  ;;  %v555_v55 = vadd.f32 %v19986_v52, %v516_v54  ;;  %v479_v22 = vmul.f32 %v18812_v44, %v19971_v39 }
 0x18d   :  { %v517_v19 = vmul.f32 %v19980_v6, %v478_v49 }
 0x18e   :  { %v518_v9 = vmul.f32 %v19980_v6, %v479_v22 }
 0x18f   :  { %15527 = vmatmul.mubr.msk.f32.gmra.mrb[42].mxu0 %vm62_vm0, %v547_v48  ;;  %v556_v43 = vadd.f32 %v19986_v52, %v517_v19 }
 0x190   :  { %858 = vmatprep.mubr.f32.mxu0 %v19480_v36  ;;  %v557_v46 = vadd.f32 %v19986_v52, %v518_v9 }
 0x193   :  { %15528 = vmatmul.mubr.msk.f32.gmra.mrb[44].mxu0 %vm62_vm0, %v548_v24 }
 0x194   :  { %864 = vmatprep.mubr.f32.mxu0 %v19480_v36 }
 0x197   :  { %15529 = vmatmul.mubr.msk.f32.gmra.mrb[46].mxu0 %vm62_vm0, %v549_v5 }
 0x198   :  { %870 = vmatprep.mubr.f32.mxu0 %v19480_v36 }
 0x19b   :  { %15530 = vmatmul.mubr.msk.f32.gmra.mrb[48].mxu0 %vm62_vm0, %v550_v58 }
 0x19c   :  { %876 = vmatprep.mubr.f32.mxu0 %v19480_v36 }
 0x19f   :  { %15531 = vmatmul.mubr.msk.f32.gmra.mrb[50].mxu0 %vm62_vm0, %v551_v37 }
 0x1a0   :  { %882 = vmatprep.mubr.f32.mxu0 %v19480_v36 }
 0x1a3   :  { %15532 = vmatmul.mubr.msk.f32.gmra.mrb[52].mxu0 %vm62_vm0, %v552_v42 }
 0x1a4   :  { %888 = vmatprep.mubr.f32.mxu0 %v19480_v36 }
 0x1a7   :  { %15533 = vmatmul.mubr.msk.f32.gmra.mrb[54].mxu0 %vm62_vm0, %v553_v2 }
 0x1a8   :  { %894 = vmatprep.mubr.f32.mxu0 %v19480_v36 }
 0x1ab   :  { %15534 = vmatmul.mubr.msk.f32.gmra.mrb[56].mxu0 %vm62_vm0, %v554_v21 }
 0x1ac   :  { %900 = vmatprep.mubr.f32.mxu0 %v19480_v36 }
 0x1af   :  { %15535 = vmatmul.mubr.msk.f32.gmra.mrb[58].mxu0 %vm62_vm0, %v555_v55 }
 0x1b0   :  { %906 = vmatprep.mubr.f32.mxu0 %v19480_v36 }
 0x1b3   :  { %15536 = vmatmul.mubr.msk.f32.gmra.mrb[60].mxu0 %vm62_vm0, %v556_v43 }
 0x1b4   :  { %912 = vmatprep.mubr.f32.mxu0 %v19480_v36 }
 0x1b7   :  { %15537 = vmatmul.mubr.msk.f32.gmra.mrb[62].mxu0 %vm62_vm0, %v557_v46 }
 0x20e   :  { %v20146_v15 = vpop.f32.mrb[0].mxu0 }
 0x20f   :  { %919 = vst [vmem:[#allocation2] sm:$0xff] %v20146_v15  ;;  %v20149_v39 = vpop.f32.mrb[1].mxu0  ;;  %16550 = vmatprep.mubr.msk.f32.mxu1 %vm1449_vm1, %v20146_v15 }
 0x210   :  { %24982 = vst [vmem:[#allocation8_spill] sm:$0xff] %v20149_v39  ;;  %921 = vst.msk [vmem:[#allocation2 + $0x8] sm:$0xff] %vm920_vm2, %v20149_v39 }
 0x212   :  { %v20155_v6 = vpop.f32.mrb[2].mxu0 }
 0x213   :  { %922 = vst [vmem:[#allocation2 + $0x10] sm:$0xff] %v20155_v6  ;;  %v20158_v36 = vpop.f32.mrb[3].mxu0  ;;  %v20162_v52 = vpack.i.bf16 %v20155_v6, %v20146_v15 }
 0x214   :  { %24983 = vst [vmem:[#allocation9_spill] sm:$0xff] %v20158_v36  ;;  %923 = vst.msk [vmem:[#allocation2 + $0x18] sm:$0xff] %vm920_vm2, %v20158_v36 }
 0x215   :  { %18190 = vrot.lane.b32.xlu0 %v20162_v52, %s19481_s2 }
 0x216   :  { %v20168_v25 = vpop.f32.mrb[4].mxu0 }
 0x217   :  { %924 = vst [vmem:[#allocation2 + $0x20] sm:$0xff] %v20168_v25  ;;  %v20171_v62 = vpop.f32.mrb[5].mxu0  ;;  %v20184_v8 = vld [vmem:[#allocation2 + $0x8] sm:$0xff] }
 0x218   :  { %24984 = vst [vmem:[#allocation10_spill] sm:$0xff] %v20171_v62  ;;  %925 = vst.msk [vmem:[#allocation2 + $0x28] sm:$0xff] %vm920_vm2, %v20171_v62 }
 0x21a   :  { %v20175_v35 = vpop.f32.mrb[6].mxu0 }
 0x21b   :  { %926 = vst [vmem:[#allocation2 + $0x30] sm:$0xff] %v20175_v35  ;;  %v20178_v63 = vpop.f32.mrb[7].mxu0  ;;  %v20182_v14 = vpack.i.bf16 %v20175_v35, %v20168_v25  ;;  %v20186_v3 = vld [vmem:[#allocation2 + $0x18] sm:$0xff] }
 0x21c   :  { %24985 = vst [vmem:[#allocation11_spill] sm:$0xff] %v20178_v63  ;;  %927 = vst.msk [vmem:[#allocation2 + $0x38] sm:$0xff] %vm920_vm2, %v20178_v63 }
 0x21d   :  { %18195 = vrot.lane.b32.xlu1 %v20182_v14, %s19481_s2 }
 0x21e   :  { %v20194_v29 = vpop.f32.mrb[8].mxu0 }
 0x21f   :  { %928 = vst [vmem:[#allocation2 + $0x40] sm:$0xff] %v20194_v29  ;;  %v20197_v1 = vpop.f32.mrb[9].mxu0  ;;  %v1411_v48 = vld [vmem:[#allocation2 + $0x28] sm:$0xff] }
 0x220   :  { %24986 = vst [vmem:[#allocation12_spill] sm:$0xff] %v20197_v1  ;;  %929 = vst.msk [vmem:[#allocation2 + $0x48] sm:$0xff] %vm920_vm2, %v20197_v1 }
 0x222   :  { %v20201_v45 = vpop.f32.mrb[10].mxu0 }
 0x223   :  { %930 = vst [vmem:[#allocation2 + $0x50] sm:$0xff] %v20201_v45  ;;  %v20204_v51 = vpop.f32.mrb[11].mxu0  ;;  %v1412_v30 = vld [vmem:[#allocation2 + $0x38] sm:$0xff]  ;;  %v20208_v57 = vpack.i.bf16 %v20201_v45, %v20194_v29 }
 0x224   :  { %24987 = vst [vmem:[#allocation13_spill] sm:$0xff] %v20204_v51  ;;  %931 = vst.msk [vmem:[#allocation2 + $0x58] sm:$0xff] %vm920_vm2, %v20204_v51  ;;  %v17614_v13 = vpack.c.bf16 %v1412_v30, %v1411_v48 }
 0x225   :  { %18200 = vrot.lane.b32.xlu1 %v20208_v57, %s19481_s2 }
 0x226   :  { %17615 = vmatprep.subr.bf16.mxu0 %v17614_v13  ;;  %v20214_v17 = vpop.f32.mrb[12].mxu0 }
 0x227   :  { %17617 = vmatpush3.bf16.msra.mxu0 %v17614_v13  ;;  %932 = vst [vmem:[#allocation2 + $0x60] sm:$0xff] %v20214_v17  ;;  %v20217_v18 = vpop.f32.mrb[13].mxu0  ;;  %v20221_v12 = vld [vmem:[#allocation2 + $0x48] sm:$0xff] }
 0x228   :  { %24988 = vst [vmem:[#allocation14_spill] sm:$0xff] %v20217_v18  ;;  %933 = vst.msk [vmem:[#allocation2 + $0x68] sm:$0xff] %vm920_vm2, %v20217_v18 }
 0x22a   :  { %v20225_v0 = vpop.f32.mrb[14].mxu0 }
 0x22b   :  { %v20223_v24 = vld [vmem:[#allocation2 + $0x58] sm:$0xff]  ;;  %934 = vst [vmem:[#allocation2 + $0x70] sm:$0xff] %v20225_v0  ;;  %v20230_v33 = vpop.f32.mrb[15].mxu0  ;;  %v20234_v34 = vpack.i.bf16 %v20225_v0, %v20214_v17 }
 0x22c   :  { %24989 = vst [vmem:[#allocation15_spill] sm:$0xff] %v20230_v33  ;;  %935 = vst.msk [vmem:[#allocation2 + $0x78] sm:$0xff] %vm920_vm2, %v20230_v33 }
 0x22d   :  { %18205 = vrot.lane.b32.xlu1 %v20234_v34, %s19481_s2 }
 0x22e   :  { %v20240_v11 = vpop.f32.mrb[16].mxu0 }
 0x22f   :  { %936 = vst [vmem:[#allocation2 + $0x80] sm:$0xff] %v20240_v11  ;;  %v20243_v56 = vpop.f32.mrb[17].mxu0  ;;  %v1415_v31 = vld [vmem:[#allocation2 + $0x68] sm:$0xff] }
 0x230   :  { %24990 = vst [vmem:[#allocation16_spill] sm:$0xff] %v20243_v56  ;;  %937 = vst.msk [vmem:[#allocation2 + $0x88] sm:$0xff] %vm920_vm2, %v20243_v56 }
 0x232   :  { %v20247_v5 = vpop.f32.mrb[18].mxu0 }
 0x233   :  { %938 = vst [vmem:[#allocation2 + $0x90] sm:$0xff] %v20247_v5  ;;  %v20250_v32 = vpop.f32.mrb[19].mxu0  ;;  %v1416_v27 = vld [vmem:[#allocation2 + $0x78] sm:$0xff]  ;;  %v20254_v50 = vpack.i.bf16 %v20247_v5, %v20240_v11 }
 0x234   :  { %24991 = vst [vmem:[#allocation17_spill] sm:$0xff] %v20250_v32  ;;  %939 = vst.msk [vmem:[#allocation2 + $0x98] sm:$0xff] %vm920_vm2, %v20250_v32  ;;  %v20258_v10 = vpack.c.bf16 %v1416_v27, %v1415_v31 }
 0x235   :  { %18210 = vrot.lane.b32.xlu0 %v20254_v50, %s19481_s2 }
 0x236   :  { %v20262_v58 = vpop.f32.mrb[20].mxu0  ;;  %17623 = vmatprep.subr.bf16.mxu0 %v20258_v10 }
 0x237   :  { %940 = vst [vmem:[#allocation2 + $0xa0] sm:$0xff] %v20262_v58  ;;  %v20266_v7 = vpop.f32.mrb[21].mxu0 }
 0x238   :  { %24992 = vst [vmem:[#allocation18_spill] sm:$0xff] %v20266_v7  ;;  %941 = vst.msk [vmem:[#allocation2 + $0xa8] sm:$0xff] %vm920_vm2, %v20266_v7 }
 0x23a   :  { %v20270_v47 = vpop.f32.mrb[22].mxu0 }
 0x23b   :  { %942 = vst [vmem:[#allocation2 + $0xb0] sm:$0xff] %v20270_v47  ;;  %v20273_v20 = vpop.f32.mrb[23].mxu0  ;;  %v20277_v53 = vpack.i.bf16 %v20270_v47, %v20262_v58 }
 0x23c   :  { %24993 = vst [vmem:[#allocation19_spill] sm:$0xff] %v20273_v20  ;;  %943 = vst.msk [vmem:[#allocation2 + $0xb8] sm:$0xff] %vm920_vm2, %v20273_v20 }
 0x23d   :  { %18215 = vrot.lane.b32.xlu1 %v20277_v53, %s19481_s2 }
 0x23e   :  { %v20283_v37 = vpop.f32.mrb[24].mxu0 }
 0x23f   :  { %944 = vst [vmem:[#allocation2 + $0xc0] sm:$0xff] %v20283_v37  ;;  %v20286_v28 = vpop.f32.mrb[25].mxu0 }
 0x240   :  { %24994 = vst [vmem:[#allocation20_spill] sm:$0xff] %v20286_v28  ;;  %945 = vst.msk [vmem:[#allocation2 + $0xc8] sm:$0xff] %vm920_vm2, %v20286_v28 }
 0x242   :  { %v20290_v16 = vpop.f32.mrb[26].mxu0 }
 0x243   :  { %946 = vst [vmem:[#allocation2 + $0xd0] sm:$0xff] %v20290_v16  ;;  %v20293_v60 = vpop.f32.mrb[27].mxu0  ;;  %v20297_v42 = vpack.i.bf16 %v20290_v16, %v20283_v37 }
 0x244   :  { %24995 = vst [vmem:[#allocation21_spill] sm:$0xff] %v20293_v60  ;;  %947 = vst.msk [vmem:[#allocation2 + $0xd8] sm:$0xff] %vm920_vm2, %v20293_v60 }
 0x245   :  { %18220 = vrot.lane.b32.xlu0 %v20297_v42, %s19481_s2 }
 0x246   :  { %v20303_v40 = vpop.f32.mrb[28].mxu0 }
 0x247   :  { %948 = vst [vmem:[#allocation2 + $0xe0] sm:$0xff] %v20303_v40  ;;  %v20306_v23 = vpop.f32.mrb[29].mxu0 }
 0x248   :  { %24996 = vst [vmem:[#allocation22_spill] sm:$0xff] %v20306_v23  ;;  %949 = vst.msk [vmem:[#allocation2 + $0xe8] sm:$0xff] %vm920_vm2, %v20306_v23 }
 0x24a   :  { %v20310_v26 = vpop.f32.mrb[30].mxu0 }
 0x24b   :  { %950 = vst [vmem:[#allocation2 + $0xf0] sm:$0xff] %v20310_v26  ;;  %v20313_v2 = vpop.f32.mrb[31].mxu0  ;;  %v20317_v61 = vpack.i.bf16 %v20310_v26, %v20303_v40 }
 0x24c   :  { %24997 = vst [vmem:[#allocation23_spill] sm:$0xff] %v20313_v2  ;;  %951 = vst.msk [vmem:[#allocation2 + $0xf8] sm:$0xff] %vm920_vm2, %v20313_v2 }
 0x24d   :  { %18225 = vrot.lane.b32.xlu1 %v20317_v61, %s19481_s2 }
 0x24e   :  { %v20323_v38 = vpop.f32.mrb[32].mxu0 }
 0x24f   :  { %952 = vst [vmem:[#allocation2 + $0x100] sm:$0xff] %v20323_v38  ;;  %v20326_v59 = vpop.f32.mrb[33].mxu0 }
 0x250   :  { %24998 = vst [vmem:[#allocation24_spill] sm:$0xff] %v20326_v59  ;;  %953 = vst.msk [vmem:[#allocation2 + $0x108] sm:$0xff] %vm920_vm2, %v20326_v59 }
 0x252   :  { %v20330_v21 = vpop.f32.mrb[34].mxu0 }
 0x253   :  { %954 = vst [vmem:[#allocation2 + $0x110] sm:$0xff] %v20330_v21  ;;  %v20333_v54 = vpop.f32.mrb[35].mxu0  ;;  %v20337_v49 = vpack.i.bf16 %v20330_v21, %v20323_v38 }
 0x254   :  { %24999 = vst [vmem:[#allocation25_spill] sm:$0xff] %v20333_v54  ;;  %955 = vst.msk [vmem:[#allocation2 + $0x118] sm:$0xff] %vm920_vm2, %v20333_v54 }
 0x255   :  { %18230 = vrot.lane.b32.xlu0 %v20337_v49, %s19481_s2 }
 0x256   :  { %v20343_v44 = vpop.f32.mrb[36].mxu0 }
 0x257   :  { %956 = vst [vmem:[#allocation2 + $0x120] sm:$0xff] %v20343_v44  ;;  %v20346_v55 = vpop.f32.mrb[37].mxu0 }
 0x258   :  { %25000 = vst [vmem:[#allocation26_spill] sm:$0xff] %v20346_v55  ;;  %957 = vst.msk [vmem:[#allocation2 + $0x128] sm:$0xff] %vm920_vm2, %v20346_v55 }
 0x25a   :  { %v20350_v19 = vpop.f32.mrb[38].mxu0 }
 0x25b   :  { %958 = vst [vmem:[#allocation2 + $0x130] sm:$0xff] %v20350_v19  ;;  %v20353_v22 = vpop.f32.mrb[39].mxu0  ;;  %v20357_v43 = vpack.i.bf16 %v20350_v19, %v20343_v44 }
 0x25c   :  { %25001 = vst [vmem:[#allocation27_spill] sm:$0xff] %v20353_v22  ;;  %959 = vst.msk [vmem:[#allocation2 + $0x138] sm:$0xff] %vm920_vm2, %v20353_v22 }
 0x25d   :  { %18235 = vrot.lane.b32.xlu1 %v20357_v43, %s19481_s2 }
 0x25e   :  { %v20363_v9 = vpop.f32.mrb[40].mxu0 }
 0x25f   :  { %960 = vst [vmem:[#allocation2 + $0x140] sm:$0xff] %v20363_v9  ;;  %v20366_v46 = vpop.f32.mrb[41].mxu0 }
 0x260   :  { %25002 = vst [vmem:[#allocation28_spill] sm:$0xff] %v20366_v46  ;;  %961 = vst.msk [vmem:[#allocation2 + $0x148] sm:$0xff] %vm920_vm2, %v20366_v46 }
 0x262   :  { %v20370_v48 = vpop.f32.mrb[42].mxu0 }
 0x263   :  { %962 = vst [vmem:[#allocation2 + $0x150] sm:$0xff] %v20370_v48  ;;  %v20373_v30 = vpop.f32.mrb[43].mxu0  ;;  %v20377_v13 = vpack.i.bf16 %v20370_v48, %v20363_v9 }
 0x264   :  { %25003 = vst [vmem:[#allocation29_spill] sm:$0xff] %v20373_v30  ;;  %963 = vst.msk [vmem:[#allocation2 + $0x158] sm:$0xff] %vm920_vm2, %v20373_v30 }
 0x265   :  { %18240 = vrot.lane.b32.xlu0 %v20377_v13, %s19481_s2 }
 0x266   :  { %v20383_v31 = vpop.f32.mrb[44].mxu0 }
 0x267   :  { %964 = vst [vmem:[#allocation2 + $0x160] sm:$0xff] %v20383_v31  ;;  %v20386_v27 = vpop.f32.mrb[45].mxu0 }
 0x268   :  { %25004 = vst [vmem:[#allocation30_spill] sm:$0xff] %v20386_v27  ;;  %965 = vst.msk [vmem:[#allocation2 + $0x168] sm:$0xff] %vm920_vm2, %v20386_v27 }
 0x26a   :  { %v20390_v41 = vpop.f32.mrb[46].mxu0 }
 0x26b   :  { %966 = vst [vmem:[#allocation2 + $0x170] sm:$0xff] %v20390_v41  ;;  %v20393_v4 = vpop.f32.mrb[47].mxu0  ;;  %v20397_v60 = vpack.i.bf16 %v20390_v41, %v20383_v31 }
 0x26c   :  { %25005 = vst [vmem:[#allocation31_spill] sm:$0xff] %v20393_v4  ;;  %967 = vst.msk [vmem:[#allocation2 + $0x178] sm:$0xff] %vm920_vm2, %v20393_v4 }
 0x26d   :  { %18245 = vrot.lane.b32.xlu1 %v20397_v60, %s19481_s2 }
 0x26e   :  { %v20403_v28 = vpop.f32.mrb[48].mxu0 }
 0x26f   :  { %968 = vst [vmem:[#allocation2 + $0x180] sm:$0xff] %v20403_v28  ;;  %v20406_v20 = vpop.f32.mrb[49].mxu0 }
 0x270   :  { %25006 = vst [vmem:[#allocation32_spill] sm:$0xff] %v20406_v20  ;;  %969 = vst.msk [vmem:[#allocation2 + $0x188] sm:$0xff] %vm920_vm2, %v20406_v20 }
 0x272   :  { %v20410_v7 = vpop.f32.mrb[50].mxu0 }
 0x273   :  { %970 = vst [vmem:[#allocation2 + $0x190] sm:$0xff] %v20410_v7  ;;  %v20413_v32 = vpop.f32.mrb[51].mxu0  ;;  %v20417_v56 = vpack.i.bf16 %v20410_v7, %v20403_v28 }
 0x274   :  { %25007 = vst [vmem:[#allocation33_spill] sm:$0xff] %v20413_v32  ;;  %971 = vst.msk [vmem:[#allocation2 + $0x198] sm:$0xff] %vm920_vm2, %v20413_v32 }
 0x275   :  { %18250 = vrot.lane.b32.xlu0 %v20417_v56, %s19481_s2 }
 0x276   :  { %v20423_v33 = vpop.f32.mrb[52].mxu0 }
 0x277   :  { %972 = vst [vmem:[#allocation2 + $0x1a0] sm:$0xff] %v20423_v33  ;;  %v20426_v20 = vpop.f32.mrb[53].mxu0 }
 0x278   :  { %25008 = vst [vmem:[#allocation34_spill] sm:$0xff] %v20426_v20  ;;  %973 = vst.msk [vmem:[#allocation2 + $0x1a8] sm:$0xff] %vm920_vm2, %v20426_v20 }
 0x27a   :  { %v20430_v18 = vpop.f32.mrb[54].mxu0 }
 0x27b   :  { %974 = vst [vmem:[#allocation2 + $0x1b0] sm:$0xff] %v20430_v18  ;;  %v20433_v4 = vpop.f32.mrb[55].mxu0  ;;  %v20437_v32 = vpack.i.bf16 %v20430_v18, %v20423_v33 }
 0x27c   :  { %25009 = vst [vmem:[#allocation35_spill] sm:$0xff] %v20433_v4  ;;  %975 = vst.msk [vmem:[#allocation2 + $0x1b8] sm:$0xff] %vm920_vm2, %v20433_v4 }
 0x27d   :  { %18255 = vrot.lane.b32.xlu1 %v20437_v32, %s19481_s2 }
 0x27e   :  { %v20443_v27 = vpop.f32.mrb[56].mxu0 }
 0x27f   :  { %976 = vst [vmem:[#allocation2 + $0x1c0] sm:$0xff] %v20443_v27  ;;  %v20446_v20 = vpop.f32.mrb[57].mxu0  ;;  %v20459_v51 = vld [vmem:[#allocation2 + $0x1a8] sm:$0xff] }
 0x280   :  { %25010 = vst [vmem:[#allocation36_spill] sm:$0xff] %v20446_v20  ;;  %977 = vst.msk [vmem:[#allocation2 + $0x1c8] sm:$0xff] %vm920_vm2, %v20446_v20 }
 0x282   :  { %v20450_v30 = vpop.f32.mrb[58].mxu0 }
 0x283   :  { %978 = vst [vmem:[#allocation2 + $0x1d0] sm:$0xff] %v20450_v30  ;;  %v20453_v46 = vpop.f32.mrb[59].mxu0  ;;  %v20457_v4 = vpack.i.bf16 %v20450_v30, %v20443_v27  ;;  %v20461_v1 = vld [vmem:[#allocation2 + $0x1b8] sm:$0xff] }
 0x284   :  { %25011 = vst [vmem:[#allocation37_spill] sm:$0xff] %v20453_v46  ;;  %979 = vst.msk [vmem:[#allocation2 + $0x1d8] sm:$0xff] %vm920_vm2, %v20453_v46  ;;  %v20467_v20 = vpack.c.bf16 %v20461_v1, %v20459_v51  ;;  %v25013_v46 = vmov 0 }
 0x285   :  { %18260 = vrot.lane.b32.xlu0 %v20457_v4, %s19481_s2  ;;  %v25014_v46 = vsel %vm20478_vm3, 4294967295, %v25013_v46 }
 0x286   :  { %v20471_v55 = vpop.f32.mrb[60].mxu0  ;;  %25015 = vst [vmem:[#allocation39_spill] sm:$0xff] %v25014_v46 }
 0x287   :  { %v18191_v22 = vpop.permute.xlu0 %18190  ;;  %980 = vst [vmem:[#allocation2 + $0x1e0] sm:$0xff] %v20471_v55  ;;  %v20474_v59 = vpop.f32.mrb[61].mxu0 }
 0x288   :  { %v18193_v63 = vunpack.i.h.bf16 %v18191_v22  ;;  %v18192_v62 = vunpack.i.l.bf16 %v18191_v22  ;;  %25012 = vst [vmem:[#allocation38_spill] sm:$0xff] %v20474_v59  ;;  %981 = vst.msk [vmem:[#allocation2 + $0x1e8] sm:$0xff] %vm920_vm2, %v20474_v59 }
 0x289   :  { %18270 = vrot.lane.b32.xlu0 %v20162_v52, %s19482_s3 }
 0x28a   :  { %v17514_v36 = vpack.c.bf16 %v18193_v63, %v18192_v62  ;;  %v20486_v39 = vpop.f32.mrb[62].mxu0 }
 0x28b   :  { %982 = vst [vmem:[#allocation2 + $0x1f0] sm:$0xff] %v20486_v39  ;;  %v20491_v22 = vpop.f32.mrb[63].mxu0  ;;  %v20495_v54 = vpack.i.bf16 %v20486_v39, %v20471_v55 }
 0x28c   :  { %17516 = vmatprep.subr.msk.bf16.mxu1 %vm20478_vm3, %v17514_v36  ;;  %25016 = vst [vmem:[#allocation40_spill] sm:$0xff] %v20491_v22  ;;  %983 = vst.msk [vmem:[#allocation2 + $0x1f8] sm:$0xff] %vm920_vm2, %v20491_v22 }
 0x28d   :  { %17519 = vmatpush3.bf16.xpose.msk.msra.mxu1 %vm20478_vm3, %v17514_v36  ;;  %4619 = vrot.lane.b32.xlu0 %v20155_v6, %s19483_s21 }
 0x28e   :  { %18265 = vrot.lane.b32.xlu1 %v20495_v54, %s19481_s2 }
 0x28f   :  { %v18196_v52 = vpop.permute.xlu1 %18195  ;;  %v20517_v36 = vld [vmem:[#allocation2 + $0x1e8] sm:$0xff] }
 0x290   :  { %v18198_v62 = vunpack.i.h.bf16 %v18196_v52  ;;  %v18197_v63 = vunpack.i.l.bf16 %v18196_v52 }
 0x291   :  { %4710 = vrot.lane.b32.xlu0 %v20168_v25, %s19483_s21 }
 0x292   :  { %v17520_v59 = vpack.c.bf16 %v18198_v62, %v18197_v63  ;;  %18275 = vrot.lane.b32.xlu1 %v20182_v14, %s19482_s3 }
 0x293   :  { %v20519_v52 = vld [vmem:[#allocation2 + $0x1f8] sm:$0xff] }
 0x294   :  { %16551 = vmatmul.mubr.msk.f32.vlgmr.msra.gmra.mrb[0].mxu1 %vm1449_vm1, %v20155_v6  ;;  %17522 = vmatprep.subr.msk.bf16.mxu1 %vm20478_vm3, %v17520_v59  ;;  %v20523_v62 = vpack.c.bf16 %v20519_v52, %v20517_v36 }
 0x295   :  { %17525 = vmatpush3.bf16.xpose.msk.msra.mxu1 %vm20478_vm3, %v17520_v59  ;;  %16557 = vmatprep.mubr.msk.f32.mxu1 %vm1449_vm1, %v20168_v25 }
 0x296   :  { %18290 = vrot.lane.b32.xlu0 %v20254_v50, %s19482_s3  ;;  %18280 = vrot.lane.b32.xlu1 %v20208_v57, %s19482_s3 }
 0x297   :  { %v18201_v6 = vpop.permute.xlu1 %18200 }
 0x298   :  { %v18203_v14 = vunpack.i.h.bf16 %v18201_v6  ;;  %v18202_v59 = vunpack.i.l.bf16 %v18201_v6 }
 0x29a   :  { %v17526_v63 = vpack.c.bf16 %v18203_v14, %v18202_v59  ;;  %4805 = vrot.lane.b32.xlu0 %v20201_v45, %s19483_s21  ;;  %4617 = vrot.lane.b32.xlu1 %v20146_v15, %s19483_s21 }
 0x29c   :  { %16558 = vmatmul.mubr.msk.f32.vlgmr.msra.gmra.mrb[2].mxu1 %vm1449_vm1, %v20175_v35  ;;  %17528 = vmatprep.subr.msk.bf16.mxu1 %vm20478_vm3, %v17526_v63 }
 0x29d   :  { %17531 = vmatpush3.bf16.xpose.msk.msra.mxu1 %vm20478_vm3, %v17526_v63  ;;  %16564 = vmatprep.mubr.msk.f32.mxu1 %vm1449_vm1, %v20194_v29 }
 0x29e   :  { %4896 = vrot.lane.b32.xlu0 %v20214_v17, %s19483_s21  ;;  %18285 = vrot.lane.b32.xlu1 %v20234_v34, %s19482_s3 }
 0x29f   :  { %v18206_v25 = vpop.permute.xlu1 %18205 }
 0x2a0   :  { %v18208_v15 = vunpack.i.h.bf16 %v18206_v25  ;;  %v18207_v57 = vunpack.i.l.bf16 %v18206_v25 }
 0x2a2   :  { %18300 = vrot.lane.b32.xlu0 %v20297_v42, %s19482_s3  ;;  %4712 = vrot.lane.b32.xlu1 %v20175_v35, %s19483_s21  ;;  %v17532_v50 = vpack.c.bf16 %v18208_v15, %v18207_v57 }
 0x2a4   :  { %16565 = vmatmul.mubr.msk.f32.vlgmr.msra.gmra.mrb[4].mxu1 %vm1449_vm1, %v20201_v45  ;;  %17534 = vmatprep.subr.msk.bf16.mxu1 %vm20478_vm3, %v17532_v50 }
 0x2a5   :  { %16571 = vmatprep.mubr.msk.f32.mxu1 %vm1449_vm1, %v20214_v17  ;;  %17537 = vmatpush3.bf16.xpose.msk.msra.mxu1 %vm20478_vm3, %v17532_v50 }
 0x2a6   :  { %4991 = vrot.lane.b32.xlu0 %v20247_v5, %s19483_s21  ;;  %4803 = vrot.lane.b32.xlu1 %v20194_v29, %s19483_s21 }
 0x2a7   :  { %v18211_v35 = vpop.permute.xlu0 %18210 }
 0x2a8   :  { %v18213_v34 = vunpack.i.h.bf16 %v18211_v35  ;;  %v18212_v42 = vunpack.i.l.bf16 %v18211_v35 }
 0x2aa   :  { %5082 = vrot.lane.b32.xlu0 %v20262_v58, %s19483_s21  ;;  %18295 = vrot.lane.b32.xlu1 %v20277_v53, %s19482_s3  ;;  %v17538_v45 = vpack.c.bf16 %v18213_v34, %v18212_v42 }
 0x2ac   :  { %17540 = vmatprep.subr.msk.bf16.mxu1 %vm20478_vm3, %v17538_v45  ;;  %16572 = vmatmul.mubr.msk.f32.vlgmr.msra.gmra.mrb[6].mxu1 %vm1449_vm1, %v20225_v0 }
 0x2ad   :  { %17543 = vmatpush3.bf16.xpose.msk.msra.mxu1 %vm20478_vm3, %v17538_v45  ;;  %16578 = vmatprep.mubr.msk.f32.mxu1 %vm1449_vm1, %v20240_v11 }
 0x2ae   :  { %18310 = vrot.lane.b32.xlu0 %v20337_v49, %s19482_s3  ;;  %4898 = vrot.lane.b32.xlu1 %v20225_v0, %s19483_s21 }
 0x2af   :  { %v18216_v29 = vpop.permute.xlu1 %18215 }
 0x2b0   :  { %v18218_v17 = vunpack.i.h.bf16 %v18216_v29  ;;  %v18217_v53 = vunpack.i.l.bf16 %v18216_v29  ;;  %v17610_v29 = vpack.c.bf16 %v20186_v3, %v20184_v8 }
 0x2b2   :  { %5177 = vrot.lane.b32.xlu0 %v20290_v16, %s19483_s21  ;;  %v17544_v6 = vpack.c.bf16 %v18218_v17, %v18217_v53  ;;  %4989 = vrot.lane.b32.xlu1 %v20240_v11, %s19483_s21 }
 0x2b4   :  { %17546 = vmatprep.subr.msk.bf16.mxu1 %vm20478_vm3, %v17544_v6  ;;  %16579 = vmatmul.mubr.msk.f32.vlgmr.msra.gmra.mrb[8].mxu1 %vm1449_vm1, %v20247_v5 }
 0x2b5   :  { %17549 = vmatpush3.bf16.xpose.msk.msra.mxu1 %vm20478_vm3, %v17544_v6  ;;  %16585 = vmatprep.mubr.msk.f32.mxu1 %vm1449_vm1, %v20262_v58 }
 0x2b6   :  { %5268 = vrot.lane.b32.xlu0 %v20303_v40, %s19483_s21  ;;  %18305 = vrot.lane.b32.xlu1 %v20317_v61, %s19482_s3 }
 0x2b7   :  { %v18221_v0 = vpop.permute.xlu0 %18220 }
 0x2b8   :  { %v18223_v11 = vunpack.i.h.bf16 %v18221_v0  ;;  %v18222_v49 = vunpack.i.l.bf16 %v18221_v0 }
 0x2ba   :  { %18320 = vrot.lane.b32.xlu0 %v20377_v13, %s19482_s3  ;;  %v17550_v14 = vpack.c.bf16 %v18223_v11, %v18222_v49  ;;  %5084 = vrot.lane.b32.xlu1 %v20270_v47, %s19483_s21 }
 0x2bc   :  { %17552 = vmatprep.subr.msk.bf16.mxu1 %vm20478_vm3, %v17550_v14  ;;  %16586 = vmatmul.mubr.msk.f32.vlgmr.msra.gmra.mrb[10].mxu1 %vm1449_vm1, %v20270_v47 }
 0x2bd   :  { %17555 = vmatpush3.bf16.xpose.msk.msra.mxu1 %vm20478_vm3, %v17550_v14  ;;  %16592 = vmatprep.mubr.msk.f32.mxu1 %vm1449_vm1, %v20283_v37 }
 0x2be   :  { %5363 = vrot.lane.b32.xlu0 %v20330_v21, %s19483_s21  ;;  %5175 = vrot.lane.b32.xlu1 %v20283_v37, %s19483_s21 }
 0x2bf   :  { %v18226_v5 = vpop.permute.xlu1 %18225 }
 0x2c0   :  { %v18228_v58 = vunpack.i.h.bf16 %v18226_v5  ;;  %v18227_v61 = vunpack.i.l.bf16 %v18226_v5 }
 0x2c2   :  { %5454 = vrot.lane.b32.xlu0 %v20343_v44, %s19483_s21  ;;  %v17556_v13 = vpack.c.bf16 %v18228_v58, %v18227_v61  ;;  %18315 = vrot.lane.b32.xlu1 %v20357_v43, %s19482_s3 }
 0x2c4   :  { %17558 = vmatprep.subr.msk.bf16.mxu1 %vm20478_vm3, %v17556_v13  ;;  %16593 = vmatmul.mubr.msk.f32.vlgmr.msra.gmra.mrb[12].mxu1 %vm1449_vm1, %v20290_v16 }
 0x2c5   :  { %17561 = vmatpush3.bf16.xpose.msk.msra.mxu1 %vm20478_vm3, %v17556_v13  ;;  %16599 = vmatprep.mubr.msk.f32.mxu1 %vm1449_vm1, %v20303_v40 }
 0x2c6   :  { %18330 = vrot.lane.b32.xlu0 %v20417_v56, %s19482_s3  ;;  %5270 = vrot.lane.b32.xlu1 %v20310_v26, %s19483_s21 }
 0x2c7   :  { %v18231_v47 = vpop.permute.xlu0 %18230 }
 0x2c8   :  { %v18233_v37 = vunpack.i.h.bf16 %v18231_v47  ;;  %v18232_v43 = vunpack.i.l.bf16 %v18231_v47 }
 0x2ca   :  { %5549 = vrot.lane.b32.xlu0 %v20370_v48, %s19483_s21  ;;  %v17562_v59 = vpack.c.bf16 %v18233_v37, %v18232_v43  ;;  %5361 = vrot.lane.b32.xlu1 %v20323_v38, %s19483_s21 }
 0x2cc   :  { %17564 = vmatprep.subr.msk.bf16.mxu1 %vm20478_vm3, %v17562_v59  ;;  %16600 = vmatmul.mubr.msk.f32.vlgmr.msra.gmra.mrb[14].mxu1 %vm1449_vm1, %v20310_v26 }
 0x2cd   :  { %17567 = vmatpush3.bf16.xpose.msk.msra.mxu1 %vm20478_vm3, %v17562_v59  ;;  %16606 = vmatprep.mubr.msk.f32.mxu1 %vm1449_vm1, %v20323_v38 }
 0x2ce   :  { %5640 = vrot.lane.b32.xlu0 %v20383_v31, %s19483_s21  ;;  %18325 = vrot.lane.b32.xlu1 %v20397_v60, %s19482_s3 }
 0x2cf   :  { %v18236_v56 = vpop.permute.xlu1 %18235 }
 0x2d0   :  { %v18238_v16 = vunpack.i.h.bf16 %v18236_v56  ;;  %v18237_v40 = vunpack.i.l.bf16 %v18236_v56 }
 0x2d2   :  { %5733 = vrot.lane.b32.xlu0 %v20403_v28, %s19483_s21  ;;  %v17568_v63 = vpack.c.bf16 %v18238_v16, %v18237_v40  ;;  %5456 = vrot.lane.b32.xlu1 %v20350_v19, %s19483_s21 }
 0x2d4   :  { %17570 = vmatprep.subr.msk.bf16.mxu1 %vm20478_vm3, %v17568_v63  ;;  %16607 = vmatmul.mubr.msk.f32.vlgmr.msra.gmra.mrb[16].mxu1 %vm1449_vm1, %v20330_v21 }
 0x2d5   :  { %17573 = vmatpush3.bf16.xpose.msk.msra.mxu1 %vm20478_vm3, %v17568_v63  ;;  %16613 = vmatprep.mubr.msk.f32.mxu1 %vm1449_vm1, %v20343_v44 }
 0x2d6   :  { %5735 = vrot.lane.b32.xlu0 %v20410_v7, %s19483_s21  ;;  %5547 = vrot.lane.b32.xlu1 %v20363_v9, %s19483_s21 }
 0x2d7   :  { %v18241_v60 = vpop.permute.xlu0 %18240 }
 0x2d8   :  { %v18243_v26 = vunpack.i.h.bf16 %v18241_v60  ;;  %v18242_v38 = vunpack.i.l.bf16 %v18241_v60 }
 0x2da   :  { %5919 = vrot.lane.b32.xlu0 %v20443_v27, %s19483_s21  ;;  %v17574_v25 = vpack.c.bf16 %v18243_v26, %v18242_v38  ;;  %18335 = vrot.lane.b32.xlu1 %v20437_v32, %s19482_s3 }
 0x2dc   :  { %17576 = vmatprep.subr.msk.bf16.mxu1 %vm20478_vm3, %v17574_v25  ;;  %16614 = vmatmul.mubr.msk.f32.vlgmr.msra.gmra.mrb[18].mxu1 %vm1449_vm1, %v20350_v19 }
 0x2dd   :  { %17579 = vmatpush3.bf16.xpose.msk.msra.mxu1 %vm20478_vm3, %v17574_v25  ;;  %16620 = vmatprep.mubr.msk.f32.mxu1 %vm1449_vm1, %v20363_v9 }
 0x2de   :  { %18345 = vrot.lane.b32.xlu0 %v20495_v54, %s19482_s3  ;;  %5642 = vrot.lane.b32.xlu1 %v20390_v41, %s19483_s21 }
 0x2df   :  { %v18246_v21 = vpop.permute.xlu1 %18245 }
 0x2e0   :  { %v18248_v32 = vunpack.i.h.bf16 %v18246_v21  ;;  %v18247_v44 = vunpack.i.l.bf16 %v18246_v21 }
 0x2e2   :  { %v17580_v15 = vpack.c.bf16 %v18248_v32, %v18247_v44  ;;  %18340 = vrot.lane.b32.xlu1 %v20457_v4, %s19482_s3 }
 0x2e4   :  { %17582 = vmatprep.subr.msk.bf16.mxu1 %vm20478_vm3, %v17580_v15  ;;  %16621 = vmatmul.mubr.msk.f32.vlgmr.msra.gmra.mrb[20].mxu1 %vm1449_vm1, %v20370_v48 }
 0x2e5   :  { %17585 = vmatpush3.bf16.xpose.msk.msra.mxu1 %vm20478_vm3, %v17580_v15  ;;  %16627 = vmatprep.mubr.msk.f32.mxu1 %vm1449_vm1, %v20383_v31 }
 0x2e6   :  { %5826 = vrot.lane.b32.xlu1 %v20423_v33, %s19483_s21 }
 0x2e7   :  { %v18251_v54 = vpop.permute.xlu0 %18250 }
 0x2e8   :  { %v18253_v19 = vunpack.i.h.bf16 %v18251_v54  ;;  %v18252_v9 = vunpack.i.l.bf16 %v18251_v54 }
 0x2ea   :  { %v17586_v57 = vpack.c.bf16 %v18253_v19, %v18252_v9  ;;  %5828 = vrot.lane.b32.xlu1 %v20430_v18, %s19483_s21 }
 0x2ec   :  { %17588 = vmatprep.subr.msk.bf16.mxu1 %vm20478_vm3, %v17586_v57  ;;  %16628 = vmatmul.mubr.msk.f32.vlgmr.msra.gmra.mrb[22].mxu1 %vm1449_vm1, %v20390_v41 }
 0x2ed   :  { %17591 = vmatpush3.bf16.xpose.msk.msra.mxu1 %vm20478_vm3, %v17586_v57  ;;  %16634 = vmatprep.mubr.msk.f32.mxu1 %vm1449_vm1, %v20403_v28 }
 0x2ee   :  { %5921 = vrot.lane.b32.xlu1 %v20450_v30, %s19483_s21 }
 0x2ef   :  { %v18256_v4 = vpop.permute.xlu1 %18255 }
 0x2f0   :  { %v18258_v48 = vunpack.i.h.bf16 %v18256_v4  ;;  %v18257_v31 = vunpack.i.l.bf16 %v18256_v4 }
 0x2f2   :  { %v17592_v50 = vpack.c.bf16 %v18258_v48, %v18257_v31 }
 0x2f4   :  { %17594 = vmatprep.subr.msk.bf16.mxu1 %vm20478_vm3, %v17592_v50  ;;  %16635 = vmatmul.mubr.msk.f32.vlgmr.msra.gmra.mrb[24].mxu1 %vm1449_vm1, %v20410_v7 }
 0x2f5   :  { %17597 = vmatpush3.bf16.xpose.msk.msra.mxu1 %vm20478_vm3, %v17592_v50  ;;  %16641 = vmatprep.mubr.msk.f32.mxu1 %vm1449_vm1, %v20423_v33 }
 0x2f7   :  { %v18261_v41 = vpop.permute.xlu0 %18260 }
 0x2f8   :  { %v18263_v35 = vunpack.i.h.bf16 %v18261_v41  ;;  %v18262_v34 = vunpack.i.l.bf16 %v18261_v41 }
 0x2fa   :  { %v17598_v28 = vpack.c.bf16 %v18263_v35, %v18262_v34 }
 0x2fb   :  { %v20766_v56 = vpop.permute.xlu0 %18270 }
 0x2fc   :  { %17600 = vmatprep.subr.msk.bf16.mxu1 %vm20478_vm3, %v17598_v28  ;;  %16642 = vmatmul.mubr.msk.f32.vlgmr.msra.gmra.mrb[26].mxu1 %vm1449_vm1, %v20430_v18  ;;  %v20727_v18 = vpack.c.bf16 %v20223_v24, %v20221_v12 }
 0x2fd   :  { %17603 = vmatpush3.bf16.xpose.msk.msra.mxu1 %vm20478_vm3, %v17598_v28  ;;  %16648 = vmatprep.mubr.msk.f32.mxu1 %vm1449_vm1, %v20443_v27  ;;  %v20738_v27 = vld [vmem:[%s24805_s1] sm:$0xff] }
 0x2ff   :  { %v20780_v21 = vpop.permute.xlu0 %4619 }
 0x300   :  { %v18266_v7 = vpop.permute.xlu1 %18265  ;;  %25020 = vst [vmem:[#allocation44_spill] sm:$0xff] %v20780_v21 }
 0x301   :  { %v18268_v42 = vunpack.i.h.bf16 %v18266_v7  ;;  %v18267_v45 = vunpack.i.l.bf16 %v18266_v7 }
 0x303   :  { %v17604_v33 = vpack.c.bf16 %v18268_v42, %v18267_v45  ;;  %v20784_v15 = vpop.permute.xlu0 %4710 }
 0x304   :  { %16649 = vmatmul.mubr.msk.f32.vlgmr.msra.gmra.mrb[28].mxu1 %vm1449_vm1, %v20450_v30  ;;  %v20733_v30 = vld [vmem:[%s24805_s1 + $0x8] sm:$0xff]  ;;  %v20746_v11 = vpop.permute.xlu1 %18275  ;;  %25022 = vst [vmem:[#allocation46_spill] sm:$0xff] %v20784_v15 }
 0x305   :  { %17606 = vmatprep.subr.msk.bf16.mxu1 %vm20478_vm3, %v17604_v33  ;;  %16655 = vmatprep.mubr.msk.f32.mxu1 %vm1449_vm1, %v20471_v55 }
 0x306   :  { %17609 = vmatpush3.bf16.xpose.msk.msra.mxu1 %vm20478_vm3, %v17604_v33 }
 0x307   :  { %17611 = vmatprep.subr.bf16.mxu1 %v17610_v29 }
 0x308   :  { %v20752_v58 = vpop.permute.xlu1 %18280  ;;  %v20796_v48 = vpop.permute.xlu0 %18290 }
 0x309   :  { %25017 = vst [vmem:[#allocation41_spill] sm:$0xff] %v20752_v58  ;;  %25024 = vst [vmem:[#allocation48_spill] sm:$0xff] %v20796_v48 }
 0x30c   :  { %v20762_v43 = vpop.permute.xlu1 %4617  ;;  %v20810_v42 = vpop.permute.xlu0 %4805 }
 0x30d   :  { %16656 = vmatmul.mubr.msk.f32.vlgmr.msra.gmra.mrb[30].mxu1 %vm1449_vm1, %v20486_v39  ;;  %25018 = vst [vmem:[#allocation42_spill] sm:$0xff] %v20762_v43  ;;  %25026 = vst [vmem:[#allocation50_spill] sm:$0xff] %v20810_v42  ;;  %v21016_v43 = vld [vmem:[#allocation2 + $0x178] sm:$0xff] }
 0x30e   :  { %17613 = vmatpush3.bf16.msra.mxu1 %v17610_v29 }
 0x30f   :  { %17619 = vmatprep.subr.bf16.mxu1 %v20727_v18 }
 0x310   :  { %v20778_v25 = vpop.permute.xlu1 %18285 }
 0x311   :  { %25019 = vst [vmem:[#allocation43_spill] sm:$0xff] %v20778_v25 }
 0x314   :  { %v20782_v32 = vpop.permute.xlu1 %4712 }
 0x315   :  { %25021 = vst [vmem:[#allocation45_spill] sm:$0xff] %v20782_v32 }
 0x318   :  { %v20794_v4 = vpop.permute.xlu1 %4803 }
 0x319   :  { %25023 = vst [vmem:[#allocation47_spill] sm:$0xff] %v20794_v4 }
 0x31c   :  { %v20808_v7 = vpop.permute.xlu1 %18295 }
 0x31d   :  { %25025 = vst [vmem:[#allocation49_spill] sm:$0xff] %v20808_v7  ;;  %v4582_v7 = vld [vmem:[#allocation2 + $0x28] sm:$0xff] }
 0x367   :  { %v16552_v17 = vpop.f32.mrb[0].mxu1 }
 0x368   :  { %v20741_v53 = vadd.f32 %v16552_v17, %v20733_v30  ;;  %v1524_v6 = vpop.f32.mrb[1].mxu1 }
 0x369   :  { %v20744_v0 = vadd.f32 %v1524_v6, %v20738_v27  ;;  %v20817_v6 = vpop.permute.xlu1 %4898 }
 0x36a   :  { %v2871_v49 = vsel %vm1449_vm1, %v20741_v53, -inf  ;;  %25027 = vst [vmem:[#allocation51_spill] sm:$0xff] %v20817_v6 }
 0x36b   :  { %2872 = vmax.xlane.f32.xlu1 %v2871_v49  ;;  %v2868_v14 = vsel %vm1449_vm1, %v20744_v0, -inf  ;;  %v20819_v49 = vpop.permute.xlu0 %4896 }
 0x36c   :  { %2869 = vmax.xlane.f32.xlu0 %v2868_v14  ;;  %25028 = vst [vmem:[#allocation52_spill] sm:$0xff] %v20819_v49 }
 0x36f   :  { %v16559_v5 = vpop.f32.mrb[2].mxu1 }
 0x370   :  { %v20755_v61 = vadd.f32 %v16559_v5, %v20733_v30  ;;  %v1613_v13 = vpop.f32.mrb[3].mxu1 }
 0x371   :  { %v20758_v47 = vadd.f32 %v1613_v13, %v20738_v27 }
 0x372   :  { %v2877_v37 = vsel %vm1449_vm1, %v20755_v61, -inf }
 0x373   :  { %2878 = vmax.xlane.f32.xlu0 %v2877_v37  ;;  %v2874_v59 = vsel %vm1449_vm1, %v20758_v47, -inf  ;;  %v20828_v37 = vpop.permute.xlu1 %4989 }
 0x374   :  { %25029 = vst [vmem:[#allocation53_spill] sm:$0xff] %v20828_v37 }
 0x377   :  { %v16566_v16 = vpop.f32.mrb[4].mxu1  ;;  %2875 = vmax.xlane.f32.xlu0 %v2874_v59 }
 0x378   :  { %v20769_v40 = vadd.f32 %v16566_v16, %v20733_v30  ;;  %v1702_v63 = vpop.f32.mrb[5].mxu1  ;;  %v20830_v16 = vpop.permute.xlu0 %18300 }
 0x379   :  { %v20772_v60 = vadd.f32 %v1702_v63, %v20738_v27  ;;  %25030 = vst [vmem:[#allocation54_spill] sm:$0xff] %v20830_v16 }
 0x37a   :  { %v2883_v26 = vsel %vm1449_vm1, %v20769_v40, -inf }
 0x37b   :  { %2884 = vmax.xlane.f32.xlu1 %v2883_v26  ;;  %v2880_v38 = vsel %vm1449_vm1, %v20772_v60, -inf }
 0x37c   :  { %2881 = vmax.xlane.f32.xlu0 %v2880_v38 }
 0x37f   :  { %v16573_v44 = vpop.f32.mrb[6].mxu1 }
 0x380   :  { %v20787_v54 = vadd.f32 %v16573_v44, %v20733_v30  ;;  %v1791_v19 = vpop.f32.mrb[7].mxu1 }
 0x381   :  { %v20790_v9 = vadd.f32 %v1791_v19, %v20738_v27  ;;  %v20840_v19 = vpop.permute.xlu1 %18305 }
 0x382   :  { %v2889_v57 = vsel %vm1449_vm1, %v20787_v54, -inf  ;;  %25031 = vst [vmem:[#allocation55_spill] sm:$0xff] %v20840_v19 }
 0x383   :  { %2890 = vmax.xlane.f32.xlu0 %v2889_v57  ;;  %v2886_v31 = vsel %vm1449_vm1, %v20790_v9, -inf  ;;  %v20842_v57 = vpop.permute.xlu0 %4991 }
 0x384   :  { %25032 = vst [vmem:[#allocation56_spill] sm:$0xff] %v20842_v57 }
 0x387   :  { %v16580_v50 = vpop.f32.mrb[8].mxu1  ;;  %2887 = vmax.xlane.f32.xlu0 %v2886_v31 }
 0x388   :  { %v20801_v41 = vadd.f32 %v16580_v50, %v20733_v30  ;;  %v1880_v35 = vpop.f32.mrb[9].mxu1 }
 0x389   :  { %v20804_v34 = vadd.f32 %v1880_v35, %v20738_v27 }
 0x38a   :  { %v2895_v28 = vsel %vm1449_vm1, %v20801_v41, -inf }
 0x38b   :  { %2896 = vmax.xlane.f32.xlu1 %v2895_v28  ;;  %v2892_v45 = vsel %vm1449_vm1, %v20804_v34, -inf }
 0x38f   :  { %v16587_v33 = vpop.f32.mrb[10].mxu1  ;;  %2893 = vmax.xlane.f32.xlu1 %v2892_v45 }
 0x390   :  { %v20815_v29 = vadd.f32 %v16587_v33, %v20733_v30  ;;  %v1969_v17 = vpop.f32.mrb[11].mxu1 }
 0x391   :  { %v20822_v14 = vadd.f32 %v1969_v17, %v20738_v27  ;;  %v20854_v17 = vpop.permute.xlu1 %5084 }
 0x392   :  { %v2901_v5 = vsel %vm1449_vm1, %v20815_v29, -inf  ;;  %25033 = vst [vmem:[#allocation57_spill] sm:$0xff] %v20854_v17 }
 0x393   :  { %2902 = vmax.xlane.f32.xlu0 %v2901_v5  ;;  %v2898_v13 = vsel %vm1449_vm1, %v20822_v14, -inf  ;;  %v20856_v5 = vpop.permute.xlu0 %5082 }
 0x394   :  { %25034 = vst [vmem:[#allocation58_spill] sm:$0xff] %v20856_v5 }
 0x397   :  { %v16594_v59 = vpop.f32.mrb[12].mxu1  ;;  %2899 = vmax.xlane.f32.xlu0 %v2898_v13 }
 0x398   :  { %v20833_v63 = vadd.f32 %v16594_v59, %v20733_v30  ;;  %v2058_v26 = vpop.f32.mrb[13].mxu1 }
 0x399   :  { %v20836_v38 = vadd.f32 %v2058_v26, %v20738_v27 }
 0x39a   :  { %v2907_v44 = vsel %vm1449_vm1, %v20833_v63, -inf }
 0x39b   :  { %2908 = vmax.xlane.f32.xlu1 %v2907_v44  ;;  %v2904_v31 = vsel %vm1449_vm1, %v20836_v38, -inf }
 0x39f   :  { %v16601_v50 = vpop.f32.mrb[14].mxu1  ;;  %2905 = vmax.xlane.f32.xlu1 %v2904_v31  ;;  %v20863_v31 = vpop.permute.xlu1 %5175 }
 0x3a0   :  { %v20847_v35 = vadd.f32 %v16601_v50, %v20733_v30  ;;  %v2147_v28 = vpop.f32.mrb[15].mxu1  ;;  %25035 = vst [vmem:[#allocation59_spill] sm:$0xff] %v20863_v31  ;;  %v20865_v50 = vpop.permute.xlu0 %18310 }
 0x3a1   :  { %v20850_v45 = vadd.f32 %v2147_v28, %v20738_v27  ;;  %25036 = vst [vmem:[#allocation60_spill] sm:$0xff] %v20865_v50 }
 0x3a2   :  { %v2913_v33 = vsel %vm1449_vm1, %v20847_v35, -inf }
 0x3a3   :  { %2914 = vmax.xlane.f32.xlu0 %v2913_v33  ;;  %v2910_v13 = vsel %vm1449_vm1, %v20850_v45, -inf  ;;  %v20874_v23 = vpop.permute.xlu1 %18315 }
 0x3a4   :  { %25037 = vst [vmem:[#allocation61_spill] sm:$0xff] %v20874_v23 }
 0x3a7   :  { %v16608_v59 = vpop.f32.mrb[16].mxu1  ;;  %2911 = vmax.xlane.f32.xlu0 %v2910_v13 }
 0x3a8   :  { %v20861_v26 = vadd.f32 %v16608_v59, %v20733_v30  ;;  %v2236_v44 = vpop.f32.mrb[17].mxu1  ;;  %v20876_v59 = vpop.permute.xlu0 %5177 }
 0x3a9   :  { %v20868_v28 = vadd.f32 %v2236_v44, %v20738_v27  ;;  %25038 = vst [vmem:[#allocation62_spill] sm:$0xff] %v20876_v59 }
 0x3aa   :  { %v2919_v33 = vsel %vm1449_vm1, %v20861_v26, -inf }
 0x3ab   :  { %2920 = vmax.xlane.f32.xlu1 %v2919_v33  ;;  %v2916_v22 = vsel %vm1449_vm1, %v20868_v28, -inf  ;;  %v20886_v33 = vpop.permute.xlu1 %5270 }
 0x3ac   :  { %25039 = vst [vmem:[#allocation63_spill] sm:$0xff] %v20886_v33  ;;  %v20888_v57 = vpop.permute.xlu0 %5268 }
 0x3ad   :  { %25040 = vst [vmem:[#allocation64_spill] sm:$0xff] %v20888_v57 }
 0x3af   :  { %v16615_v13 = vpop.f32.mrb[18].mxu1  ;;  %2917 = vmax.xlane.f32.xlu1 %v2916_v22 }
 0x3b0   :  { %v20879_v2 = vadd.f32 %v16615_v13, %v20733_v30  ;;  %v2325_v17 = vpop.f32.mrb[19].mxu1  ;;  %v20902_v33 = vpop.permute.xlu0 %18320 }
 0x3b1   :  { %v20882_v44 = vadd.f32 %v2325_v17, %v20738_v27  ;;  %25042 = vst [vmem:[#allocation66_spill] sm:$0xff] %v20902_v33 }
 0x3b2   :  { %v2925_v31 = vsel %vm1449_vm1, %v20879_v2, -inf }
 0x3b3   :  { %2926 = vmax.xlane.f32.xlu0 %v2925_v31  ;;  %v2922_v22 = vsel %vm1449_vm1, %v20882_v44, -inf  ;;  %v20900_v31 = vpop.permute.xlu1 %5361 }
 0x3b4   :  { %25041 = vst [vmem:[#allocation65_spill] sm:$0xff] %v20900_v31 }
 0x3b7   :  { %v16622_v23 = vpop.f32.mrb[20].mxu1  ;;  %2923 = vmax.xlane.f32.xlu0 %v2922_v22  ;;  %v20909_v50 = vpop.permute.xlu1 %18325 }
 0x3b8   :  { %v20893_v13 = vadd.f32 %v16622_v23, %v20733_v30  ;;  %v2414_v59 = vpop.f32.mrb[21].mxu1  ;;  %25043 = vst [vmem:[#allocation67_spill] sm:$0xff] %v20909_v50 }
 0x3b9   :  { %v20896_v17 = vadd.f32 %v2414_v59, %v20738_v27  ;;  %v20911_v59 = vpop.permute.xlu0 %5363 }
 0x3ba   :  { %v2931_v5 = vsel %vm1449_vm1, %v20893_v13, -inf  ;;  %25044 = vst [vmem:[#allocation68_spill] sm:$0xff] %v20911_v59 }
 0x3bb   :  { %2932 = vmax.xlane.f32.xlu1 %v2931_v5  ;;  %v2928_v57 = vsel %vm1449_vm1, %v20896_v17, -inf  ;;  %v20920_v33 = vpop.permute.xlu1 %5456 }
 0x3bc   :  { %25045 = vst [vmem:[#allocation69_spill] sm:$0xff] %v20920_v33 }
 0x3bf   :  { %v16629_v6 = vpop.f32.mrb[22].mxu1  ;;  %2929 = vmax.xlane.f32.xlu1 %v2928_v57 }
 0x3c0   :  { %v20907_v23 = vadd.f32 %v16629_v6, %v20733_v30  ;;  %v2503_v22 = vpop.f32.mrb[23].mxu1  ;;  %v20922_v6 = vpop.permute.xlu0 %5454 }
 0x3c1   :  { %v20914_v37 = vadd.f32 %v2503_v22, %v20738_v27  ;;  %25046 = vst [vmem:[#allocation70_spill] sm:$0xff] %v20922_v6 }
 0x3c2   :  { %v2937_v5 = vsel %vm1449_vm1, %v20907_v23, -inf }
 0x3c3   :  { %2938 = vmax.xlane.f32.xlu0 %v2937_v5  ;;  %v2934_v31 = vsel %vm1449_vm1, %v20914_v37, -inf  ;;  %v20932_v5 = vpop.permute.xlu1 %5547 }
 0x3c4   :  { %25047 = vst [vmem:[#allocation71_spill] sm:$0xff] %v20932_v5  ;;  %v20934_v19 = vpop.permute.xlu0 %18330 }
 0x3c5   :  { %25048 = vst [vmem:[#allocation72_spill] sm:$0xff] %v20934_v19 }
 0x3c7   :  { %v16636_v57 = vpop.f32.mrb[24].mxu1  ;;  %2935 = vmax.xlane.f32.xlu0 %v2934_v31 }
 0x3c8   :  { %v20925_v50 = vadd.f32 %v16636_v57, %v20733_v30  ;;  %v2592_v59 = vpop.f32.mrb[25].mxu1  ;;  %v20950_v19 = vpop.permute.xlu0 %5549 }
 0x3c9   :  { %v20928_v22 = vadd.f32 %v2592_v59, %v20738_v27  ;;  %25050 = vst [vmem:[#allocation74_spill] sm:$0xff] %v20950_v19 }
 0x3ca   :  { %v2943_v42 = vsel %vm1449_vm1, %v20925_v50, -inf }
 0x3cb   :  { %2944 = vmax.xlane.f32.xlu1 %v2943_v42  ;;  %v2940_v31 = vsel %vm1449_vm1, %v20928_v22, -inf  ;;  %v20946_v42 = vpop.permute.xlu1 %18335 }
 0x3cc   :  { %25049 = vst [vmem:[#allocation73_spill] sm:$0xff] %v20946_v42 }
 0x3cf   :  { %v16643_v33 = vpop.f32.mrb[26].mxu1  ;;  %2941 = vmax.xlane.f32.xlu1 %v2940_v31  ;;  %v20955_v16 = vpop.permute.xlu1 %5642 }
 0x3d0   :  { %v20939_v57 = vadd.f32 %v16643_v33, %v20733_v30  ;;  %v2681_v6 = vpop.f32.mrb[27].mxu1  ;;  %25052 = vst [vmem:[#allocation76_spill] sm:$0xff] %v20955_v16 }
 0x3d1   :  { %v20942_v59 = vadd.f32 %v2681_v6, %v20738_v27  ;;  %v20957_v6 = vpop.permute.xlu0 %5640 }
 0x3d2   :  { %v2949_v49 = vsel %vm1449_vm1, %v20939_v57, -inf  ;;  %25053 = vst [vmem:[#allocation77_spill] sm:$0xff] %v20957_v6 }
 0x3d3   :  { %2950 = vmax.xlane.f32.xlu1 %v2949_v49  ;;  %v2946_v5 = vsel %vm1449_vm1, %v20942_v59, -inf  ;;  %v20961_v49 = vpop.permute.xlu1 %18340 }
 0x3d4   :  { %2947 = vmax.xlane.f32.xlu0 %v2946_v5  ;;  %25054 = vst [vmem:[#allocation78_spill] sm:$0xff] %v20961_v49 }
 0x3d5   :  { %v20963_v21 = vpop.permute.xlu0 %5733 }
 0x3d6   :  { %25055 = vst [vmem:[#allocation79_spill] sm:$0xff] %v20963_v21 }
 0x3d7   :  { %v16650_v31 = vpop.f32.mrb[28].mxu1  ;;  %v20970_v16 = vpop.permute.xlu1 %5826 }
 0x3d8   :  { %v20953_v33 = vadd.f32 %v16650_v31, %v20733_v30  ;;  %v2770_v32 = vpop.f32.mrb[29].mxu1  ;;  %25057 = vst [vmem:[#allocation81_spill] sm:$0xff] %v20970_v16 }
 0x3d9   :  { %v20972_v6 = vpop.permute.xlu0 %5735  ;;  %v21019_v25 = vadd.f32 %v2770_v32, %v20738_v27 }
 0x3da   :  { %25051 = vst [vmem:[#allocation75_spill] sm:$0xff] %v20953_v33  ;;  %v2955_v4 = vsel %vm1449_vm1, %v20953_v33, -inf  ;;  %25058 = vst [vmem:[#allocation82_spill] sm:$0xff] %v20972_v6 }
 0x3db   :  { %2956 = vmax.xlane.f32.xlu1 %v2955_v4  ;;  %v20976_v4 = vpop.permute.xlu1 %5828 }
 0x3dc   :  { %25059 = vst [vmem:[#allocation83_spill] sm:$0xff] %v20976_v4  ;;  %v4589_v4 = vld [vmem:[#allocation2 + $0x98] sm:$0xff] }
 0x3dd   :  { %v20978_v49 = vpop.permute.xlu0 %5919 }
 0x3de   :  { %25060 = vst [vmem:[#allocation84_spill] sm:$0xff] %v20978_v49  ;;  %v4588_v49 = vld [vmem:[#allocation2 + $0x88] sm:$0xff] }
 0x3df   :  { %v20980_v21 = vpop.permute.xlu1 %5921 }
 0x3e0   :  { %v16657_v42 = vpop.f32.mrb[30].mxu1  ;;  %25061 = vst [vmem:[#allocation85_spill] sm:$0xff] %v20980_v21 }
 0x3e1   :  { %v20966_v5 = vadd.f32 %v16657_v42, %v20733_v30  ;;  %v2859_v19 = vpop.f32.mrb[31].mxu1  ;;  %v20982_v30 = vpop.permute.xlu0 %18345  ;;  %v4583_v42 = vld [vmem:[#allocation2 + $0x38] sm:$0xff] }
 0x3e2   :  { %25062 = vst [vmem:[#allocation86_spill] sm:$0xff] %v20982_v30  ;;  %v20987_v6 = vpack.i.bf16 %v4583_v42, %v4582_v7  ;;  %v20992_v30 = vpack.i.bf16 %v4589_v4, %v4588_v49 }
 0x3e3   :  { %25056 = vst [vmem:[#allocation80_spill] sm:$0xff] %v20966_v5  ;;  %v2961_v31 = vsel %vm1449_vm1, %v20966_v5, -inf  ;;  %v21025_v5 = vld [vmem:[#allocation2 + $0x168] sm:$0xff] }
 0x3e4   :  { %2962 = vmax.xlane.f32.xlu1 %v2961_v31 }
 0x3ea   :  { %6012 = vrot.lane.b32.xlu0 %v20471_v55, %s19483_s21 }
 0x3f5   :  { %6014 = vrot.lane.b32.xlu1 %v20486_v39, %s19483_s21  ;;  %v20994_v39 = vld [vmem:[#allocation2 + $0xd8] sm:$0xff] }
 0x3f8   :  { %v2873_v31 = vpop.xlane.xlu1 %2872 }
 0x3f9   :  { %v2965_v16 = vsub.f32 %v20741_v53, %v2873_v31  ;;  %v2870_v15 = vpop.xlane.xlu0 %2869  ;;  %18355 = vrot.lane.b32.xlu1 %v20987_v6, %s19483_s21  ;;  %v20998_v53 = vld [vmem:[#allocation2 + $0xc8] sm:$0xff] }
 0x3fa   :  { %v2964_v55 = vsub.f32 %v20744_v0, %v2870_v15  ;;  %v21002_v0 = vpack.i.bf16 %v20994_v39, %v20998_v53 }
 0x3fb   :  { %v2998_v48 = vmul.f32 1.442695, %v2965_v16  ;;  %v21005_v16 = vld [vmem:[#allocation2 + $0x118] sm:$0xff] }
 0x3fc   :  { %v2996_v21 = vmul.f32 1.442695, %v2964_v55 }
 0x3fd   :  { %18370 = vrot.lane.b32.xlu1 %v20992_v30, %s19483_s21 }
 0x3fe   :  { %18813 = vpow2.f32 %v2996_v21  ;;  %v21009_v21 = vld [vmem:[#allocation2 + $0x108] sm:$0xff] }
 0x3ff   :  { %18815 = vpow2.f32 %v2998_v48  ;;  %v21013_v42 = vpack.i.bf16 %v21005_v16, %v21009_v21 }
 0x400   :  { %v2879_v7 = vpop.xlane.xlu0 %2878 }
 0x401   :  { %v2967_v15 = vsub.f32 %v20755_v61, %v2879_v7  ;;  %18380 = vrot.lane.b32.xlu1 %v21002_v0, %s19483_s21  ;;  %25063 = vst [vmem:[#allocation87_spill] sm:$0xff] %v21013_v42 }
 0x403   :  { %v3002_v55 = vmul.f32 1.442695, %v2967_v15  ;;  %v21032_v15 = vpack.i.bf16 %v21016_v43, %v21025_v5 }
 0x404   :  { %v2876_v48 = vpop.xlane.xlu0 %2875 }
 0x405   :  { %v2966_v31 = vsub.f32 %v20758_v47, %v2876_v48  ;;  %18390 = vrot.lane.b32.xlu1 %v21013_v42, %s19483_s21  ;;  %v21040_v42 = vadd.f32 %v2859_v19, %v20738_v27  ;;  %v21057_v19 = vpack.i.bf16 %v20519_v52, %v20517_v36 }
 0x407   :  { %v3000_v61 = vmul.f32 1.442695, %v2966_v31  ;;  %v17626_v31 = vpack.c.bf16 %v4589_v4, %v4588_v49  ;;  %v2958_v27 = vsel %vm1449_vm1, %v21040_v42, -inf  ;;  %v21061_v49 = vld [vmem:[#allocation2 + $0xb8] sm:$0xff] }
 0x408   :  { %v21023_v7 = vpop.eup %18813  ;;  %v2885_v58 = vpop.xlane.xlu1 %2884 }
 0x409   :  { %25064 = vst [vmem:[#allocation88_spill] sm:$0xff] %v21023_v7  ;;  %v21027_v33 = vpop.eup %18815  ;;  %18817 = vpow2.f32 %v3000_v61  ;;  %v2969_v47 = vsub.f32 %v20769_v40, %v2885_v58  ;;  %16662 = vmatprep.mubr.msk.f32.mxu1 %vm1449_vm1, %v21023_v7  ;;  %v2882_v32 = vpop.xlane.xlu0 %2881  ;;  %18405 = vrot.lane.b32.xlu1 %v21032_v15, %s19483_s21  ;;  %v2952_v58 = vsel %vm1449_vm1, %v21019_v25, -inf }
 0x40a   :  { %25065 = vst [vmem:[#allocation89_spill] sm:$0xff] %v21027_v33  ;;  %18819 = vpow2.f32 %v3002_v55  ;;  %v2968_v48 = vsub.f32 %v20772_v60, %v2882_v32  ;;  %16663 = vmatmul.mubr.msk.f32.vlgmr.msra.gmra.mrb[32].mxu1 %vm1449_vm1, %v21027_v33  ;;  %2953 = vmax.xlane.f32.xlu0 %v2952_v58  ;;  %v21049_v60 = vpack.i.bf16 %v20461_v1, %v20459_v51  ;;  %v21069_v55 = vld [vmem:[#allocation2 + $0x20] sm:$0xff] }
 0x40b   :  { %v3006_v61 = vmul.f32 1.442695, %v2969_v47  ;;  %17621 = vmatpush3.bf16.msra.mxu1 %v20727_v18  ;;  %v21059_v18 = vld [vmem:[#allocation2 + $0x30] sm:$0xff]  ;;  %v21073_v47 = vld [vmem:[#allocation2 + $0xa8] sm:$0xff] }
 0x40c   :  { %v3004_v40 = vmul.f32 1.442695, %v2968_v48  ;;  %17627 = vmatprep.subr.bf16.mxu1 %v17626_v31  ;;  %v21078_v52 = vpack.i.bf16 %v21059_v18, %v21069_v55  ;;  %v17630_v32 = vpack.c.bf16 %v21061_v49, %v21073_v47 }
 0x40d   :  { %18415 = vrot.lane.b32.xlu1 %v21049_v60, %s19483_s21 }
 0x40e   :  { %18821 = vpow2.f32 %v3004_v40  ;;  %2959 = vmax.xlane.f32.xlu0 %v2958_v27 }
 0x40f   :  { %18823 = vpow2.f32 %v3006_v61 }
 0x410   :  { %v2891_v1 = vpop.xlane.xlu0 %2890 }
 0x411   :  { %18425 = vrot.lane.b32.xlu1 %v21057_v19, %s19483_s21  ;;  %v2971_v36 = vsub.f32 %v20787_v54, %v2891_v1  ;;  %v21094_v1 = vld [vmem:[#allocation2] sm:$0xff] }
 0x413   :  { %v21063_v4 = vpop.eup %18817  ;;  %v3010_v40 = vmul.f32 1.442695, %v2971_v36 }
 0x414   :  { %25066 = vst [vmem:[#allocation90_spill] sm:$0xff] %v21063_v4  ;;  %v21067_v51 = vpop.eup %18819  ;;  %16669 = vmatprep.mubr.msk.f32.mxu0 %vm1449_vm1, %v21063_v4  ;;  %v2888_v48 = vpop.xlane.xlu0 %2887 }
 0x415   :  { %25067 = vst [vmem:[#allocation91_spill] sm:$0xff] %v21067_v51  ;;  %16670 = vmatmul.mubr.msk.f32.vlgmr.msra.gmra.mrb[64].mxu0 %vm1449_vm1, %v21067_v51  ;;  %18435 = vrot.lane.b32.xlu1 %v21078_v52, %s19484_s25  ;;  %v2970_v54 = vsub.f32 %v20790_v9, %v2888_v48  ;;  %v21100_v51 = vld [vmem:[#allocation2 + $0x70] sm:$0xff]  ;;  %v21104_v9 = vld [vmem:[#allocation2 + $0x60] sm:$0xff] }
 0x416   :  { %17625 = vmatpush3.bf16.msra.mxu0 %v20258_v10  ;;  %v17634_v10 = vpack.c.bf16 %v20994_v39, %v20998_v53  ;;  %v21109_v48 = vpack.i.bf16 %v21100_v51, %v21104_v9 }
 0x417   :  { %17631 = vmatprep.subr.bf16.mxu0 %v17630_v32  ;;  %v3008_v27 = vmul.f32 1.442695, %v2970_v54 }
 0x418   :  { %v21087_v61 = vpop.eup %18821  ;;  %v2897_v4 = vpop.xlane.xlu1 %2896 }
 0x419   :  { %25068 = vst [vmem:[#allocation92_spill] sm:$0xff] %v21087_v61  ;;  %v21090_v58 = vpop.eup %18823  ;;  %16676 = vmatprep.mubr.msk.f32.mxu1 %vm1449_vm1, %v21087_v61  ;;  %8109 = vrot.lane.b32.xlu1 %v21094_v1, %s19485_s26  ;;  %18825 = vpow2.f32 %v3008_v27  ;;  %v2973_v36 = vsub.f32 %v20801_v41, %v2897_v4  ;;  %v1424_v4 = vld [vmem:[#allocation2 + $0xf8] sm:$0xff]  ;;  %v25071_v27 = vpack.i.bf16 %v20186_v3, %v20184_v8  ;;  %v21123_v61 = vld [vmem:[#allocation2 + $0x40] sm:$0xff] }
 0x41a   :  { %25069 = vst [vmem:[#allocation93_spill] sm:$0xff] %v21090_v58  ;;  %16677 = vmatmul.mubr.msk.f32.vlgmr.msra.gmra.mrb[34].mxu1 %vm1449_vm1, %v21090_v58  ;;  %18827 = vpow2.f32 %v3010_v40  ;;  %v21136_v3 = vld [vmem:[#allocation2 + $0xa0] sm:$0xff] }
 0x41b   :  { %17629 = vmatpush3.bf16.msra.mxu1 %v17626_v31  ;;  %v3014_v54 = vmul.f32 1.442695, %v2973_v36 }
 0x41c   :  { %17635 = vmatprep.subr.bf16.mxu1 %v17634_v10  ;;  %v2894_v39 = vpop.xlane.xlu1 %2893 }
 0x41d   :  { %18445 = vrot.lane.b32.xlu1 %v21109_v48, %s19484_s25  ;;  %v2972_v53 = vsub.f32 %v20804_v34, %v2894_v39  ;;  %v21125_v34 = vld [vmem:[#allocation2 + $0xb0] sm:$0xff] }
 0x41f   :  { %v3012_v58 = vmul.f32 1.442695, %v2972_v53 }
 0x420   :  { %v2903_v31 = vpop.xlane.xlu0 %2902 }
 0x421   :  { %8204 = vrot.lane.b32.xlu1 %v21059_v18, %s19485_s26  ;;  %18829 = vpow2.f32 %v3012_v58  ;;  %v2975_v41 = vsub.f32 %v20815_v29, %v2903_v31  ;;  %v1423_v58 = vld [vmem:[#allocation2 + $0xe8] sm:$0xff]  ;;  %v4587_v31 = vld [vmem:[#allocation2 + $0x78] sm:$0xff] }
 0x422   :  { %18831 = vpow2.f32 %v3014_v54  ;;  %v17638_v8 = vpack.c.bf16 %v1424_v4, %v1423_v58  ;;  %v21140_v54 = vpack.i.bf16 %v21125_v34, %v21136_v3 }
 0x423   :  { %v21117_v40 = vpop.eup %18825  ;;  %v3018_v53 = vmul.f32 1.442695, %v2975_v41 }
 0x424   :  { %25070 = vst [vmem:[#allocation94_spill] sm:$0xff] %v21117_v40  ;;  %18350 = vrot.lane.b32.xlu0 %v25071_v27, %s19483_s21  ;;  %v21127_v36 = vpop.eup %18827  ;;  %16683 = vmatprep.mubr.msk.f32.mxu0 %vm1449_vm1, %v21117_v40  ;;  %v2900_v29 = vpop.xlane.xlu0 %2899  ;;  %v25073_v40 = vpack.i.bf16 %v20223_v24, %v20221_v12 }
 0x425   :  { %25072 = vst [vmem:[#allocation95_spill] sm:$0xff] %v21127_v36  ;;  %8295 = vrot.lane.b32.xlu1 %v21123_v61, %s19485_s26  ;;  %v2974_v39 = vsub.f32 %v20822_v14, %v2900_v29  ;;  %16684 = vmatmul.mubr.msk.f32.vlgmr.msra.gmra.mrb[66].mxu0 %vm1449_vm1, %v21127_v36  ;;  %v4586_v29 = vld [vmem:[#allocation2 + $0x68] sm:$0xff] }
 0x426   :  { %17633 = vmatpush3.bf16.msra.mxu0 %v17630_v32  ;;  %v21148_v41 = vpack.i.bf16 %v4587_v31, %v4586_v29 }
 0x427   :  { %v3016_v27 = vmul.f32 1.442695, %v2974_v39  ;;  %17639 = vmatprep.subr.bf16.mxu0 %v17638_v8 }
 0x428   :  { %18360 = vrot.lane.b32.xlu0 %v25073_v40, %s19483_s21  ;;  %v2909_v14 = vpop.xlane.xlu1 %2908  ;;  %v21168_v40 = vpack.i.bf16 %v21061_v49, %v21073_v47 }
 0x429   :  { %18455 = vrot.lane.b32.xlu1 %v21140_v54, %s19484_s25  ;;  %18833 = vpow2.f32 %v3016_v27  ;;  %v2977_v32 = vsub.f32 %v20833_v63, %v2909_v14  ;;  %v17642_v63 = vpack.c.bf16 %v21005_v16, %v21009_v21  ;;  %v21172_v27 = vld [vmem:[#allocation2 + $0x80] sm:$0xff]  ;;  %v21178_v16 = vpack.i.bf16 %v1424_v4, %v1423_v58 }
 0x42a   :  { %18835 = vpow2.f32 %v3018_v53  ;;  %v21180_v21 = vld [vmem:[#allocation2 + $0xe0] sm:$0xff] }
 0x42b   :  { %v21151_v36 = vpop.eup %18829  ;;  %v3022_v53 = vmul.f32 1.442695, %v2977_v32 }
 0x42c   :  { %25074 = vst [vmem:[#allocation96_spill] sm:$0xff] %v21151_v36  ;;  %18365 = vrot.lane.b32.xlu0 %v21148_v41, %s19483_s21  ;;  %v21155_v39 = vpop.eup %18831  ;;  %v2906_v12 = vpop.xlane.xlu1 %2905  ;;  %16690 = vmatprep.mubr.msk.f32.mxu1 %vm1449_vm1, %v21151_v36  ;;  %v21231_v36 = vld [vmem:[#allocation2 + $0x120] sm:$0xff] }
 0x42d   :  { %25075 = vst [vmem:[#allocation97_spill] sm:$0xff] %v21155_v39  ;;  %8390 = vrot.lane.b32.xlu1 %v21100_v51, %s19485_s26  ;;  %v2976_v24 = vsub.f32 %v20836_v38, %v2906_v12  ;;  %16691 = vmatmul.mubr.msk.f32.vlgmr.msra.gmra.mrb[36].mxu1 %vm1449_vm1, %v21155_v39  ;;  %v21174_v38 = vld [vmem:[#allocation2 + $0xf0] sm:$0xff]  ;;  %v4600_v39 = vld [vmem:[#allocation2 + $0x148] sm:$0xff] }
 0x42e   :  { %17637 = vmatpush3.bf16.msra.mxu1 %v17634_v10  ;;  %v21185_v47 = vpack.i.bf16 %v21174_v38, %v21180_v21  ;;  %v1428_v10 = vld [vmem:[#allocation2 + $0x138] sm:$0xff] }
 0x42f   :  { %v3020_v31 = vmul.f32 1.442695, %v2976_v24  ;;  %17643 = vmatprep.subr.bf16.mxu1 %v17642_v63 }
 0x430   :  { %18375 = vrot.lane.b32.xlu0 %v21168_v40, %s19483_s21  ;;  %v2915_v14 = vpop.xlane.xlu0 %2914 }
 0x431   :  { %8481 = vrot.lane.b32.xlu1 %v21172_v27, %s19485_s26  ;;  %18837 = vpow2.f32 %v3020_v31  ;;  %v2979_v49 = vsub.f32 %v20847_v35, %v2915_v14  ;;  %v1427_v35 = vld [vmem:[#allocation2 + $0x128] sm:$0xff]  ;;  %v4601_v31 = vld [vmem:[#allocation2 + $0x158] sm:$0xff] }
 0x432   :  { %18839 = vpow2.f32 %v3022_v53  ;;  %v17646_v12 = vpack.c.bf16 %v1428_v10, %v1427_v35  ;;  %v21200_v24 = vpack.i.bf16 %v1428_v10, %v1427_v35  ;;  %v21217_v35 = vld [vmem:[#allocation2 + $0x130] sm:$0xff] }
 0x433   :  { %v21187_v29 = vpop.eup %18833  ;;  %v3026_v53 = vmul.f32 1.442695, %v2979_v49  ;;  %v21215_v49 = vld [vmem:[#allocation2 + $0xc0] sm:$0xff]  ;;  %v18474_v7 = vpack.i.bf16 %v21217_v35, %v21231_v36 }
 0x434   :  { %25076 = vst [vmem:[#allocation98_spill] sm:$0xff] %v21187_v29  ;;  %18385 = vrot.lane.b32.xlu0 %v21178_v16, %s19483_s21  ;;  %v21191_v32 = vpop.eup %18835  ;;  %16697 = vmatprep.mubr.msk.f32.mxu0 %vm1449_vm1, %v21187_v29  ;;  %v2912_v4 = vpop.xlane.xlu0 %2911 }
 0x435   :  { %25077 = vst [vmem:[#allocation99_spill] sm:$0xff] %v21191_v32  ;;  %18465 = vrot.lane.b32.xlu1 %v21185_v47, %s19484_s25  ;;  %v2978_v58 = vsub.f32 %v20850_v45, %v2912_v4  ;;  %16698 = vmatmul.mubr.msk.f32.vlgmr.msra.gmra.mrb[68].mxu0 %vm1449_vm1, %v21191_v32  ;;  %v21206_v45 = vpack.i.bf16 %v4601_v31, %v4600_v39  ;;  %v21209_v4 = vld [vmem:[#allocation2 + $0x198] sm:$0xff] }
 0x436   :  { %17641 = vmatpush3.bf16.msra.mxu0 %v17638_v8 }
 0x437   :  { %v3024_v14 = vmul.f32 1.442695, %v2978_v58  ;;  %17647 = vmatprep.subr.bf16.mxu0 %v17646_v12  ;;  %25078 = vst [vmem:[#allocation100_spill] sm:$0xff] %v21206_v45 }
 0x438   :  { %18395 = vrot.lane.b32.xlu0 %v21200_v24, %s19483_s21  ;;  %v2921_v29 = vpop.xlane.xlu1 %2920 }
 0x439   :  { %8576 = vrot.lane.b32.xlu1 %v21125_v34, %s19485_s26  ;;  %18841 = vpow2.f32 %v3024_v14  ;;  %v2981_v10 = vsub.f32 %v20861_v26, %v2921_v29  ;;  %v4604_v26 = vld [vmem:[#allocation2 + $0x188] sm:$0xff] }
 0x43a   :  { %18843 = vpow2.f32 %v3026_v53  ;;  %v17650_v53 = vpack.c.bf16 %v4601_v31, %v4600_v39  ;;  %v21229_v32 = vpack.i.bf16 %v21209_v4, %v4604_v26  ;;  %v21240_v39 = vld [vmem:[#allocation2 + $0x1c8] sm:$0xff] }
 0x43b   :  { %v21211_v8 = vpop.eup %18837  ;;  %v3030_v33 = vmul.f32 1.442695, %v2981_v10 }
 0x43c   :  { %25079 = vst [vmem:[#allocation101_spill] sm:$0xff] %v21211_v8  ;;  %18400 = vrot.lane.b32.xlu0 %v21206_v45, %s19483_s21  ;;  %v21219_v58 = vpop.eup %18839  ;;  %v2918_v14 = vpop.xlane.xlu1 %2917  ;;  %16704 = vmatprep.mubr.msk.f32.mxu1 %vm1449_vm1, %v21211_v8  ;;  %v21235_v45 = vld [vmem:[#allocation2 + $0x1d8] sm:$0xff] }
 0x43d   :  { %25080 = vst [vmem:[#allocation102_spill] sm:$0xff] %v21219_v58  ;;  %8667 = vrot.lane.b32.xlu1 %v21215_v49, %s19485_s26  ;;  %v2980_v29 = vsub.f32 %v20868_v28, %v2918_v14  ;;  %16705 = vmatmul.mubr.msk.f32.vlgmr.msra.gmra.mrb[38].mxu1 %vm1449_vm1, %v21219_v58  ;;  %v21244_v31 = vpack.i.bf16 %v21235_v45, %v21240_v39 }
 0x43e   :  { %17645 = vmatpush3.bf16.msra.mxu1 %v17642_v63  ;;  %v21246_v63 = vld [vmem:[#allocation2 + $0x10] sm:$0xff] }
 0x43f   :  { %v3028_v8 = vmul.f32 1.442695, %v2980_v29  ;;  %17651 = vmatprep.subr.bf16.mxu1 %v17650_v53  ;;  %25081 = vst [vmem:[#allocation103_spill] sm:$0xff] %v21244_v31 }
 0x440   :  { %18410 = vrot.lane.b32.xlu0 %v21229_v32, %s19483_s21  ;;  %v2927_v28 = vpop.xlane.xlu0 %2926 }
 0x441   :  { %18475 = vrot.lane.b32.xlu1 %v18474_v7, %s19484_s25  ;;  %18845 = vpow2.f32 %v3028_v8  ;;  %v2983_v10 = vsub.f32 %v20879_v2, %v2927_v28  ;;  %v21261_v8 = vpack.i.bf16 %v21246_v63, %v21094_v1  ;;  %v21268_v28 = vld [vmem:[#allocation2 + $0x50] sm:$0xff] }
 0x442   :  { %18847 = vpow2.f32 %v3030_v33  ;;  %v17654_v33 = vpack.c.bf16 %v21016_v43, %v21025_v5  ;;  %v21280_v43 = vld [vmem:[#allocation2 + $0x160] sm:$0xff] }
 0x443   :  { %v21249_v14 = vpop.eup %18841  ;;  %v3034_v58 = vmul.f32 1.442695, %v2983_v10 }
 0x444   :  { %25082 = vst [vmem:[#allocation104_spill] sm:$0xff] %v21249_v14  ;;  %18420 = vrot.lane.b32.xlu0 %v21244_v31, %s19483_s21  ;;  %v21253_v29 = vpop.eup %18843  ;;  %16711 = vmatprep.mubr.msk.f32.mxu0 %vm1449_vm1, %v21249_v14  ;;  %v2924_v7 = vpop.xlane.xlu0 %2923  ;;  %v21272_v14 = vld [vmem:[#allocation2 + $0x100] sm:$0xff]  ;;  %v8063_v31 = vld [vmem:[#allocation2 + $0x170] sm:$0xff] }
 0x445   :  { %25083 = vst [vmem:[#allocation105_spill] sm:$0xff] %v21253_v29  ;;  %8762 = vrot.lane.b32.xlu1 %v21174_v38, %s19485_s26  ;;  %v2982_v2 = vsub.f32 %v20882_v44, %v2924_v7  ;;  %16712 = vmatmul.mubr.msk.f32.vlgmr.msra.gmra.mrb[70].mxu0 %vm1449_vm1, %v21253_v29  ;;  %v21278_v7 = vpack.i.bf16 %v21268_v28, %v21123_v61 }
 0x446   :  { %17649 = vmatpush3.bf16.msra.mxu0 %v17646_v12  ;;  %v18484_v12 = vpack.i.bf16 %v8063_v31, %v21280_v43 }
 0x447   :  { %v3032_v38 = vmul.f32 1.442695, %v2982_v2  ;;  %17655 = vmatprep.subr.bf16.mxu0 %v17654_v33 }
 0x448   :  { %18430 = vrot.lane.b32.xlu0 %v21261_v8, %s19484_s25  ;;  %v2933_v44 = vpop.xlane.xlu1 %2932 }
 0x449   :  { %8853 = vrot.lane.b32.xlu1 %v21272_v14, %s19485_s26  ;;  %18849 = vpow2.f32 %v3032_v38  ;;  %v2985_v5 = vsub.f32 %v20893_v13, %v2933_v44  ;;  %v17658_v13 = vpack.c.bf16 %v21209_v4, %v4604_v26  ;;  %v21308_v4 = vld [vmem:[#allocation2 + $0x140] sm:$0xff]  ;;  %v8067_v26 = vld [vmem:[#allocation2 + $0x1b0] sm:$0xff] }
 0x44a   :  { %18851 = vpow2.f32 %v3034_v58 }
 0x44b   :  { %v21284_v10 = vpop.eup %18845  ;;  %v3038_v58 = vmul.f32 1.442695, %v2985_v5 }
 0x44c   :  { %25084 = vst [vmem:[#allocation106_spill] sm:$0xff] %v21284_v10  ;;  %18440 = vrot.lane.b32.xlu0 %v21278_v7, %s19484_s25  ;;  %v21288_v2 = vpop.eup %18847  ;;  %v2930_v29 = vpop.xlane.xlu1 %2929  ;;  %16718 = vmatprep.mubr.msk.f32.mxu1 %vm1449_vm1, %v21284_v10  ;;  %v21301_v10 = vld [vmem:[#allocation2 + $0x90] sm:$0xff] }
 0x44d   :  { %18485 = vrot.lane.b32.xlu1 %v18484_v12, %s19484_s25  ;;  %v2984_v38 = vsub.f32 %v20896_v17, %v2930_v29  ;;  %16719 = vmatmul.mubr.msk.f32.vlgmr.msra.gmra.mrb[40].mxu1 %vm1449_vm1, %v21288_v2 }
 0x44e   :  { %17653 = vmatpush3.bf16.msra.mxu1 %v17650_v53 }
 0x44f   :  { %v3036_v44 = vmul.f32 1.442695, %v2984_v38  ;;  %17659 = vmatprep.subr.bf16.mxu1 %v17658_v13  ;;  %v8066_v38 = vld [vmem:[#allocation2 + $0x1a0] sm:$0xff] }
 0x450   :  { %8111 = vrot.lane.b32.xlu0 %v21246_v63, %s19485_s26  ;;  %v2939_v12 = vpop.xlane.xlu0 %2938 }
 0x451   :  { %8948 = vrot.lane.b32.xlu1 %v21217_v35, %s19485_s26  ;;  %18853 = vpow2.f32 %v3036_v44  ;;  %v2987_v17 = vsub.f32 %v20907_v23, %v2939_v12  ;;  %v21318_v23 = vpack.i.bf16 %v21301_v10, %v21172_v27  ;;  %v18494_v44 = vpack.i.bf16 %v8067_v26, %v8066_v38 }
 0x452   :  { %18855 = vpow2.f32 %v3038_v58 }
 0x453   :  { %v21304_v29 = vpop.eup %18849  ;;  %v3042_v58 = vmul.f32 1.442695, %v2987_v17 }
 0x454   :  { %25085 = vst [vmem:[#allocation107_spill] sm:$0xff] %v21304_v29  ;;  %8202 = vrot.lane.b32.xlu0 %v21069_v55, %s19485_s26  ;;  %v21310_v53 = vpop.eup %18851  ;;  %16725 = vmatprep.mubr.msk.f32.mxu0 %vm1449_vm1, %v21304_v29  ;;  %v2936_v35 = vpop.xlane.xlu0 %2935 }
 0x455   :  { %25086 = vst [vmem:[#allocation108_spill] sm:$0xff] %v21310_v53  ;;  %9039 = vrot.lane.b32.xlu1 %v21308_v4, %s19485_s26  ;;  %v2986_v5 = vsub.f32 %v20914_v37, %v2936_v35  ;;  %16726 = vmatmul.mubr.msk.f32.vlgmr.msra.gmra.mrb[72].mxu0 %vm1449_vm1, %v21310_v53 }
 0x456   :  { %17657 = vmatpush3.bf16.msra.mxu0 %v17654_v33  ;;  %v8069_v33 = vld [vmem:[#allocation2 + $0x1d0] sm:$0xff] }
 0x457   :  { %v3040_v12 = vmul.f32 1.442695, %v2986_v5  ;;  %17663 = vmatprep.subr.bf16.mxu0 %v20467_v20 }
 0x458   :  { %18450 = vrot.lane.b32.xlu0 %v21318_v23, %s19484_s25  ;;  %v2945_v29 = vpop.xlane.xlu1 %2944 }
 0x459   :  { %18495 = vrot.lane.b32.xlu1 %v18494_v44, %s19484_s25  ;;  %18857 = vpow2.f32 %v3040_v12  ;;  %v2989_v37 = vsub.f32 %v20925_v50, %v2945_v29  ;;  %v17666_v50 = vpack.c.bf16 %v21235_v45, %v21240_v39  ;;  %v21342_v29 = vld [vmem:[#allocation2 + $0x1c0] sm:$0xff] }
 0x45a   :  { %18859 = vpow2.f32 %v3042_v58  ;;  %v21344_v58 = vld [vmem:[#allocation2 + $0xd0] sm:$0xff] }
 0x45b   :  { %v21328_v35 = vpop.eup %18853  ;;  %v3046_v12 = vmul.f32 1.442695, %v2989_v37 }
 0x45c   :  { %8297 = vrot.lane.b32.xlu0 %v21268_v28, %s19485_s26  ;;  %v21332_v17 = vpop.eup %18855  ;;  %v2942_v5 = vpop.xlane.xlu1 %2941  ;;  %16732 = vmatprep.mubr.msk.f32.mxu1 %vm1449_vm1, %v21328_v35 }
 0x45d   :  { %25087 = vst [vmem:[#allocation109_spill] sm:$0xff] %v21332_v17  ;;  %9134 = vrot.lane.b32.xlu1 %v8063_v31, %s19485_s26  ;;  %v2988_v44 = vsub.f32 %v20928_v22, %v2942_v5  ;;  %16733 = vmatmul.mubr.msk.f32.vlgmr.msra.gmra.mrb[42].mxu1 %vm1449_vm1, %v21332_v17  ;;  %v18499_v31 = vpack.i.bf16 %v8069_v33, %v21342_v29 }
 0x45e   :  { %17661 = vmatpush3.bf16.msra.mxu1 %v17658_v13  ;;  %v21352_v5 = vpack.i.bf16 %v21344_v58, %v21215_v49 }
 0x45f   :  { %v3044_v53 = vmul.f32 1.442695, %v2988_v44  ;;  %17667 = vmatprep.subr.bf16.mxu1 %v17666_v50 }
 0x460   :  { %8388 = vrot.lane.b32.xlu0 %v21104_v9, %s19485_s26  ;;  %v2951_v22 = vpop.xlane.xlu1 %2950 }
 0x461   :  { %18500 = vrot.lane.b32.xlu1 %v18499_v31, %s19484_s25  ;;  %18861 = vpow2.f32 %v3044_v53  ;;  %v2991_v45 = vsub.f32 %v20939_v57, %v2951_v22  ;;  %v2948_v39 = vpop.xlane.xlu0 %2947  ;;  %v18273_v57 = vunpack.i.h.bf16 %v20766_v56  ;;  %v21374_v53 = vld [vmem:[#allocation2 + $0x110] sm:$0xff]  ;;  %v18277_v22 = vunpack.i.l.bf16 %v20746_v11 }
 0x462   :  { %18863 = vpow2.f32 %v3046_v12  ;;  %v2990_v13 = vsub.f32 %v20942_v59, %v2948_v39  ;;  %v18272_v59 = vunpack.i.l.bf16 %v20766_v56  ;;  %v18278_v56 = vunpack.i.h.bf16 %v20746_v11  ;;  %v8061_v11 = vld [vmem:[#allocation2 + $0x150] sm:$0xff] }
 0x463   :  { %v21356_v37 = vpop.eup %18857  ;;  %v3050_v44 = vmul.f32 1.442695, %v2991_v45 }
 0x464   :  { %25088 = vst [vmem:[#allocation110_spill] sm:$0xff] %v21356_v37  ;;  %18460 = vrot.lane.b32.xlu0 %v21352_v5, %s19484_s25  ;;  %v21360_v17 = vpop.eup %18859  ;;  %v3048_v31 = vmul.f32 1.442695, %v2990_v13  ;;  %16739 = vmatprep.mubr.msk.f32.mxu0 %vm1449_vm1, %v21356_v37  ;;  %v21385_v12 = vpack.c.bf16 %v18273_v57, %v18272_v59  ;;  %v21407_v39 = vpack.c.bf16 %v18278_v56, %v18277_v22 }
 0x465   :  { %25089 = vst [vmem:[#allocation111_spill] sm:$0xff] %v21360_v17  ;;  %9318 = vrot.lane.b32.xlu1 %v8066_v38, %s19485_s26  ;;  %16740 = vmatmul.mubr.msk.f32.vlgmr.msra.gmra.mrb[74].mxu0 %vm1449_vm1, %v21360_v17 }
 0x466   :  { %18865 = vpow2.f32 %v3048_v31  ;;  %17665 = vmatpush3.bf16.msra.mxu0 %v20467_v20 }
 0x467   :  { %18867 = vpow2.f32 %v3050_v44  ;;  %17671 = vmatprep.subr.bf16.mxu0 %v20523_v62  ;;  %v8070_v44 = vld [vmem:[#allocation2 + $0x1e0] sm:$0xff] }
 0x468   :  { %8483 = vrot.lane.b32.xlu0 %v21301_v10, %s19485_s26 }
 0x469   :  { %9320 = vrot.lane.b32.xlu1 %v8067_v26, %s19485_s26  ;;  %v21389_v26 = vpack.i.bf16 %v21374_v53, %v21272_v14 }
 0x46b   :  { %v21376_v38 = vpop.eup %18861 }
 0x46c   :  { %25090 = vst [vmem:[#allocation112_spill] sm:$0xff] %v21376_v38  ;;  %8574 = vrot.lane.b32.xlu0 %v21136_v3, %s19485_s26  ;;  %v21380_v20 = vpop.eup %18863  ;;  %16746 = vmatprep.mubr.msk.f32.mxu1 %vm1449_vm1, %v21376_v38 }
 0x46d   :  { %25091 = vst [vmem:[#allocation113_spill] sm:$0xff] %v21380_v20  ;;  %9413 = vrot.lane.b32.xlu1 %v8069_v33, %s19485_s26  ;;  %16747 = vmatmul.mubr.msk.f32.vlgmr.msra.gmra.mrb[44].mxu1 %vm1449_vm1, %v21380_v20  ;;  %v8071_v33 = vld [vmem:[#allocation2 + $0x1f0] sm:$0xff] }
 0x46e   :  { %17669 = vmatpush3.bf16.msra.mxu1 %v17666_v50  ;;  %v18479_v50 = vpack.i.bf16 %v8061_v11, %v21308_v4  ;;  %v18504_v57 = vpack.i.bf16 %v8071_v33, %v8070_v44 }
 0x46f   :  { %17676 = vmatprep.subr.msk.bf16.mxu1 %vm20478_vm3, %v21385_v12 }
 0x470   :  { %18470 = vrot.lane.b32.xlu0 %v21389_v26, %s19484_s25  ;;  %v21400_v45 = vpop.eup %18865 }
 0x471   :  { %25092 = vst [vmem:[#allocation114_spill] sm:$0xff] %v21400_v45  ;;  %9506 = vrot.lane.b32.xlu1 %v8071_v33, %s19485_s26  ;;  %v21403_v14 = vpop.eup %18867  ;;  %16753 = vmatprep.mubr.msk.f32.mxu0 %vm1449_vm1, %v21400_v45  ;;  %v25097_v33 = vld [vmem:[#allocation41_spill] sm:$0xff] }
 0x472   :  { %25093 = vst [vmem:[#allocation115_spill] sm:$0xff] %v21403_v14  ;;  %16754 = vmatmul.mubr.msk.f32.vlgmr.msra.gmra.mrb[76].mxu0 %vm1449_vm1, %v21403_v14 }
 0x473   :  { %17673 = vmatpush3.bf16.msra.mxu0 %v20523_v62  ;;  %v25094_v62 = vld [vmem:[#allocation87_spill] sm:$0xff] }
 0x474   :  { %8669 = vrot.lane.b32.xlu0 %v21344_v58, %s19485_s26  ;;  %17682 = vmatprep.subr.msk.bf16.mxu0 %vm20478_vm3, %v21407_v39 }
 0x475   :  { %18515 = vrot.lane.b32.xlu1 %v20987_v6, %s19485_s26  ;;  %v8065_v6 = vld [vmem:[#allocation2 + $0x190] sm:$0xff] }
 0x478   :  { %8760 = vrot.lane.b32.xlu0 %v21180_v21, %s19485_s26 }
 0x479   :  { %18530 = vrot.lane.b32.xlu1 %v20992_v30, %s19485_s26  ;;  %v8064_v30 = vld [vmem:[#allocation2 + $0x180] sm:$0xff] }
 0x47a   :  { %v18489_v21 = vpack.i.bf16 %v8065_v6, %v8064_v30 }
 0x47c   :  { %18480 = vrot.lane.b32.xlu0 %v18479_v50, %s19484_s25 }
 0x47d   :  { %18540 = vrot.lane.b32.xlu1 %v21002_v0, %s19485_s26  ;;  %v2957_v0 = vpop.xlane.xlu1 %2956 }
 0x480   :  { %8855 = vrot.lane.b32.xlu0 %v21374_v53, %s19485_s26 }
 0x481   :  { %18550 = vrot.lane.b32.xlu1 %v25094_v62, %s19485_s26 }
 0x484   :  { %8946 = vrot.lane.b32.xlu0 %v21231_v36, %s19485_s26  ;;  %v25095_v36 = vld [vmem:[#allocation75_spill] sm:$0xff] }
 0x485   :  { %18565 = vrot.lane.b32.xlu1 %v21032_v15, %s19485_s26  ;;  %v21445_v15 = vpop.permute.xlu0 %6012  ;;  %v2993_v4 = vsub.f32 %v25095_v36, %v2957_v0 }
 0x488   :  { %18490 = vrot.lane.b32.xlu0 %v18489_v21, %s19484_s25 }
 0x489   :  { %18575 = vrot.lane.b32.xlu1 %v21049_v60, %s19485_s26  ;;  %v2963_v60 = vpop.xlane.xlu1 %2962 }
 0x48c   :  { %9041 = vrot.lane.b32.xlu0 %v8061_v11, %s19485_s26  ;;  %v18283_v11 = vunpack.i.h.bf16 %v25097_v33 }
 0x48d   :  { %18585 = vrot.lane.b32.xlu1 %v21057_v19, %s19485_s26 }
 0x490   :  { %9132 = vrot.lane.b32.xlu0 %v21280_v43, %s19485_s26  ;;  %v3054_v43 = vmul.f32 1.442695, %v2993_v4  ;;  %v25102_v4 = vld [vmem:[#allocation42_spill] sm:$0xff] }
 0x491   :  { %18595 = vrot.lane.b32.xlu1 %v21078_v52, %s19486_s27  ;;  %v25096_v52 = vld [vmem:[#allocation80_spill] sm:$0xff] }
 0x492   :  { %v2995_v31 = vsub.f32 %v25096_v52, %v2963_v60 }
 0x494   :  { %9225 = vrot.lane.b32.xlu0 %v8064_v30, %s19485_s26  ;;  %v25100_v30 = vld [vmem:[#allocation43_spill] sm:$0xff] }
 0x495   :  { %11601 = vrot.lane.b32.xlu1 %v21094_v1, %s19487_s28  ;;  %v3058_v1 = vmul.f32 1.442695, %v2995_v31  ;;  %v18288_v21 = vunpack.i.h.bf16 %v25100_v30  ;;  %v18287_v0 = vunpack.i.l.bf16 %v25100_v30  ;;  %v25106_v31 = vld [vmem:[#allocation49_spill] sm:$0xff] }
 0x497   :  { %v2954_v19 = vpop.xlane.xlu0 %2953 }
 0x498   :  { %v2992_v13 = vsub.f32 %v21019_v25, %v2954_v19  ;;  %9227 = vrot.lane.b32.xlu0 %v8065_v6, %s19485_s26 }
 0x499   :  { %18605 = vrot.lane.b32.xlu1 %v21109_v48, %s19486_s27  ;;  %v8073_v48 = vld [vmem:[#allocation2 + $0x18] sm:$0xff] }
 0x49a   :  { %v3052_v59 = vmul.f32 1.442695, %v2992_v13  ;;  %v25104_v13 = vld [vmem:[#allocation48_spill] sm:$0xff] }
 0x49b   :  { %v2960_v56 = vpop.xlane.xlu0 %2959 }
 0x49c   :  { %18869 = vpow2.f32 %v3052_v59  ;;  %v2994_v22 = vsub.f32 %v21040_v42, %v2960_v56  ;;  %18505 = vrot.lane.b32.xlu0 %v18504_v57, %s19484_s25  ;;  %v18282_v42 = vunpack.i.l.bf16 %v25097_v33  ;;  %v18298_v57 = vunpack.i.h.bf16 %v25106_v31  ;;  %v25107_v56 = vld [vmem:[#allocation44_spill] sm:$0xff]  ;;  %v25112_v33 = vld [vmem:[#allocation55_spill] sm:$0xff] }
 0x49d   :  { %18871 = vpow2.f32 %v3054_v43  ;;  %11696 = vrot.lane.b32.xlu1 %v21059_v18, %s19487_s28  ;;  %v8072_v18 = vld [vmem:[#allocation2 + $0x8] sm:$0xff]  ;;  %v18292_v43 = vunpack.i.l.bf16 %v25104_v13  ;;  %v18297_v59 = vunpack.i.l.bf16 %v25106_v31  ;;  %v25124_v31 = vld [vmem:[#allocation64_spill] sm:$0xff] }
 0x49e   :  { %v3056_v25 = vmul.f32 1.442695, %v2994_v22  ;;  %v18509_v62 = vpack.i.bf16 %v8073_v48, %v8072_v18  ;;  %v25110_v48 = vld [vmem:[#allocation45_spill] sm:$0xff]  ;;  %v25113_v18 = vld [vmem:[#allocation50_spill] sm:$0xff] }
 0x4a0   :  { %18873 = vpow2.f32 %v3056_v25  ;;  %9411 = vrot.lane.b32.xlu0 %v21342_v29, %s19485_s26  ;;  %v17686_v29 = vpack.c.bf16 %v18283_v11, %v18282_v42  ;;  %v17704_v25 = vpack.c.bf16 %v18298_v57, %v18297_v59  ;;  %v18308_v11 = vunpack.i.h.bf16 %v25112_v33  ;;  %v25125_v59 = vld [vmem:[#allocation67_spill] sm:$0xff] }
 0x4a1   :  { %18875 = vpow2.f32 %v3058_v1  ;;  %11787 = vrot.lane.b32.xlu1 %v21123_v61, %s19487_s28  ;;  %v8077_v61 = vld [vmem:[#allocation2 + $0x58] sm:$0xff]  ;;  %v18307_v42 = vunpack.i.l.bf16 %v25112_v33  ;;  %v25131_v33 = vld [vmem:[#allocation70_spill] sm:$0xff] }
 0x4a3   :  { %v17716_v30 = vpack.c.bf16 %v18308_v11, %v18307_v42  ;;  %v25132_v42 = vld [vmem:[#allocation73_spill] sm:$0xff] }
 0x4a4   :  { %9504 = vrot.lane.b32.xlu0 %v8070_v44, %s19485_s26  ;;  %v25105_v44 = vld [vmem:[#allocation46_spill] sm:$0xff] }
 0x4a5   :  { %18615 = vrot.lane.b32.xlu1 %v21140_v54, %s19486_s27  ;;  %v8076_v54 = vld [vmem:[#allocation2 + $0x48] sm:$0xff] }
 0x4a6   :  { %v21469_v50 = vpop.eup %18869  ;;  %v18519_v60 = vpack.i.bf16 %v8077_v61, %v8076_v54 }
 0x4a7   :  { %25098 = vst [vmem:[#allocation87_spill] sm:$0xff] %v21469_v50  ;;  %v21471_v6 = vpop.eup %18871  ;;  %16760 = vmatprep.mubr.msk.f32.mxu1 %vm1449_vm1, %v21469_v50 }
 0x4a8   :  { %25099 = vst [vmem:[#allocation75_spill] sm:$0xff] %v21471_v6  ;;  %18510 = vrot.lane.b32.xlu0 %v18509_v62, %s19485_s26  ;;  %16761 = vmatmul.mubr.msk.f32.vlgmr.msra.gmra.mrb[46].mxu1 %vm1449_vm1, %v21471_v6  ;;  %v25115_v62 = vld [vmem:[#allocation60_spill] sm:$0xff] }
 0x4a9   :  { %17679 = vmatpush3.bf16.xpose.msk.msra.mxu1 %vm20478_vm3, %v21385_v12  ;;  %11882 = vrot.lane.b32.xlu1 %v21100_v51, %s19487_s28  ;;  %v18293_v12 = vunpack.i.h.bf16 %v25104_v13  ;;  %v17692_v51 = vpack.c.bf16 %v18288_v21, %v18287_v0  ;;  %v18313_v61 = vunpack.i.h.bf16 %v25115_v62  ;;  %v25117_v21 = vld [vmem:[#allocation58_spill] sm:$0xff]  ;;  %v25118_v0 = vld [vmem:[#allocation61_spill] sm:$0xff]  ;;  %v25120_v13 = vld [vmem:[#allocation100_spill] sm:$0xff] }
 0x4aa   :  { %v21485_v36 = vpop.eup %18873  ;;  %16774 = vmatprep.mubr.msk.f32.mxu1 %vm1449_vm1, %v25102_v4  ;;  %17688 = vmatprep.subr.msk.bf16.mxu1 %vm20478_vm3, %v17686_v29  ;;  %v18318_v54 = vunpack.i.h.bf16 %v25118_v0  ;;  %v18317_v4 = vunpack.i.l.bf16 %v25118_v0 }
 0x4ab   :  { %25101 = vst [vmem:[#allocation80_spill] sm:$0xff] %v21485_v36  ;;  %v21491_v19 = vpop.eup %18875  ;;  %16767 = vmatprep.mubr.msk.f32.mxu0 %vm1449_vm1, %v21485_v36  ;;  %v17698_v52 = vpack.c.bf16 %v18293_v12, %v18292_v43  ;;  %v25122_v12 = vld [vmem:[#allocation66_spill] sm:$0xff] }
 0x4ac   :  { %25103 = vst [vmem:[#allocation41_spill] sm:$0xff] %v21491_v19  ;;  %18520 = vrot.lane.b32.xlu0 %v18519_v60, %s19485_s26  ;;  %16768 = vmatmul.mubr.msk.f32.vlgmr.msra.gmra.mrb[78].mxu0 %vm1449_vm1, %v21491_v19  ;;  %v25119_v60 = vld [vmem:[#allocation56_spill] sm:$0xff]  ;;  %v18323_v43 = vunpack.i.h.bf16 %v25122_v12 }
 0x4ad   :  { %17685 = vmatpush3.bf16.xpose.msk.msra.mxu0 %vm20478_vm3, %v21407_v39  ;;  %11973 = vrot.lane.b32.xlu1 %v21172_v27, %s19487_s28  ;;  %v25108_v27 = vld [vmem:[#allocation47_spill] sm:$0xff]  ;;  %v25109_v39 = vld [vmem:[#allocation54_spill] sm:$0xff] }
 0x4ae   :  { %16781 = vmatprep.mubr.msk.f32.mxu0 %vm1449_vm1, %v25105_v44  ;;  %17694 = vmatprep.subr.msk.bf16.mxu0 %vm20478_vm3, %v17692_v51  ;;  %v18303_v22 = vunpack.i.h.bf16 %v25109_v39  ;;  %v18302_v1 = vunpack.i.l.bf16 %v25109_v39  ;;  %v17728_v44 = vpack.c.bf16 %v18318_v54, %v18317_v4  ;;  %v25126_v39 = vld [vmem:[#allocation62_spill] sm:$0xff] }
 0x4b0   :  { %16775 = vmatmul.mubr.msk.f32.vlgmr.msra.gmra.mrb[48].mxu1 %vm1449_vm1, %v25107_v56  ;;  %18525 = vrot.lane.b32.xlu0 %v21148_v41, %s19485_s26  ;;  %v25111_v41 = vld [vmem:[#allocation52_spill] sm:$0xff]  ;;  %v18328_v56 = vunpack.i.h.bf16 %v25125_v59 }
 0x4b1   :  { %17691 = vmatpush3.bf16.xpose.msk.msra.mxu1 %vm20478_vm3, %v17686_v29  ;;  %16788 = vmatprep.mubr.msk.f32.mxu1 %vm1449_vm1, %v25108_v27  ;;  %v18312_v29 = vunpack.i.l.bf16 %v25115_v62  ;;  %v18327_v27 = vunpack.i.l.bf16 %v25125_v59  ;;  %v25133_v62 = vld [vmem:[#allocation68_spill] sm:$0xff] }
 0x4b2   :  { %18625 = vrot.lane.b32.xlu1 %v21185_v47, %s19486_s27  ;;  %17700 = vmatprep.subr.msk.bf16.mxu1 %vm20478_vm3, %v17698_v52  ;;  %v17710_v47 = vpack.c.bf16 %v18303_v22, %v18302_v1  ;;  %v25127_v22 = vld [vmem:[#allocation103_spill] sm:$0xff]  ;;  %v25129_v1 = vld [vmem:[#allocation72_spill] sm:$0xff] }
 0x4b4   :  { %16782 = vmatmul.mubr.msk.f32.vlgmr.msra.gmra.mrb[80].mxu0 %vm1449_vm1, %v25110_v48  ;;  %18535 = vrot.lane.b32.xlu0 %v21168_v40, %s19485_s26  ;;  %v25114_v40 = vld [vmem:[#allocation53_spill] sm:$0xff]  ;;  %v18332_v48 = vunpack.i.l.bf16 %v25129_v1 }
 0x4b5   :  { %17697 = vmatpush3.bf16.xpose.msk.msra.mxu0 %vm20478_vm3, %v17692_v51  ;;  %16795 = vmatprep.mubr.msk.f32.mxu0 %vm1449_vm1, %v25111_v41  ;;  %v18322_v51 = vunpack.i.l.bf16 %v25122_v12  ;;  %v17740_v41 = vpack.c.bf16 %v18328_v56, %v18327_v27  ;;  %v25145_v27 = vld [vmem:[#allocation82_spill] sm:$0xff] }
 0x4b6   :  { %12068 = vrot.lane.b32.xlu1 %v21125_v34, %s19487_s28  ;;  %17706 = vmatprep.subr.msk.bf16.mxu0 %vm20478_vm3, %v17704_v25  ;;  %v21547_v34 = vpop.permute.xlu1 %6014 }
 0x4b7   :  { %v17734_v57 = vpack.c.bf16 %v18323_v43, %v18322_v51 }
 0x4b8   :  { %16789 = vmatmul.mubr.msk.f32.vlgmr.msra.gmra.mrb[50].mxu1 %vm1449_vm1, %v25113_v18  ;;  %18545 = vrot.lane.b32.xlu0 %v21178_v16, %s19485_s26  ;;  %v25116_v16 = vld [vmem:[#allocation51_spill] sm:$0xff]  ;;  %v18338_v18 = vunpack.i.h.bf16 %v25132_v42 }
 0x4b9   :  { %17703 = vmatpush3.bf16.xpose.msk.msra.mxu1 %vm20478_vm3, %v17698_v52  ;;  %16802 = vmatprep.mubr.msk.f32.mxu1 %vm1449_vm1, %v25114_v40  ;;  %v25123_v52 = vld [vmem:[#allocation57_spill] sm:$0xff]  ;;  %v18337_v40 = vunpack.i.l.bf16 %v25132_v42 }
 0x4ba   :  { %12159 = vrot.lane.b32.xlu1 %v21215_v49, %s19487_s28  ;;  %17712 = vmatprep.subr.msk.bf16.mxu1 %vm20478_vm3, %v17710_v47  ;;  %v17722_v49 = vpack.c.bf16 %v18313_v61, %v18312_v29  ;;  %v25135_v29 = vld [vmem:[#allocation78_spill] sm:$0xff] }
 0x4bb   :  { %v17752_v61 = vpack.c.bf16 %v18338_v18, %v18337_v40 }
 0x4bc   :  { %16796 = vmatmul.mubr.msk.f32.vlgmr.msra.gmra.mrb[82].mxu0 %vm1449_vm1, %v25116_v16  ;;  %18555 = vrot.lane.b32.xlu0 %v21200_v24, %s19485_s26  ;;  %v25121_v24 = vld [vmem:[#allocation59_spill] sm:$0xff]  ;;  %v18342_v16 = vunpack.i.l.bf16 %v25135_v29 }
 0x4bd   :  { %17709 = vmatpush3.bf16.xpose.msk.msra.mxu0 %vm20478_vm3, %v17704_v25  ;;  %16809 = vmatprep.mubr.msk.f32.mxu0 %vm1449_vm1, %v25117_v21  ;;  %v18333_v25 = vunpack.i.h.bf16 %v25129_v1  ;;  %v25136_v21 = vld [vmem:[#allocation69_spill] sm:$0xff]  ;;  %v25147_v1 = vld [vmem:[#allocation83_spill] sm:$0xff] }
 0x4be   :  { %17718 = vmatprep.subr.msk.bf16.mxu0 %vm20478_vm3, %v17716_v30 }
 0x4bf   :  { %v17746_v11 = vpack.c.bf16 %v18333_v25, %v18332_v48 }
 0x4c0   :  { %16803 = vmatmul.mubr.msk.f32.vlgmr.msra.gmra.mrb[52].mxu1 %vm1449_vm1, %v25119_v60  ;;  %18560 = vrot.lane.b32.xlu0 %v25120_v13, %s19485_s26  ;;  %v25139_v60 = vld [vmem:[#allocation74_spill] sm:$0xff]  ;;  %v25140_v13 = vld [vmem:[#allocation79_spill] sm:$0xff] }
 0x4c1   :  { %17715 = vmatpush3.bf16.xpose.msk.msra.mxu1 %vm20478_vm3, %v17710_v47  ;;  %16816 = vmatprep.mubr.msk.f32.mxu1 %vm1449_vm1, %v25121_v24  ;;  %v25130_v47 = vld [vmem:[#allocation63_spill] sm:$0xff] }
 0x4c2   :  { %17724 = vmatprep.subr.msk.bf16.mxu1 %vm20478_vm3, %v17722_v49 }
 0x4c4   :  { %16810 = vmatmul.mubr.msk.f32.vlgmr.msra.gmra.mrb[84].mxu0 %vm1449_vm1, %v25123_v52  ;;  %18570 = vrot.lane.b32.xlu0 %v21229_v32, %s19485_s26  ;;  %v25128_v32 = vld [vmem:[#allocation65_spill] sm:$0xff]  ;;  %v18356_v52 = vpop.permute.xlu1 %18355 }
 0x4c5   :  { %17721 = vmatpush3.bf16.xpose.msk.msra.mxu0 %vm20478_vm3, %v17716_v30  ;;  %16823 = vmatprep.mubr.msk.f32.mxu0 %vm1449_vm1, %v25124_v31  ;;  %v18343_v30 = vunpack.i.h.bf16 %v25135_v29  ;;  %v25144_v31 = vld [vmem:[#allocation81_spill] sm:$0xff]  ;;  %v18358_v59 = vunpack.i.h.bf16 %v18356_v52  ;;  %v18357_v56 = vunpack.i.l.bf16 %v18356_v52 }
 0x4c6   :  { %17730 = vmatprep.subr.msk.bf16.mxu0 %vm20478_vm3, %v17728_v44 }
 0x4c7   :  { %v17758_v4 = vpack.c.bf16 %v18343_v30, %v18342_v16  ;;  %v17774_v25 = vpack.c.bf16 %v18358_v59, %v18357_v56 }
 0x4c8   :  { %16817 = vmatmul.mubr.msk.f32.vlgmr.msra.gmra.mrb[54].mxu1 %vm1449_vm1, %v25126_v39  ;;  %18580 = vrot.lane.b32.xlu0 %v25127_v22, %s19485_s26  ;;  %v25146_v39 = vld [vmem:[#allocation84_spill] sm:$0xff] }
 0x4c9   :  { %17727 = vmatpush3.bf16.xpose.msk.msra.mxu1 %vm20478_vm3, %v17722_v49  ;;  %16830 = vmatprep.mubr.msk.f32.mxu1 %vm1449_vm1, %v25128_v32  ;;  %v25138_v49 = vld [vmem:[#allocation86_spill] sm:$0xff] }
 0x4ca   :  { %17736 = vmatprep.subr.msk.bf16.mxu1 %vm20478_vm3, %v17734_v57  ;;  %v18348_v0 = vunpack.i.h.bf16 %v25138_v49  ;;  %v18347_v54 = vunpack.i.l.bf16 %v25138_v49 }
 0x4cc   :  { %16824 = vmatmul.mubr.msk.f32.vlgmr.msra.gmra.mrb[86].mxu0 %vm1449_vm1, %v25130_v47  ;;  %18590 = vrot.lane.b32.xlu0 %v21261_v8, %s19486_s27  ;;  %v25134_v8 = vld [vmem:[#allocation71_spill] sm:$0xff]  ;;  %v17764_v12 = vpack.c.bf16 %v18348_v0, %v18347_v54 }
 0x4cd   :  { %17733 = vmatpush3.bf16.xpose.msk.msra.mxu0 %vm20478_vm3, %v17728_v44  ;;  %16837 = vmatprep.mubr.msk.f32.mxu0 %vm1449_vm1, %v25131_v33  ;;  %v25142_v44 = vld [vmem:[#allocation76_spill] sm:$0xff] }
 0x4ce   :  { %17742 = vmatprep.subr.msk.bf16.mxu0 %vm20478_vm3, %v17740_v41 }
 0x4d0   :  { %16831 = vmatmul.mubr.msk.f32.vlgmr.msra.gmra.mrb[56].mxu1 %vm1449_vm1, %v25133_v62  ;;  %18600 = vrot.lane.b32.xlu0 %v21278_v7, %s19486_s27  ;;  %v25137_v7 = vld [vmem:[#allocation77_spill] sm:$0xff]  ;;  %v21709_v62 = vpop.permute.xlu1 %18370 }
 0x4d1   :  { %17739 = vmatpush3.bf16.xpose.msk.msra.mxu1 %vm20478_vm3, %v17734_v57  ;;  %16844 = vmatprep.mubr.msk.f32.mxu1 %vm1449_vm1, %v25134_v8 }
 0x4d2   :  { %17748 = vmatprep.subr.msk.bf16.mxu1 %vm20478_vm3, %v17746_v11 }
 0x4d4   :  { %16838 = vmatmul.mubr.msk.f32.vlgmr.msra.gmra.mrb[88].mxu0 %vm1449_vm1, %v25136_v21  ;;  %11603 = vrot.lane.b32.xlu0 %v21246_v63, %s19487_s28  ;;  %v18351_v63 = vpop.permute.xlu0 %18350 }
 0x4d5   :  { %17745 = vmatpush3.bf16.xpose.msk.msra.mxu0 %vm20478_vm3, %v17740_v41  ;;  %16851 = vmatprep.mubr.msk.f32.mxu0 %vm1449_vm1, %v25137_v7  ;;  %v18353_v43 = vunpack.i.h.bf16 %v18351_v63  ;;  %v18352_v51 = vunpack.i.l.bf16 %v18351_v63 }
 0x4d6   :  { %17754 = vmatprep.subr.msk.bf16.mxu0 %vm20478_vm3, %v17752_v61 }
 0x4d8   :  { %16845 = vmatmul.mubr.msk.f32.vlgmr.msra.gmra.mrb[58].mxu1 %vm1449_vm1, %v25139_v60  ;;  %11694 = vrot.lane.b32.xlu0 %v21069_v55, %s19487_s28  ;;  %v18361_v57 = vpop.permute.xlu0 %18360 }
 0x4d9   :  { %17751 = vmatpush3.bf16.xpose.msk.msra.mxu1 %vm20478_vm3, %v17746_v11  ;;  %16858 = vmatprep.mubr.msk.f32.mxu1 %vm1449_vm1, %v25140_v13  ;;  %v18363_v22 = vunpack.i.h.bf16 %v18361_v57  ;;  %v18362_v32 = vunpack.i.l.bf16 %v18361_v57  ;;  %v25150_v11 = vld [vmem:[#allocation85_spill] sm:$0xff] }
 0x4da   :  { %17760 = vmatprep.subr.msk.bf16.mxu1 %vm20478_vm3, %v17758_v4 }
 0x4dc   :  { %16852 = vmatmul.mubr.msk.f32.vlgmr.msra.gmra.mrb[90].mxu0 %vm1449_vm1, %v25142_v44  ;;  %18610 = vrot.lane.b32.xlu0 %v21318_v23, %s19486_s27  ;;  %v17770_v23 = vpack.c.bf16 %v18353_v43, %v18352_v51  ;;  %v18366_v48 = vpop.permute.xlu0 %18365 }
 0x4dd   :  { %v21649_v24 = vpop.f32.mrb[32].mxu1  ;;  %17757 = vmatpush3.bf16.xpose.msk.msra.mxu0 %vm20478_vm3, %v17752_v61  ;;  %16865 = vmatprep.mubr.msk.f32.mxu0 %vm1449_vm1, %v25144_v31  ;;  %v18368_v47 = vunpack.i.h.bf16 %v18366_v48  ;;  %v18367_v33 = vunpack.i.l.bf16 %v18366_v48  ;;  %v21717_v61 = vpop.permute.xlu1 %18380 }
 0x4de   :  { %25141 = vst [vmem:[#allocation43_spill] sm:$0xff] %v21649_v24  ;;  %v21655_v55 = vpop.f32.mrb[33].mxu1  ;;  %17766 = vmatprep.subr.msk.bf16.mxu0 %vm20478_vm3, %v17764_v12 }
 0x4df   :  { %25143 = vst [vmem:[#allocation42_spill] sm:$0xff] %v21655_v55  ;;  %v21698_v18 = vpack.c.bf16 %v18368_v47, %v18367_v33 }
 0x4e0   :  { %16859 = vmatmul.mubr.msk.f32.vlgmr.msra.gmra.mrb[60].mxu1 %vm1449_vm1, %v25145_v27  ;;  %11789 = vrot.lane.b32.xlu0 %v21268_v28, %s19487_s28  ;;  %v21690_v42 = vpop.permute.xlu0 %18375 }
 0x4e1   :  { %17763 = vmatpush3.bf16.xpose.msk.msra.mxu1 %vm20478_vm3, %v17758_v4  ;;  %16872 = vmatprep.mubr.msk.f32.mxu1 %vm1449_vm1, %v25146_v39 }
 0x4e2   :  { %17771 = vmatprep.subr.bf16.mxu1 %v17770_v23 }
 0x4e4   :  { %16866 = vmatmul.mubr.msk.f32.vlgmr.msra.gmra.mrb[92].mxu0 %vm1449_vm1, %v25147_v1  ;;  %11880 = vrot.lane.b32.xlu0 %v21104_v9, %s19487_s28  ;;  %v21687_v9 = vpack.c.bf16 %v18363_v22, %v18362_v32 }
 0x4e5   :  { %17769 = vmatpush3.bf16.xpose.msk.msra.mxu0 %vm20478_vm3, %v17764_v12  ;;  %16879 = vmatprep.mubr.msk.f32.mxu0 %vm1449_vm1, %v21445_v15 }
 0x4e6   :  { %17775 = vmatprep.subr.bf16.mxu0 %v17774_v25 }
 0x4e8   :  { %v21679_v28 = vpop.f32.mrb[64].mxu0  ;;  %16873 = vmatmul.mubr.msk.f32.vlgmr.msra.gmra.mrb[62].mxu1 %vm1449_vm1, %v25150_v11  ;;  %18620 = vrot.lane.b32.xlu0 %v21352_v5, %s19486_s27  ;;  %v21705_v5 = vpop.permute.xlu0 %18385 }
 0x4e9   :  { %25148 = vst [vmem:[#allocation48_spill] sm:$0xff] %v21679_v28  ;;  %v21681_v41 = vpop.f32.mrb[65].mxu0  ;;  %17773 = vmatpush3.bf16.msra.mxu1 %v17770_v23 }
 0x4ea   :  { %25149 = vst [vmem:[#allocation46_spill] sm:$0xff] %v21681_v41  ;;  %17779 = vmatprep.subr.bf16.mxu1 %v21687_v9 }
 0x4ec   :  { %16880 = vmatmul.mubr.msk.f32.vlgmr.msra.gmra.mrb[94].mxu0 %vm1449_vm1, %v21547_v34  ;;  %11975 = vrot.lane.b32.xlu0 %v21301_v10, %s19487_s28  ;;  %v21711_v34 = vpop.permute.xlu0 %18395 }
 0x4ed   :  { %v21692_v15 = vpop.f32.mrb[34].mxu1  ;;  %17777 = vmatpush3.bf16.msra.mxu0 %v17774_v25 }
 0x4ee   :  { %25151 = vst [vmem:[#allocation49_spill] sm:$0xff] %v21692_v15  ;;  %v21700_v40 = vpop.f32.mrb[35].mxu1  ;;  %17783 = vmatprep.subr.bf16.mxu0 %v21698_v18 }
 0x4ef   :  { %25152 = vst [vmem:[#allocation44_spill] sm:$0xff] %v21700_v40 }
 0x4f0   :  { %12066 = vrot.lane.b32.xlu0 %v21136_v3, %s19487_s28  ;;  %v21719_v29 = vpop.permute.xlu0 %18400  ;;  %v21723_v3 = vpop.permute.xlu1 %18390 }
 0x4f4   :  { %18630 = vrot.lane.b32.xlu0 %v21389_v26, %s19486_s27  ;;  %v21727_v21 = vpop.permute.xlu0 %18410  ;;  %v21729_v26 = vpop.permute.xlu1 %18405 }
 0x4f8   :  { %v21713_v10 = vpop.f32.mrb[66].mxu0  ;;  %v21731_v7 = vpop.permute.xlu0 %18420 }
 0x4f9   :  { %25153 = vst [vmem:[#allocation47_spill] sm:$0xff] %v21713_v10  ;;  %v21715_v8 = vpop.f32.mrb[67].mxu0  ;;  %v21737_v54 = vpop.permute.xlu1 %18415 }
 0x4fa   :  { %25154 = vst [vmem:[#allocation54_spill] sm:$0xff] %v21715_v8 }
 0x4fc   :  { %v21739_v4 = vpop.permute.xlu0 %18430 }
 0x4fd   :  { %25159 = vst [vmem:[#allocation53_spill] sm:$0xff] %v21739_v4  ;;  %v21745_v13 = vpop.permute.xlu1 %18425 }
 0x500   :  { %v21721_v30 = vpop.f32.mrb[36].mxu1  ;;  %v21747_v12 = vpop.permute.xlu0 %18440 }
 0x501   :  { %25155 = vst [vmem:[#allocation45_spill] sm:$0xff] %v21721_v30  ;;  %v21725_v16 = vpop.f32.mrb[37].mxu1  ;;  %25162 = vst [vmem:[#allocation58_spill] sm:$0xff] %v21747_v12  ;;  %v21751_v51 = vpop.permute.xlu1 %18435 }
 0x502   :  { %25156 = vst [vmem:[#allocation52_spill] sm:$0xff] %v21725_v16  ;;  %25164 = vst [vmem:[#allocation56_spill] sm:$0xff] %v21751_v51  ;;  %v11554_v51 = vld [vmem:[#allocation2 + $0x160] sm:$0xff] }
 0x504   :  { %v21755_v52 = vpop.permute.xlu0 %8111 }
 0x505   :  { %25166 = vst [vmem:[#allocation59_spill] sm:$0xff] %v21755_v52  ;;  %v21757_v31 = vpop.permute.xlu1 %8109 }
 0x506   :  { %25167 = vst [vmem:[#allocation66_spill] sm:$0xff] %v21757_v31 }
 0x508   :  { %v21733_v49 = vpop.f32.mrb[68].mxu0  ;;  %v21759_v57 = vpop.permute.xlu0 %8202 }
 0x509   :  { %25157 = vst [vmem:[#allocation55_spill] sm:$0xff] %v21733_v49  ;;  %v21735_v0 = vpop.f32.mrb[69].mxu0  ;;  %25168 = vst [vmem:[#allocation57_spill] sm:$0xff] %v21759_v57  ;;  %v21765_v27 = vpop.permute.xlu1 %18445 }
 0x50a   :  { %25158 = vst [vmem:[#allocation50_spill] sm:$0xff] %v21735_v0  ;;  %25171 = vst [vmem:[#allocation62_spill] sm:$0xff] %v21765_v27 }
 0x50c   :  { %v21767_v23 = vpop.permute.xlu0 %18450 }
 0x50d   :  { %25172 = vst [vmem:[#allocation103_spill] sm:$0xff] %v21767_v23  ;;  %v21773_v32 = vpop.permute.xlu1 %8204 }
 0x50e   :  { %25175 = vst [vmem:[#allocation63_spill] sm:$0xff] %v21773_v32 }
 0x510   :  { %v21741_v60 = vpop.f32.mrb[38].mxu1  ;;  %v21775_v1 = vpop.permute.xlu0 %8297 }
 0x511   :  { %25160 = vst [vmem:[#allocation60_spill] sm:$0xff] %v21741_v60  ;;  %v21743_v63 = vpop.f32.mrb[39].mxu1  ;;  %25176 = vst [vmem:[#allocation70_spill] sm:$0xff] %v21775_v1  ;;  %v21779_v48 = vpop.permute.xlu1 %8295 }
 0x512   :  { %25161 = vst [vmem:[#allocation51_spill] sm:$0xff] %v21743_v63  ;;  %25178 = vst [vmem:[#allocation68_spill] sm:$0xff] %v21779_v48 }
 0x514   :  { %v21783_v33 = vpop.permute.xlu0 %8388 }
 0x515   :  { %25180 = vst [vmem:[#allocation78_spill] sm:$0xff] %v21783_v33  ;;  %v21785_v11 = vpop.permute.xlu1 %18455 }
 0x516   :  { %25181 = vst [vmem:[#allocation69_spill] sm:$0xff] %v21785_v11 }
 0x518   :  { %v21749_v43 = vpop.f32.mrb[70].mxu0  ;;  %v21787_v60 = vpop.permute.xlu0 %18460 }
 0x519   :  { %25163 = vst [vmem:[#allocation61_spill] sm:$0xff] %v21749_v43  ;;  %v21753_v44 = vpop.f32.mrb[71].mxu0  ;;  %25182 = vst [vmem:[#allocation77_spill] sm:$0xff] %v21787_v60  ;;  %v21793_v19 = vpop.permute.xlu1 %8390 }
 0x51a   :  { %25165 = vst [vmem:[#allocation100_spill] sm:$0xff] %v21753_v44  ;;  %25185 = vst [vmem:[#allocation79_spill] sm:$0xff] %v21793_v19 }
 0x51c   :  { %v21795_v49 = vpop.permute.xlu0 %8483 }
 0x51d   :  { %25186 = vst [vmem:[#allocation76_spill] sm:$0xff] %v21795_v49  ;;  %v21801_v16 = vpop.permute.xlu1 %8481 }
 0x51e   :  { %25189 = vst [vmem:[#allocation84_spill] sm:$0xff] %v21801_v16 }
 0x520   :  { %v21761_v59 = vpop.f32.mrb[40].mxu1  ;;  %v21803_v10 = vpop.permute.xlu0 %8574 }
 0x521   :  { %25169 = vst [vmem:[#allocation64_spill] sm:$0xff] %v21761_v59  ;;  %v21763_v56 = vpop.f32.mrb[41].mxu1  ;;  %25190 = vst [vmem:[#allocation83_spill] sm:$0xff] %v21803_v10  ;;  %v21809_v40 = vpop.permute.xlu1 %18465 }
 0x522   :  { %25170 = vst [vmem:[#allocation67_spill] sm:$0xff] %v21763_v56  ;;  %25193 = vst [vmem:[#allocation117_spill] sm:$0xff] %v21809_v40 }
 0x528   :  { %v21769_v39 = vpop.f32.mrb[72].mxu0 }
 0x529   :  { %25173 = vst [vmem:[#allocation65_spill] sm:$0xff] %v21769_v39  ;;  %v21771_v22 = vpop.f32.mrb[73].mxu0 }
 0x52a   :  { %25174 = vst [vmem:[#allocation72_spill] sm:$0xff] %v21771_v22 }
 0x530   :  { %v21777_v25 = vpop.f32.mrb[42].mxu1 }
 0x531   :  { %25177 = vst [vmem:[#allocation73_spill] sm:$0xff] %v21777_v25  ;;  %v21781_v47 = vpop.f32.mrb[43].mxu1 }
 0x532   :  { %25179 = vst [vmem:[#allocation71_spill] sm:$0xff] %v21781_v47 }
 0x538   :  { %v21789_v63 = vpop.f32.mrb[74].mxu0 }
 0x539   :  { %25183 = vst [vmem:[#allocation86_spill] sm:$0xff] %v21789_v63  ;;  %v21791_v36 = vpop.f32.mrb[75].mxu0  ;;  %v21811_v63 = vpop.permute.xlu0 %18470 }
 0x53a   :  { %25184 = vst [vmem:[#allocation74_spill] sm:$0xff] %v21791_v36  ;;  %25194 = vst [vmem:[#allocation118_spill] sm:$0xff] %v21811_v63  ;;  %v21813_v36 = vpop.permute.xlu1 %8576 }
 0x53b   :  { %25195 = vst [vmem:[#allocation119_spill] sm:$0xff] %v21813_v36 }
 0x53d   :  { %v21815_v25 = vpop.permute.xlu0 %8669 }
 0x53e   :  { %25196 = vst [vmem:[#allocation120_spill] sm:$0xff] %v21815_v25  ;;  %v21817_v28 = vpop.permute.xlu1 %8667 }
 0x53f   :  { %25197 = vst [vmem:[#allocation121_spill] sm:$0xff] %v21817_v28 }
 0x540   :  { %v21797_v0 = vpop.f32.mrb[44].mxu1 }
 0x541   :  { %25187 = vst [vmem:[#allocation81_spill] sm:$0xff] %v21797_v0  ;;  %v21799_v30 = vpop.f32.mrb[45].mxu1  ;;  %v21819_v0 = vpop.permute.xlu0 %8760 }
 0x542   :  { %25188 = vst [vmem:[#allocation82_spill] sm:$0xff] %v21799_v30  ;;  %25198 = vst [vmem:[#allocation122_spill] sm:$0xff] %v21819_v0  ;;  %v21821_v30 = vpop.permute.xlu1 %18475 }
 0x543   :  { %25199 = vst [vmem:[#allocation123_spill] sm:$0xff] %v21821_v30 }
 0x545   :  { %v21805_v8 = vpop.f32.mrb[76].mxu0  ;;  %v21823_v47 = vpop.permute.xlu0 %18480 }
 0x546   :  { %25191 = vst [vmem:[#allocation85_spill] sm:$0xff] %v21805_v8  ;;  %v21807_v15 = vpop.f32.mrb[77].mxu0  ;;  %25200 = vst [vmem:[#allocation124_spill] sm:$0xff] %v21823_v47  ;;  %v21825_v41 = vpop.permute.xlu1 %8762 }
 0x547   :  { %25192 = vst [vmem:[#allocation116_spill] sm:$0xff] %v21807_v15  ;;  %25201 = vst [vmem:[#allocation125_spill] sm:$0xff] %v21825_v41 }
 0x549   :  { %v21827_v8 = vpop.permute.xlu0 %8855 }
 0x54a   :  { %25202 = vst [vmem:[#allocation126_spill] sm:$0xff] %v21827_v8  ;;  %v21829_v15 = vpop.permute.xlu1 %8853 }
 0x54b   :  { %25203 = vst [vmem:[#allocation127_spill] sm:$0xff] %v21829_v15 }
 0x54d   :  { %v21831_v39 = vpop.permute.xlu0 %8946 }
 0x54e   :  { %25204 = vst [vmem:[#allocation128_spill] sm:$0xff] %v21831_v39  ;;  %v21833_v24 = vpop.permute.xlu1 %18485 }
 0x54f   :  { %25205 = vst [vmem:[#allocation129_spill] sm:$0xff] %v21833_v24 }
 0x551   :  { %v21835_v22 = vpop.permute.xlu0 %18490 }
 0x552   :  { %25206 = vst [vmem:[#allocation130_spill] sm:$0xff] %v21835_v22  ;;  %v21837_v55 = vpop.permute.xlu1 %8948 }
 0x553   :  { %25207 = vst [vmem:[#allocation131_spill] sm:$0xff] %v21837_v55 }
 0x555   :  { %v21839_v59 = vpop.permute.xlu0 %9041 }
 0x556   :  { %25208 = vst [vmem:[#allocation132_spill] sm:$0xff] %v21839_v59  ;;  %v21841_v56 = vpop.permute.xlu1 %9039  ;;  %v21860_v59 = vld [vmem:[%s24805_s1 + $0x18] sm:$0xff] }
 0x557   :  { %25209 = vst [vmem:[#allocation133_spill] sm:$0xff] %v21841_v56 }
 0x559   :  { %v21843_v43 = vpop.permute.xlu0 %9132 }
 0x55a   :  { %25210 = vst [vmem:[#allocation134_spill] sm:$0xff] %v21843_v43  ;;  %v21851_v15 = vpop.permute.xlu1 %18495  ;;  %v21865_v43 = vld [vmem:[%s24805_s1 + $0x10] sm:$0xff] }
 0x55b   :  { %25214 = vst [vmem:[#allocation138_spill] sm:$0xff] %v21851_v15 }
 0x55d   :  { %v21855_v25 = vpop.permute.xlu0 %9225 }
 0x55e   :  { %25216 = vst [vmem:[#allocation140_spill] sm:$0xff] %v21855_v25 }
 0x561   :  { %v21877_v56 = vpop.permute.xlu0 %9227 }
 0x562   :  { %25218 = vst [vmem:[#allocation142_spill] sm:$0xff] %v21877_v56 }
 0x565   :  { %v21894_v36 = vpop.permute.xlu0 %18505 }
 0x566   :  { %25220 = vst [vmem:[#allocation144_spill] sm:$0xff] %v21894_v36 }
 0x57b   :  { %v21845_v44 = vpop.f32.mrb[46].mxu1 }
 0x57c   :  { %25211 = vst [vmem:[#allocation135_spill] sm:$0xff] %v21845_v44  ;;  %v21847_v41 = vpop.f32.mrb[47].mxu1 }
 0x57d   :  { %25212 = vst [vmem:[#allocation136_spill] sm:$0xff] %v21847_v41 }
 0x57f   :  { %v21849_v8 = vpop.f32.mrb[78].mxu0 }
 0x580   :  { %25213 = vst [vmem:[#allocation137_spill] sm:$0xff] %v21849_v8  ;;  %v21853_v39 = vpop.f32.mrb[79].mxu0 }
 0x581   :  { %25215 = vst [vmem:[#allocation139_spill] sm:$0xff] %v21853_v39  ;;  %v21873_v39 = vpop.permute.xlu1 %9134 }
 0x582   :  { %25217 = vst [vmem:[#allocation141_spill] sm:$0xff] %v21873_v39 }
 0x583   :  { %v16776_v44 = vpop.f32.mrb[48].mxu1 }
 0x584   :  { %v21868_v41 = vadd.f32 %v16776_v44, %v21860_v59  ;;  %v4699_v8 = vpop.f32.mrb[49].mxu1 }
 0x585   :  { %v21871_v55 = vadd.f32 %v21865_v43, %v4699_v8  ;;  %v21889_v47 = vpop.permute.xlu1 %18500 }
 0x586   :  { %v6106_v25 = vsel %vm1449_vm1, %v21868_v41, -inf  ;;  %25219 = vst [vmem:[#allocation143_spill] sm:$0xff] %v21889_v47 }
 0x587   :  { %6107 = vmax.xlane.f32.xlu1 %v6106_v25  ;;  %v16783_v15 = vpop.f32.mrb[80].mxu0  ;;  %v6103_v22 = vsel %vm1449_vm1, %v21871_v55, -inf }
 0x588   :  { %v21882_v24 = vadd.f32 %v16783_v15, %v21860_v59  ;;  %v4792_v44 = vpop.f32.mrb[81].mxu0  ;;  %6104 = vmax.xlane.f32.xlu0 %v6103_v22 }
 0x589   :  { %v21887_v39 = vadd.f32 %v21865_v43, %v4792_v44  ;;  %v21903_v47 = vpop.permute.xlu1 %9318 }
 0x58a   :  { %v6112_v8 = vsel %vm1449_vm1, %v21882_v24, -inf  ;;  %25221 = vst [vmem:[#allocation145_spill] sm:$0xff] %v21903_v47 }
 0x58b   :  { %v16790_v0 = vpop.f32.mrb[50].mxu1  ;;  %v6109_v44 = vsel %vm1449_vm1, %v21887_v39, -inf }
 0x58c   :  { %v21892_v25 = vadd.f32 %v16790_v0, %v21860_v59  ;;  %v4885_v56 = vpop.f32.mrb[51].mxu1  ;;  %6113 = vmax.xlane.f32.xlu0 %v6112_v8  ;;  %v21905_v0 = vpop.permute.xlu0 %9411 }
 0x58d   :  { %v21899_v22 = vadd.f32 %v21865_v43, %v4885_v56  ;;  %25222 = vst [vmem:[#allocation146_spill] sm:$0xff] %v21905_v0  ;;  %v21925_v10 = vpop.permute.xlu1 %9320 }
 0x58e   :  { %v6118_v15 = vsel %vm1449_vm1, %v21892_v25, -inf  ;;  %25223 = vst [vmem:[#allocation147_spill] sm:$0xff] %v21925_v10 }
 0x58f   :  { %6119 = vmax.xlane.f32.xlu1 %v6118_v15  ;;  %v16797_v6 = vpop.f32.mrb[82].mxu0  ;;  %v6115_v49 = vsel %vm1449_vm1, %v21899_v22, -inf }
 0x590   :  { %v4978_v28 = vpop.f32.mrb[83].mxu0  ;;  %6110 = vmax.xlane.f32.xlu0 %v6109_v44  ;;  %v21908_v8 = vadd.f32 %v16797_v6, %v21860_v59  ;;  %v21927_v63 = vpop.permute.xlu0 %9504 }
 0x591   :  { %v21921_v0 = vadd.f32 %v21865_v43, %v4978_v28  ;;  %25224 = vst [vmem:[#allocation148_spill] sm:$0xff] %v21927_v63  ;;  %v21939_v10 = vpop.permute.xlu1 %9413 }
 0x592   :  { %v6124_v47 = vsel %vm1449_vm1, %v21908_v8, -inf  ;;  %25225 = vst [vmem:[#allocation149_spill] sm:$0xff] %v21939_v10 }
 0x593   :  { %v16804_v36 = vpop.f32.mrb[52].mxu1  ;;  %v6121_v28 = vsel %vm1449_vm1, %v21921_v0, -inf }
 0x594   :  { %v21913_v56 = vadd.f32 %v16804_v36, %v21860_v59  ;;  %v5071_v15 = vpop.f32.mrb[53].mxu1  ;;  %6116 = vmax.xlane.f32.xlu0 %v6115_v49 }
 0x595   :  { %v21916_v30 = vadd.f32 %v21865_v43, %v5071_v15 }
 0x596   :  { %v6130_v44 = vsel %vm1449_vm1, %v21913_v56, -inf }
 0x597   :  { %6131 = vmax.xlane.f32.xlu1 %v6130_v44  ;;  %v16811_v6 = vpop.f32.mrb[84].mxu0  ;;  %v6127_v49 = vsel %vm1449_vm1, %v21916_v30, -inf }
 0x598   :  { %v5164_v36 = vpop.f32.mrb[85].mxu0  ;;  %6125 = vmax.xlane.f32.xlu0 %v6124_v47  ;;  %v21932_v15 = vadd.f32 %v16811_v6, %v21860_v59  ;;  %v21946_v6 = vpop.permute.xlu0 %18510 }
 0x599   :  { %25226 = vst [vmem:[#allocation150_spill] sm:$0xff] %v21946_v6 }
 0x59b   :  { %v16818_v19 = vpop.f32.mrb[54].mxu1  ;;  %6128 = vmax.xlane.f32.xlu1 %v6127_v49  ;;  %v21949_v49 = vadd.f32 %v21865_v43, %v5164_v36  ;;  %v21960_v36 = vpop.permute.xlu1 %9506 }
 0x59c   :  { %v21937_v44 = vadd.f32 %v16818_v19, %v21860_v59  ;;  %v5257_v50 = vpop.f32.mrb[55].mxu1  ;;  %6122 = vmax.xlane.f32.xlu0 %v6121_v28  ;;  %v6136_v19 = vsel %vm1449_vm1, %v21932_v15, -inf  ;;  %25227 = vst [vmem:[#allocation151_spill] sm:$0xff] %v21960_v36  ;;  %v21965_v14 = vpop.permute.xlu0 %18520 }
 0x59d   :  { %v21942_v47 = vadd.f32 %v21865_v43, %v5257_v50  ;;  %v6133_v6 = vsel %vm1449_vm1, %v21949_v49, -inf  ;;  %25228 = vst [vmem:[#allocation152_spill] sm:$0xff] %v21965_v14 }
 0x59e   :  { %v6142_v63 = vsel %vm1449_vm1, %v21937_v44, -inf }
 0x59f   :  { %6143 = vmax.xlane.f32.xlu1 %v6142_v63  ;;  %v16825_v16 = vpop.f32.mrb[86].mxu0  ;;  %v6139_v28 = vsel %vm1449_vm1, %v21942_v47, -inf  ;;  %v21977_v60 = vpop.permute.xlu1 %18515 }
 0x5a0   :  { %v5350_v1 = vpop.f32.mrb[87].mxu0  ;;  %6137 = vmax.xlane.f32.xlu0 %v6136_v19  ;;  %v21956_v50 = vadd.f32 %v16825_v16, %v21860_v59  ;;  %25229 = vst [vmem:[#allocation153_spill] sm:$0xff] %v21977_v60 }
 0x5a2   :  { %v6148_v36 = vsel %vm1449_vm1, %v21956_v50, -inf }
 0x5a3   :  { %v16832_v10 = vpop.f32.mrb[56].mxu1  ;;  %6140 = vmax.xlane.f32.xlu1 %v6139_v28  ;;  %v21973_v28 = vadd.f32 %v21865_v43, %v5350_v1  ;;  %v22001_v48 = vpop.permute.xlu1 %18530 }
 0x5a4   :  { %v21963_v63 = vadd.f32 %v16832_v10, %v21860_v59  ;;  %v5443_v40 = vpop.f32.mrb[57].mxu1  ;;  %6134 = vmax.xlane.f32.xlu0 %v6133_v6  ;;  %25231 = vst [vmem:[#allocation155_spill] sm:$0xff] %v22001_v48 }
 0x5a5   :  { %v21968_v19 = vadd.f32 %v21865_v43, %v5443_v40  ;;  %v21981_v40 = vpop.permute.xlu0 %18525  ;;  %v6145_v1 = vsel %vm1449_vm1, %v21973_v28, -inf }
 0x5a6   :  { %v6154_v16 = vsel %vm1449_vm1, %v21963_v63, -inf  ;;  %25230 = vst [vmem:[#allocation154_spill] sm:$0xff] %v21981_v40 }
 0x5a7   :  { %6155 = vmax.xlane.f32.xlu1 %v6154_v16  ;;  %v16839_v33 = vpop.f32.mrb[88].mxu0  ;;  %v6151_v6 = vsel %vm1449_vm1, %v21968_v19, -inf }
 0x5a8   :  { %v5536_v10 = vpop.f32.mrb[89].mxu0  ;;  %6149 = vmax.xlane.f32.xlu0 %v6148_v36  ;;  %v21984_v14 = vadd.f32 %v16839_v33, %v21860_v59 }
 0x5a9   :  { %v21997_v40 = vadd.f32 %v21865_v43, %v5536_v10 }
 0x5ab   :  { %v16846_v32 = vpop.f32.mrb[58].mxu1  ;;  %6152 = vmax.xlane.f32.xlu1 %v6151_v6  ;;  %v6160_v6 = vsel %vm1449_vm1, %v21984_v14, -inf }
 0x5ac   :  { %v21989_v16 = vadd.f32 %v16846_v32, %v21860_v59  ;;  %v5629_v45 = vpop.f32.mrb[59].mxu1  ;;  %6146 = vmax.xlane.f32.xlu0 %v6145_v1 }
 0x5ad   :  { %v21992_v36 = vadd.f32 %v21865_v43, %v5629_v45  ;;  %v22006_v45 = vpop.permute.xlu0 %18535 }
 0x5ae   :  { %v6166_v60 = vsel %vm1449_vm1, %v21989_v16, -inf  ;;  %25232 = vst [vmem:[#allocation156_spill] sm:$0xff] %v22006_v45 }
 0x5af   :  { %6167 = vmax.xlane.f32.xlu1 %v6166_v60  ;;  %v16853_v33 = vpop.f32.mrb[90].mxu0  ;;  %v6157_v60 = vsel %vm1449_vm1, %v21997_v40, -inf }
 0x5b0   :  { %v22004_v32 = vadd.f32 %v16853_v33, %v21860_v59  ;;  %v5722_v1 = vpop.f32.mrb[91].mxu0  ;;  %6161 = vmax.xlane.f32.xlu0 %v6160_v6  ;;  %v22019_v33 = vpop.permute.xlu1 %18540 }
 0x5b1   :  { %v22009_v52 = vadd.f32 %v21865_v43, %v5722_v1  ;;  %25233 = vst [vmem:[#allocation157_spill] sm:$0xff] %v22019_v33  ;;  %v22021_v6 = vpop.permute.xlu0 %18545 }
 0x5b2   :  { %25234 = vst [vmem:[#allocation158_spill] sm:$0xff] %v22021_v6 }
 0x5b3   :  { %v16860_v11 = vpop.f32.mrb[60].mxu1 }
 0x5b4   :  { %v22014_v10 = vadd.f32 %v16860_v11, %v21860_v59  ;;  %v5815_v20 = vpop.f32.mrb[61].mxu1  ;;  %6158 = vmax.xlane.f32.xlu0 %v6157_v60  ;;  %v22029_v11 = vld [vmem:[#allocation2 + $0x130] sm:$0xff]  ;;  %v22031_v31 = vpop.permute.xlu1 %18550 }
 0x5b5   :  { %v22017_v48 = vadd.f32 %v21865_v43, %v5815_v20  ;;  %25235 = vst [vmem:[#allocation159_spill] sm:$0xff] %v22031_v31  ;;  %v22036_v33 = vpop.permute.xlu0 %18555 }
 0x5b6   :  { %25236 = vst [vmem:[#allocation160_spill] sm:$0xff] %v22036_v33 }
 0x5b7   :  { %v16867_v45 = vpop.f32.mrb[92].mxu0 }
 0x5b8   :  { %v22024_v1 = vadd.f32 %v16867_v45, %v21860_v59  ;;  %v5908_v57 = vpop.f32.mrb[93].mxu0  ;;  %v22041_v45 = vld [vmem:[#allocation2 + $0x120] sm:$0xff]  ;;  %v22052_v12 = vpop.permute.xlu1 %18565 }
 0x5b9   :  { %v22027_v23 = vadd.f32 %v21865_v43, %v5908_v57  ;;  %v18634_v57 = vpack.i.bf16 %v22029_v11, %v22041_v45  ;;  %25238 = vst [vmem:[#allocation162_spill] sm:$0xff] %v22052_v12  ;;  %v22054_v33 = vpop.permute.xlu0 %18560 }
 0x5ba   :  { %25239 = vst [vmem:[#allocation163_spill] sm:$0xff] %v22054_v33 }
 0x5bb   :  { %v16874_v38 = vpop.f32.mrb[62].mxu1 }
 0x5bc   :  { %v22034_v20 = vadd.f32 %v16874_v38, %v21860_v59  ;;  %v6001_v60 = vpop.f32.mrb[63].mxu1 }
 0x5bd   :  { %v22039_v6 = vadd.f32 %v21865_v43, %v6001_v60  ;;  %v22056_v60 = vpop.permute.xlu1 %18575  ;;  %v22058_v37 = vpop.permute.xlu0 %18570 }
 0x5be   :  { %25240 = vst [vmem:[#allocation164_spill] sm:$0xff] %v22056_v60  ;;  %25241 = vst [vmem:[#allocation165_spill] sm:$0xff] %v22058_v37  ;;  %v6163_v37 = vsel %vm1449_vm1, %v21992_v36, -inf }
 0x5bf   :  { %v16881_v27 = vpop.f32.mrb[94].mxu0 }
 0x5c0   :  { %v22046_v17 = vadd.f32 %v16881_v27, %v21860_v59  ;;  %18635 = vrot.lane.b32.xlu1 %v18634_v57, %s19486_s27  ;;  %v6094_v31 = vpop.f32.mrb[95].mxu0 }
 0x5c1   :  { %v22050_v38 = vadd.f32 %v21865_v43, %v6094_v31  ;;  %v22062_v46 = vpop.permute.xlu1 %18585  ;;  %v22064_v59 = vpop.permute.xlu0 %18580 }
 0x5c2   :  { %25237 = vst [vmem:[#allocation161_spill] sm:$0xff] %v22046_v17  ;;  %25242 = vst [vmem:[#allocation166_spill] sm:$0xff] %v22062_v46 }
 0x5c3   :  { %25243 = vst [vmem:[#allocation167_spill] sm:$0xff] %v22064_v59 }
 0x5c5   :  { %v22066_v27 = vpop.permute.xlu1 %18595  ;;  %v22068_v57 = vpop.permute.xlu0 %18590 }
 0x5c6   :  { %25244 = vst [vmem:[#allocation168_spill] sm:$0xff] %v22066_v27  ;;  %25245 = vst [vmem:[#allocation169_spill] sm:$0xff] %v22068_v57  ;;  %v6172_v27 = vsel %vm1449_vm1, %v22004_v32, -inf }
 0x5c9   :  { %v22070_v43 = vpop.permute.xlu1 %11601  ;;  %v22072_v31 = vpop.permute.xlu0 %18600 }
 0x5ca   :  { %12161 = vrot.lane.b32.xlu0 %v21344_v58, %s19487_s28  ;;  %25246 = vst [vmem:[#allocation170_spill] sm:$0xff] %v22070_v43  ;;  %25247 = vst [vmem:[#allocation171_spill] sm:$0xff] %v22072_v31  ;;  %v6181_v43 = vsel %vm1449_vm1, %v22027_v23, -inf }
 0x5cd   :  { %v22074_v12 = vpop.permute.xlu1 %18605  ;;  %v22076_v60 = vpop.permute.xlu0 %11603 }
 0x5ce   :  { %25248 = vst [vmem:[#allocation172_spill] sm:$0xff] %v22074_v12  ;;  %25249 = vst [vmem:[#allocation173_spill] sm:$0xff] %v22076_v60  ;;  %v6178_v12 = vsel %vm1449_vm1, %v22014_v10, -inf }
 0x5d1   :  { %v22080_v58 = vpop.permute.xlu1 %11696  ;;  %v22082_v46 = vpop.permute.xlu0 %11694 }
 0x5d2   :  { %25250 = vst [vmem:[#allocation174_spill] sm:$0xff] %v22080_v58  ;;  %25251 = vst [vmem:[#allocation175_spill] sm:$0xff] %v22082_v46  ;;  %v6169_v46 = vsel %vm1449_vm1, %v22009_v52, -inf }
 0x5d5   :  { %v22090_v60 = vpop.permute.xlu1 %11787  ;;  %v22094_v58 = vpop.permute.xlu0 %18610 }
 0x5d6   :  { %25252 = vst [vmem:[#allocation176_spill] sm:$0xff] %v22090_v60  ;;  %25253 = vst [vmem:[#allocation177_spill] sm:$0xff] %v22094_v58  ;;  %v6184_v60 = vsel %vm1449_vm1, %v22024_v1, -inf }
 0x5d9   :  { %v22102_v31 = vpop.permute.xlu0 %11789 }
 0x5da   :  { %25255 = vst [vmem:[#allocation179_spill] sm:$0xff] %v22102_v31  ;;  %v6196_v31 = vsel %vm1449_vm1, %v22046_v17, -inf }
 0x5dd   :  { %v22110_v58 = vpop.permute.xlu0 %11880 }
 0x5de   :  { %25257 = vst [vmem:[#allocation181_spill] sm:$0xff] %v22110_v58  ;;  %v11552_v58 = vld [vmem:[#allocation2 + $0x140] sm:$0xff] }
 0x5e4   :  { %6164 = vmax.xlane.f32.xlu1 %v6163_v37  ;;  %v6187_v37 = vsel %vm1449_vm1, %v22039_v6, -inf }
 0x5e8   :  { %6173 = vmax.xlane.f32.xlu1 %v6172_v27  ;;  %v6193_v27 = vsel %vm1449_vm1, %v22050_v38, -inf }
 0x5e9   :  { %6182 = vmax.xlane.f32.xlu0 %v6181_v43  ;;  %v22100_v43 = vpop.permute.xlu1 %18615 }
 0x5ea   :  { %25254 = vst [vmem:[#allocation178_spill] sm:$0xff] %v22100_v43  ;;  %v22116_v43 = vpop.permute.xlu0 %18620 }
 0x5eb   :  { %25259 = vst [vmem:[#allocation183_spill] sm:$0xff] %v22116_v43  ;;  %v19455_v43 = vld [vmem:[#allocation2 + $0x100] sm:$0xff] }
 0x5ec   :  { %6179 = vmax.xlane.f32.xlu1 %v6178_v12  ;;  %v6175_v12 = vsel %vm1449_vm1, %v22017_v48, -inf }
 0x5ed   :  { %6188 = vmax.xlane.f32.xlu0 %v6187_v37  ;;  %v22108_v37 = vpop.permute.xlu1 %11882 }
 0x5ee   :  { %25256 = vst [vmem:[#allocation180_spill] sm:$0xff] %v22108_v37  ;;  %v22122_v57 = vpop.permute.xlu0 %11975  ;;  %v11553_v37 = vld [vmem:[#allocation2 + $0x150] sm:$0xff] }
 0x5ef   :  { %25261 = vst [vmem:[#allocation185_spill] sm:$0xff] %v22122_v57  ;;  %v18639_v59 = vpack.i.bf16 %v11553_v37, %v11552_v58  ;;  %v19454_v57 = vld [vmem:[#allocation2 + $0xf0] sm:$0xff] }
 0x5f0   :  { %6170 = vmax.xlane.f32.xlu1 %v6169_v46  ;;  %v6190_v46 = vsel %vm1449_vm1, %v22034_v20, -inf }
 0x5f1   :  { %6194 = vmax.xlane.f32.xlu0 %v6193_v27  ;;  %v22114_v27 = vpop.permute.xlu1 %11973 }
 0x5f2   :  { %25258 = vst [vmem:[#allocation182_spill] sm:$0xff] %v22114_v27  ;;  %v11557_v27 = vld [vmem:[#allocation2 + $0x190] sm:$0xff] }
 0x5f4   :  { %6176 = vmax.xlane.f32.xlu1 %v6175_v12 }
 0x5f5   :  { %v22120_v12 = vpop.permute.xlu1 %18625 }
 0x5f6   :  { %25260 = vst [vmem:[#allocation184_spill] sm:$0xff] %v22120_v12 }
 0x5f8   :  { %6185 = vmax.xlane.f32.xlu1 %v6184_v60  ;;  %v19453_v60 = vld [vmem:[#allocation2 + $0xe0] sm:$0xff] }
 0x5f9   :  { %v22125_v33 = vpop.permute.xlu1 %12068 }
 0x5fa   :  { %25262 = vst [vmem:[#allocation186_spill] sm:$0xff] %v22125_v33  ;;  %v22139_v33 = vld [vmem:[#allocation2 + $0x180] sm:$0xff] }
 0x5fc   :  { %6191 = vmax.xlane.f32.xlu1 %v6190_v46  ;;  %v22127_v46 = vpop.permute.xlu0 %12066 }
 0x5fd   :  { %25263 = vst [vmem:[#allocation187_spill] sm:$0xff] %v22127_v46  ;;  %v11555_v46 = vld [vmem:[#allocation2 + $0x170] sm:$0xff] }
 0x5fe   :  { %v18644_v17 = vpack.i.bf16 %v11555_v46, %v11554_v51 }
 0x600   :  { %6197 = vmax.xlane.f32.xlu1 %v6196_v31  ;;  %v22132_v31 = vpop.permute.xlu1 %12159  ;;  %v22134_v12 = vpop.permute.xlu0 %18630 }
 0x601   :  { %25264 = vst [vmem:[#allocation188_spill] sm:$0xff] %v22132_v31  ;;  %25265 = vst [vmem:[#allocation189_spill] sm:$0xff] %v22134_v12  ;;  %v18649_v31 = vpack.i.bf16 %v11557_v27, %v22139_v33 }
 0x607   :  { %12252 = vrot.lane.b32.xlu0 %v19453_v60, %s19487_s28 }
 0x60b   :  { %18640 = vrot.lane.b32.xlu0 %v18639_v59, %s19486_s27 }
 0x60f   :  { %12347 = vrot.lane.b32.xlu0 %v21374_v53, %s19487_s28 }
 0x611   :  { %12254 = vrot.lane.b32.xlu1 %v19454_v57, %s19487_s28 }
 0x613   :  { %12438 = vrot.lane.b32.xlu0 %v22041_v45, %s19487_s28 }
 0x614   :  { %v6108_v60 = vpop.xlane.xlu1 %6107 }
 0x615   :  { %v6200_v59 = vsub.f32 %v21868_v41, %v6108_v60  ;;  %12345 = vrot.lane.b32.xlu1 %v19455_v43, %s19487_s28  ;;  %v6105_v53 = vpop.xlane.xlu0 %6104 }
 0x616   :  { %v6199_v12 = vsub.f32 %v21871_v55, %v6105_v53  ;;  %v11560_v53 = vld [vmem:[#allocation2 + $0x1c0] sm:$0xff] }
 0x617   :  { %v6233_v57 = vmul.f32 1.442695, %v6200_v59  ;;  %18650 = vrot.lane.b32.xlu0 %v18649_v31, %s19486_s27  ;;  %v22152_v59 = vld [vmem:[#allocation2 + $0x1d0] sm:$0xff] }
 0x618   :  { %v6231_v45 = vmul.f32 1.442695, %v6199_v12 }
 0x619   :  { %18645 = vrot.lane.b32.xlu1 %v18644_v17, %s19486_s27  ;;  %v6114_v4 = vpop.xlane.xlu0 %6113 }
 0x61a   :  { %18877 = vpow2.f32 %v6231_v45  ;;  %v6202_v41 = vsub.f32 %v21882_v24, %v6114_v4  ;;  %v18659_v4 = vpack.i.bf16 %v22152_v59, %v11560_v53  ;;  %v11558_v45 = vld [vmem:[#allocation2 + $0x1a0] sm:$0xff] }
 0x61b   :  { %18879 = vpow2.f32 %v6233_v57  ;;  %12533 = vrot.lane.b32.xlu0 %v11553_v37, %s19487_s28  ;;  %v22156_v57 = vld [vmem:[#allocation2 + $0x1b0] sm:$0xff] }
 0x61c   :  { %v6120_v43 = vpop.xlane.xlu1 %6119  ;;  %v6237_v31 = vmul.f32 1.442695, %v6202_v41 }
 0x61d   :  { %12440 = vrot.lane.b32.xlu1 %v22029_v11, %s19487_s28  ;;  %v6111_v55 = vpop.xlane.xlu0 %6110  ;;  %v6204_v12 = vsub.f32 %v21892_v25, %v6120_v43  ;;  %v18373_v11 = vunpack.i.h.bf16 %v21709_v62 }
 0x61e   :  { %v6201_v60 = vsub.f32 %v21887_v39, %v6111_v55  ;;  %v18372_v39 = vunpack.i.l.bf16 %v21709_v62 }
 0x61f   :  { %12624 = vrot.lane.b32.xlu0 %v11554_v51, %s19487_s28  ;;  %v6241_v25 = vmul.f32 1.442695, %v6204_v12  ;;  %v18654_v51 = vpack.i.bf16 %v22156_v57, %v11558_v45 }
 0x620   :  { %v6235_v17 = vmul.f32 1.442695, %v6201_v60 }
 0x621   :  { %12531 = vrot.lane.b32.xlu1 %v11552_v58, %s19487_s28  ;;  %v6117_v24 = vpop.xlane.xlu0 %6116 }
 0x622   :  { %18881 = vpow2.f32 %v6235_v17  ;;  %v6203_v37 = vsub.f32 %v21899_v22, %v6117_v24  ;;  %v17786_v22 = vpack.c.bf16 %v18373_v11, %v18372_v39 }
 0x623   :  { %18883 = vpow2.f32 %v6237_v31  ;;  %18660 = vrot.lane.b32.xlu0 %v18659_v4, %s19486_s27  ;;  %v18378_v4 = vunpack.i.h.bf16 %v21690_v42 }
 0x624   :  { %v22165_v41 = vpop.eup %18877  ;;  %v6239_v58 = vmul.f32 1.442695, %v6203_v37  ;;  %v6132_v43 = vpop.xlane.xlu1 %6131  ;;  %v18377_v37 = vunpack.i.l.bf16 %v21690_v42 }
 0x625   :  { %v22167_v55 = vpop.eup %18879  ;;  %v6208_v60 = vsub.f32 %v21913_v56, %v6132_v43  ;;  %18655 = vrot.lane.b32.xlu1 %v18654_v51, %s19486_s27  ;;  %16886 = vmatprep.mubr.msk.f32.mxu1 %vm1449_vm1, %v22165_v41  ;;  %v6126_v62 = vpop.xlane.xlu0 %6125  ;;  %v22186_v51 = vld [vmem:[#allocation2 + $0x1f0] sm:$0xff]  ;;  %v11562_v43 = vld [vmem:[#allocation2 + $0x1e0] sm:$0xff] }
 0x626   :  { %18885 = vpow2.f32 %v6239_v58  ;;  %16887 = vmatmul.mubr.msk.f32.vlgmr.msra.gmra.mrb[64].mxu1 %vm1449_vm1, %v22167_v55  ;;  %v6206_v31 = vsub.f32 %v21908_v8, %v6126_v62  ;;  %v22199_v58 = vpack.c.bf16 %v18378_v4, %v18377_v37  ;;  %v11566_v37 = vld [vmem:[#allocation2 + $0x28] sm:$0xff] }
 0x627   :  { %18887 = vpow2.f32 %v6241_v25  ;;  %17781 = vmatpush3.bf16.msra.mxu1 %v21687_v9  ;;  %12719 = vrot.lane.b32.xlu0 %v11557_v27, %s19487_s28  ;;  %v6249_v12 = vmul.f32 1.442695, %v6208_v60 }
 0x628   :  { %17787 = vmatprep.subr.bf16.mxu1 %v17786_v22  ;;  %v6129_v56 = vpop.xlane.xlu1 %6128  ;;  %v6245_v39 = vmul.f32 1.442695, %v6206_v31 }
 0x629   :  { %v6207_v17 = vsub.f32 %v21916_v30, %v6129_v56  ;;  %12626 = vrot.lane.b32.xlu1 %v11555_v46, %s19487_s28  ;;  %v6123_v24 = vpop.xlane.xlu0 %6122  ;;  %18889 = vpow2.f32 %v6249_v12 }
 0x62a   :  { %v6205_v11 = vsub.f32 %v21921_v0, %v6123_v24  ;;  %v18383_v0 = vunpack.i.h.bf16 %v21717_v61 }
 0x62b   :  { %v6247_v8 = vmul.f32 1.442695, %v6207_v17  ;;  %12810 = vrot.lane.b32.xlu0 %v11558_v45, %s19487_s28  ;;  %v18382_v45 = vunpack.i.l.bf16 %v21717_v61 }
 0x62c   :  { %v22184_v9 = vpop.eup %18881  ;;  %v6243_v27 = vmul.f32 1.442695, %v6205_v11  ;;  %v6144_v25 = vpop.xlane.xlu1 %6143 }
 0x62d   :  { %v22188_v30 = vpop.eup %18883  ;;  %18891 = vpow2.f32 %v6247_v8  ;;  %v6212_v46 = vsub.f32 %v21937_v44, %v6144_v25  ;;  %12717 = vrot.lane.b32.xlu1 %v22139_v33, %s19487_s28  ;;  %16893 = vmatprep.mubr.msk.f32.mxu0 %vm1449_vm1, %v22184_v9  ;;  %v6138_v42 = vpop.xlane.xlu0 %6137  ;;  %v18664_v33 = vpack.i.bf16 %v22186_v51, %v11562_v43 }
 0x62e   :  { %18893 = vpow2.f32 %v6243_v27  ;;  %16894 = vmatmul.mubr.msk.f32.vlgmr.msra.gmra.mrb[96].mxu0 %vm1449_vm1, %v22188_v30  ;;  %v6210_v44 = vsub.f32 %v21932_v15, %v6138_v42  ;;  %v17794_v15 = vpack.c.bf16 %v18383_v0, %v18382_v45  ;;  %v18393_v27 = vunpack.i.h.bf16 %v21723_v3 }
 0x62f   :  { %18895 = vpow2.f32 %v6245_v39  ;;  %17785 = vmatpush3.bf16.msra.mxu0 %v21698_v18  ;;  %12903 = vrot.lane.b32.xlu0 %v11560_v53, %s19487_s28  ;;  %v6257_v62 = vmul.f32 1.442695, %v6212_v46  ;;  %v11567_v53 = vld [vmem:[#allocation2 + $0x38] sm:$0xff]  ;;  %v18388_v46 = vunpack.i.h.bf16 %v21705_v5  ;;  %v18387_v42 = vunpack.i.l.bf16 %v21705_v5 }
 0x630   :  { %v22205_v60 = vpop.eup %18885  ;;  %17791 = vmatprep.subr.bf16.mxu0 %v22199_v58  ;;  %v6141_v61 = vpop.xlane.xlu1 %6140  ;;  %v6253_v17 = vmul.f32 1.442695, %v6210_v44  ;;  %v18674_v39 = vpack.i.bf16 %v11567_v53, %v11566_v37 }
 0x631   :  { %v22208_v31 = vpop.eup %18887  ;;  %v6211_v12 = vsub.f32 %v21942_v47, %v6141_v61  ;;  %18665 = vrot.lane.b32.xlu1 %v18664_v33, %s19486_s27  ;;  %v6135_v56 = vpop.xlane.xlu0 %6134  ;;  %16900 = vmatprep.mubr.msk.f32.mxu1 %vm1449_vm1, %v22205_v60  ;;  %18897 = vpow2.f32 %v6257_v62 }
 0x632   :  { %v6209_v18 = vsub.f32 %v21949_v49, %v6135_v56  ;;  %16901 = vmatmul.mubr.msk.f32.vlgmr.msra.gmra.mrb[66].mxu1 %vm1449_vm1, %v22208_v31 }
 0x633   :  { %v6255_v24 = vmul.f32 1.442695, %v6211_v12  ;;  %17789 = vmatpush3.bf16.msra.mxu1 %v17786_v22  ;;  %12996 = vrot.lane.b32.xlu0 %v11562_v43, %s19487_s28  ;;  %v22221_v8 = vpop.eup %18889  ;;  %v18392_v22 = vunpack.i.l.bf16 %v21723_v3  ;;  %v11565_v12 = vld [vmem:[#allocation2 + $0x18] sm:$0xff] }
 0x634   :  { %v6251_v47 = vmul.f32 1.442695, %v6209_v18  ;;  %17795 = vmatprep.subr.bf16.mxu1 %v17794_v15  ;;  %v6156_v4 = vpop.xlane.xlu1 %6155  ;;  %v11575_v18 = vld [vmem:[#allocation2 + $0xb8] sm:$0xff] }
 0x635   :  { %18899 = vpow2.f32 %v6255_v24  ;;  %v6216_v11 = vsub.f32 %v21963_v63, %v6156_v4  ;;  %12812 = vrot.lane.b32.xlu1 %v22156_v57, %s19487_s28  ;;  %v6150_v49 = vpop.xlane.xlu0 %6149  ;;  %v11571_v57 = vld [vmem:[#allocation2 + $0x78] sm:$0xff]  ;;  %v17802_v62 = vpack.c.bf16 %v18393_v27, %v18392_v22  ;;  %v11574_v24 = vld [vmem:[#allocation2 + $0xa8] sm:$0xff] }
 0x636   :  { %18901 = vpow2.f32 %v6251_v47  ;;  %v6214_v63 = vsub.f32 %v21956_v50, %v6150_v49  ;;  %v11570_v50 = vld [vmem:[#allocation2 + $0x68] sm:$0xff]  ;;  %v18694_v37 = vpack.i.bf16 %v11575_v18, %v11574_v24  ;;  %v18398_v49 = vunpack.i.h.bf16 %v21711_v34  ;;  %v11579_v27 = vld [vmem:[#allocation2 + $0xf8] sm:$0xff] }
 0x637   :  { %v22225_v25 = vpop.eup %18891  ;;  %18903 = vpow2.f32 %v6253_v17  ;;  %18675 = vrot.lane.b32.xlu0 %v18674_v39, %s19487_s28  ;;  %v6265_v45 = vmul.f32 1.442695, %v6216_v11  ;;  %v18684_v61 = vpack.i.bf16 %v11571_v57, %v11570_v50  ;;  %v18397_v39 = vunpack.i.l.bf16 %v21711_v34  ;;  %v11578_v34 = vld [vmem:[#allocation2 + $0xe8] sm:$0xff]  ;;  %v11583_v50 = vld [vmem:[#allocation2 + $0x138] sm:$0xff] }
 0x638   :  { %v22231_v0 = vpop.eup %18893  ;;  %v6153_v43 = vpop.xlane.xlu1 %6152  ;;  %16914 = vmatprep.mubr.msk.f32.mxu1 %vm1449_vm1, %v22225_v25  ;;  %v18704_v57 = vpack.i.bf16 %v11579_v27, %v11578_v34  ;;  %v11585_v24 = vld [vmem:[#allocation2 + $0x158] sm:$0xff]  ;;  %v18418_v34 = vunpack.i.h.bf16 %v21737_v54 }
 0x639   :  { %v22235_v3 = vpop.eup %18895  ;;  %v6215_v44 = vsub.f32 %v21968_v19, %v6153_v43  ;;  %12905 = vrot.lane.b32.xlu1 %v22152_v59, %s19487_s28  ;;  %16907 = vmatprep.mubr.msk.f32.mxu0 %vm1449_vm1, %v22231_v0  ;;  %v6147_v5 = vpop.xlane.xlu0 %6146  ;;  %v6261_v19 = vmul.f32 1.442695, %v6214_v63  ;;  %v17798_v59 = vpack.c.bf16 %v18388_v46, %v18387_v42  ;;  %18905 = vpow2.f32 %v6265_v45  ;;  %v11568_v45 = vld [vmem:[#allocation2 + $0x48] sm:$0xff]  ;;  %v11587_v27 = vld [vmem:[#allocation2 + $0x178] sm:$0xff] }
 0x63a   :  { %v6213_v33 = vsub.f32 %v21973_v28, %v6147_v5  ;;  %16915 = vmatmul.mubr.msk.f32.vlgmr.msra.gmra.mrb[68].mxu1 %vm1449_vm1, %v22221_v8  ;;  %16908 = vmatmul.mubr.msk.f32.vlgmr.msra.gmra.mrb[98].mxu0 %vm1449_vm1, %v22235_v3  ;;  %v11564_v28 = vld [vmem:[#allocation2 + $0x8] sm:$0xff] }
 0x63b   :  { %v6263_v56 = vmul.f32 1.442695, %v6215_v44  ;;  %17797 = vmatpush3.bf16.msra.mxu1 %v17794_v15  ;;  %17793 = vmatpush3.bf16.msra.mxu0 %v22199_v58  ;;  %v18669_v47 = vpack.i.bf16 %v11565_v12, %v11564_v28  ;;  %v22251_v4 = vpop.eup %18897  ;;  %v18403_v58 = vunpack.i.h.bf16 %v21719_v29  ;;  %v18402_v15 = vunpack.i.l.bf16 %v21719_v29  ;;  %v11569_v29 = vld [vmem:[#allocation2 + $0x58] sm:$0xff] }
 0x63c   :  { %v6259_v53 = vmul.f32 1.442695, %v6213_v33  ;;  %17803 = vmatprep.subr.bf16.mxu1 %v17802_v62  ;;  %18685 = vrot.lane.b32.xlu0 %v18684_v61, %s19487_s28  ;;  %v17806_v44 = vpack.c.bf16 %v18398_v49, %v18397_v39  ;;  %v18679_v5 = vpack.i.bf16 %v11569_v29, %v11568_v45  ;;  %v11582_v61 = vld [vmem:[#allocation2 + $0x128] sm:$0xff]  ;;  %v18407_v28 = vunpack.i.l.bf16 %v21729_v26  ;;  %v11581_v29 = vld [vmem:[#allocation2 + $0x118] sm:$0xff] }
 0x63d   :  { %18907 = vpow2.f32 %v6263_v56  ;;  %17799 = vmatprep.subr.bf16.mxu0 %v17798_v59  ;;  %12998 = vrot.lane.b32.xlu1 %v22186_v51, %s19487_s28  ;;  %v6162_v17 = vpop.xlane.xlu0 %6161  ;;  %v17810_v63 = vpack.c.bf16 %v18403_v58, %v18402_v15  ;;  %v18412_v56 = vunpack.i.l.bf16 %v21727_v21  ;;  %v11584_v15 = vld [vmem:[#allocation2 + $0x148] sm:$0xff] }
 0x63e   :  { %18909 = vpow2.f32 %v6259_v53  ;;  %v6218_v51 = vsub.f32 %v21984_v14, %v6162_v17  ;;  %v18408_v53 = vunpack.i.h.bf16 %v21729_v26  ;;  %v11576_v49 = vld [vmem:[#allocation2 + $0xc8] sm:$0xff] }
 0x63f   :  { %v22255_v11 = vpop.eup %18899  ;;  %18911 = vpow2.f32 %v6261_v19  ;;  %v18413_v19 = vunpack.i.h.bf16 %v21727_v21  ;;  %v11577_v21 = vld [vmem:[#allocation2 + $0xd8] sm:$0xff]  ;;  %v11580_v45 = vld [vmem:[#allocation2 + $0x108] sm:$0xff] }
 0x640   :  { %v22260_v22 = vpop.eup %18901  ;;  %18695 = vrot.lane.b32.xlu0 %v18694_v37, %s19487_s28  ;;  %16928 = vmatprep.mubr.msk.f32.mxu1 %vm1449_vm1, %v22255_v11  ;;  %v6269_v43 = vmul.f32 1.442695, %v6218_v51  ;;  %v18719_v37 = vpack.i.bf16 %v11585_v24, %v11584_v15  ;;  %v17814_v39 = vpack.c.bf16 %v18408_v53, %v18407_v28  ;;  %v18699_v51 = vpack.i.bf16 %v11577_v21, %v11576_v49  ;;  %v15538_v53 = vld [vmem:[%s24809_s5] ss:$0 sm:$0xff]  ;;  %v11593_v28 = vld [vmem:[#allocation2 + $0x1d8] sm:$0xff]  ;;  %v6168_v21 = vpop.xlane.xlu1 %6167 }
 0x641   :  { %v22265_v46 = vpop.eup %18903  ;;  %18670 = vrot.lane.b32.xlu1 %v18669_v47, %s19487_s28  ;;  %v6159_v42 = vpop.xlane.xlu0 %6158  ;;  %16921 = vmatprep.mubr.msk.f32.mxu0 %vm1449_vm1, %v22260_v22  ;;  %v22299_v26 = vpack.c.bf16 %v18413_v19, %v18412_v56  ;;  %v11591_v56 = vld [vmem:[#allocation2 + $0x1b8] sm:$0xff] }
 0x642   :  { %v6217_v14 = vsub.f32 %v21997_v40, %v6159_v42  ;;  %16929 = vmatmul.mubr.msk.f32.vlgmr.msra.gmra.mrb[70].mxu1 %vm1449_vm1, %v22251_v4  ;;  %16922 = vmatmul.mubr.msk.f32.vlgmr.msra.gmra.mrb[100].mxu0 %vm1449_vm1, %v22265_v46  ;;  %v11573_v40 = vld [vmem:[#allocation2 + $0x98] sm:$0xff]  ;;  %v11586_v42 = vld [vmem:[#allocation2 + $0x168] sm:$0xff] }
 0x643   :  { %17805 = vmatpush3.bf16.msra.mxu1 %v17802_v62  ;;  %17801 = vmatpush3.bf16.msra.mxu0 %v17798_v59  ;;  %v22277_v12 = vpop.eup %18905  ;;  %v18714_v62 = vpack.i.bf16 %v11583_v50, %v11582_v61  ;;  %v11572_v59 = vld [vmem:[#allocation2 + $0x88] sm:$0xff] }
 0x644   :  { %v6267_v33 = vmul.f32 1.442695, %v6217_v14  ;;  %17811 = vmatprep.subr.bf16.mxu1 %v17810_v63  ;;  %18705 = vrot.lane.b32.xlu0 %v18704_v57, %s19487_s28  ;;  %v18689_v17 = vpack.i.bf16 %v11573_v40, %v11572_v59  ;;  %v18417_v14 = vunpack.i.l.bf16 %v21737_v54  ;;  %v18724_v57 = vpack.i.bf16 %v11587_v27, %v11586_v42  ;;  %v11594_v61 = vld [vmem:[#allocation2 + $0x1e8] sm:$0xff]  ;;  %v22327_v15 = vpop.permute.xlu1 %18635 }
 0x645   :  { %17807 = vmatprep.subr.bf16.mxu0 %v17806_v44  ;;  %18680 = vrot.lane.b32.xlu1 %v18679_v5, %s19487_s28  ;;  %v11595_v5 = vld [vmem:[#allocation2 + $0x1f8] sm:$0xff]  ;;  %25266 = vst [vmem:[#allocation190_spill] sm:$0xff] %v22327_v15 }
 0x646   :  { %18913 = vpow2.f32 %v6267_v33  ;;  %v11588_v33 = vld [vmem:[#allocation2 + $0x188] sm:$0xff]  ;;  %v22316_v40 = vpack.c.bf16 %v18418_v34, %v18417_v14  ;;  %v18744_v19 = vpack.i.bf16 %v11595_v5, %v11594_v61  ;;  %v18422_v61 = vunpack.i.l.bf16 %v21731_v7 }
 0x647   :  { %v22281_v18 = vpop.eup %18907  ;;  %18915 = vpow2.f32 %v6269_v43  ;;  %v11589_v43 = vld [vmem:[#allocation2 + $0x198] sm:$0xff] }
 0x648   :  { %v22285_v47 = vpop.eup %18909  ;;  %18715 = vrot.lane.b32.xlu0 %v18714_v62, %s19487_s28  ;;  %16942 = vmatprep.mubr.msk.f32.mxu1 %vm1449_vm1, %v22281_v18  ;;  %v18729_v54 = vpack.i.bf16 %v11589_v43, %v11588_v33  ;;  %v11590_v62 = vld [vmem:[#allocation2 + $0x1a8] sm:$0xff] }
 0x649   :  { %v22290_v58 = vpop.eup %18911  ;;  %18690 = vrot.lane.b32.xlu1 %v18689_v17, %s19487_s28  ;;  %16935 = vmatprep.mubr.msk.f32.mxu0 %vm1449_vm1, %v22285_v47  ;;  %v18734_v59 = vpack.i.bf16 %v11591_v56, %v11590_v62  ;;  %v11592_v17 = vld [vmem:[#allocation2 + $0x1c8] sm:$0xff]  ;;  %v25270_v56 = vld [vmem:[#allocation106_spill] sm:$0xff] }
 0x64a   :  { %16943 = vmatmul.mubr.msk.f32.vlgmr.msra.gmra.mrb[72].mxu1 %vm1449_vm1, %v22277_v12  ;;  %16936 = vmatmul.mubr.msk.f32.vlgmr.msra.gmra.mrb[102].mxu0 %vm1449_vm1, %v22290_v58  ;;  %v18739_v24 = vpack.i.bf16 %v11593_v28, %v11592_v17  ;;  %v3108_v62 = vsel %vm1449_vm1, %v25270_v56, 0.0 }
 0x64b   :  { %17813 = vmatpush3.bf16.msra.mxu1 %v17810_v63  ;;  %17809 = vmatpush3.bf16.msra.mxu0 %v17806_v44  ;;  %v18709_v63 = vpack.i.bf16 %v11581_v29, %v11580_v45 }
 0x64c   :  { %17819 = vmatprep.subr.bf16.mxu1 %v22299_v26  ;;  %18720 = vrot.lane.b32.xlu0 %v18719_v37, %s19487_s28  ;;  %v6220_v37 = vsub.f32 %v21989_v16, %v6168_v21  ;;  %v25269_v16 = vld [vmem:[#allocation105_spill] sm:$0xff] }
 0x64d   :  { %17815 = vmatprep.subr.bf16.mxu0 %v17814_v39  ;;  %18700 = vrot.lane.b32.xlu1 %v18699_v51, %s19487_s28  ;;  %v3105_v5 = vsel %vm1449_vm1, %v25269_v16, 0.0 }
 0x64e   :  { %v6273_v27 = vmul.f32 1.442695, %v6220_v37  ;;  %v25271_v37 = vld [vmem:[#allocation88_spill] sm:$0xff] }
 0x650   :  { %v22306_v44 = vpop.eup %18913  ;;  %18725 = vrot.lane.b32.xlu0 %v18724_v57, %s19487_s28  ;;  %v25268_v57 = vld [vmem:[#allocation104_spill] sm:$0xff] }
 0x651   :  { %v22309_v50 = vpop.eup %18915  ;;  %18710 = vrot.lane.b32.xlu1 %v18709_v63, %s19487_s28  ;;  %16949 = vmatprep.mubr.msk.f32.mxu0 %vm1449_vm1, %v22306_v44  ;;  %v3102_v45 = vsel %vm1449_vm1, %v25268_v57, 0.0 }
 0x652   :  { %16950 = vmatmul.mubr.msk.f32.vlgmr.msra.gmra.mrb[104].mxu0 %vm1449_vm1, %v22309_v50 }
 0x653   :  { %17817 = vmatpush3.bf16.msra.mxu0 %v17814_v39  ;;  %v22330_v39 = vpop.permute.xlu0 %12161 }
 0x654   :  { %18730 = vrot.lane.b32.xlu0 %v18729_v54, %s19487_s28  ;;  %17823 = vmatprep.subr.bf16.mxu0 %v22316_v40  ;;  %25267 = vst [vmem:[#allocation191_spill] sm:$0xff] %v22330_v39  ;;  %v18423_v54 = vunpack.i.h.bf16 %v21731_v7 }
 0x655   :  { %18745 = vrot.lane.b32.xlu1 %v18744_v19, %s19487_s28 }
 0x658   :  { %18735 = vrot.lane.b32.xlu0 %v18734_v59, %s19487_s28 }
 0x659   :  { %990 = vrot.lane.b32.xlu1 %v15538_v53, %s19481_s2 }
 0x65c   :  { %18740 = vrot.lane.b32.xlu0 %v18739_v24, %s19487_s28 }
 0x671   :  { %v6165_v49 = vpop.xlane.xlu1 %6164 }
 0x672   :  { %v6219_v51 = vsub.f32 %v21992_v36, %v6165_v49  ;;  %v3060_v49 = vsel %vm1449_vm1, %v25271_v37, 0.0 }
 0x674   :  { %v6271_v29 = vmul.f32 1.442695, %v6219_v51 }
 0x675   :  { %v6174_v42 = vpop.xlane.xlu1 %6173 }
 0x676   :  { %18917 = vpow2.f32 %v6271_v29  ;;  %v6183_v34 = vpop.xlane.xlu0 %6182  ;;  %v6222_v43 = vsub.f32 %v22004_v32, %v6174_v42  ;;  %v25272_v29 = vld [vmem:[#allocation107_spill] sm:$0xff] }
 0x677   :  { %18919 = vpow2.f32 %v6273_v27  ;;  %v6225_v33 = vsub.f32 %v22027_v23, %v6183_v34  ;;  %v3111_v23 = vsel %vm1449_vm1, %v21288_v2, 0.0  ;;  %v22359_v2 = vpack.c.bf16 %v18423_v54, %v18422_v61  ;;  %v25276_v54 = vld [vmem:[#allocation90_spill] sm:$0xff] }
 0x678   :  { %v6277_v59 = vmul.f32 1.442695, %v6222_v43  ;;  %v25275_v43 = vld [vmem:[#allocation108_spill] sm:$0xff]  ;;  %v3066_v61 = vsel %vm1449_vm1, %v25276_v54, 0.0 }
 0x679   :  { %v6180_v14 = vpop.xlane.xlu1 %6179  ;;  %v6283_v21 = vmul.f32 1.442695, %v6225_v33  ;;  %v3117_v16 = vsel %vm1449_vm1, %v25275_v43, 0.0  ;;  %v18427_v33 = vunpack.i.l.bf16 %v21745_v13  ;;  %v25286_v43 = vld [vmem:[#allocation110_spill] sm:$0xff] }
 0x67a   :  { %v6189_v63 = vpop.xlane.xlu0 %6188  ;;  %v6224_v32 = vsub.f32 %v22014_v10, %v6180_v14 }
 0x67b   :  { %3103 = vadd.xlane.f32.xlu0 %v3102_v45  ;;  %v6227_v7 = vsub.f32 %v22039_v6, %v6189_v63  ;;  %v25274_v45 = vld [vmem:[#allocation89_spill] sm:$0xff] }
 0x67c   :  { %v6281_v51 = vmul.f32 1.442695, %v6224_v32 }
 0x67d   :  { %3106 = vadd.xlane.f32.xlu1 %v3105_v5  ;;  %v6171_v36 = vpop.xlane.xlu1 %6170  ;;  %v6287_v42 = vmul.f32 1.442695, %v6227_v7  ;;  %v18428_v5 = vunpack.i.h.bf16 %v21745_v13 }
 0x67e   :  { %v6221_v19 = vsub.f32 %v22009_v52, %v6171_v36  ;;  %v6195_v17 = vpop.xlane.xlu0 %6194 }
 0x67f   :  { %3109 = vadd.xlane.f32.xlu0 %v3108_v62  ;;  %v6229_v6 = vsub.f32 %v22050_v38, %v6195_v17  ;;  %v3063_v38 = vsel %vm1449_vm1, %v25274_v45, 0.0  ;;  %v17830_v17 = vpack.c.bf16 %v18428_v5, %v18427_v33 }
 0x680   :  { %v22345_v53 = vpop.eup %18917  ;;  %v6275_v28 = vmul.f32 1.442695, %v6221_v19 }
 0x681   :  { %v22349_v24 = vpop.eup %18919  ;;  %3112 = vadd.xlane.f32.xlu1 %v3111_v23  ;;  %v6177_v52 = vpop.xlane.xlu1 %6176  ;;  %16956 = vmatprep.mubr.msk.f32.mxu1 %vm1449_vm1, %v22345_v53  ;;  %v25279_v23 = vld [vmem:[#allocation53_spill] sm:$0xff] }
 0x682   :  { %18921 = vpow2.f32 %v6275_v28  ;;  %v6223_v10 = vsub.f32 %v22017_v48, %v6177_v52  ;;  %16957 = vmatmul.mubr.msk.f32.vlgmr.msra.gmra.mrb[74].mxu1 %vm1449_vm1, %v22349_v24  ;;  %v3114_v48 = vsel %vm1449_vm1, %v25272_v29, 0.0  ;;  %v22366_v14 = vpop.permute.xlu0 %12252  ;;  %v18432_v7 = vunpack.i.l.bf16 %v25279_v23  ;;  %v25280_v52 = vld [vmem:[#allocation161_spill] sm:$0xff]  ;;  %v25282_v29 = vld [vmem:[#allocation56_spill] sm:$0xff] }
 0x683   :  { %18923 = vpow2.f32 %v6277_v59  ;;  %3061 = vadd.xlane.f32.xlu0 %v3060_v49  ;;  %17821 = vmatpush3.bf16.msra.mxu1 %v22299_v26  ;;  %25273 = vst [vmem:[#allocation104_spill] sm:$0xff] %v22366_v14  ;;  %v6291_v26 = vmul.f32 1.442695, %v6229_v6  ;;  %v3120_v59 = vsel %vm1449_vm1, %v21328_v35, 0.0 }
 0x684   :  { %v6279_v27 = vmul.f32 1.442695, %v6223_v10  ;;  %17827 = vmatprep.subr.bf16.mxu1 %v22359_v2  ;;  %18925 = vpow2.f32 %v6283_v21  ;;  %v18433_v21 = vunpack.i.h.bf16 %v25279_v23 }
 0x685   :  { %3115 = vadd.xlane.f32.xlu1 %v3114_v48  ;;  %v6186_v34 = vpop.xlane.xlu1 %6185  ;;  %v18438_v48 = vunpack.i.h.bf16 %v25282_v29 }
 0x686   :  { %18927 = vpow2.f32 %v6279_v27  ;;  %v6226_v57 = vsub.f32 %v22024_v1, %v6186_v34  ;;  %v22380_v56 = vpop.permute.xlu0 %18640 }
 0x687   :  { %18929 = vpow2.f32 %v6281_v51  ;;  %3064 = vadd.xlane.f32.xlu0 %v3063_v38  ;;  %25277 = vst [vmem:[#allocation105_spill] sm:$0xff] %v22380_v56  ;;  %v25281_v51 = vld [vmem:[#allocation109_spill] sm:$0xff] }
 0x688   :  { %v6285_v63 = vmul.f32 1.442695, %v6226_v57  ;;  %18931 = vpow2.f32 %v6287_v42  ;;  %v3123_v6 = vsel %vm1449_vm1, %v25281_v51, 0.0  ;;  %v18437_v42 = vunpack.i.l.bf16 %v25282_v29  ;;  %v25284_v57 = vld [vmem:[#allocation92_spill] sm:$0xff] }
 0x689   :  { %3118 = vadd.xlane.f32.xlu1 %v3117_v16  ;;  %v6192_v36 = vpop.xlane.xlu1 %6191  ;;  %v3072_v45 = vsel %vm1449_vm1, %v25284_v57, 0.0  ;;  %v3126_v16 = vsel %vm1449_vm1, %v25286_v43, 0.0  ;;  %v25297_v57 = vld [vmem:[#allocation95_spill] sm:$0xff] }
 0x68a   :  { %18933 = vpow2.f32 %v6285_v63  ;;  %v6228_v1 = vsub.f32 %v22034_v20, %v6192_v36  ;;  %v25278_v20 = vld [vmem:[#allocation91_spill] sm:$0xff]  ;;  %v22410_v34 = vpop.permute.xlu0 %12347  ;;  %v17840_v33 = vpack.c.bf16 %v18438_v48, %v18437_v42 }
 0x68b   :  { %18935 = vpow2.f32 %v6291_v26  ;;  %3067 = vadd.xlane.f32.xlu0 %v3066_v61  ;;  %v3069_v28 = vsel %vm1449_vm1, %v25278_v20, 0.0  ;;  %25283 = vst [vmem:[#allocation106_spill] sm:$0xff] %v22410_v34  ;;  %v25298_v43 = vld [vmem:[#allocation103_spill] sm:$0xff] }
 0x68c   :  { %v22378_v19 = vpop.eup %18921  ;;  %v6289_v62 = vmul.f32 1.442695, %v6228_v1  ;;  %v25288_v1 = vld [vmem:[#allocation58_spill] sm:$0xff] }
 0x68d   :  { %v22384_v13 = vpop.eup %18923  ;;  %3121 = vadd.xlane.f32.xlu1 %v3120_v59  ;;  %v6198_v32 = vpop.xlane.xlu1 %6197  ;;  %16963 = vmatprep.mubr.msk.f32.mxu0 %vm1449_vm1, %v22378_v19  ;;  %v18443_v54 = vunpack.i.h.bf16 %v25288_v1  ;;  %v18442_v61 = vunpack.i.l.bf16 %v25288_v1  ;;  %v25301_v1 = vld [vmem:[#allocation113_spill] sm:$0xff] }
 0x68e   :  { %18937 = vpow2.f32 %v6289_v62  ;;  %v6230_v10 = vsub.f32 %v25280_v52, %v6198_v32  ;;  %16964 = vmatmul.mubr.msk.f32.vlgmr.msra.gmra.mrb[106].mxu0 %vm1449_vm1, %v22384_v13  ;;  %v22395_v35 = vpop.eup %18925  ;;  %v22441_v59 = vpop.permute.xlu0 %12438  ;;  %v25290_v32 = vld [vmem:[#allocation111_spill] sm:$0xff] }
 0x68f   :  { %3070 = vadd.xlane.f32.xlu0 %v3069_v28  ;;  %17825 = vmatpush3.bf16.msra.mxu0 %v22316_v40  ;;  %v17834_v40 = vpack.c.bf16 %v18433_v21, %v18432_v7  ;;  %25289 = vst [vmem:[#allocation88_spill] sm:$0xff] %v22441_v59  ;;  %v3129_v20 = vsel %vm1449_vm1, %v25290_v32, 0.0  ;;  %v25291_v28 = vld [vmem:[#allocation62_spill] sm:$0xff] }
 0x690   :  { %v22398_v37 = vpop.eup %18927  ;;  %v6293_v49 = vmul.f32 1.442695, %v6230_v10  ;;  %16977 = vmatprep.mubr.msk.f32.mxu0 %vm1449_vm1, %v22395_v35  ;;  %17831 = vmatprep.subr.bf16.mxu0 %v17830_v17  ;;  %v18447_v23 = vunpack.i.l.bf16 %v25291_v28  ;;  %v25293_v7 = vld [vmem:[#allocation94_spill] sm:$0xff] }
 0x691   :  { %v22404_v27 = vpop.eup %18929  ;;  %3124 = vadd.xlane.f32.xlu1 %v3123_v6  ;;  %16970 = vmatprep.mubr.msk.f32.mxu1 %vm1449_vm1, %v22398_v37  ;;  %v22449_v21 = vpop.permute.xlu1 %12254  ;;  %v3078_v52 = vsel %vm1449_vm1, %v25293_v7, 0.0  ;;  %v25294_v10 = vld [vmem:[#allocation66_spill] sm:$0xff]  ;;  %v25295_v6 = vld [vmem:[#allocation112_spill] sm:$0xff] }
 0x692   :  { %18939 = vpow2.f32 %v6293_v49  ;;  %16971 = vmatmul.mubr.msk.f32.vlgmr.msra.gmra.mrb[76].mxu1 %vm1449_vm1, %v22404_v27  ;;  %v22416_v38 = vpop.eup %18931  ;;  %25292 = vst [vmem:[#allocation107_spill] sm:$0xff] %v22449_v21  ;;  %v17846_v49 = vpack.c.bf16 %v18443_v54, %v18442_v61  ;;  %v3132_v29 = vsel %vm1449_vm1, %v25295_v6, 0.0  ;;  %v22463_v42 = vpop.permute.xlu0 %18650  ;;  %v3135_v54 = vsel %vm1449_vm1, %v25301_v1, 0.0  ;;  %v25302_v61 = vld [vmem:[#allocation69_spill] sm:$0xff]  ;;  %v25312_v1 = vld [vmem:[#allocation78_spill] sm:$0xff] }
 0x693   :  { %3073 = vadd.xlane.f32.xlu0 %v3072_v45  ;;  %17829 = vmatpush3.bf16.msra.mxu1 %v22359_v2  ;;  %v25287_v2 = vld [vmem:[#allocation93_spill] sm:$0xff]  ;;  %25296 = vst [vmem:[#allocation89_spill] sm:$0xff] %v22463_v42  ;;  %v3081_v45 = vsel %vm1449_vm1, %v25297_v57, 0.0  ;;  %v18458_v32 = vunpack.i.h.bf16 %v25302_v61 }
 0x694   :  { %v22419_v26 = vpop.eup %18933  ;;  %16984 = vmatprep.mubr.msk.f32.mxu1 %vm1449_vm1, %v22416_v38  ;;  %17836 = vmatprep.subr.msk.bf16.mxu1 %vm20478_vm3, %v17834_v40  ;;  %v3075_v36 = vsel %vm1449_vm1, %v25287_v2, 0.0 }
 0x695   :  { %v22427_v5 = vpop.eup %18935  ;;  %3127 = vadd.xlane.f32.xlu1 %v3126_v16  ;;  %16978 = vmatmul.mubr.msk.f32.vlgmr.msra.gmra.mrb[108].mxu0 %vm1449_vm1, %v22419_v26  ;;  %v18453_v16 = vunpack.i.h.bf16 %v25298_v43  ;;  %v22473_v2 = vpop.permute.xlu1 %12345 }
 0x696   :  { %17833 = vmatpush3.bf16.msra.mxu0 %v17830_v17  ;;  %16991 = vmatprep.mubr.msk.f32.mxu0 %vm1449_vm1, %v22427_v5  ;;  %v18448_v17 = vunpack.i.h.bf16 %v25291_v28  ;;  %25299 = vst [vmem:[#allocation108_spill] sm:$0xff] %v22473_v2  ;;  %v25303_v28 = vld [vmem:[#allocation96_spill] sm:$0xff]  ;;  %v22487_v7 = vpop.permute.xlu0 %12533 }
 0x697   :  { %3076 = vadd.xlane.f32.xlu0 %v3075_v36  ;;  %17842 = vmatprep.subr.msk.bf16.mxu0 %vm20478_vm3, %v17840_v33  ;;  %v25300_v36 = vld [vmem:[#allocation57_spill] sm:$0xff]  ;;  %25305 = vst [vmem:[#allocation90_spill] sm:$0xff] %v22487_v7  ;;  %v22970_v7 = vld [vmem:[%s24805_s1 + $0x20] sm:$0xff] }
 0x698   :  { %v22439_v62 = vpop.eup %18937  ;;  %v17852_v48 = vpack.c.bf16 %v18448_v17, %v18447_v23  ;;  %v3084_v17 = vsel %vm1449_vm1, %v25303_v28, 0.0  ;;  %v25304_v23 = vld [vmem:[#allocation59_spill] sm:$0xff] }
 0x699   :  { %3130 = vadd.xlane.f32.xlu1 %v3129_v20  ;;  %16985 = vmatmul.mubr.msk.f32.vlgmr.msra.gmra.mrb[78].mxu1 %vm1449_vm1, %v22439_v62  ;;  %v18457_v20 = vunpack.i.l.bf16 %v25302_v61  ;;  %v22497_v57 = vpop.permute.xlu1 %18645 }
 0x69a   :  { %16998 = vmatprep.mubr.msk.f32.mxu1 %vm1449_vm1, %v25294_v10  ;;  %v25307_v10 = vld [vmem:[#allocation114_spill] sm:$0xff]  ;;  %25308 = vst [vmem:[#allocation91_spill] sm:$0xff] %v22497_v57 }
 0x69b   :  { %3079 = vadd.xlane.f32.xlu0 %v3078_v52  ;;  %v25306_v52 = vld [vmem:[#allocation68_spill] sm:$0xff]  ;;  %v3138_v6 = vsel %vm1449_vm1, %v25307_v10, 0.0  ;;  %v25317_v10 = vld [vmem:[#allocation70_spill] sm:$0xff] }
 0x69c   :  { %v22455_v51 = vpop.eup %18939  ;;  %17839 = vmatpush3.bf16.xpose.msk.msra.mxu1 %vm20478_vm3, %v17834_v40  ;;  %v18452_v40 = vunpack.i.l.bf16 %v25298_v43  ;;  %v25310_v43 = vld [vmem:[#allocation97_spill] sm:$0xff] }
 0x69d   :  { %17848 = vmatprep.subr.msk.bf16.mxu1 %vm20478_vm3, %v17846_v49  ;;  %3133 = vadd.xlane.f32.xlu1 %v3132_v29  ;;  %v17864_v29 = vpack.c.bf16 %v18458_v32, %v18457_v20  ;;  %v25314_v32 = vld [vmem:[#allocation117_spill] sm:$0xff] }
 0x69e   :  { %16992 = vmatmul.mubr.msk.f32.vlgmr.msra.gmra.mrb[110].mxu0 %vm1449_vm1, %v22455_v51  ;;  %v18468_v20 = vunpack.i.h.bf16 %v25314_v32  ;;  %v18467_v28 = vunpack.i.l.bf16 %v25314_v32  ;;  %v25324_v32 = vld [vmem:[#allocation83_spill] sm:$0xff] }
 0x69f   :  { %3082 = vadd.xlane.f32.xlu0 %v3081_v45  ;;  %17845 = vmatpush3.bf16.xpose.msk.msra.mxu0 %vm20478_vm3, %v17840_v33  ;;  %v17858_v33 = vpack.c.bf16 %v18453_v16, %v18452_v40  ;;  %v25309_v45 = vld [vmem:[#allocation63_spill] sm:$0xff]  ;;  %v3087_v16 = vsel %vm1449_vm1, %v25310_v43, 0.0 }
 0x6a0   :  { %17005 = vmatprep.mubr.msk.f32.mxu0 %vm1449_vm1, %v25300_v36  ;;  %17854 = vmatprep.subr.msk.bf16.mxu0 %vm20478_vm3, %v17852_v48  ;;  %v25320_v43 = vld [vmem:[#allocation87_spill] sm:$0xff] }
 0x6a1   :  { %3136 = vadd.xlane.f32.xlu1 %v3135_v54  ;;  %v25313_v54 = vld [vmem:[#allocation115_spill] sm:$0xff] }
 0x6a2   :  { %v3141_v61 = vsel %vm1449_vm1, %v25313_v54, 0.0 }
 0x6a3   :  { %3085 = vadd.xlane.f32.xlu0 %v3084_v17  ;;  %16999 = vmatmul.mubr.msk.f32.vlgmr.msra.gmra.mrb[80].mxu1 %vm1449_vm1, %v25304_v23  ;;  %v22515_v17 = vpop.permute.xlu0 %12624  ;;  %v25316_v23 = vld [vmem:[#allocation98_spill] sm:$0xff] }
 0x6a4   :  { %17851 = vmatpush3.bf16.xpose.msk.msra.mxu1 %vm20478_vm3, %v17846_v49  ;;  %17012 = vmatprep.mubr.msk.f32.mxu1 %vm1449_vm1, %v25306_v52  ;;  %v25311_v49 = vld [vmem:[#allocation77_spill] sm:$0xff]  ;;  %25315 = vst [vmem:[#allocation53_spill] sm:$0xff] %v22515_v17  ;;  %v3090_v52 = vsel %vm1449_vm1, %v25316_v23, 0.0 }
 0x6a5   :  { %17860 = vmatprep.subr.msk.bf16.mxu1 %vm20478_vm3, %v17858_v33  ;;  %3139 = vadd.xlane.f32.xlu1 %v3138_v6  ;;  %v18463_v40 = vunpack.i.h.bf16 %v25311_v49  ;;  %v18462_v36 = vunpack.i.l.bf16 %v25311_v49  ;;  %v22521_v6 = vpop.permute.xlu1 %12440  ;;  %v17876_v49 = vpack.c.bf16 %v18468_v20, %v18467_v28  ;;  %v25325_v20 = vld [vmem:[#allocation99_spill] sm:$0xff] }
 0x6a6   :  { %17006 = vmatmul.mubr.msk.f32.vlgmr.msra.gmra.mrb[112].mxu0 %vm1449_vm1, %v25309_v45  ;;  %25318 = vst [vmem:[#allocation161_spill] sm:$0xff] %v22521_v6  ;;  %v25319_v45 = vld [vmem:[#allocation84_spill] sm:$0xff]  ;;  %v3093_v28 = vsel %vm1449_vm1, %v25325_v20, 0.0 }
 0x6a7   :  { %3088 = vadd.xlane.f32.xlu0 %v3087_v16  ;;  %17857 = vmatpush3.bf16.xpose.msk.msra.mxu0 %vm20478_vm3, %v17852_v48  ;;  %v17870_v48 = vpack.c.bf16 %v18463_v40, %v18462_v36  ;;  %v3144_v16 = vsel %vm1449_vm1, %v25320_v43, 0.0  ;;  %v25321_v40 = vld [vmem:[#allocation79_spill] sm:$0xff]  ;;  %v6298_v36 = vsel %vm1449_vm1, %v22167_v55, 0.0  ;;  %v25328_v43 = vld [vmem:[#allocation76_spill] sm:$0xff] }
 0x6a8   :  { %17019 = vmatprep.mubr.msk.f32.mxu0 %vm1449_vm1, %v25312_v1  ;;  %17866 = vmatprep.subr.msk.bf16.mxu0 %vm20478_vm3, %v17864_v29  ;;  %v25322_v1 = vld [vmem:[#allocation118_spill] sm:$0xff]  ;;  %v25326_v55 = vld [vmem:[#allocation123_spill] sm:$0xff] }
 0x6a9   :  { %3142 = vadd.xlane.f32.xlu1 %v3141_v61  ;;  %v18473_v54 = vunpack.i.h.bf16 %v25322_v1  ;;  %v22539_v61 = vpop.permute.xlu0 %18660  ;;  %v18478_v23 = vunpack.i.h.bf16 %v25326_v55 }
 0x6aa   :  { %25323 = vst [vmem:[#allocation109_spill] sm:$0xff] %v22539_v61 }
 0x6ab   :  { %3091 = vadd.xlane.f32.xlu0 %v3090_v52  ;;  %17013 = vmatmul.mubr.msk.f32.vlgmr.msra.gmra.mrb[82].mxu1 %vm1449_vm1, %v25317_v10  ;;  %v18477_v52 = vunpack.i.l.bf16 %v25326_v55  ;;  %v22549_v10 = vpop.permute.xlu1 %12531  ;;  %v25335_v55 = vld [vmem:[#allocation122_spill] sm:$0xff] }
 0x6ac   :  { %17863 = vmatpush3.bf16.xpose.msk.msra.mxu1 %vm20478_vm3, %v17858_v33  ;;  %17026 = vmatprep.mubr.msk.f32.mxu1 %vm1449_vm1, %v25319_v45  ;;  %v18472_v33 = vunpack.i.l.bf16 %v25322_v1  ;;  %25327 = vst [vmem:[#allocation56_spill] sm:$0xff] %v22549_v10 }
 0x6ad   :  { %17872 = vmatprep.subr.msk.bf16.mxu1 %vm20478_vm3, %v17870_v48  ;;  %3145 = vadd.xlane.f32.xlu1 %v3144_v16  ;;  %v25329_v16 = vld [vmem:[#allocation121_spill] sm:$0xff]  ;;  %v17888_v1 = vpack.c.bf16 %v18478_v23, %v18477_v52  ;;  %v6340_v23 = vsel %vm1449_vm1, %v22290_v58, 0.0  ;;  %v6352_v58 = vsel %vm1449_vm1, %v22309_v50, 0.0  ;;  %v25343_v50 = vld [vmem:[#allocation128_spill] sm:$0xff] }
 0x6ae   :  { %17020 = vmatmul.mubr.msk.f32.vlgmr.msra.gmra.mrb[114].mxu0 %vm1449_vm1, %v25321_v40  ;;  %v17882_v45 = vpack.c.bf16 %v18473_v54, %v18472_v33  ;;  %v25330_v40 = vld [vmem:[#allocation75_spill] sm:$0xff]  ;;  %v6304_v33 = vsel %vm1449_vm1, %v22188_v30, 0.0  ;;  %v25336_v30 = vld [vmem:[#allocation129_spill] sm:$0xff] }
 0x6af   :  { %6299 = vadd.xlane.f32.xlu0 %v6298_v36  ;;  %17869 = vmatpush3.bf16.xpose.msk.msra.mxu0 %vm20478_vm3, %v17864_v29  ;;  %v6295_v29 = vsel %vm1449_vm1, %v22165_v41, 0.0  ;;  %v3147_v36 = vsel %vm1449_vm1, %v25330_v40, 0.0  ;;  %v22563_v41 = vpop.permute.xlu0 %12719  ;;  %v25332_v54 = vld [vmem:[#allocation119_spill] sm:$0xff]  ;;  %v18488_v52 = vunpack.i.h.bf16 %v25336_v30 }
 0x6b0   :  { %17033 = vmatprep.mubr.msk.f32.mxu0 %vm1449_vm1, %v25324_v32  ;;  %17878 = vmatprep.subr.msk.bf16.mxu0 %vm20478_vm3, %v17876_v49  ;;  %25331 = vst [vmem:[#allocation92_spill] sm:$0xff] %v22563_v41 }
 0x6b1   :  { %3094 = vadd.xlane.f32.xlu1 %v3093_v28  ;;  %v22573_v28 = vpop.permute.xlu1 %18655 }
 0x6b2   :  { %25334 = vst [vmem:[#allocation110_spill] sm:$0xff] %v22573_v28 }
 0x6b3   :  { %6296 = vadd.xlane.f32.xlu0 %v6295_v29  ;;  %17027 = vmatmul.mubr.msk.f32.vlgmr.msra.gmra.mrb[84].mxu1 %vm1449_vm1, %v25328_v43  ;;  %v18487_v29 = vunpack.i.l.bf16 %v25336_v30  ;;  %v6310_v43 = vsel %vm1449_vm1, %v22208_v31, 0.0  ;;  %v22587_v40 = vpop.permute.xlu0 %12810 }
 0x6b4   :  { %17875 = vmatpush3.bf16.xpose.msk.msra.mxu1 %vm20478_vm3, %v17870_v48  ;;  %17040 = vmatprep.mubr.msk.f32.mxu1 %vm1449_vm1, %v25329_v16  ;;  %v25333_v48 = vld [vmem:[#allocation124_spill] sm:$0xff]  ;;  %25338 = vst [vmem:[#allocation93_spill] sm:$0xff] %v22587_v40 }
 0x6b5   :  { %17884 = vmatprep.subr.msk.bf16.mxu1 %vm20478_vm3, %v17882_v45  ;;  %3148 = vadd.xlane.f32.xlu1 %v3147_v36  ;;  %v18483_v32 = vunpack.i.h.bf16 %v25333_v48  ;;  %v18482_v20 = vunpack.i.l.bf16 %v25333_v48  ;;  %v25337_v16 = vld [vmem:[#allocation120_spill] sm:$0xff]  ;;  %v25339_v36 = vld [vmem:[#allocation127_spill] sm:$0xff]  ;;  %v17900_v31 = vpack.c.bf16 %v18488_v52, %v18487_v29  ;;  %v6301_v48 = vsel %vm1449_vm1, %v22184_v9, 0.0 }
 0x6b6   :  { %17034 = vmatmul.mubr.msk.f32.vlgmr.msra.gmra.mrb[116].mxu0 %vm1449_vm1, %v25332_v54  ;;  %v22597_v54 = vpop.permute.xlu1 %12626  ;;  %v6307_v29 = vsel %vm1449_vm1, %v22205_v60, 0.0 }
 0x6b7   :  { %6305 = vadd.xlane.f32.xlu0 %v6304_v33  ;;  %17881 = vmatpush3.bf16.xpose.msk.msra.mxu0 %vm20478_vm3, %v17876_v49  ;;  %v17894_v49 = vpack.c.bf16 %v18483_v32, %v18482_v20  ;;  %25340 = vst [vmem:[#allocation58_spill] sm:$0xff] %v22597_v54  ;;  %v25341_v33 = vld [vmem:[#allocation125_spill] sm:$0xff]  ;;  %v22615_v52 = vpop.permute.xlu0 %12903 }
 0x6b8   :  { %17047 = vmatprep.mubr.msk.f32.mxu0 %vm1449_vm1, %v25335_v55  ;;  %17890 = vmatprep.subr.msk.bf16.mxu0 %vm20478_vm3, %v17888_v1  ;;  %v6358_v55 = vsel %vm1449_vm1, %v22349_v24, 0.0  ;;  %25345 = vst [vmem:[#allocation111_spill] sm:$0xff] %v22615_v52  ;;  %v25348_v24 = vld [vmem:[#allocation133_spill] sm:$0xff] }
 0x6b9   :  { %6341 = vadd.xlane.f32.xlu1 %v6340_v23  ;;  %v25344_v23 = vld [vmem:[#allocation138_spill] sm:$0xff] }
 0x6ba   :  { %v18498_v9 = vunpack.i.h.bf16 %v25344_v23  ;;  %v18497_v30 = vunpack.i.l.bf16 %v25344_v23 }
 0x6bb   :  { %6311 = vadd.xlane.f32.xlu0 %v6310_v43  ;;  %17041 = vmatmul.mubr.msk.f32.vlgmr.msra.gmra.mrb[86].mxu1 %vm1449_vm1, %v25337_v16  ;;  %v25346_v43 = vld [vmem:[#allocation126_spill] sm:$0xff]  ;;  %v22621_v16 = vpop.permute.xlu1 %12717 }
 0x6bc   :  { %17887 = vmatpush3.bf16.xpose.msk.msra.mxu1 %vm20478_vm3, %v17882_v45  ;;  %17054 = vmatprep.mubr.msk.f32.mxu1 %vm1449_vm1, %v25339_v36  ;;  %v25342_v45 = vld [vmem:[#allocation130_spill] sm:$0xff]  ;;  %25347 = vst [vmem:[#allocation62_spill] sm:$0xff] %v22621_v16  ;;  %v6349_v36 = vsel %vm1449_vm1, %v22306_v44, 0.0  ;;  %v17912_v60 = vpack.c.bf16 %v18498_v9, %v18497_v30  ;;  %v22639_v44 = vpop.permute.xlu0 %12996  ;;  %v25355_v30 = vld [vmem:[#allocation132_spill] sm:$0xff] }
 0x6bd   :  { %17896 = vmatprep.subr.msk.bf16.mxu1 %vm20478_vm3, %v17894_v49  ;;  %6353 = vadd.xlane.f32.xlu1 %v6352_v58  ;;  %v18493_v32 = vunpack.i.h.bf16 %v25342_v45  ;;  %v18492_v20 = vunpack.i.l.bf16 %v25342_v45  ;;  %v25349_v58 = vld [vmem:[#allocation131_spill] sm:$0xff]  ;;  %25351 = vst [vmem:[#allocation94_spill] sm:$0xff] %v22639_v44 }
 0x6be   :  { %17048 = vmatmul.mubr.msk.f32.vlgmr.msra.gmra.mrb[118].mxu0 %vm1449_vm1, %v25341_v33  ;;  %v6316_v33 = vsel %vm1449_vm1, %v22235_v3, 0.0  ;;  %v25353_v3 = vld [vmem:[#allocation144_spill] sm:$0xff] }
 0x6bf   :  { %6302 = vadd.xlane.f32.xlu0 %v6301_v48  ;;  %17893 = vmatpush3.bf16.xpose.msk.msra.mxu0 %vm20478_vm3, %v17888_v1  ;;  %v17906_v1 = vpack.c.bf16 %v18493_v32, %v18492_v20  ;;  %v25350_v48 = vld [vmem:[#allocation143_spill] sm:$0xff]  ;;  %v25352_v32 = vld [vmem:[#allocation134_spill] sm:$0xff]  ;;  %v6355_v20 = vsel %vm1449_vm1, %v22345_v53, 0.0  ;;  %v22649_v23 = vpop.permute.xlu1 %18665  ;;  %v6364_v53 = vsel %vm1449_vm1, %v22384_v13, 0.0 }
 0x6c0   :  { %17061 = vmatprep.mubr.msk.f32.mxu0 %vm1449_vm1, %v25343_v50  ;;  %17902 = vmatprep.subr.msk.bf16.mxu0 %vm20478_vm3, %v17900_v31  ;;  %v18503_v45 = vunpack.i.h.bf16 %v25350_v48  ;;  %v18508_v50 = vunpack.i.h.bf16 %v25353_v3  ;;  %25354 = vst [vmem:[#allocation66_spill] sm:$0xff] %v22649_v23 }
 0x6c1   :  { %6359 = vadd.xlane.f32.xlu1 %v6358_v55  ;;  %v18507_v55 = vunpack.i.l.bf16 %v25353_v3 }
 0x6c3   :  { %6308 = vadd.xlane.f32.xlu0 %v6307_v29  ;;  %17055 = vmatmul.mubr.msk.f32.vlgmr.msra.gmra.mrb[88].mxu1 %vm1449_vm1, %v25346_v43  ;;  %v25356_v29 = vld [vmem:[#allocation140_spill] sm:$0xff]  ;;  %v17924_v43 = vpack.c.bf16 %v18508_v50, %v18507_v55  ;;  %v22673_v13 = vpop.permute.xlu1 %12812  ;;  %v25365_v55 = vld [vmem:[#allocation146_spill] sm:$0xff] }
 0x6c4   :  { %17899 = vmatpush3.bf16.xpose.msk.msra.mxu1 %vm20478_vm3, %v17894_v49  ;;  %17068 = vmatprep.mubr.msk.f32.mxu1 %vm1449_vm1, %v25348_v24  ;;  %v18502_v49 = vunpack.i.l.bf16 %v25350_v48  ;;  %v25358_v24 = vld [vmem:[#allocation141_spill] sm:$0xff]  ;;  %25360 = vst [vmem:[#allocation95_spill] sm:$0xff] %v22673_v13 }
 0x6c5   :  { %17908 = vmatprep.subr.msk.bf16.mxu1 %vm20478_vm3, %v17906_v1  ;;  %6350 = vadd.xlane.f32.xlu1 %v6349_v36  ;;  %v6313_v36 = vsel %vm1449_vm1, %v22231_v0, 0.0  ;;  %v25361_v48 = vld [vmem:[#allocation145_spill] sm:$0xff] }
 0x6c6   :  { %17062 = vmatmul.mubr.msk.f32.vlgmr.msra.gmra.mrb[120].mxu0 %vm1449_vm1, %v25349_v58  ;;  %v17918_v9 = vpack.c.bf16 %v18503_v45, %v18502_v49  ;;  %v6370_v45 = vsel %vm1449_vm1, %v22404_v27, 0.0  ;;  %v25362_v0 = vld [vmem:[#allocation153_spill] sm:$0xff]  ;;  %v6361_v27 = vsel %vm1449_vm1, %v22378_v19, 0.0  ;;  %v25369_v19 = vld [vmem:[#allocation148_spill] sm:$0xff] }
 0x6c7   :  { %6317 = vadd.xlane.f32.xlu0 %v6316_v33  ;;  %17905 = vmatpush3.bf16.xpose.msk.msra.mxu0 %vm20478_vm3, %v17900_v31  ;;  %v6322_v31 = vsel %vm1449_vm1, %v22221_v8, 0.0  ;;  %v22663_v8 = vpop.permute.xlu0 %18675  ;;  %v18518_v49 = vunpack.i.h.bf16 %v25362_v0 }
 0x6c8   :  { %17075 = vmatprep.mubr.msk.f32.mxu0 %vm1449_vm1, %v25352_v32  ;;  %17914 = vmatprep.subr.msk.bf16.mxu0 %vm20478_vm3, %v17912_v60  ;;  %25357 = vst [vmem:[#allocation112_spill] sm:$0xff] %v22663_v8  ;;  %v18517_v32 = vunpack.i.l.bf16 %v25362_v0 }
 0x6c9   :  { %6356 = vadd.xlane.f32.xlu1 %v6355_v20  ;;  %v6319_v20 = vsel %vm1449_vm1, %v22225_v25, 0.0  ;;  %v25367_v25 = vld [vmem:[#allocation147_spill] sm:$0xff] }
 0x6cb   :  { %6323 = vadd.xlane.f32.xlu0 %v6322_v31  ;;  %17069 = vmatmul.mubr.msk.f32.vlgmr.msra.gmra.mrb[90].mxu1 %vm1449_vm1, %v25355_v30  ;;  %v22687_v50 = vpop.permute.xlu0 %18685  ;;  %v22695_v31 = vpop.permute.xlu1 %12905  ;;  %v6328_v30 = vsel %vm1449_vm1, %v22265_v46, 0.0 }
 0x6cc   :  { %17911 = vmatpush3.bf16.xpose.msk.msra.mxu1 %vm20478_vm3, %v17906_v1  ;;  %17082 = vmatprep.mubr.msk.f32.mxu1 %vm1449_vm1, %v25356_v29  ;;  %v25359_v1 = vld [vmem:[#allocation150_spill] sm:$0xff]  ;;  %25364 = vst [vmem:[#allocation103_spill] sm:$0xff] %v22687_v50  ;;  %25366 = vst [vmem:[#allocation57_spill] sm:$0xff] %v22695_v31  ;;  %v17934_v29 = vpack.c.bf16 %v18518_v49, %v18517_v32  ;;  %v25374_v49 = vld [vmem:[#allocation151_spill] sm:$0xff] }
 0x6cd   :  { %17920 = vmatprep.subr.msk.bf16.mxu1 %vm20478_vm3, %v17918_v9  ;;  %6365 = vadd.xlane.f32.xlu1 %v6364_v53  ;;  %v18513_v58 = vunpack.i.h.bf16 %v25359_v1  ;;  %v18512_v33 = vunpack.i.l.bf16 %v25359_v1  ;;  %v25368_v53 = vld [vmem:[#allocation152_spill] sm:$0xff]  ;;  %v25370_v1 = vld [vmem:[#allocation154_spill] sm:$0xff] }
 0x6ce   :  { %17076 = vmatmul.mubr.msk.f32.vlgmr.msra.gmra.mrb[122].mxu0 %vm1449_vm1, %v25358_v24  ;;  %v18523_v24 = vunpack.i.h.bf16 %v25368_v53  ;;  %v18527_v46 = vunpack.i.l.bf16 %v25370_v1 }
 0x6cf   :  { %6314 = vadd.xlane.f32.xlu0 %v6313_v36  ;;  %17917 = vmatpush3.bf16.xpose.msk.msra.mxu0 %vm20478_vm3, %v17912_v60  ;;  %v25363_v60 = vld [vmem:[#allocation142_spill] sm:$0xff]  ;;  %v17930_v3 = vpack.c.bf16 %v18513_v58, %v18512_v33  ;;  %v6367_v36 = vsel %vm1449_vm1, %v22398_v37, 0.0  ;;  %v18528_v58 = vunpack.i.h.bf16 %v25370_v1  ;;  %v22711_v33 = vpop.permute.xlu0 %18695  ;;  %v22719_v0 = vpop.permute.xlu1 %12998  ;;  %v6376_v37 = vsel %vm1449_vm1, %v22419_v26, 0.0 }
 0x6d0   :  { %17089 = vmatprep.mubr.msk.f32.mxu0 %vm1449_vm1, %v25361_v48  ;;  %17926 = vmatprep.subr.msk.bf16.mxu0 %vm20478_vm3, %v17924_v43  ;;  %25371 = vst [vmem:[#allocation113_spill] sm:$0xff] %v22711_v33  ;;  %v6334_v48 = vsel %vm1449_vm1, %v22251_v4, 0.0  ;;  %25373 = vst [vmem:[#allocation69_spill] sm:$0xff] %v22719_v0  ;;  %v6325_v4 = vsel %vm1449_vm1, %v22260_v22, 0.0  ;;  %v6382_v26 = vsel %vm1449_vm1, %v22439_v62, 0.0  ;;  %v6373_v22 = vsel %vm1449_vm1, %v22395_v35, 0.0 }
 0x6d1   :  { %6371 = vadd.xlane.f32.xlu1 %v6370_v45  ;;  %v25372_v45 = vld [vmem:[#allocation149_spill] sm:$0xff]  ;;  %v22728_v32 = vpack.c.bf16 %v18528_v58, %v18527_v46  ;;  %v6379_v62 = vsel %vm1449_vm1, %v22416_v38, 0.0  ;;  %v6388_v35 = vsel %vm1449_vm1, %v22455_v51, 0.0  ;;  %v6385_v38 = vsel %vm1449_vm1, %v22427_v5, 0.0 }
 0x6d3   :  { %6320 = vadd.xlane.f32.xlu0 %v6319_v20  ;;  %17083 = vmatmul.mubr.msk.f32.vlgmr.msra.gmra.mrb[92].mxu1 %vm1449_vm1, %v25363_v60  ;;  %25375 = vst [vmem:[#allocation96_spill] sm:$0xff] %v22728_v32  ;;  %v22730_v20 = vpop.permute.xlu0 %18705  ;;  %v22735_v60 = vpop.permute.xlu1 %18670 }
 0x6d4   :  { %17923 = vmatpush3.bf16.xpose.msk.msra.mxu1 %vm20478_vm3, %v17918_v9  ;;  %17096 = vmatprep.mubr.msk.f32.mxu1 %vm1449_vm1, %v25365_v55  ;;  %v18522_v9 = vunpack.i.l.bf16 %v25368_v53  ;;  %25376 = vst [vmem:[#allocation59_spill] sm:$0xff] %v22730_v20  ;;  %25377 = vst [vmem:[#allocation68_spill] sm:$0xff] %v22735_v60 }
 0x6d5   :  { %17931 = vmatprep.subr.bf16.mxu1 %v17930_v3  ;;  %6362 = vadd.xlane.f32.xlu1 %v6361_v27  ;;  %v6346_v27 = vsel %vm1449_vm1, %v22277_v12, 0.0  ;;  %v6343_v12 = vsel %vm1449_vm1, %v22281_v18, 0.0 }
 0x6d6   :  { %17090 = vmatmul.mubr.msk.f32.vlgmr.msra.gmra.mrb[124].mxu0 %vm1449_vm1, %v25367_v25 }
 0x6d7   :  { %6329 = vadd.xlane.f32.xlu0 %v6328_v30  ;;  %17929 = vmatpush3.bf16.xpose.msk.msra.mxu0 %vm20478_vm3, %v17924_v43  ;;  %v22717_v43 = vpack.c.bf16 %v18523_v24, %v18522_v9  ;;  %v22741_v55 = vpop.permute.xlu0 %18715  ;;  %v22745_v25 = vpop.permute.xlu1 %18680 }
 0x6d8   :  { %17103 = vmatprep.mubr.msk.f32.mxu0 %vm1449_vm1, %v25369_v19  ;;  %17935 = vmatprep.subr.bf16.mxu0 %v17934_v29  ;;  %25378 = vst [vmem:[#allocation114_spill] sm:$0xff] %v22741_v55  ;;  %25379 = vst [vmem:[#allocation63_spill] sm:$0xff] %v22745_v25 }
 0x6d9   :  { %6368 = vadd.xlane.f32.xlu1 %v6367_v36 }
 0x6db   :  { %6335 = vadd.xlane.f32.xlu0 %v6334_v48  ;;  %17097 = vmatmul.mubr.msk.f32.vlgmr.msra.gmra.mrb[94].mxu1 %vm1449_vm1, %v25372_v45  ;;  %v22751_v30 = vpop.permute.xlu0 %18720 }
 0x6dc   :  { %17933 = vmatpush3.bf16.msra.mxu1 %v17930_v3  ;;  %v6331_v3 = vsel %vm1449_vm1, %v22255_v11, 0.0  ;;  %v6337_v11 = vsel %vm1449_vm1, %v22285_v47, 0.0  ;;  %25380 = vst [vmem:[#allocation97_spill] sm:$0xff] %v22751_v30 }
 0x6dd   :  { %17939 = vmatprep.subr.bf16.mxu1 %v22717_v43  ;;  %6377 = vadd.xlane.f32.xlu1 %v6376_v37 }
 0x6de   :  { %17104 = vmatmul.mubr.msk.f32.vlgmr.msra.gmra.mrb[126].mxu0 %vm1449_vm1, %v25374_v49 }
 0x6df   :  { %6326 = vadd.xlane.f32.xlu0 %v6325_v4  ;;  %17937 = vmatpush3.bf16.msra.mxu0 %v17934_v29  ;;  %v22755_v29 = vpop.permute.xlu1 %18690  ;;  %v22761_v53 = vpop.permute.xlu0 %18725 }
 0x6e0   :  { %17943 = vmatprep.subr.bf16.mxu0 %v22728_v32  ;;  %25381 = vst [vmem:[#allocation77_spill] sm:$0xff] %v22755_v29  ;;  %25382 = vst [vmem:[#allocation78_spill] sm:$0xff] %v22761_v53  ;;  %v25404_v29 = vld [vmem:[#allocation65_spill] sm:$0xff] }
 0x6e1   :  { %6383 = vadd.xlane.f32.xlu1 %v6382_v26 }
 0x6e3   :  { %6332 = vadd.xlane.f32.xlu0 %v6331_v3  ;;  %v22763_v47 = vpop.permute.xlu1 %18700  ;;  %v22765_v24 = vpop.permute.xlu0 %18730 }
 0x6e4   :  { %25383 = vst [vmem:[#allocation115_spill] sm:$0xff] %v22763_v47  ;;  %25384 = vst [vmem:[#allocation117_spill] sm:$0xff] %v22765_v24  ;;  %v25400_v47 = vld [vmem:[#allocation64_spill] sm:$0xff] }
 0x6e5   :  { %6374 = vadd.xlane.f32.xlu1 %v6373_v22 }
 0x6e7   :  { %6347 = vadd.xlane.f32.xlu0 %v6346_v27  ;;  %v22769_v51 = vpop.permute.xlu1 %18710  ;;  %v22773_v36 = vpop.permute.xlu0 %18735 }
 0x6e8   :  { %25385 = vst [vmem:[#allocation98_spill] sm:$0xff] %v22769_v51  ;;  %25386 = vst [vmem:[#allocation70_spill] sm:$0xff] %v22773_v36 }
 0x6e9   :  { %6380 = vadd.xlane.f32.xlu1 %v6379_v62 }
 0x6eb   :  { %6338 = vadd.xlane.f32.xlu0 %v6337_v11  ;;  %v22775_v18 = vpop.permute.xlu1 %18745  ;;  %v22781_v58 = vpop.permute.xlu0 %18740 }
 0x6ec   :  { %25387 = vst [vmem:[#allocation84_spill] sm:$0xff] %v22775_v18  ;;  %25388 = vst [vmem:[#allocation87_spill] sm:$0xff] %v22781_v58 }
 0x6ed   :  { %6389 = vadd.xlane.f32.xlu1 %v6388_v35 }
 0x6ef   :  { %6344 = vadd.xlane.f32.xlu0 %v6343_v12  ;;  %v22785_v48 = vpop.permute.xlu1 %990 }
 0x6f1   :  { %6386 = vadd.xlane.f32.xlu1 %v6385_v38 }
 0x6f9   :  { %v22767_v9 = vpop.f32.mrb[64].mxu1 }
 0x6fa   :  { %v22771_v19 = vpop.f32.mrb[65].mxu1 }
 0x701   :  { %v22777_v1 = vpop.f32.mrb[96].mxu0 }
 0x702   :  { %v22779_v5 = vpop.f32.mrb[97].mxu0 }
 0x705   :  { %v22783_v46 = vpop.f32.mrb[66].mxu1 }
 0x706   :  { %v22787_v45 = vpop.f32.mrb[67].mxu1 }
 0x708   :  { %v3104_v37 = vpop.xlane.xlu0 %3103 }
 0x709   :  { %18941 = vrcp.f32 %v3104_v37  ;;  %v25393_v37 = vld [vmem:[#allocation100_spill] sm:$0xff] }
 0x70a   :  { %v3107_v49 = vpop.xlane.xlu1 %3106 }
 0x70b   :  { %18943 = vrcp.f32 %v3107_v49 }
 0x70c   :  { %v3110_v4 = vpop.xlane.xlu0 %3109 }
 0x70d   :  { %18945 = vrcp.f32 %v3110_v4  ;;  %v22789_v26 = vpop.f32.mrb[68].mxu1  ;;  %v22791_v3 = vpop.f32.mrb[98].mxu0 }
 0x70e   :  { %25389 = vst [vmem:[#allocation79_spill] sm:$0xff] %v22789_v26  ;;  %25390 = vst [vmem:[#allocation118_spill] sm:$0xff] %v22791_v3  ;;  %v22793_v22 = vpop.f32.mrb[69].mxu1  ;;  %v3113_v27 = vpop.xlane.xlu1 %3112 }
 0x70f   :  { %25391 = vst [vmem:[#allocation83_spill] sm:$0xff] %v22793_v22  ;;  %18947 = vrcp.f32 %v3113_v27  ;;  %v22795_v62 = vpop.f32.mrb[99].mxu0  ;;  %v25397_v27 = vld [vmem:[#allocation61_spill] sm:$0xff] }
 0x710   :  { %25392 = vst [vmem:[#allocation99_spill] sm:$0xff] %v22795_v62  ;;  %v3062_v11 = vpop.xlane.xlu0 %3061 }
 0x711   :  { %18949 = vrcp.f32 %v3062_v11 }
 0x712   :  { %v3116_v35 = vpop.xlane.xlu1 %3115 }
 0x713   :  { %v18942_v12 = vpop.eup %18941  ;;  %18951 = vrcp.f32 %v3116_v35 }
 0x714   :  { %v3065_v38 = vpop.xlane.xlu0 %3064  ;;  %v4498_v49 = vmul.f32 %v18942_v12, %v25393_v37  ;;  %v25399_v12 = vld [vmem:[#allocation67_spill] sm:$0xff] }
 0x715   :  { %v18944_v18 = vpop.eup %18943  ;;  %18953 = vrcp.f32 %v3065_v38  ;;  %v22798_v4 = vpop.f32.mrb[70].mxu1 }
 0x716   :  { %25394 = vst [vmem:[#allocation123_spill] sm:$0xff] %v22798_v4  ;;  %v22800_v58 = vpop.f32.mrb[100].mxu0  ;;  %v22802_v36 = vpop.f32.mrb[71].mxu1  ;;  %v4499_v30 = vmul.f32 %v18944_v18, %v25397_v27  ;;  %4530 = vst.msk [vmem:[#allocation4 + $0x70] sm:$0xff] %vm1449_vm1, %v4498_v49 }
 0x717   :  { %25395 = vst [vmem:[#allocation76_spill] sm:$0xff] %v22800_v58  ;;  %25396 = vst [vmem:[#allocation121_spill] sm:$0xff] %v22802_v36  ;;  %v3119_v24 = vpop.xlane.xlu1 %3118  ;;  %v18946_v11 = vpop.eup %18945 }
 0x718   :  { %18955 = vrcp.f32 %v3119_v24  ;;  %v22806_v51 = vpop.f32.mrb[101].mxu0  ;;  %v3068_v35 = vpop.xlane.xlu0 %3067  ;;  %4531 = vst.msk [vmem:[#allocation4 + $0x78] sm:$0xff] %vm1449_vm1, %v4499_v30  ;;  %v4500_v38 = vmul.f32 %v18946_v11, %v25399_v12  ;;  %v25401_v24 = vld [vmem:[#allocation42_spill] sm:$0xff] }
 0x719   :  { %25398 = vst [vmem:[#allocation75_spill] sm:$0xff] %v22806_v51  ;;  %v18948_v37 = vpop.eup %18947  ;;  %18957 = vrcp.f32 %v3068_v35 }
 0x71a   :  { %v4501_v55 = vmul.f32 %v18948_v37, %v25400_v47  ;;  %4532 = vst.msk [vmem:[#allocation4 + $0x80] sm:$0xff] %vm1449_vm1, %v4500_v38  ;;  %v25402_v47 = vld [vmem:[#allocation72_spill] sm:$0xff]  ;;  %v25403_v37 = vld [vmem:[#allocation43_spill] sm:$0xff] }
 0x71b   :  { %v3122_v53 = vpop.xlane.xlu1 %3121  ;;  %v18950_v20 = vpop.eup %18949 }
 0x71c   :  { %18959 = vrcp.f32 %v3122_v53  ;;  %v3071_v18 = vpop.xlane.xlu0 %3070  ;;  %4533 = vst.msk [vmem:[#allocation4 + $0x88] sm:$0xff] %vm1449_vm1, %v4501_v55  ;;  %v4484_v49 = vmul.f32 %v18950_v20, %v25401_v24 }
 0x71d   :  { %v18952_v27 = vpop.eup %18951  ;;  %18961 = vrcp.f32 %v3071_v18  ;;  %v22814_v33 = vpop.f32.mrb[72].mxu1 }
 0x71e   :  { %v22816_v30 = vpop.f32.mrb[102].mxu0  ;;  %v22818_v11 = vpop.f32.mrb[73].mxu1  ;;  %4516 = vst.msk [vmem:[#allocation4] sm:$0xff] %vm1449_vm1, %v4484_v49  ;;  %v4502_v12 = vmul.f32 %v18952_v27, %v25402_v47  ;;  %v25405_v27 = vld [vmem:[#allocation46_spill] sm:$0xff] }
 0x71f   :  { %v3125_v35 = vpop.xlane.xlu1 %3124  ;;  %v18954_v38 = vpop.eup %18953 }
 0x720   :  { %18963 = vrcp.f32 %v3125_v35  ;;  %v22822_v53 = vpop.f32.mrb[103].mxu0  ;;  %v3074_v55 = vpop.xlane.xlu0 %3073  ;;  %v4485_v20 = vmul.f32 %v18954_v38, %v25403_v37  ;;  %4534 = vst.msk [vmem:[#allocation4 + $0x90] sm:$0xff] %vm1449_vm1, %v4502_v12 }
 0x721   :  { %18965 = vrcp.f32 %v3074_v55  ;;  %v25406_v55 = vld [vmem:[#allocation71_spill] sm:$0xff] }
 0x722   :  { %v18956_v18 = vpop.eup %18955  ;;  %4517 = vst.msk [vmem:[#allocation4 + $0x8] sm:$0xff] %vm1449_vm1, %v4485_v20 }
 0x723   :  { %v3128_v24 = vpop.xlane.xlu1 %3127  ;;  %v4503_v4 = vmul.f32 %v18956_v18, %v25404_v29  ;;  %v18958_v36 = vpop.eup %18957  ;;  %v25407_v18 = vld [vmem:[#allocation48_spill] sm:$0xff] }
 0x724   :  { %18967 = vrcp.f32 %v3128_v24  ;;  %v3077_v49 = vpop.xlane.xlu0 %3076  ;;  %v4486_v47 = vmul.f32 %v18958_v36, %v25405_v27 }
 0x725   :  { %4535 = vst.msk [vmem:[#allocation4 + $0x98] sm:$0xff] %vm1449_vm1, %v4503_v4  ;;  %18969 = vrcp.f32 %v3077_v49  ;;  %v22830_v58 = vpop.f32.mrb[104].mxu0  ;;  %v25408_v49 = vld [vmem:[#allocation73_spill] sm:$0xff] }
 0x726   :  { %v18960_v35 = vpop.eup %18959  ;;  %v22832_v12 = vpop.f32.mrb[105].mxu0  ;;  %4518 = vst.msk [vmem:[#allocation4 + $0x10] sm:$0xff] %vm1449_vm1, %v4486_v47  ;;  %v25409_v47 = vld [vmem:[#allocation44_spill] sm:$0xff] }
 0x727   :  { %v3131_v38 = vpop.xlane.xlu1 %3130  ;;  %v4504_v37 = vmul.f32 %v18960_v35, %v25406_v55  ;;  %v18962_v20 = vpop.eup %18961  ;;  %v25410_v55 = vld [vmem:[#allocation74_spill] sm:$0xff] }
 0x728   :  { %18971 = vrcp.f32 %v3131_v38  ;;  %v3080_v29 = vpop.xlane.xlu0 %3079  ;;  %v4487_v24 = vmul.f32 %v18962_v20, %v25407_v18  ;;  %v25411_v18 = vld [vmem:[#allocation49_spill] sm:$0xff] }
 0x729   :  { %4536 = vst.msk [vmem:[#allocation4 + $0xa0] sm:$0xff] %vm1449_vm1, %v4504_v37  ;;  %18973 = vrcp.f32 %v3080_v29 }
 0x72a   :  { %v18964_v36 = vpop.eup %18963  ;;  %4519 = vst.msk [vmem:[#allocation4 + $0x18] sm:$0xff] %vm1449_vm1, %v4487_v24 }
 0x72b   :  { %v3134_v4 = vpop.xlane.xlu1 %3133  ;;  %v4505_v27 = vmul.f32 %v18964_v36, %v25408_v49  ;;  %v18966_v51 = vpop.eup %18965 }
 0x72c   :  { %18975 = vrcp.f32 %v3134_v4  ;;  %v3083_v26 = vpop.xlane.xlu0 %3082  ;;  %v4488_v22 = vmul.f32 %v18966_v51, %v25409_v47  ;;  %v25412_v51 = vld [vmem:[#allocation86_spill] sm:$0xff] }
 0x72d   :  { %4537 = vst.msk [vmem:[#allocation4 + $0xa8] sm:$0xff] %vm1449_vm1, %v4505_v27  ;;  %18977 = vrcp.f32 %v3083_v26 }
 0x72e   :  { %v18968_v35 = vpop.eup %18967  ;;  %4520 = vst.msk [vmem:[#allocation4 + $0x20] sm:$0xff] %vm1449_vm1, %v4488_v22  ;;  %v25413_v22 = vld [vmem:[#allocation54_spill] sm:$0xff] }
 0x72f   :  { %v3137_v38 = vpop.xlane.xlu1 %3136  ;;  %v4506_v37 = vmul.f32 %v18968_v35, %v25410_v55  ;;  %v18970_v20 = vpop.eup %18969  ;;  %v25414_v55 = vld [vmem:[#allocation82_spill] sm:$0xff] }
 0x730   :  { %18979 = vrcp.f32 %v3137_v38  ;;  %v3086_v29 = vpop.xlane.xlu0 %3085  ;;  %v4489_v24 = vmul.f32 %v18970_v20, %v25411_v18  ;;  %v25415_v18 = vld [vmem:[#allocation47_spill] sm:$0xff] }
 0x731   :  { %4538 = vst.msk [vmem:[#allocation4 + $0xb0] sm:$0xff] %vm1449_vm1, %v4506_v37  ;;  %18981 = vrcp.f32 %v3086_v29 }
 0x732   :  { %v18972_v36 = vpop.eup %18971  ;;  %4521 = vst.msk [vmem:[#allocation4 + $0x28] sm:$0xff] %vm1449_vm1, %v4489_v24 }
 0x733   :  { %v3140_v4 = vpop.xlane.xlu1 %3139  ;;  %v4507_v49 = vmul.f32 %v18972_v36, %v25412_v51  ;;  %v18974_v26 = vpop.eup %18973  ;;  %v25416_v51 = vld [vmem:[#allocation81_spill] sm:$0xff] }
 0x734   :  { %18983 = vrcp.f32 %v3140_v4  ;;  %v3089_v27 = vpop.xlane.xlu0 %3088  ;;  %v4490_v47 = vmul.f32 %v18974_v26, %v25413_v22  ;;  %v25417_v22 = vld [vmem:[#allocation52_spill] sm:$0xff] }
 0x735   :  { %4539 = vst.msk [vmem:[#allocation4 + $0xb8] sm:$0xff] %vm1449_vm1, %v4507_v49  ;;  %18985 = vrcp.f32 %v3089_v27 }
 0x736   :  { %v18976_v35 = vpop.eup %18975  ;;  %4522 = vst.msk [vmem:[#allocation4 + $0x30] sm:$0xff] %vm1449_vm1, %v4490_v47 }
 0x737   :  { %v3143_v38 = vpop.xlane.xlu1 %3142  ;;  %v4508_v37 = vmul.f32 %v18976_v35, %v25414_v55  ;;  %v18978_v20 = vpop.eup %18977  ;;  %v25418_v55 = vld [vmem:[#allocation116_spill] sm:$0xff] }
 0x738   :  { %18987 = vrcp.f32 %v3143_v38  ;;  %v3092_v29 = vpop.xlane.xlu0 %3091  ;;  %v4491_v24 = vmul.f32 %v18978_v20, %v25415_v18  ;;  %v25419_v18 = vld [vmem:[#allocation45_spill] sm:$0xff] }
 0x739   :  { %4540 = vst.msk [vmem:[#allocation4 + $0xc0] sm:$0xff] %vm1449_vm1, %v4508_v37  ;;  %18989 = vrcp.f32 %v3092_v29 }
 0x73a   :  { %v18980_v36 = vpop.eup %18979  ;;  %4523 = vst.msk [vmem:[#allocation4 + $0x38] sm:$0xff] %vm1449_vm1, %v4491_v24 }
 0x73b   :  { %v3146_v4 = vpop.xlane.xlu1 %3145  ;;  %v4509_v49 = vmul.f32 %v18980_v36, %v25416_v51  ;;  %v18982_v26 = vpop.eup %18981  ;;  %v25420_v51 = vld [vmem:[#allocation85_spill] sm:$0xff] }
 0x73c   :  { %18991 = vrcp.f32 %v3146_v4  ;;  %v22856_v27 = vpop.xlane.xlu0 %6299  ;;  %v4492_v47 = vmul.f32 %v18982_v26, %v25417_v22 }
 0x73d   :  { %4541 = vst.msk [vmem:[#allocation4 + $0xc8] sm:$0xff] %vm1449_vm1, %v4509_v49 }
 0x73e   :  { %v18984_v35 = vpop.eup %18983  ;;  %4524 = vst.msk [vmem:[#allocation4 + $0x40] sm:$0xff] %vm1449_vm1, %v4492_v47  ;;  %v25421_v47 = vld [vmem:[#allocation50_spill] sm:$0xff] }
 0x73f   :  { %v3095_v38 = vpop.xlane.xlu1 %3094  ;;  %v4510_v37 = vmul.f32 %v18984_v35, %v25418_v55  ;;  %v18986_v20 = vpop.eup %18985 }
 0x740   :  { %18993 = vrcp.f32 %v3095_v38  ;;  %v22862_v29 = vpop.xlane.xlu0 %6296  ;;  %v4493_v24 = vmul.f32 %v18986_v20, %v25419_v18  ;;  %v25422_v20 = vld [vmem:[#allocation136_spill] sm:$0xff] }
 0x741   :  { %4542 = vst.msk [vmem:[#allocation4 + $0xd0] sm:$0xff] %vm1449_vm1, %v4510_v37 }
 0x742   :  { %v18988_v36 = vpop.eup %18987  ;;  %4525 = vst.msk [vmem:[#allocation4 + $0x48] sm:$0xff] %vm1449_vm1, %v4493_v24 }
 0x743   :  { %v3149_v4 = vpop.xlane.xlu1 %3148  ;;  %v4511_v49 = vmul.f32 %v18988_v36, %v25420_v51  ;;  %v18990_v26 = vpop.eup %18989  ;;  %v25423_v36 = vld [vmem:[#allocation55_spill] sm:$0xff] }
 0x744   :  { %18995 = vrcp.f32 %v3149_v4  ;;  %v22868_v22 = vpop.xlane.xlu0 %6305  ;;  %v4494_v35 = vmul.f32 %v18990_v26, %v25421_v47 }
 0x745   :  { %4543 = vst.msk [vmem:[#allocation4 + $0xd8] sm:$0xff] %vm1449_vm1, %v4511_v49  ;;  %v25424_v49 = vld [vmem:[#allocation135_spill] sm:$0xff] }
 0x746   :  { %v18992_v38 = vpop.eup %18991  ;;  %4526 = vst.msk [vmem:[#allocation4 + $0x50] sm:$0xff] %vm1449_vm1, %v4494_v35 }
 0x747   :  { %v6342_v55 = vpop.xlane.xlu1 %6341  ;;  %v4512_v37 = vmul.f32 %v18992_v38, %v25422_v20 }
 0x748   :  { %18997 = vrcp.f32 %v6342_v55  ;;  %v22874_v18 = vpop.xlane.xlu0 %6311 }
 0x749   :  { %4544 = vst.msk [vmem:[#allocation4 + $0xe0] sm:$0xff] %vm1449_vm1, %v4512_v37 }
 0x74a   :  { %v18994_v24 = vpop.eup %18993 }
 0x74b   :  { %v4495_v4 = vmul.f32 %v18994_v24, %v25423_v36 }
 0x74c   :  { %v22878_v51 = vpop.xlane.xlu0 %6302 }
 0x74d   :  { %4527 = vst.msk [vmem:[#allocation4 + $0x58] sm:$0xff] %vm1449_vm1, %v4495_v4 }
 0x74e   :  { %v18996_v26 = vpop.eup %18995 }
 0x74f   :  { %v4513_v47 = vmul.f32 %v18996_v26, %v25424_v49 }
 0x750   :  { %v22882_v0 = vpop.xlane.xlu0 %6308 }
 0x751   :  { %4545 = vst.msk [vmem:[#allocation4 + $0xe8] sm:$0xff] %vm1449_vm1, %v4513_v47 }
 0x752   :  { %v18998_v35 = vpop.eup %18997 }
 0x753   :  { %v7862_v38 = vmul.f32 %v18998_v35, %v22816_v30 }
 0x754   :  { %v22886_v55 = vpop.xlane.xlu0 %6317 }
 0x755   :  { %7941 = vrot.lane.b32.xlu1 %v7862_v38, %s19486_s27  ;;  %v22889_v20 = vpop.f32.mrb[74].mxu1 }
 0x756   :  { %v22891_v37 = vpop.f32.mrb[75].mxu1 }
 0x758   :  { %v22893_v24 = vpop.xlane.xlu0 %6323 }
 0x759   :  { %25425 = vst [vmem:[#allocation119_spill] sm:$0xff] %v22893_v24 }
 0x75c   :  { %v22895_v36 = vpop.xlane.xlu0 %6314 }
 0x760   :  { %v22897_v4 = vpop.xlane.xlu0 %6320 }
 0x761   :  { %25426 = vst [vmem:[#allocation124_spill] sm:$0xff] %v22897_v4  ;;  %v22899_v26 = vpop.f32.mrb[106].mxu0 }
 0x762   :  { %25427 = vst [vmem:[#allocation122_spill] sm:$0xff] %v22899_v26  ;;  %v22901_v49 = vpop.f32.mrb[107].mxu0 }
 0x763   :  { %25428 = vst [vmem:[#allocation129_spill] sm:$0xff] %v22901_v49 }
 0x764   :  { %v22903_v47 = vpop.xlane.xlu0 %6329 }
 0x765   :  { %25429 = vst [vmem:[#allocation120_spill] sm:$0xff] %v22903_v47  ;;  %v22905_v30 = vpop.f32.mrb[76].mxu1 }
 0x766   :  { %25430 = vst [vmem:[#allocation127_spill] sm:$0xff] %v22905_v30  ;;  %v22907_v35 = vpop.f32.mrb[77].mxu1  ;;  %v22927_v30 = vpop.xlane.xlu1 %6353 }
 0x767   :  { %25431 = vst [vmem:[#allocation125_spill] sm:$0xff] %v22907_v35 }
 0x768   :  { %v22909_v38 = vpop.xlane.xlu0 %6335  ;;  %v22911_v50 = vpop.f32.mrb[108].mxu0 }
 0x769   :  { %25432 = vst [vmem:[#allocation130_spill] sm:$0xff] %v22909_v38  ;;  %25433 = vst [vmem:[#allocation128_spill] sm:$0xff] %v22911_v50  ;;  %v22913_v44 = vpop.f32.mrb[109].mxu0  ;;  %v22934_v50 = vld [vmem:[%s24805_s1 + $0x28] sm:$0xff] }
 0x76a   :  { %25434 = vst [vmem:[#allocation138_spill] sm:$0xff] %v22913_v44 }
 0x76c   :  { %v22915_v24 = vpop.xlane.xlu0 %6326  ;;  %v22917_v13 = vpop.f32.mrb[78].mxu1 }
 0x76d   :  { %25435 = vst [vmem:[#allocation126_spill] sm:$0xff] %v22915_v24  ;;  %25436 = vst [vmem:[#allocation133_spill] sm:$0xff] %v22917_v13  ;;  %v22919_v4 = vpop.f32.mrb[79].mxu1 }
 0x76e   :  { %25437 = vst [vmem:[#allocation131_spill] sm:$0xff] %v22919_v4 }
 0x770   :  { %v22921_v31 = vpop.xlane.xlu0 %6332 }
 0x771   :  { %25438 = vst [vmem:[#allocation143_spill] sm:$0xff] %v22921_v31  ;;  %v22923_v8 = vpop.f32.mrb[110].mxu0 }
 0x772   :  { %25439 = vst [vmem:[#allocation134_spill] sm:$0xff] %v22923_v8  ;;  %v22925_v47 = vpop.f32.mrb[111].mxu0 }
 0x773   :  { %25440 = vst [vmem:[#allocation144_spill] sm:$0xff] %v22925_v47  ;;  %v22943_v47 = vpop.xlane.xlu1 %6359 }
 0x774   :  { %v22929_v40 = vpop.xlane.xlu0 %6347 }
 0x776   :  { %v17000_v44 = vpop.f32.mrb[80].mxu1 }
 0x777   :  { %v22937_v13 = vadd.f32 %v17000_v44, %v22934_v50  ;;  %v8191_v4 = vpop.f32.mrb[81].mxu1  ;;  %v22952_v44 = vpop.xlane.xlu1 %6350 }
 0x778   :  { %v6339_v38 = vpop.xlane.xlu0 %6338  ;;  %v23027_v26 = vadd.f32 %v22970_v7, %v8191_v4 }
 0x779   :  { %18999 = vrcp.f32 %v6339_v38  ;;  %v22939_v31 = vpop.f32.mrb[112].mxu0  ;;  %v9598_v8 = vsel %vm1449_vm1, %v22937_v13, -inf }
 0x77a   :  { %v22945_v24 = vpop.f32.mrb[113].mxu0  ;;  %9599 = vmax.xlane.f32.xlu1 %v9598_v8 }
 0x77b   :  { %v22961_v8 = vpop.xlane.xlu1 %6356 }
 0x77e   :  { %v17014_v25 = vpop.f32.mrb[82].mxu1 }
 0x77f   :  { %v22948_v54 = vadd.f32 %v17014_v25, %v22934_v50  ;;  %v22950_v52 = vpop.f32.mrb[83].mxu1 }
 0x781   :  { %v22954_v41 = vpop.f32.mrb[114].mxu0  ;;  %v9610_v38 = vsel %vm1449_vm1, %v22948_v54, -inf }
 0x782   :  { %v22958_v23 = vpop.f32.mrb[115].mxu0  ;;  %9611 = vmax.xlane.f32.xlu1 %v9610_v38  ;;  %v23086_v62 = vadd.f32 %v22954_v41, %v22934_v50 }
 0x783   :  { %v19000_v17 = vpop.eup %18999 }
 0x784   :  { %v7861_v60 = vmul.f32 %v19000_v17, %v22822_v53 }
 0x786   :  { %7939 = vrot.lane.b32.xlu0 %v7861_v60, %s19486_s27  ;;  %v17028_v25 = vpop.f32.mrb[84].mxu1 }
 0x787   :  { %v22965_v6 = vadd.f32 %v17028_v25, %v22934_v50  ;;  %v8563_v16 = vpop.f32.mrb[85].mxu1  ;;  %v22982_v25 = vpop.xlane.xlu1 %6365 }
 0x788   :  { %v22973_v28 = vadd.f32 %v22970_v7, %v8563_v16  ;;  %25441 = vst [vmem:[#allocation132_spill] sm:$0xff] %v22982_v25  ;;  %v23106_v25 = vadd.f32 %v22970_v7, %v22958_v23 }
 0x789   :  { %v17035_v38 = vpop.f32.mrb[116].mxu0  ;;  %v9622_v17 = vsel %vm1449_vm1, %v22965_v6, -inf }
 0x78a   :  { %v22978_v53 = vadd.f32 %v17035_v38, %v22934_v50  ;;  %v22980_v60 = vpop.f32.mrb[117].mxu0  ;;  %9623 = vmax.xlane.f32.xlu1 %v9622_v17  ;;  %v9619_v59 = vsel %vm1449_vm1, %v22973_v28, -inf }
 0x78b   :  { %v22994_v57 = vpop.xlane.xlu1 %6371 }
 0x78c   :  { %25442 = vst [vmem:[#allocation140_spill] sm:$0xff] %v22994_v57 }
 0x78e   :  { %v17042_v61 = vpop.f32.mrb[86].mxu1  ;;  %9620 = vmax.xlane.f32.xlu1 %v9619_v59 }
 0x78f   :  { %v22987_v16 = vadd.f32 %v17042_v61, %v22934_v50  ;;  %v8749_v10 = vpop.f32.mrb[87].mxu1  ;;  %v23006_v2 = vpop.xlane.xlu1 %6362 }
 0x790   :  { %v22990_v21 = vadd.f32 %v22970_v7, %v8749_v10 }
 0x791   :  { %v17049_v34 = vpop.f32.mrb[118].mxu0  ;;  %v9634_v38 = vsel %vm1449_vm1, %v22987_v16, -inf }
 0x792   :  { %v22997_v17 = vadd.f32 %v17049_v34, %v22934_v50  ;;  %v22999_v42 = vpop.f32.mrb[119].mxu0  ;;  %9635 = vmax.xlane.f32.xlu1 %v9634_v38  ;;  %v9631_v59 = vsel %vm1449_vm1, %v22990_v21, -inf }
 0x793   :  { %v23021_v56 = vpop.xlane.xlu1 %6368 }
 0x794   :  { %25445 = vst [vmem:[#allocation145_spill] sm:$0xff] %v23021_v56 }
 0x796   :  { %v17056_v61 = vpop.f32.mrb[88].mxu1  ;;  %9632 = vmax.xlane.f32.xlu1 %v9631_v59 }
 0x797   :  { %v23004_v10 = vadd.f32 %v17056_v61, %v22934_v50  ;;  %v8935_v14 = vpop.f32.mrb[89].mxu1  ;;  %v23034_v32 = vpop.xlane.xlu1 %6377 }
 0x798   :  { %v23009_v39 = vadd.f32 %v22970_v7, %v8935_v14  ;;  %25448 = vst [vmem:[#allocation146_spill] sm:$0xff] %v23034_v32 }
 0x799   :  { %25443 = vst [vmem:[#allocation141_spill] sm:$0xff] %v23004_v10  ;;  %v17063_v57 = vpop.f32.mrb[120].mxu0  ;;  %v9646_v34 = vsel %vm1449_vm1, %v23004_v10, -inf  ;;  %v23068_v10 = vadd.f32 %v22970_v7, %v22950_v52 }
 0x79a   :  { %25444 = vst [vmem:[#allocation150_spill] sm:$0xff] %v23009_v39  ;;  %v23014_v38 = vadd.f32 %v17063_v57, %v22934_v50  ;;  %v9028_v15 = vpop.f32.mrb[121].mxu0  ;;  %9647 = vmax.xlane.f32.xlu1 %v9646_v34  ;;  %v9643_v61 = vsel %vm1449_vm1, %v23009_v39, -inf }
 0x79b   :  { %v23017_v59 = vadd.f32 %v22970_v7, %v9028_v15 }
 0x79e   :  { %v17070_v63 = vpop.f32.mrb[90].mxu1  ;;  %9644 = vmax.xlane.f32.xlu1 %v9643_v61  ;;  %v23038_v61 = vadd.f32 %v22939_v31, %v22934_v50 }
 0x79f   :  { %v23024_v14 = vadd.f32 %v17070_v63, %v22934_v50  ;;  %v9121_v35 = vpop.f32.mrb[91].mxu1  ;;  %v9595_v63 = vsel %vm1449_vm1, %v23027_v26, -inf }
 0x7a0   :  { %v23030_v57 = vadd.f32 %v22970_v7, %v9121_v35  ;;  %v9604_v31 = vsel %vm1449_vm1, %v23038_v61, -inf }
 0x7a1   :  { %25446 = vst [vmem:[#allocation153_spill] sm:$0xff] %v23024_v14  ;;  %v17077_v34 = vpop.f32.mrb[122].mxu0  ;;  %v9658_v15 = vsel %vm1449_vm1, %v23024_v14, -inf }
 0x7a2   :  { %25447 = vst [vmem:[#allocation142_spill] sm:$0xff] %v23030_v57  ;;  %v9214_v49 = vpop.f32.mrb[123].mxu0  ;;  %9659 = vmax.xlane.f32.xlu1 %v9658_v15  ;;  %v23043_v4 = vadd.f32 %v17077_v34, %v22934_v50  ;;  %v9655_v35 = vsel %vm1449_vm1, %v23030_v57, -inf  ;;  %v23049_v15 = vadd.f32 %v22970_v7, %v22945_v24 }
 0x7a4   :  { %25449 = vst [vmem:[#allocation147_spill] sm:$0xff] %v23043_v4  ;;  %v9664_v34 = vsel %vm1449_vm1, %v23043_v4, -inf  ;;  %v25454_v4 = vld [vmem:[#allocation23_spill] sm:$0xff] }
 0x7a5   :  { %9596 = vmax.xlane.f32.xlu0 %v9595_v63  ;;  %v23058_v63 = vpop.xlane.xlu1 %6383  ;;  %v1008_v52 = vadd.f32 %v22785_v48, %v25454_v4 }
 0x7a6   :  { %v17084_v56 = vpop.f32.mrb[92].mxu1  ;;  %9656 = vmax.xlane.f32.xlu1 %v9655_v35  ;;  %25451 = vst [vmem:[#allocation148_spill] sm:$0xff] %v23058_v63 }
 0x7a7   :  { %v9307_v3 = vpop.f32.mrb[93].mxu1  ;;  %v23054_v32 = vadd.f32 %v17084_v56, %v22934_v50  ;;  %v9601_v56 = vsel %vm1449_vm1, %v23049_v15, -inf }
 0x7a9   :  { %25450 = vst [vmem:[#allocation152_spill] sm:$0xff] %v23054_v32  ;;  %v17091_v14 = vpop.f32.mrb[124].mxu0  ;;  %9605 = vmax.xlane.f32.xlu0 %v9604_v31  ;;  %v23073_v31 = vadd.f32 %v22970_v7, %v9214_v49  ;;  %v23082_v39 = vpop.xlane.xlu1 %6374 }
 0x7aa   :  { %v23061_v35 = vadd.f32 %v17091_v14, %v22934_v50  ;;  %v9400_v57 = vpop.f32.mrb[125].mxu0  ;;  %9665 = vmax.xlane.f32.xlu1 %v9664_v34  ;;  %v9670_v14 = vsel %vm1449_vm1, %v23054_v32, -inf  ;;  %25455 = vst [vmem:[#allocation151_spill] sm:$0xff] %v23082_v39 }
 0x7ab   :  { %v23064_v24 = vadd.f32 %v22970_v7, %v9400_v57  ;;  %25452 = vst [vmem:[#allocation154_spill] sm:$0xff] %v23073_v31  ;;  %v9661_v4 = vsel %vm1449_vm1, %v23073_v31, -inf }
 0x7ad   :  { %9602 = vmax.xlane.f32.xlu0 %v9601_v56  ;;  %v9607_v56 = vsel %vm1449_vm1, %v23068_v10, -inf  ;;  %v23112_v31 = vpop.xlane.xlu1 %6380 }
 0x7ae   :  { %v17098_v63 = vpop.f32.mrb[94].mxu1  ;;  %9671 = vmax.xlane.f32.xlu1 %v9670_v14  ;;  %v23094_v14 = vadd.f32 %v22970_v7, %v9307_v3  ;;  %v9616_v3 = vsel %vm1449_vm1, %v23086_v62, -inf  ;;  %25459 = vst [vmem:[#allocation64_spill] sm:$0xff] %v23112_v31 }
 0x7af   :  { %v23078_v34 = vadd.f32 %v17098_v63, %v22934_v50  ;;  %v9493_v57 = vpop.f32.mrb[95].mxu1 }
 0x7b0   :  { %v23089_v49 = vadd.f32 %v22970_v7, %v9493_v57  ;;  %v15554_v57 = vmul.f32 -1.442695, %v1008_v52  ;;  %v23122_v52 = vadd.f32 %v22970_v7, %v22980_v60  ;;  %v23136_v60 = vadd.f32 %v22970_v7, %v22999_v42  ;;  %v25462_v42 = vld [vmem:[#allocation22_spill] sm:$0xff] }
 0x7b1   :  { %25453 = vst [vmem:[#allocation149_spill] sm:$0xff] %v23078_v34  ;;  %v17105_v63 = vpop.f32.mrb[126].mxu0  ;;  %9608 = vmax.xlane.f32.xlu0 %v9607_v56  ;;  %v9667_v56 = vsel %vm1449_vm1, %v23094_v14, -inf  ;;  %v23118_v23 = vpop.xlane.xlu1 %6389 }
 0x7b2   :  { %25456 = vst [vmem:[#allocation100_spill] sm:$0xff] %v23089_v49  ;;  %v23099_v39 = vadd.f32 %v17105_v63, %v22934_v50  ;;  %v9586_v32 = vpop.f32.mrb[127].mxu0  ;;  %9662 = vmax.xlane.f32.xlu1 %v9661_v4  ;;  %19001 = vpow2.f32 %v15554_v57  ;;  %v9613_v50 = vsel %vm1449_vm1, %v23106_v25, -inf  ;;  %25460 = vst [vmem:[#allocation42_spill] sm:$0xff] %v23118_v23  ;;  %v9628_v63 = vsel %vm1449_vm1, %v22978_v53, -inf }
 0x7b3   :  { %v23102_v41 = vadd.f32 %v22970_v7, %v9586_v32  ;;  %v9676_v32 = vsel %vm1449_vm1, %v23061_v35, -inf  ;;  %v9682_v4 = vsel %vm1449_vm1, %v23078_v34, -inf  ;;  %v9625_v57 = vsel %vm1449_vm1, %v23122_v52, -inf }
 0x7b4   :  { %25457 = vst [vmem:[#allocation61_spill] sm:$0xff] %v23099_v39  ;;  %v1007_v7 = vadd.f32 %v22785_v48, %v25462_v42  ;;  %v9649_v23 = vsel %vm1449_vm1, %v23017_v59, -inf }
 0x7b5   :  { %25458 = vst [vmem:[#allocation67_spill] sm:$0xff] %v23102_v41  ;;  %9617 = vmax.xlane.f32.xlu0 %v9616_v3 }
 0x7b6   :  { %9668 = vmax.xlane.f32.xlu1 %v9667_v56  ;;  %v9688_v56 = vsel %vm1449_vm1, %v23099_v39, -inf }
 0x7b9   :  { %9614 = vmax.xlane.f32.xlu0 %v9613_v50  ;;  %v23132_v50 = vpop.xlane.xlu1 %6386 }
 0x7ba   :  { %9677 = vmax.xlane.f32.xlu1 %v9676_v32  ;;  %25461 = vst [vmem:[#allocation72_spill] sm:$0xff] %v23132_v50  ;;  %v9640_v32 = vsel %vm1449_vm1, %v22997_v17, -inf }
 0x7bc   :  { %v19002_v3 = vpop.eup %19001 }
 0x7bd   :  { %9629 = vmax.xlane.f32.xlu0 %v9628_v63  ;;  %v1136_v63 = vadd.f32 1.0, %v19002_v3 }
 0x7be   :  { %9683 = vmax.xlane.f32.xlu1 %v9682_v4 }
 0x7bf   :  { %19003 = vrcp.f32 %v1136_v63  ;;  %v9679_v63 = vsel %vm1449_vm1, %v23089_v49, -inf  ;;  %v25470_v49 = vld [vmem:[#allocation10_spill] sm:$0xff] }
 0x7c1   :  { %9626 = vmax.xlane.f32.xlu0 %v9625_v57  ;;  %v9637_v57 = vsel %vm1449_vm1, %v23136_v60, -inf }
 0x7c2   :  { %9689 = vmax.xlane.f32.xlu1 %v9688_v56  ;;  %v9652_v56 = vsel %vm1449_vm1, %v23014_v38, -inf }
 0x7c5   :  { %9641 = vmax.xlane.f32.xlu0 %v9640_v32  ;;  %v15553_v32 = vmul.f32 -1.442695, %v1007_v7 }
 0x7c7   :  { %v7942_v4 = vpop.permute.xlu1 %7941  ;;  %19005 = vpow2.f32 %v15553_v32  ;;  %v25464_v32 = vld [vmem:[#allocation101_spill] sm:$0xff] }
 0x7c8   :  { %8023 = vst.msk [vmem:[#allocation4 + $0x78] sm:$0xff] %vm8007_vm4, %v7942_v4  ;;  %v9673_v4 = vsel %vm1449_vm1, %v23064_v24, -inf  ;;  %v3096_v31 = vsel %vm1449_vm1, %v25464_v32, 0.0 }
 0x7c9   :  { %9638 = vmax.xlane.f32.xlu0 %v9637_v57  ;;  %v19004_v3 = vpop.eup %19003  ;;  %v9685_v57 = vsel %vm1449_vm1, %v23102_v41, -inf  ;;  %v25467_v41 = vld [vmem:[#allocation41_spill] sm:$0xff] }
 0x7cd   :  { %9653 = vmax.xlane.f32.xlu0 %v9652_v56 }
 0x7d1   :  { %9650 = vmax.xlane.f32.xlu0 %v9649_v23  ;;  %v19006_v56 = vpop.eup %19005  ;;  %v25463_v23 = vld [vmem:[#allocation25_spill] sm:$0xff] }
 0x7d2   :  { %v1135_v42 = vadd.f32 1.0, %v19006_v56 }
 0x7d3   :  { %1279 = vrot.lane.b32.xlu1 %v19004_v3, %s19481_s2  ;;  %v1010_v3 = vadd.f32 %v22785_v48, %v25463_v23 }
 0x7d4   :  { %19007 = vrcp.f32 %v1135_v42  ;;  %v25466_v42 = vld [vmem:[#allocation8_spill] sm:$0xff] }
 0x7d5   :  { %9674 = vmax.xlane.f32.xlu0 %v9673_v4  ;;  %v15556_v50 = vmul.f32 -1.442695, %v1010_v3  ;;  %v6345_v4 = vpop.xlane.xlu0 %6344  ;;  %v993_v23 = vadd.f32 %v22785_v48, %v25466_v42  ;;  %v25468_v3 = vld [vmem:[#allocation9_spill] sm:$0xff] }
 0x7d6   :  { %v994_v39 = vadd.f32 %v22785_v48, %v25468_v3  ;;  %v995_v3 = vadd.f32 %v22785_v48, %v25470_v49 }
 0x7d7   :  { %19009 = vpow2.f32 %v15556_v50  ;;  %v15539_v32 = vmul.f32 -1.442695, %v993_v23 }
 0x7d8   :  { %19011 = vrcp.f32 %v22929_v40  ;;  %v15540_v50 = vmul.f32 -1.442695, %v994_v39  ;;  %v25471_v39 = vld [vmem:[#allocation11_spill] sm:$0xff] }
 0x7d9   :  { %9680 = vmax.xlane.f32.xlu0 %v9679_v63  ;;  %19013 = vpow2.f32 %v15539_v32 }
 0x7da   :  { %19015 = vpow2.f32 %v15540_v50 }
 0x7dd   :  { %9686 = vmax.xlane.f32.xlu0 %v9685_v57  ;;  %v25465_v57 = vld [vmem:[#allocation102_spill] sm:$0xff] }
 0x7de   :  { %v19008_v7 = vpop.eup %19007  ;;  %v3099_v56 = vsel %vm1449_vm1, %v25465_v57, 0.0  ;;  %v25469_v57 = vld [vmem:[#allocation24_spill] sm:$0xff] }
 0x7f3   :  { %1277 = vrot.lane.b32.xlu0 %v19008_v7, %s19481_s2  ;;  %v3153_v7 = vsel %vm1449_vm1, %v25467_v41, 0.0 }
 0x7f7   :  { %3097 = vadd.xlane.f32.xlu1 %v3096_v31  ;;  %v19010_v31 = vpop.eup %19009 }
 0x7f8   :  { %v7940_v63 = vpop.permute.xlu0 %7939  ;;  %v19012_v42 = vpop.eup %19011 }
 0x7f9   :  { %8022 = vst.msk [vmem:[#allocation4 + $0x70] sm:$0xff] %vm8007_vm4, %v7940_v63  ;;  %v1138_v63 = vadd.f32 1.0, %v19010_v31  ;;  %v19014_v23 = vpop.eup %19013  ;;  %v7864_v40 = vmul.f32 %v19012_v42, %v22814_v33  ;;  %v15541_v31 = vmul.f32 -1.442695, %v995_v3  ;;  %v25473_v42 = vld [vmem:[#allocation26_spill] sm:$0xff]  ;;  %v25474_v3 = vld [vmem:[#allocation27_spill] sm:$0xff] }
 0x7fa   :  { %v19016_v50 = vpop.eup %19015 }
 0x7fb   :  { %3100 = vadd.xlane.f32.xlu1 %v3099_v56  ;;  %v1009_v56 = vadd.f32 %v22785_v48, %v25469_v57  ;;  %19017 = vrcp.f32 %v1138_v63  ;;  %v1121_v57 = vadd.f32 1.0, %v19014_v23  ;;  %v1122_v33 = vadd.f32 1.0, %v19016_v50 }
 0x7fc   :  { %19019 = vrcp.f32 %v22862_v29  ;;  %v25472_v29 = vld [vmem:[#allocation80_spill] sm:$0xff]  ;;  %v1012_v23 = vadd.f32 %v22785_v48, %v25474_v3 }
 0x7fd   :  { %v15555_v41 = vmul.f32 -1.442695, %v1009_v56  ;;  %19021 = vrcp.f32 %v22856_v27  ;;  %v3150_v63 = vsel %vm1449_vm1, %v25472_v29, 0.0 }
 0x7ff   :  { %3154 = vadd.xlane.f32.xlu1 %v3153_v7  ;;  %v996_v7 = vadd.f32 %v22785_v48, %v25471_v39  ;;  %19023 = vpow2.f32 %v15555_v41  ;;  %v1011_v39 = vadd.f32 %v22785_v48, %v25473_v42 }
 0x800   :  { %19025 = vpow2.f32 %v15541_v31 }
 0x801   :  { %v15542_v27 = vmul.f32 -1.442695, %v996_v7  ;;  %19027 = vrcp.f32 %v1121_v57  ;;  %v15557_v7 = vmul.f32 -1.442695, %v1011_v39  ;;  %v25475_v57 = vld [vmem:[#allocation12_spill] sm:$0xff] }
 0x803   :  { %19029 = vpow2.f32 %v15542_v27  ;;  %v25476_v27 = vld [vmem:[#allocation13_spill] sm:$0xff] }
 0x804   :  { %19031 = vrcp.f32 %v1122_v33 }
 0x805   :  { %v19018_v49 = vpop.eup %19017  ;;  %19033 = vrcp.f32 %v22878_v51 }
 0x806   :  { %v19020_v56 = vpop.eup %19019  ;;  %19035 = vrcp.f32 %v6345_v4 }
 0x807   :  { %v23180_v32 = vpop.xlane.xlu1 %9599  ;;  %v7847_v41 = vmul.f32 %v19020_v56, %v22771_v19  ;;  %v997_v19 = vadd.f32 %v22785_v48, %v25475_v57  ;;  %19037 = vpow2.f32 %v15557_v7  ;;  %v998_v56 = vadd.f32 %v22785_v48, %v25476_v27 }
 0x808   :  { %19039 = vrcp.f32 %v22868_v22  ;;  %v25477_v22 = vld [vmem:[#allocation28_spill] sm:$0xff] }
 0x809   :  { %v15543_v4 = vmul.f32 -1.442695, %v997_v19  ;;  %v15544_v39 = vmul.f32 -1.442695, %v998_v56 }
 0x80f   :  { %v23185_v34 = vpop.xlane.xlu1 %9611 }
 0x810   :  { %7945 = vrot.lane.b32.xlu1 %v7864_v40, %s19486_s27  ;;  %v19022_v40 = vpop.eup %19021 }
 0x811   :  { %v19024_v31 = vpop.eup %19023  ;;  %v7848_v50 = vmul.f32 %v19022_v40, %v22767_v9 }
 0x812   :  { %3151 = vadd.xlane.f32.xlu0 %v3150_v63  ;;  %v15558_v63 = vmul.f32 -1.442695, %v1012_v23  ;;  %v1137_v33 = vadd.f32 1.0, %v19024_v31  ;;  %v19026_v51 = vpop.eup %19025 }
 0x813   :  { %v19028_v42 = vpop.eup %19027  ;;  %v1123_v3 = vadd.f32 1.0, %v19026_v51 }
 0x814   :  { %1283 = vrot.lane.b32.xlu1 %v19018_v49, %s19481_s2  ;;  %19041 = vpow2.f32 %v15558_v63 }
 0x815   :  { %19043 = vrcp.f32 %v1137_v33 }
 0x816   :  { %19045 = vrcp.f32 %v22952_v44 }
 0x817   :  { %v23193_v29 = vpop.xlane.xlu1 %9623  ;;  %19047 = vpow2.f32 %v15543_v4 }
 0x818   :  { %7911 = vrot.lane.b32.xlu1 %v7847_v41, %s19486_s27  ;;  %v19030_v41 = vpop.eup %19029  ;;  %19049 = vpow2.f32 %v15544_v39 }
 0x819   :  { %v19032_v23 = vpop.eup %19031  ;;  %19051 = vrcp.f32 %v1123_v3  ;;  %v1124_v63 = vadd.f32 1.0, %v19030_v41 }
 0x81a   :  { %v19034_v40 = vpop.eup %19033  ;;  %19053 = vrcp.f32 %v22927_v30 }
 0x81b   :  { %v23200_v49 = vpop.xlane.xlu1 %9620  ;;  %v19036_v7 = vpop.eup %19035  ;;  %v7849_v19 = vmul.f32 %v19034_v40, %v22779_v5  ;;  %19055 = vrcp.f32 %v1124_v63 }
 0x81c   :  { %7913 = vrot.lane.b32.xlu1 %v7848_v50, %s19486_s27  ;;  %v1013_v50 = vadd.f32 %v22785_v48, %v25477_v22  ;;  %v19038_v57 = vpop.eup %19037  ;;  %v7863_v44 = vmul.f32 %v19036_v7, %v22818_v11  ;;  %19057 = vrcp.f32 %v22882_v0  ;;  %v25479_v22 = vld [vmem:[#allocation30_spill] sm:$0xff] }
 0x81d   :  { %v19040_v27 = vpop.eup %19039  ;;  %v1139_v4 = vadd.f32 1.0, %v19038_v57  ;;  %v1015_v0 = vadd.f32 %v22785_v48, %v25479_v22 }
 0x81e   :  { %v15559_v33 = vmul.f32 -1.442695, %v1013_v50  ;;  %v19042_v51 = vpop.eup %19041  ;;  %v7850_v5 = vmul.f32 %v19040_v27, %v22777_v1 }
 0x81f   :  { %v23206_v9 = vpop.xlane.xlu1 %9635  ;;  %v19044_v30 = vpop.eup %19043  ;;  %v1140_v3 = vadd.f32 1.0, %v19042_v51 }
 0x820   :  { %1249 = vrot.lane.b32.xlu1 %v19028_v42, %s19481_s2  ;;  %v25478_v42 = vld [vmem:[#allocation29_spill] sm:$0xff]  ;;  %v19046_v11 = vpop.eup %19045  ;;  %19059 = vpow2.f32 %v15559_v33 }
 0x821   :  { %v1014_v39 = vadd.f32 %v22785_v48, %v25478_v42  ;;  %19061 = vrcp.f32 %v1139_v4  ;;  %v7865_v1 = vmul.f32 %v19046_v11, %v22832_v12 }
 0x822   :  { %19063 = vrcp.f32 %v22874_v18  ;;  %v15561_v18 = vmul.f32 -1.442695, %v1015_v0 }
 0x823   :  { %v23210_v31 = vpop.xlane.xlu1 %9632  ;;  %v15560_v40 = vmul.f32 -1.442695, %v1014_v39  ;;  %19065 = vrcp.f32 %v1140_v3 }
 0x824   :  { %1251 = vrot.lane.b32.xlu1 %v19032_v23, %s19481_s2  ;;  %v19048_v23 = vpop.eup %19047 }
 0x825   :  { %v19050_v7 = vpop.eup %19049  ;;  %19067 = vpow2.f32 %v15560_v40 }
 0x826   :  { %v19052_v50 = vpop.eup %19051  ;;  %v1126_v27 = vadd.f32 1.0, %v19050_v7  ;;  %19069 = vrcp.f32 %v22961_v8 }
 0x827   :  { %v23218_v56 = vpop.xlane.xlu1 %9647  ;;  %v19054_v63 = vpop.eup %19053 }
 0x828   :  { %7915 = vrot.lane.b32.xlu1 %v7849_v19, %s19486_s27  ;;  %7943 = vrot.lane.b32.xlu0 %v7863_v44, %s19486_s27  ;;  %v1125_v19 = vadd.f32 1.0, %v19048_v23  ;;  %v9692_v44 = vsub.f32 %v22937_v13, %v23180_v32  ;;  %v19056_v33 = vpop.eup %19055  ;;  %v7866_v12 = vmul.f32 %v19054_v63, %v22830_v58  ;;  %v25480_v32 = vld [vmem:[#allocation31_spill] sm:$0xff] }
 0x829   :  { %v19058_v4 = vpop.eup %19057  ;;  %v1016_v8 = vadd.f32 %v22785_v48, %v25480_v32 }
 0x82a   :  { %19071 = vrcp.f32 %v1125_v19  ;;  %v9725_v13 = vmul.f32 1.442695, %v9692_v44 }
 0x82b   :  { %v23226_v41 = vpop.xlane.xlu1 %9644  ;;  %19073 = vrcp.f32 %v1126_v27  ;;  %v15562_v7 = vmul.f32 -1.442695, %v1016_v8  ;;  %v9703_v8 = vsub.f32 %v22990_v21, %v23210_v31 }
 0x82c   :  { %7917 = vrot.lane.b32.xlu1 %v7850_v5, %s19486_s27  ;;  %1281 = vrot.lane.b32.xlu0 %v19044_v30, %s19481_s2  ;;  %v19060_v30 = vpop.eup %19059  ;;  %19075 = vpow2.f32 %v15561_v18 }
 0x82d   :  { %v19062_v11 = vpop.eup %19061  ;;  %19077 = vrcp.f32 %v22943_v47 }
 0x82e   :  { %v19064_v3 = vpop.eup %19063 }
 0x82f   :  { %v23234_v57 = vpop.xlane.xlu1 %9659  ;;  %v19066_v22 = vpop.eup %19065 }
 0x830   :  { %1253 = vrot.lane.b32.xlu1 %v19052_v50, %s19481_s2  ;;  %7947 = vrot.lane.b32.xlu0 %v7865_v1, %s19486_s27  ;;  %v19068_v0 = vpop.eup %19067  ;;  %v7852_v50 = vmul.f32 %v19064_v3, %v22783_v46  ;;  %v9699_v46 = vsub.f32 %v22973_v28, %v23200_v49  ;;  %v9700_v28 = vsub.f32 %v22965_v6, %v23193_v29 }
 0x831   :  { %v19070_v1 = vpop.eup %19069  ;;  %v1142_v18 = vadd.f32 1.0, %v19068_v0  ;;  %v9704_v6 = vsub.f32 %v22987_v16, %v23206_v9  ;;  %v25482_v9 = vld [vmem:[#allocation157_spill] sm:$0xff] }
 0x832   :  { %v9597_v51 = vpop.xlane.xlu0 %9596  ;;  %v9739_v49 = vmul.f32 1.442695, %v9699_v46  ;;  %v18542_v46 = vunpack.i.l.bf16 %v25482_v9 }
 0x833   :  { %v9691_v42 = vsub.f32 %v23027_v26, %v9597_v51  ;;  %v23243_v39 = vpop.xlane.xlu1 %9656  ;;  %v7851_v26 = vmul.f32 %v19058_v4, %v22787_v45  ;;  %v1141_v45 = vadd.f32 1.0, %v19060_v30  ;;  %v9749_v0 = vmul.f32 1.442695, %v9704_v6  ;;  %v25491_v6 = vld [vmem:[#allocation96_spill] sm:$0xff] }
 0x834   :  { %1255 = vrot.lane.b32.xlu1 %v19056_v33, %s19481_s2  ;;  %7949 = vrot.lane.b32.xlu0 %v7866_v12, %s19486_s27  ;;  %v7867_v33 = vmul.f32 %v19070_v1, %v22891_v37  ;;  %v25486_v1 = vld [vmem:[#allocation150_spill] sm:$0xff] }
 0x835   :  { %v9723_v5 = vmul.f32 1.442695, %v9691_v42 }
 0x836   :  { %v9606_v58 = vpop.xlane.xlu0 %9605 }
 0x837   :  { %19079 = vpow2.f32 %v9723_v5  ;;  %v23251_v23 = vpop.xlane.xlu1 %9665  ;;  %v9694_v40 = vsub.f32 %v23038_v61, %v9606_v58  ;;  %v9696_v61 = vsub.f32 %v22948_v54, %v23185_v34  ;;  %v25481_v34 = vld [vmem:[#allocation155_spill] sm:$0xff] }
 0x838   :  { %19081 = vpow2.f32 %v9725_v13  ;;  %7919 = vrot.lane.b32.xlu1 %v7851_v26, %s19486_s27  ;;  %1285 = vrot.lane.b32.xlu0 %v19062_v11, %s19481_s2  ;;  %v18533_v12 = vunpack.i.h.bf16 %v25481_v34  ;;  %v18532_v4 = vunpack.i.l.bf16 %v25481_v34  ;;  %v18543_v26 = vunpack.i.h.bf16 %v25482_v9 }
 0x839   :  { %19083 = vrcp.f32 %v22895_v36  ;;  %v9729_v44 = vmul.f32 1.442695, %v9694_v40  ;;  %v19072_v36 = vpop.eup %19071  ;;  %v9733_v32 = vmul.f32 1.442695, %v9696_v61  ;;  %v25483_v40 = vld [vmem:[#allocation156_spill] sm:$0xff] }
 0x83a   :  { %v9603_v47 = vpop.xlane.xlu0 %9602  ;;  %19085 = vpow2.f32 %v15562_v7  ;;  %v23294_v21 = vpack.c.bf16 %v18533_v12, %v18532_v4  ;;  %v18538_v7 = vunpack.i.h.bf16 %v25483_v40  ;;  %v25489_v12 = vld [vmem:[#allocation153_spill] sm:$0xff] }
 0x83b   :  { %v9693_v63 = vsub.f32 %v23049_v15, %v9603_v47  ;;  %v23259_v19 = vpop.xlane.xlu1 %9671  ;;  %19087 = vrcp.f32 %v22886_v55  ;;  %v19074_v15 = vpop.eup %19073  ;;  %v9712_v4 = vsub.f32 %v25489_v12, %v23234_v57 }
 0x83c   :  { %7921 = vrot.lane.b32.xlu1 %v7852_v50, %s19486_s27  ;;  %1287 = vrot.lane.b32.xlu0 %v19066_v22, %s19481_s2  ;;  %19089 = vrcp.f32 %v1141_v45  ;;  %v19076_v54 = vpop.eup %19075  ;;  %v25484_v22 = vld [vmem:[#allocation132_spill] sm:$0xff]  ;;  %v18537_v45 = vunpack.i.l.bf16 %v25483_v40 }
 0x83d   :  { %v9727_v27 = vmul.f32 1.442695, %v9693_v63  ;;  %v19078_v55 = vpop.eup %19077  ;;  %v1143_v31 = vadd.f32 1.0, %v19076_v54  ;;  %v9707_v63 = vsub.f32 %v25486_v1, %v23226_v41  ;;  %v25488_v41 = vld [vmem:[#allocation142_spill] sm:$0xff] }
 0x83e   :  { %v9609_v51 = vpop.xlane.xlu0 %9608  ;;  %v7868_v11 = vmul.f32 %v19078_v55, %v22889_v20  ;;  %v9747_v20 = vmul.f32 1.442695, %v9703_v8 }
 0x83f   :  { %19091 = vpow2.f32 %v9727_v27  ;;  %v9695_v42 = vsub.f32 %v23068_v10, %v9609_v51  ;;  %v23272_v13 = vpop.xlane.xlu1 %9662  ;;  %v25487_v27 = vld [vmem:[#allocation141_spill] sm:$0xff]  ;;  %v9711_v51 = vsub.f32 %v25488_v41, %v23243_v39 }
 0x840   :  { %19093 = vpow2.f32 %v9729_v44  ;;  %1257 = vrot.lane.b32.xlu1 %v19072_v36, %s19481_s2  ;;  %7951 = vrot.lane.b32.xlu0 %v7867_v33, %s19486_s27 }
 0x841   :  { %v23278_v37 = vpop.eup %19079  ;;  %v9731_v30 = vmul.f32 1.442695, %v9695_v42  ;;  %19095 = vrcp.f32 %v1142_v18  ;;  %v9708_v18 = vsub.f32 %v25487_v27, %v23218_v56  ;;  %v25490_v42 = vld [vmem:[#allocation118_spill] sm:$0xff] }
 0x842   :  { %v23282_v10 = vpop.eup %19081  ;;  %19097 = vrcp.f32 %v23006_v2  ;;  %17110 = vmatprep.mubr.msk.f32.mxu1 %vm1449_vm1, %v23278_v37  ;;  %v9618_v29 = vpop.xlane.xlu0 %9617  ;;  %v9741_v2 = vmul.f32 1.442695, %v9700_v28  ;;  %v9755_v28 = vmul.f32 1.442695, %v9707_v63 }
 0x843   :  { %v19084_v5 = vpop.eup %19083  ;;  %19099 = vpow2.f32 %v9731_v30  ;;  %v23290_v58 = vpop.xlane.xlu1 %9668  ;;  %17111 = vmatmul.mubr.msk.f32.vlgmr.msra.gmra.mrb[96].mxu1 %vm1449_vm1, %v23282_v10  ;;  %v9698_v16 = vsub.f32 %v23086_v62, %v9618_v29  ;;  %v25485_v62 = vld [vmem:[#allocation99_spill] sm:$0xff]  ;;  %v9757_v30 = vmul.f32 1.442695, %v9708_v18  ;;  %v25498_v18 = vld [vmem:[#allocation122_spill] sm:$0xff] }
 0x844   :  { %19101 = vpow2.f32 %v9733_v32  ;;  %17941 = vmatpush3.bf16.msra.mxu1 %v22717_v43  ;;  %1259 = vrot.lane.b32.xlu1 %v19074_v15, %s19481_s2  ;;  %v19086_v3 = vpop.eup %19085  ;;  %v7853_v50 = vmul.f32 %v19084_v5, %v25485_v62  ;;  %v9763_v5 = vmul.f32 1.442695, %v9711_v51 }
 0x845   :  { %19103 = vpow2.f32 %v9739_v49  ;;  %7953 = vrot.lane.b32.xlu0 %v7868_v11, %s19486_s27  ;;  %17947 = vmatprep.subr.bf16.mxu1 %v23294_v21  ;;  %v19088_v43 = vpop.eup %19087  ;;  %v9737_v15 = vmul.f32 1.442695, %v9698_v16  ;;  %v1144_v54 = vadd.f32 1.0, %v19086_v3  ;;  %v23331_v49 = vpack.c.bf16 %v18538_v7, %v18537_v45  ;;  %v25494_v7 = vld [vmem:[#allocation129_spill] sm:$0xff] }
 0x846   :  { %19105 = vrcp.f32 %v25484_v22  ;;  %v9615_v47 = vpop.xlane.xlu0 %9614  ;;  %v19090_v36 = vpop.eup %19089  ;;  %v7854_v55 = vmul.f32 %v19088_v43, %v25490_v42  ;;  %v17954_v11 = vpack.c.bf16 %v18543_v26, %v18542_v46  ;;  %v9715_v26 = vsub.f32 %v23094_v14, %v23290_v58  ;;  %v25496_v58 = vld [vmem:[#allocation158_spill] sm:$0xff] }
 0x847   :  { %v9697_v61 = vsub.f32 %v23106_v25, %v9615_v47  ;;  %v23309_v44 = vpop.xlane.xlu1 %9677  ;;  %19107 = vrcp.f32 %v1143_v31  ;;  %v18548_v63 = vunpack.i.h.bf16 %v25496_v58 }
 0x848   :  { %19109 = vpow2.f32 %v9741_v2  ;;  %7923 = vrot.lane.b32.xlu1 %v7853_v50, %s19486_s27  ;;  %v25492_v2 = vld [vmem:[#allocation159_spill] sm:$0xff]  ;;  %v25495_v50 = vld [vmem:[#allocation152_spill] sm:$0xff]  ;;  %v9771_v41 = vmul.f32 1.442695, %v9715_v26 }
 0x849   :  { %v23315_v33 = vpop.eup %19091  ;;  %19111 = vpow2.f32 %v9747_v20  ;;  %v9735_v25 = vmul.f32 1.442695, %v9697_v61  ;;  %1289 = vrot.lane.b32.xlu0 %v19090_v36, %s19481_s2  ;;  %v18553_v16 = vunpack.i.h.bf16 %v25492_v2  ;;  %v18552_v9 = vunpack.i.l.bf16 %v25492_v2  ;;  %v25501_v26 = vld [vmem:[#allocation167_spill] sm:$0xff] }
 0x84a   :  { %v23320_v34 = vpop.eup %19093  ;;  %19113 = vpow2.f32 %v9749_v0  ;;  %17117 = vmatprep.mubr.msk.f32.mxu0 %vm1449_vm1, %v23315_v33  ;;  %v9630_v56 = vpop.xlane.xlu0 %9629  ;;  %v9765_v20 = vmul.f32 1.442695, %v9712_v4  ;;  %v9716_v43 = vsub.f32 %v25495_v50, %v23259_v19  ;;  %v18547_v61 = vunpack.i.l.bf16 %v25496_v58 }
 0x84b   :  { %v19096_v32 = vpop.eup %19095  ;;  %19115 = vpow2.f32 %v9735_v25  ;;  %v23327_v39 = vpop.xlane.xlu1 %9683  ;;  %17118 = vmatmul.mubr.msk.f32.vlgmr.msra.gmra.mrb[128].mxu0 %vm1449_vm1, %v23320_v34  ;;  %v9702_v57 = vsub.f32 %v22978_v53, %v9630_v56  ;;  %v25493_v53 = vld [vmem:[#allocation145_spill] sm:$0xff]  ;;  %v17962_v36 = vpack.c.bf16 %v18553_v16, %v18552_v9  ;;  %v25500_v9 = vld [vmem:[#allocation160_spill] sm:$0xff] }
 0x84c   :  { %v19098_v8 = vpop.eup %19097  ;;  %19117 = vpow2.f32 %v9737_v15  ;;  %17945 = vmatpush3.bf16.msra.mxu0 %v25491_v6  ;;  %7925 = vrot.lane.b32.xlu1 %v7854_v55, %s19486_s27  ;;  %v9773_v12 = vmul.f32 1.442695, %v9716_v43 }
 0x84d   :  { %v23336_v29 = vpop.eup %19099  ;;  %1291 = vrot.lane.b32.xlu0 %v19096_v32, %s19481_s2  ;;  %17951 = vmatprep.subr.bf16.mxu0 %v23331_v49  ;;  %19119 = vrcp.f32 %v1144_v54  ;;  %v7869_v22 = vmul.f32 %v19098_v8, %v25494_v7  ;;  %v9745_v45 = vmul.f32 1.442695, %v9702_v57  ;;  %v17958_v32 = vpack.c.bf16 %v18548_v63, %v18547_v61 }
 0x84e   :  { %v23340_v31 = vpop.eup %19101  ;;  %19121 = vrcp.f32 %v25493_v53  ;;  %17124 = vmatprep.mubr.msk.f32.mxu1 %vm1449_vm1, %v23336_v29  ;;  %v9627_v3 = vpop.xlane.xlu0 %9626  ;;  %v18558_v53 = vunpack.i.h.bf16 %v25500_v9 }
 0x84f   :  { %v23347_v40 = vpop.eup %19103  ;;  %19123 = vpow2.f32 %v9755_v28  ;;  %v9701_v0 = vsub.f32 %v23122_v52, %v9627_v3  ;;  %v23353_v47 = vpop.xlane.xlu1 %9689  ;;  %17125 = vmatmul.mubr.msk.f32.vlgmr.msra.gmra.mrb[98].mxu1 %vm1449_vm1, %v23340_v31 }
 0x850   :  { %v19106_v62 = vpop.eup %19105  ;;  %19125 = vpow2.f32 %v9757_v30  ;;  %17949 = vmatpush3.bf16.msra.mxu1 %v23294_v21  ;;  %17138 = vmatprep.mubr.msk.f32.mxu1 %vm1449_vm1, %v23347_v40  ;;  %v25497_v21 = vld [vmem:[#allocation163_spill] sm:$0xff] }
 0x851   :  { %v19108_v1 = vpop.eup %19107  ;;  %19127 = vpow2.f32 %v9763_v5  ;;  %v9743_v14 = vmul.f32 1.442695, %v9701_v0  ;;  %7955 = vrot.lane.b32.xlu0 %v7869_v22, %s19486_s27  ;;  %17955 = vmatprep.subr.bf16.mxu1 %v17954_v11  ;;  %v18563_v27 = vunpack.i.h.bf16 %v25497_v21  ;;  %v7870_v15 = vmul.f32 %v19106_v62, %v25498_v18 }
 0x852   :  { %v23363_v52 = vpop.eup %19109  ;;  %19129 = vpow2.f32 %v9765_v20  ;;  %v9642_v19 = vpop.xlane.xlu0 %9641  ;;  %v18562_v54 = vunpack.i.l.bf16 %v25497_v21  ;;  %v18557_v20 = vunpack.i.l.bf16 %v25500_v9  ;;  %v18583_v0 = vunpack.i.h.bf16 %v25501_v26  ;;  %v25509_v9 = vld [vmem:[#allocation100_spill] sm:$0xff] }
 0x853   :  { %v23367_v46 = vpop.eup %19111  ;;  %19131 = vpow2.f32 %v9743_v14  ;;  %v1280_v51 = vpop.permute.xlu1 %1279  ;;  %17139 = vmatmul.mubr.msk.f32.vlgmr.msra.gmra.mrb[100].mxu1 %vm1449_vm1, %v23363_v52  ;;  %v9706_v4 = vsub.f32 %v22997_v17, %v9642_v19  ;;  %v25499_v17 = vld [vmem:[#allocation165_spill] sm:$0xff]  ;;  %v18582_v62 = vunpack.i.l.bf16 %v25501_v26 }
 0x854   :  { %v23373_v25 = vpop.eup %19113  ;;  %19133 = vpow2.f32 %v9745_v45  ;;  %1360 = vst.msk [vmem:[#allocation3 + $0x78] sm:$0xff] %vm920_vm2, %v1280_v51  ;;  %17957 = vmatpush3.bf16.msra.mxu1 %v17954_v11  ;;  %17152 = vmatprep.mubr.msk.f32.mxu1 %vm1449_vm1, %v23367_v46  ;;  %v18573_v8 = vunpack.i.h.bf16 %v25499_v17  ;;  %v18572_v30 = vunpack.i.l.bf16 %v25499_v17  ;;  %v17970_v11 = vpack.c.bf16 %v18563_v27, %v18562_v54 }
 0x855   :  { %v23380_v56 = vpop.eup %19115  ;;  %7957 = vrot.lane.b32.xlu0 %v7870_v15, %s19486_s27  ;;  %17963 = vmatprep.subr.bf16.mxu1 %v17962_v36  ;;  %19135 = vpow2.f32 %v9771_v41  ;;  %v9753_v5 = vmul.f32 1.442695, %v9706_v4  ;;  %v17966_v63 = vpack.c.bf16 %v18558_v53, %v18557_v20  ;;  %v17986_v41 = vpack.c.bf16 %v18583_v0, %v18582_v62  ;;  %v25506_v4 = vld [vmem:[#allocation162_spill] sm:$0xff]  ;;  %v25511_v0 = vld [vmem:[#allocation164_spill] sm:$0xff] }
 0x856   :  { %v23383_v42 = vpop.eup %19117  ;;  %17131 = vmatprep.mubr.msk.f32.mxu0 %vm1449_vm1, %v23380_v56  ;;  %v9639_v55 = vpop.xlane.xlu0 %9638  ;;  %19137 = vpow2.f32 %v9773_v12  ;;  %v17978_v7 = vpack.c.bf16 %v18573_v8, %v18572_v30  ;;  %v9718_v54 = vsub.f32 %v23061_v35, %v23309_v44  ;;  %v25507_v8 = vld [vmem:[#allocation149_spill] sm:$0xff]  ;;  %v18578_v62 = vunpack.i.h.bf16 %v25511_v0 }
 0x857   :  { %v19120_v28 = vpop.eup %19119  ;;  %v9705_v57 = vsub.f32 %v23136_v60, %v9639_v55  ;;  %17132 = vmatmul.mubr.msk.f32.vlgmr.msra.gmra.mrb[130].mxu0 %vm1449_vm1, %v23383_v42  ;;  %17153 = vmatmul.mubr.msk.f32.vlgmr.msra.gmra.mrb[102].mxu1 %vm1449_vm1, %v23373_v25  ;;  %v18568_v55 = vunpack.i.h.bf16 %v25506_v4  ;;  %v9720_v30 = vsub.f32 %v25507_v8, %v23327_v39 }
 0x858   :  { %v19122_v6 = vpop.eup %19121  ;;  %17953 = vmatpush3.bf16.msra.mxu0 %v23331_v49  ;;  %17965 = vmatpush3.bf16.msra.mxu1 %v17962_v36  ;;  %v25504_v36 = vld [vmem:[#allocation125_spill] sm:$0xff] }
 0x859   :  { %v23395_v2 = vpop.eup %19123  ;;  %v9751_v16 = vmul.f32 1.442695, %v9705_v57  ;;  %1293 = vrot.lane.b32.xlu0 %v19108_v1, %s19481_s2  ;;  %17959 = vmatprep.subr.bf16.mxu0 %v17958_v32  ;;  %v25502_v1 = vld [vmem:[#allocation154_spill] sm:$0xff]  ;;  %v7871_v21 = vmul.f32 %v19122_v6, %v25504_v36  ;;  %v9777_v6 = vmul.f32 1.442695, %v9718_v54 }
 0x85a   :  { %v23398_v60 = vpop.eup %19125  ;;  %17166 = vmatprep.mubr.msk.f32.mxu1 %vm1449_vm1, %v23395_v2  ;;  %17971 = vmatprep.subr.bf16.mxu1 %v17970_v11  ;;  %v9654_v3 = vpop.xlane.xlu0 %9653  ;;  %v9713_v14 = vsub.f32 %v25502_v1, %v23272_v13  ;;  %v25505_v13 = vld [vmem:[#allocation147_spill] sm:$0xff]  ;;  %v9781_v20 = vmul.f32 1.442695, %v9720_v30 }
 0x85b   :  { %v23404_v49 = vpop.eup %19127  ;;  %19139 = vpow2.f32 %v9751_v16  ;;  %17167 = vmatmul.mubr.msk.f32.vlgmr.msra.gmra.mrb[104].mxu1 %vm1449_vm1, %v23398_v60  ;;  %v9710_v50 = vsub.f32 %v23014_v38, %v9654_v3  ;;  %v25503_v38 = vld [vmem:[#allocation169_spill] sm:$0xff]  ;;  %v9714_v18 = vsub.f32 %v25505_v13, %v23251_v23 }
 0x85c   :  { %v23408_v22 = vpop.eup %19129  ;;  %19141 = vpow2.f32 %v9753_v5  ;;  %17973 = vmatpush3.bf16.msra.mxu1 %v17970_v11  ;;  %17180 = vmatprep.mubr.msk.f32.mxu1 %vm1449_vm1, %v23404_v49  ;;  %v18593_v61 = vunpack.i.h.bf16 %v25503_v38  ;;  %v18592_v19 = vunpack.i.l.bf16 %v25503_v38  ;;  %v25510_v3 = vld [vmem:[#allocation61_spill] sm:$0xff]  ;;  %v9835_v5 = vsel %vm1449_vm1, %v23395_v2, 0.0 }
 0x85d   :  { %v23415_v43 = vpop.eup %19131  ;;  %1295 = vrot.lane.b32.xlu0 %v19120_v28, %s19481_s2  ;;  %17979 = vmatprep.subr.bf16.mxu1 %v17978_v7  ;;  %v9761_v15 = vmul.f32 1.442695, %v9710_v50  ;;  %v9767_v28 = vmul.f32 1.442695, %v9713_v14  ;;  %v9769_v44 = vmul.f32 1.442695, %v9714_v18  ;;  %v18577_v50 = vunpack.i.l.bf16 %v25511_v0 }
 0x85e   :  { %v23418_v45 = vpop.eup %19133  ;;  %17145 = vmatprep.mubr.msk.f32.mxu0 %vm1449_vm1, %v23415_v43  ;;  %v9651_v58 = vpop.xlane.xlu0 %9650  ;;  %v23445_v17 = vpack.c.bf16 %v18593_v61, %v18592_v19  ;;  %v25512_v14 = vld [vmem:[#allocation67_spill] sm:$0xff]  ;;  %v9838_v18 = vsel %vm1449_vm1, %v23398_v60, 0.0  ;;  %v25514_v60 = vld [vmem:[#allocation168_spill] sm:$0xff] }
 0x85f   :  { %v9709_v27 = vsub.f32 %v23017_v59, %v9651_v58  ;;  %17146 = vmatmul.mubr.msk.f32.vlgmr.msra.gmra.mrb[132].mxu0 %vm1449_vm1, %v23418_v45  ;;  %17181 = vmatmul.mubr.msk.f32.vlgmr.msra.gmra.mrb[106].mxu1 %vm1449_vm1, %v23408_v22  ;;  %v23434_v51 = vpop.eup %19135 }
 0x860   :  { %17961 = vmatpush3.bf16.msra.mxu0 %v17958_v32  ;;  %17981 = vmatpush3.bf16.msra.mxu1 %v17978_v7  ;;  %v23439_v59 = vpop.eup %19137  ;;  %v18567_v32 = vunpack.i.l.bf16 %v25506_v4  ;;  %v9722_v7 = vsub.f32 %v25510_v3, %v23353_v47  ;;  %v17982_v47 = vpack.c.bf16 %v18578_v62, %v18577_v50  ;;  %v25519_v62 = vld [vmem:[#allocation175_spill] sm:$0xff]  ;;  %v25520_v50 = vld [vmem:[#allocation173_spill] sm:$0xff] }
 0x861   :  { %v9759_v12 = vmul.f32 1.442695, %v9709_v27  ;;  %7959 = vrot.lane.b32.xlu0 %v7871_v21, %s19486_s27  ;;  %17967 = vmatprep.subr.bf16.mxu0 %v17966_v63  ;;  %v25513_v21 = vld [vmem:[#allocation166_spill] sm:$0xff] }
 0x862   :  { %17194 = vmatprep.mubr.msk.f32.mxu1 %vm1449_vm1, %v23434_v51  ;;  %17987 = vmatprep.subr.bf16.mxu1 %v17986_v41  ;;  %v9675_v23 = vpop.xlane.xlu0 %9674  ;;  %v17974_v39 = vpack.c.bf16 %v18568_v55, %v18567_v32  ;;  %v9785_v61 = vmul.f32 1.442695, %v9722_v7  ;;  %v18588_v27 = vunpack.i.h.bf16 %v25513_v21  ;;  %v18587_v13 = vunpack.i.l.bf16 %v25513_v21  ;;  %v25515_v32 = vld [vmem:[#allocation171_spill] sm:$0xff]  ;;  %v25518_v7 = vld [vmem:[#allocation172_spill] sm:$0xff]  ;;  %v25523_v21 = vld [vmem:[#allocation178_spill] sm:$0xff] }
 0x863   :  { %19143 = vpow2.f32 %v9759_v12  ;;  %v9717_v35 = vsub.f32 %v23064_v24, %v9675_v23  ;;  %17195 = vmatmul.mubr.msk.f32.vlgmr.msra.gmra.mrb[108].mxu1 %vm1449_vm1, %v23439_v59  ;;  %v18597_v23 = vunpack.i.l.bf16 %v25514_v60  ;;  %v18607_v0 = vunpack.i.l.bf16 %v25518_v7 }
 0x864   :  { %19145 = vpow2.f32 %v9761_v15  ;;  %17989 = vmatpush3.bf16.msra.mxu1 %v17986_v41  ;;  %v17990_v4 = vpack.c.bf16 %v18588_v27, %v18587_v13  ;;  %v18618_v27 = vunpack.i.h.bf16 %v25523_v21  ;;  %v18617_v13 = vunpack.i.l.bf16 %v25523_v21 }
 0x865   :  { %v23452_v57 = vpop.eup %19139  ;;  %17996 = vmatprep.subr.msk.bf16.mxu1 %vm20478_vm3, %v23445_v17  ;;  %19147 = vpow2.f32 %v9767_v28  ;;  %v9775_v24 = vmul.f32 1.442695, %v9717_v35  ;;  %v18598_v28 = vunpack.i.h.bf16 %v25514_v60  ;;  %v18603_v35 = vunpack.i.h.bf16 %v25515_v32  ;;  %v25526_v60 = vld [vmem:[#allocation182_spill] sm:$0xff] }
 0x866   :  { %v23457_v11 = vpop.eup %19141  ;;  %17159 = vmatprep.mubr.msk.f32.mxu0 %vm1449_vm1, %v23452_v57  ;;  %v9681_v16 = vpop.xlane.xlu0 %9680  ;;  %19149 = vpow2.f32 %v9769_v44  ;;  %v18602_v44 = vunpack.i.l.bf16 %v25515_v32  ;;  %v9802_v32 = vsel %vm1449_vm1, %v23340_v31, 0.0  ;;  %v25530_v31 = vld [vmem:[#allocation185_spill] sm:$0xff] }
 0x867   :  { %v9719_v53 = vsub.f32 %v25509_v9, %v9681_v16  ;;  %17160 = vmatmul.mubr.msk.f32.vlgmr.msra.gmra.mrb[134].mxu0 %vm1449_vm1, %v23457_v11  ;;  %19151 = vpow2.f32 %v9777_v6  ;;  %v18000_v6 = vpack.c.bf16 %v18598_v28, %v18597_v23  ;;  %v9850_v16 = vsel %vm1449_vm1, %v23408_v22, 0.0 }
 0x868   :  { %17969 = vmatpush3.bf16.msra.mxu0 %v17966_v63  ;;  %19153 = vpow2.f32 %v9775_v24  ;;  %v18006_v24 = vpack.c.bf16 %v18603_v35, %v18602_v44  ;;  %v9862_v28 = vsel %vm1449_vm1, %v23439_v59, 0.0  ;;  %v18024_v23 = vpack.c.bf16 %v18618_v27, %v18617_v13  ;;  %v25528_v59 = vld [vmem:[#allocation189_spill] sm:$0xff]  ;;  %v25538_v27 = vld [vmem:[#allocation191_spill] sm:$0xff] }
 0x869   :  { %v9779_v26 = vmul.f32 1.442695, %v9719_v53  ;;  %17975 = vmatprep.subr.bf16.mxu0 %v17974_v39  ;;  %v25516_v53 = vld [vmem:[#allocation170_spill] sm:$0xff]  ;;  %v18633_v44 = vunpack.i.h.bf16 %v25528_v59  ;;  %v9808_v13 = vsel %vm1449_vm1, %v23383_v42, 0.0 }
 0x86a   :  { %v9687_v1 = vpop.xlane.xlu0 %9686 }
 0x86b   :  { %19155 = vpow2.f32 %v9779_v26  ;;  %v9721_v58 = vsub.f32 %v25512_v14, %v9687_v1  ;;  %v18608_v26 = vunpack.i.h.bf16 %v25518_v7  ;;  %v9790_v1 = vsel %vm1449_vm1, %v23282_v10, 0.0  ;;  %v25531_v7 = vld [vmem:[#allocation51_spill] sm:$0xff] }
 0x86c   :  { %19157 = vpow2.f32 %v9781_v20  ;;  %v9787_v10 = vsel %vm1449_vm1, %v23278_v37, 0.0  ;;  %v9796_v37 = vsel %vm1449_vm1, %v23320_v34, 0.0  ;;  %v25527_v34 = vld [vmem:[#allocation181_spill] sm:$0xff] }
 0x86d   :  { %v19144_v38 = vpop.eup %19143  ;;  %v9783_v19 = vmul.f32 1.442695, %v9721_v58  ;;  %v9847_v58 = vsel %vm1449_vm1, %v23404_v49, 0.0 }
 0x86e   :  { %v19146_v63 = vpop.eup %19145  ;;  %17173 = vmatprep.mubr.msk.f32.mxu0 %vm1449_vm1, %v19144_v38  ;;  %v1278_v36 = vpop.permute.xlu0 %1277  ;;  %v9841_v3 = vsel %vm1449_vm1, %v19144_v38, 0.0  ;;  %v18012_v38 = vpack.c.bf16 %v18608_v26, %v18607_v0  ;;  %v25532_v0 = vld [vmem:[#allocation180_spill] sm:$0xff] }
 0x86f   :  { %19159 = vpow2.f32 %v9783_v19  ;;  %1359 = vst.msk [vmem:[#allocation3 + $0x70] sm:$0xff] %vm920_vm2, %v1278_v36  ;;  %17174 = vmatmul.mubr.msk.f32.vlgmr.msra.gmra.mrb[136].mxu0 %vm1449_vm1, %v19146_v63  ;;  %v23476_v15 = vpop.eup %19147  ;;  %v9844_v12 = vsel %vm1449_vm1, %v19146_v63, 0.0  ;;  %v25522_v63 = vld [vmem:[#allocation183_spill] sm:$0xff] }
 0x870   :  { %17977 = vmatpush3.bf16.msra.mxu0 %v17974_v39  ;;  %9839 = vadd.xlane.f32.xlu1 %v9838_v18  ;;  %19161 = vpow2.f32 %v9785_v61  ;;  %v19150_v41 = vpop.eup %19149  ;;  %v25521_v61 = vld [vmem:[#allocation176_spill] sm:$0xff]  ;;  %v18623_v36 = vunpack.i.h.bf16 %v25522_v63  ;;  %v25524_v18 = vld [vmem:[#allocation179_spill] sm:$0xff] }
 0x871   :  { %17187 = vmatprep.mubr.msk.f32.mxu0 %vm1449_vm1, %v23476_v15  ;;  %17983 = vmatprep.subr.bf16.mxu0 %v17982_v47  ;;  %v23480_v54 = vpop.eup %19151  ;;  %v9856_v49 = vsel %vm1449_vm1, %v19150_v41, 0.0 }
 0x872   :  { %v23484_v55 = vpop.eup %19153 }
 0x873   :  { %17188 = vmatmul.mubr.msk.f32.vlgmr.msra.gmra.mrb[138].mxu0 %vm1449_vm1, %v19150_v41 }
 0x874   :  { %17985 = vmatpush3.bf16.msra.mxu0 %v17982_v47  ;;  %9845 = vadd.xlane.f32.xlu1 %v9844_v12  ;;  %v18622_v47 = vunpack.i.l.bf16 %v25522_v63  ;;  %v9868_v63 = vsel %vm1449_vm1, %v23480_v54, 0.0 }
 0x875   :  { %v23490_v8 = vpop.eup %19155  ;;  %17201 = vmatprep.mubr.msk.f32.mxu0 %vm1449_vm1, %v23484_v55  ;;  %17991 = vmatprep.subr.bf16.mxu0 %v17990_v4 }
 0x876   :  { %v23494_v30 = vpop.eup %19157  ;;  %17208 = vmatprep.mubr.msk.f32.mxu1 %vm1449_vm1, %v23490_v8  ;;  %v18030_v12 = vpack.c.bf16 %v18623_v36, %v18622_v47  ;;  %v25537_v36 = vld [vmem:[#allocation190_spill] sm:$0xff] }
 0x877   :  { %17202 = vmatmul.mubr.msk.f32.vlgmr.msra.gmra.mrb[140].mxu0 %vm1449_vm1, %v23480_v54  ;;  %17209 = vmatmul.mubr.msk.f32.vlgmr.msra.gmra.mrb[110].mxu1 %vm1449_vm1, %v23494_v30  ;;  %v18638_v47 = vunpack.i.h.bf16 %v25537_v36  ;;  %v25539_v54 = vld [vmem:[#allocation137_spill] sm:$0xff] }
 0x878   :  { %17993 = vmatpush3.bf16.msra.mxu0 %v17990_v4  ;;  %17999 = vmatpush3.bf16.xpose.msk.msra.mxu1 %vm20478_vm3, %v23445_v17  ;;  %v25517_v17 = vld [vmem:[#allocation177_spill] sm:$0xff]  ;;  %v25525_v4 = vld [vmem:[#allocation174_spill] sm:$0xff] }
 0x879   :  { %v23507_v9 = vpop.eup %19159  ;;  %9851 = vadd.xlane.f32.xlu1 %v9850_v16  ;;  %17222 = vmatprep.mubr.msk.f32.mxu1 %vm1449_vm1, %v25516_v53  ;;  %v18613_v20 = vunpack.i.h.bf16 %v25517_v17  ;;  %v18612_v22 = vunpack.i.l.bf16 %v25517_v17  ;;  %v25529_v16 = vld [vmem:[#allocation184_spill] sm:$0xff] }
 0x87a   :  { %18002 = vmatprep.subr.msk.bf16.mxu0 %vm20478_vm3, %v18000_v6  ;;  %18008 = vmatprep.subr.msk.bf16.mxu1 %vm20478_vm3, %v18006_v24  ;;  %v23515_v39 = vpop.eup %19161  ;;  %v18628_v53 = vunpack.i.h.bf16 %v25529_v16  ;;  %v18627_v17 = vunpack.i.l.bf16 %v25529_v16  ;;  %v9805_v16 = vsel %vm1449_vm1, %v23380_v56, 0.0 }
 0x87b   :  { %17215 = vmatprep.mubr.msk.f32.mxu0 %vm1449_vm1, %v23507_v9  ;;  %v18018_v14 = vpack.c.bf16 %v18613_v20, %v18612_v22  ;;  %v9793_v22 = vsel %vm1449_vm1, %v23315_v33, 0.0 }
 0x87c   :  { %17216 = vmatmul.mubr.msk.f32.vlgmr.msra.gmra.mrb[142].mxu0 %vm1449_vm1, %v23515_v39  ;;  %v18036_v33 = vpack.c.bf16 %v18628_v53, %v18627_v17 }
 0x87d   :  { %9842 = vadd.xlane.f32.xlu1 %v9841_v3  ;;  %17229 = vmatprep.mubr.msk.f32.mxu0 %vm1449_vm1, %v25519_v62  ;;  %v25533_v62 = vld [vmem:[#allocation188_spill] sm:$0xff] }
 0x87f   :  { %17223 = vmatmul.mubr.msk.f32.vlgmr.msra.gmra.mrb[112].mxu1 %vm1449_vm1, %v25520_v50  ;;  %v9859_v50 = vsel %vm1449_vm1, %v23434_v51, 0.0 }
 0x880   :  { %9791 = vadd.xlane.f32.xlu0 %v9790_v1  ;;  %18011 = vmatpush3.bf16.xpose.msk.msra.mxu1 %vm20478_vm3, %v18006_v24  ;;  %v9853_v24 = vsel %vm1449_vm1, %v23476_v15, 0.0 }
 0x881   :  { %17236 = vmatprep.mubr.msk.f32.mxu1 %vm1449_vm1, %v25521_v61  ;;  %9848 = vadd.xlane.f32.xlu1 %v9847_v58  ;;  %v9799_v58 = vsel %vm1449_vm1, %v23336_v29, 0.0  ;;  %v18637_v29 = vunpack.i.l.bf16 %v25537_v36 }
 0x882   :  { %18005 = vmatpush3.bf16.xpose.msk.msra.mxu0 %vm20478_vm3, %v18000_v6  ;;  %18020 = vmatprep.subr.msk.bf16.mxu1 %vm20478_vm3, %v18018_v14  ;;  %v18632_v6 = vunpack.i.l.bf16 %v25528_v59  ;;  %v9865_v59 = vsel %vm1449_vm1, %v23484_v55, 0.0  ;;  %v25546_v55 = vld [vmem:[#allocation107_spill] sm:$0xff] }
 0x883   :  { %18014 = vmatprep.subr.msk.bf16.mxu0 %vm20478_vm3, %v18012_v38  ;;  %v18048_v42 = vpack.c.bf16 %v18638_v47, %v18637_v29  ;;  %v25555_v29 = vld [vmem:[#allocation53_spill] sm:$0xff] }
 0x884   :  { %9788 = vadd.xlane.f32.xlu0 %v9787_v10  ;;  %v3098_v19 = vpop.xlane.xlu1 %3097  ;;  %v18042_v15 = vpack.c.bf16 %v18633_v44, %v18632_v6  ;;  %v25536_v10 = vld [vmem:[#allocation105_spill] sm:$0xff]  ;;  %v25544_v44 = vld [vmem:[#allocation91_spill] sm:$0xff] }
 0x885   :  { %19163 = vrcp.f32 %v3098_v19  ;;  %9857 = vadd.xlane.f32.xlu1 %v9856_v49  ;;  %v18643_v19 = vunpack.i.h.bf16 %v25536_v10  ;;  %v18642_v49 = vunpack.i.l.bf16 %v25536_v10  ;;  %v18648_v6 = vunpack.i.h.bf16 %v25544_v44 }
 0x886   :  { %v9877_v10 = vsel %vm1449_vm1, %v23507_v9, 0.0 }
 0x887   :  { %17237 = vmatmul.mubr.msk.f32.vlgmr.msra.gmra.mrb[114].mxu1 %vm1449_vm1, %v25524_v18 }
 0x888   :  { %9797 = vadd.xlane.f32.xlu0 %v9796_v37  ;;  %18023 = vmatpush3.bf16.xpose.msk.msra.mxu1 %vm20478_vm3, %v18018_v14  ;;  %v3101_v41 = vpop.xlane.xlu1 %3100  ;;  %v25534_v14 = vld [vmem:[#allocation187_spill] sm:$0xff] }
 0x889   :  { %17230 = vmatmul.mubr.msk.f32.vlgmr.msra.gmra.mrb[144].mxu0 %vm1449_vm1, %v25525_v4  ;;  %17250 = vmatprep.mubr.msk.f32.mxu1 %vm1449_vm1, %v25526_v60  ;;  %19165 = vrcp.f32 %v3101_v41  ;;  %v18054_v41 = vpack.c.bf16 %v18643_v19, %v18642_v49  ;;  %v25541_v4 = vld [vmem:[#allocation108_spill] sm:$0xff]  ;;  %v9874_v60 = vsel %vm1449_vm1, %v23494_v30, 0.0  ;;  %v25553_v49 = vld [vmem:[#allocation161_spill] sm:$0xff] }
 0x88a   :  { %9863 = vadd.xlane.f32.xlu1 %v9862_v28  ;;  %18017 = vmatpush3.bf16.xpose.msk.msra.mxu0 %vm20478_vm3, %v18012_v38  ;;  %v25535_v38 = vld [vmem:[#allocation60_spill] sm:$0xff] }
 0x88b   :  { %17243 = vmatprep.mubr.msk.f32.mxu0 %vm1449_vm1, %v25527_v34  ;;  %18032 = vmatprep.subr.msk.bf16.mxu1 %vm20478_vm3, %v18030_v12  ;;  %v25542_v28 = vld [vmem:[#allocation104_spill] sm:$0xff]  ;;  %v25543_v34 = vld [vmem:[#allocation89_spill] sm:$0xff] }
 0x88c   :  { %18026 = vmatprep.subr.msk.bf16.mxu0 %vm20478_vm3, %v18024_v23  ;;  %9803 = vadd.xlane.f32.xlu0 %v9802_v32  ;;  %v3155_v35 = vpop.xlane.xlu1 %3154  ;;  %v18653_v32 = vunpack.i.h.bf16 %v25543_v34  ;;  %v18652_v30 = vunpack.i.l.bf16 %v25543_v34  ;;  %v25560_v34 = vld [vmem:[#allocation58_spill] sm:$0xff] }
 0x88d   :  { %19167 = vrcp.f32 %v3155_v35 }
 0x88e   :  { %9854 = vadd.xlane.f32.xlu1 %v9853_v24  ;;  %v18647_v24 = vunpack.i.l.bf16 %v25544_v44  ;;  %v18066_v17 = vpack.c.bf16 %v18653_v32, %v18652_v30 }
 0x88f   :  { %v19164_v20 = vpop.eup %19163  ;;  %17251 = vmatmul.mubr.msk.f32.vlgmr.msra.gmra.mrb[116].mxu1 %vm1449_vm1, %v25530_v31  ;;  %v25547_v31 = vld [vmem:[#allocation56_spill] sm:$0xff] }
 0x890   :  { %9794 = vadd.xlane.f32.xlu0 %v9793_v22  ;;  %18035 = vmatpush3.bf16.xpose.msk.msra.mxu1 %vm20478_vm3, %v18030_v12  ;;  %v7946_v3 = vpop.permute.xlu1 %7945  ;;  %v4496_v26 = vmul.f32 %v19164_v20, %v25531_v7  ;;  %v25540_v12 = vld [vmem:[#allocation186_spill] sm:$0xff]  ;;  %v9871_v22 = vsel %vm1449_vm1, %v23490_v8, 0.0  ;;  %v18060_v56 = vpack.c.bf16 %v18648_v6, %v18647_v24  ;;  %v25563_v24 = vld [vmem:[#allocation112_spill] sm:$0xff] }
 0x891   :  { %17244 = vmatmul.mubr.msk.f32.vlgmr.msra.gmra.mrb[146].mxu0 %vm1449_vm1, %v25532_v0  ;;  %17264 = vmatprep.mubr.msk.f32.mxu1 %vm1449_vm1, %v25533_v62  ;;  %8025 = vst.msk [vmem:[#allocation4 + $0x88] sm:$0xff] %vm8007_vm4, %v7946_v3  ;;  %v25548_v3 = vld [vmem:[#allocation109_spill] sm:$0xff]  ;;  %v9811_v0 = vsel %vm1449_vm1, %v23347_v40, 0.0  ;;  %v25551_v40 = vld [vmem:[#allocation90_spill] sm:$0xff] }
 0x892   :  { %9860 = vadd.xlane.f32.xlu1 %v9859_v50  ;;  %18029 = vmatpush3.bf16.xpose.msk.msra.mxu0 %vm20478_vm3, %v18024_v23  ;;  %4528 = vst.msk [vmem:[#allocation4 + $0x60] sm:$0xff] %vm1449_vm1, %v4496_v26  ;;  %v9814_v23 = vsel %vm1449_vm1, %v23363_v52, 0.0  ;;  %v25545_v52 = vld [vmem:[#allocation106_spill] sm:$0xff]  ;;  %v18663_v7 = vunpack.i.h.bf16 %v25548_v3  ;;  %v18662_v26 = vunpack.i.l.bf16 %v25548_v3  ;;  %v9880_v50 = vsel %vm1449_vm1, %v23515_v39, 0.0 }
 0x893   :  { %v19166_v1 = vpop.eup %19165  ;;  %17257 = vmatprep.mubr.msk.f32.mxu0 %vm1449_vm1, %v25534_v14  ;;  %18044 = vmatprep.subr.msk.bf16.mxu1 %vm20478_vm3, %v18042_v15 }
 0x894   :  { %18038 = vmatprep.subr.msk.bf16.mxu0 %vm20478_vm3, %v18036_v33  ;;  %9800 = vadd.xlane.f32.xlu0 %v9799_v58  ;;  %v1284_v51 = vpop.permute.xlu1 %1283  ;;  %v4497_v61 = vmul.f32 %v19166_v1, %v25535_v38  ;;  %v18078_v58 = vpack.c.bf16 %v18663_v7, %v18662_v26  ;;  %v25568_v26 = vld [vmem:[#allocation103_spill] sm:$0xff] }
 0x895   :  { %1362 = vst.msk [vmem:[#allocation3 + $0x88] sm:$0xff] %vm920_vm2, %v1284_v51  ;;  %v9820_v51 = vsel %vm1449_vm1, %v23418_v45, 0.0 }
 0x896   :  { %9869 = vadd.xlane.f32.xlu1 %v9868_v63  ;;  %4529 = vst.msk [vmem:[#allocation4 + $0x68] sm:$0xff] %vm1449_vm1, %v4497_v61  ;;  %v25552_v61 = vld [vmem:[#allocation62_spill] sm:$0xff]  ;;  %v25554_v63 = vld [vmem:[#allocation68_spill] sm:$0xff] }
 0x897   :  { %v19168_v21 = vpop.eup %19167  ;;  %17265 = vmatmul.mubr.msk.f32.vlgmr.msra.gmra.mrb[118].mxu1 %vm1449_vm1, %v25538_v27  ;;  %v18673_v36 = vunpack.i.h.bf16 %v25554_v63  ;;  %v18672_v47 = vunpack.i.l.bf16 %v25554_v63  ;;  %v25556_v27 = vld [vmem:[#allocation139_spill] sm:$0xff] }
 0x898   :  { %9809 = vadd.xlane.f32.xlu0 %v9808_v13  ;;  %18047 = vmatpush3.bf16.xpose.msk.msra.mxu1 %vm20478_vm3, %v18042_v15  ;;  %v7912_v18 = vpop.permute.xlu1 %7911  ;;  %v4515_v37 = vmul.f32 %v19168_v21, %v25539_v54  ;;  %v25549_v15 = vld [vmem:[#allocation88_spill] sm:$0xff]  ;;  %v9826_v21 = vsel %vm1449_vm1, %v23373_v25, 0.0  ;;  %v25557_v54 = vld [vmem:[#allocation66_spill] sm:$0xff]  ;;  %v9817_v25 = vsel %vm1449_vm1, %v23415_v43, 0.0  ;;  %v25561_v43 = vld [vmem:[#allocation63_spill] sm:$0xff] }
 0x899   :  { %17258 = vmatmul.mubr.msk.f32.vlgmr.msra.gmra.mrb[148].mxu0 %vm1449_vm1, %v25540_v12  ;;  %17278 = vmatprep.mubr.msk.f32.mxu1 %vm1449_vm1, %v25541_v4  ;;  %8008 = vst.msk [vmem:[#allocation4] sm:$0xff] %vm8007_vm4, %v7912_v18  ;;  %v25558_v12 = vld [vmem:[#allocation92_spill] sm:$0xff]  ;;  %v18683_v32 = vunpack.i.h.bf16 %v25561_v43  ;;  %v18682_v30 = vunpack.i.l.bf16 %v25561_v43 }
 0x89a   :  { %9875 = vadd.xlane.f32.xlu1 %v9874_v60  ;;  %18041 = vmatpush3.bf16.xpose.msk.msra.mxu0 %vm20478_vm3, %v18036_v33  ;;  %4547 = vst.msk [vmem:[#allocation4 + $0xf8] sm:$0xff] %vm1449_vm1, %v4515_v37  ;;  %v25550_v33 = vld [vmem:[#allocation110_spill] sm:$0xff]  ;;  %v18668_v37 = vunpack.i.h.bf16 %v25557_v54  ;;  %v18090_v60 = vpack.c.bf16 %v18673_v36, %v18672_v47 }
 0x89b   :  { %17271 = vmatprep.mubr.msk.f32.mxu0 %vm1449_vm1, %v25542_v28  ;;  %18056 = vmatprep.subr.msk.bf16.mxu1 %vm20478_vm3, %v18054_v41  ;;  %v18658_v1 = vunpack.i.h.bf16 %v25550_v33  ;;  %v18657_v14 = vunpack.i.l.bf16 %v25550_v33  ;;  %v25559_v28 = vld [vmem:[#allocation111_spill] sm:$0xff] }
 0x89c   :  { %18050 = vmatprep.subr.msk.bf16.mxu0 %vm20478_vm3, %v18048_v42  ;;  %9815 = vadd.xlane.f32.xlu0 %v9814_v23  ;;  %v7914_v35 = vpop.permute.xlu1 %7913 }
 0x89d   :  { %8009 = vst.msk [vmem:[#allocation4 + $0x8] sm:$0xff] %vm8007_vm4, %v7914_v35  ;;  %v18072_v19 = vpack.c.bf16 %v18658_v1, %v18657_v14  ;;  %v25562_v35 = vld [vmem:[#allocation93_spill] sm:$0xff] }
 0x89e   :  { %9866 = vadd.xlane.f32.xlu1 %v9865_v59  ;;  %v9823_v59 = vsel %vm1449_vm1, %v23367_v46, 0.0  ;;  %v9832_v46 = vsel %vm1449_vm1, %v23457_v11, 0.0  ;;  %v25567_v11 = vld [vmem:[#allocation94_spill] sm:$0xff] }
 0x89f   :  { %17279 = vmatmul.mubr.msk.f32.vlgmr.msra.gmra.mrb[120].mxu1 %vm1449_vm1, %v25545_v52  ;;  %v3152_v53 = vpop.xlane.xlu0 %3151  ;;  %v18678_v52 = vunpack.i.h.bf16 %v25563_v24 }
 0x8a0   :  { %9806 = vadd.xlane.f32.xlu0 %v9805_v16  ;;  %18059 = vmatpush3.bf16.xpose.msk.msra.mxu1 %vm20478_vm3, %v18054_v41  ;;  %19169 = vrcp.f32 %v3152_v53  ;;  %v1250_v20 = vpop.permute.xlu1 %1249  ;;  %v18667_v41 = vunpack.i.l.bf16 %v25557_v54  ;;  %v18677_v16 = vunpack.i.l.bf16 %v25563_v24  ;;  %v25564_v53 = vld [vmem:[#allocation57_spill] sm:$0xff] }
 0x8a1   :  { %17272 = vmatmul.mubr.msk.f32.vlgmr.msra.gmra.mrb[150].mxu0 %vm1449_vm1, %v25546_v55  ;;  %17292 = vmatprep.mubr.msk.f32.mxu1 %vm1449_vm1, %v25547_v31  ;;  %1345 = vst.msk [vmem:[#allocation3] sm:$0xff] %vm920_vm2, %v1250_v20  ;;  %v23738_v20 = vpack.c.bf16 %v18683_v32, %v18682_v30  ;;  %v25566_v31 = vld [vmem:[#allocation95_spill] sm:$0xff] }
 0x8a2   :  { %18068 = vmatprep.subr.msk.bf16.mxu1 %vm20478_vm3, %v18066_v17  ;;  %9872 = vadd.xlane.f32.xlu1 %v9871_v22  ;;  %v18084_v23 = vpack.c.bf16 %v18668_v37, %v18667_v41  ;;  %v18094_v22 = vpack.c.bf16 %v18678_v52, %v18677_v16 }
 0x8a3   :  { %18053 = vmatpush3.bf16.xpose.msk.msra.mxu0 %vm20478_vm3, %v18048_v42  ;;  %17285 = vmatprep.mubr.msk.f32.mxu0 %vm1449_vm1, %v25549_v15  ;;  %v7944_v62 = vpop.permute.xlu0 %7943  ;;  %25565 = vst [vmem:[#allocation43_spill] sm:$0xff] %v23738_v20  ;;  %v18688_v15 = vunpack.i.h.bf16 %v25568_v26 }
 0x8a4   :  { %18062 = vmatprep.subr.msk.bf16.mxu0 %vm20478_vm3, %v18060_v56  ;;  %9812 = vadd.xlane.f32.xlu0 %v9811_v0  ;;  %8024 = vst.msk [vmem:[#allocation4 + $0x80] sm:$0xff] %vm8007_vm4, %v7944_v62  ;;  %v1252_v8 = vpop.permute.xlu1 %1251  ;;  %v18687_v0 = vunpack.i.l.bf16 %v25568_v26 }
 0x8a5   :  { %1346 = vst.msk [vmem:[#allocation3 + $0x8] sm:$0xff] %vm920_vm2, %v1252_v8  ;;  %v25569_v8 = vld [vmem:[#allocation69_spill] sm:$0xff] }
 0x8a6   :  { %9881 = vadd.xlane.f32.xlu1 %v9880_v50  ;;  %v23761_v50 = vpack.c.bf16 %v18688_v15, %v18687_v0 }
 0x8a7   :  { %17293 = vmatmul.mubr.msk.f32.vlgmr.msra.gmra.mrb[122].mxu1 %vm1449_vm1, %v25551_v40  ;;  %v1282_v38 = vpop.permute.xlu0 %1281 }
 0x8a8   :  { %9821 = vadd.xlane.f32.xlu0 %v9820_v51  ;;  %18071 = vmatpush3.bf16.xpose.msk.msra.mxu1 %vm20478_vm3, %v18066_v17  ;;  %1361 = vst.msk [vmem:[#allocation3 + $0x80] sm:$0xff] %vm920_vm2, %v1282_v38  ;;  %v7916_v39 = vpop.permute.xlu1 %7915  ;;  %25570 = vst [vmem:[#allocation65_spill] sm:$0xff] %v23761_v50 }
 0x8a9   :  { %17306 = vmatprep.mubr.msk.f32.mxu1 %vm1449_vm1, %v25552_v61  ;;  %8010 = vst.msk [vmem:[#allocation4 + $0x10] sm:$0xff] %vm8007_vm4, %v7916_v39  ;;  %18080 = vmatprep.subr.msk.bf16.mxu1 %vm20478_vm3, %v18078_v58 }
 0x8aa   :  { %v19170_v45 = vpop.eup %19169  ;;  %17286 = vmatmul.mubr.msk.f32.vlgmr.msra.gmra.mrb[152].mxu0 %vm1449_vm1, %v25553_v49  ;;  %9878 = vadd.xlane.f32.xlu1 %v9877_v10 }
 0x8ab   :  { %18065 = vmatpush3.bf16.xpose.msk.msra.mxu0 %vm20478_vm3, %v18060_v56  ;;  %17299 = vmatprep.mubr.msk.f32.mxu0 %vm1449_vm1, %v25555_v29  ;;  %v7948_v9 = vpop.permute.xlu0 %7947  ;;  %v4514_v13 = vmul.f32 %v19170_v45, %v25556_v27  ;;  %v9829_v56 = vsel %vm1449_vm1, %v23452_v57, 0.0 }
 0x8ac   :  { %18074 = vmatprep.subr.msk.bf16.mxu0 %vm20478_vm3, %v18072_v19  ;;  %9827 = vadd.xlane.f32.xlu0 %v9826_v21  ;;  %8026 = vst.msk [vmem:[#allocation4 + $0x90] sm:$0xff] %vm8007_vm4, %v7948_v9  ;;  %v7918_v18 = vpop.permute.xlu1 %7917 }
 0x8ad   :  { %8011 = vst.msk [vmem:[#allocation4 + $0x18] sm:$0xff] %vm8007_vm4, %v7918_v18 }
 0x8ae   :  { %4546 = vst.msk [vmem:[#allocation4 + $0xf0] sm:$0xff] %vm1449_vm1, %v4514_v13 }
 0x8af   :  { %17307 = vmatmul.mubr.msk.f32.vlgmr.msra.gmra.mrb[124].mxu1 %vm1449_vm1, %v25558_v12  ;;  %v7950_v4 = vpop.permute.xlu0 %7949 }
 0x8b0   :  { %9818 = vadd.xlane.f32.xlu0 %v9817_v25  ;;  %18083 = vmatpush3.bf16.xpose.msk.msra.mxu1 %vm20478_vm3, %v18078_v58  ;;  %8027 = vst.msk [vmem:[#allocation4 + $0x98] sm:$0xff] %vm8007_vm4, %v7950_v4  ;;  %v1254_v42 = vpop.permute.xlu1 %1253 }
 0x8b1   :  { %17320 = vmatprep.mubr.msk.f32.mxu1 %vm1449_vm1, %v25559_v28  ;;  %1347 = vst.msk [vmem:[#allocation3 + $0x10] sm:$0xff] %vm920_vm2, %v1254_v42  ;;  %18091 = vmatprep.subr.bf16.mxu1 %v18090_v60 }
 0x8b2   :  { %17300 = vmatmul.mubr.msk.f32.vlgmr.msra.gmra.mrb[154].mxu0 %vm1449_vm1, %v25560_v34 }
 0x8b3   :  { %18077 = vmatpush3.bf16.xpose.msk.msra.mxu0 %vm20478_vm3, %v18072_v19  ;;  %17313 = vmatprep.mubr.msk.f32.mxu0 %vm1449_vm1, %v25562_v35  ;;  %v1286_v44 = vpop.permute.xlu0 %1285 }
 0x8b4   :  { %18086 = vmatprep.subr.msk.bf16.mxu0 %vm20478_vm3, %v18084_v23  ;;  %9824 = vadd.xlane.f32.xlu0 %v9823_v59  ;;  %1363 = vst.msk [vmem:[#allocation3 + $0x90] sm:$0xff] %vm920_vm2, %v1286_v44  ;;  %v1256_v6 = vpop.permute.xlu1 %1255 }
 0x8b5   :  { %1348 = vst.msk [vmem:[#allocation3 + $0x18] sm:$0xff] %vm920_vm2, %v1256_v6 }
 0x8b7   :  { %17321 = vmatmul.mubr.msk.f32.vlgmr.msra.gmra.mrb[126].mxu1 %vm1449_vm1, %v25564_v53  ;;  %v1288_v17 = vpop.permute.xlu0 %1287 }
 0x8b8   :  { %9833 = vadd.xlane.f32.xlu0 %v9832_v46  ;;  %18093 = vmatpush3.bf16.msra.mxu1 %v18090_v60  ;;  %1364 = vst.msk [vmem:[#allocation3 + $0x98] sm:$0xff] %vm920_vm2, %v1288_v17  ;;  %v7920_v55 = vpop.permute.xlu1 %7919 }
 0x8b9   :  { %8012 = vst.msk [vmem:[#allocation4 + $0x20] sm:$0xff] %vm8007_vm4, %v7920_v55  ;;  %18099 = vmatprep.subr.bf16.mxu1 %v23738_v20 }
 0x8ba   :  { %17314 = vmatmul.mubr.msk.f32.vlgmr.msra.gmra.mrb[156].mxu0 %vm1449_vm1, %v25566_v31 }
 0x8bb   :  { %18089 = vmatpush3.bf16.xpose.msk.msra.mxu0 %vm20478_vm3, %v18084_v23  ;;  %17327 = vmatprep.mubr.msk.f32.mxu0 %vm1449_vm1, %v25567_v11  ;;  %v7952_v3 = vpop.permute.xlu0 %7951 }
 0x8bc   :  { %18095 = vmatprep.subr.bf16.mxu0 %v18094_v22  ;;  %9830 = vadd.xlane.f32.xlu0 %v9829_v56  ;;  %8028 = vst.msk [vmem:[#allocation4 + $0xa0] sm:$0xff] %vm8007_vm4, %v7952_v3  ;;  %v7922_v7 = vpop.permute.xlu1 %7921 }
 0x8bd   :  { %8013 = vst.msk [vmem:[#allocation4 + $0x28] sm:$0xff] %vm8007_vm4, %v7922_v7 }
 0x8bf   :  { %v7954_v62 = vpop.permute.xlu0 %7953 }
 0x8c0   :  { %9836 = vadd.xlane.f32.xlu0 %v9835_v5  ;;  %8029 = vst.msk [vmem:[#allocation4 + $0xa8] sm:$0xff] %vm8007_vm4, %v7954_v62  ;;  %v1258_v57 = vpop.permute.xlu1 %1257 }
 0x8c1   :  { %1349 = vst.msk [vmem:[#allocation3 + $0x20] sm:$0xff] %vm920_vm2, %v1258_v57 }
 0x8c2   :  { %17328 = vmatmul.mubr.msk.f32.vlgmr.msra.gmra.mrb[158].mxu0 %vm1449_vm1, %v25569_v8 }
 0x8c3   :  { %18097 = vmatpush3.bf16.msra.mxu0 %v18094_v22  ;;  %v1290_v33 = vpop.permute.xlu0 %1289 }
 0x8c4   :  { %18103 = vmatprep.subr.bf16.mxu0 %v23761_v50  ;;  %1365 = vst.msk [vmem:[#allocation3 + $0xa0] sm:$0xff] %vm920_vm2, %v1290_v33  ;;  %v1260_v1 = vpop.permute.xlu1 %1259 }
 0x8c5   :  { %1350 = vst.msk [vmem:[#allocation3 + $0x28] sm:$0xff] %vm920_vm2, %v1260_v1 }
 0x8c7   :  { %v1292_v2 = vpop.permute.xlu0 %1291 }
 0x8c8   :  { %1366 = vst.msk [vmem:[#allocation3 + $0xa8] sm:$0xff] %vm920_vm2, %v1292_v2  ;;  %v7924_v14 = vpop.permute.xlu1 %7923 }
 0x8c9   :  { %8014 = vst.msk [vmem:[#allocation4 + $0x30] sm:$0xff] %vm8007_vm4, %v7924_v14 }
 0x8cb   :  { %v7956_v58 = vpop.permute.xlu0 %7955 }
 0x8cc   :  { %8030 = vst.msk [vmem:[#allocation4 + $0xb0] sm:$0xff] %vm8007_vm4, %v7956_v58  ;;  %v7926_v40 = vpop.permute.xlu1 %7925 }
 0x8cd   :  { %8015 = vst.msk [vmem:[#allocation4 + $0x38] sm:$0xff] %vm8007_vm4, %v7926_v40 }
 0x8cf   :  { %v7958_v51 = vpop.permute.xlu0 %7957 }
 0x8d0   :  { %8031 = vst.msk [vmem:[#allocation4 + $0xb8] sm:$0xff] %vm8007_vm4, %v7958_v51 }
 0x8d3   :  { %v1294_v38 = vpop.permute.xlu0 %1293 }
 0x8d4   :  { %1367 = vst.msk [vmem:[#allocation3 + $0xb0] sm:$0xff] %vm920_vm2, %v1294_v38 }
 0x8d7   :  { %v1296_v39 = vpop.permute.xlu0 %1295 }
 0x8d8   :  { %1368 = vst.msk [vmem:[#allocation3 + $0xb8] sm:$0xff] %vm920_vm2, %v1296_v39 }
 0x8db   :  { %v7960_v61 = vpop.permute.xlu0 %7959 }
 0x8dc   :  { %8032 = vst.msk [vmem:[#allocation4 + $0xc0] sm:$0xff] %vm8007_vm4, %v7960_v61 }
 0x8fd   :  { %v9840_v11 = vpop.xlane.xlu1 %9839 }
 0x901   :  { %v9846_v0 = vpop.xlane.xlu1 %9845 }
 0x906   :  { %v9852_v57 = vpop.xlane.xlu1 %9851 }
 0x90a   :  { %v9843_v58 = vpop.xlane.xlu1 %9842 }
 0x90d   :  { %v9792_v10 = vpop.xlane.xlu0 %9791 }
 0x90e   :  { %19171 = vrcp.f32 %v9792_v10 }
 0x911   :  { %v9789_v45 = vpop.xlane.xlu0 %9788 }
 0x912   :  { %19173 = vrcp.f32 %v9789_v45  ;;  %v9849_v45 = vpop.xlane.xlu1 %9848 }
 0x915   :  { %v9798_v19 = vpop.xlane.xlu0 %9797 }
 0x916   :  { %19175 = vrcp.f32 %v9798_v19  ;;  %v17112_v49 = vpop.f32.mrb[96].mxu1 }
 0x917   :  { %v9963_v63 = vpop.f32.mrb[97].mxu1 }
 0x918   :  { %v19172_v36 = vpop.eup %19171 }
 0x919   :  { %v11340_v47 = vmul.f32 %v19172_v36, %v17112_v49  ;;  %v9804_v29 = vpop.xlane.xlu0 %9803 }
 0x91a   :  { %19177 = vrcp.f32 %v9804_v29 }
 0x91b   :  { %11405 = vrot.lane.b32.xlu1 %v11340_v47, %s19484_s25 }
 0x91c   :  { %v19174_v21 = vpop.eup %19173 }
 0x91d   :  { %v11339_v9 = vmul.f32 %v19174_v21, %v9963_v63  ;;  %v9795_v27 = vpop.xlane.xlu0 %9794 }
 0x91e   :  { %19179 = vrcp.f32 %v9795_v27  ;;  %v17119_v13 = vpop.f32.mrb[128].mxu0 }
 0x91f   :  { %11403 = vrot.lane.b32.xlu1 %v11339_v9, %s19484_s25  ;;  %v10052_v18 = vpop.f32.mrb[129].mxu0  ;;  %v9858_v9 = vpop.xlane.xlu1 %9857 }
 0x920   :  { %v19176_v54 = vpop.eup %19175 }
 0x921   :  { %v11342_v37 = vmul.f32 %v19176_v54, %v17119_v13  ;;  %v9801_v41 = vpop.xlane.xlu0 %9800 }
 0x922   :  { %19181 = vrcp.f32 %v9801_v41  ;;  %v17126_v12 = vpop.f32.mrb[98].mxu1 }
 0x923   :  { %11409 = vrot.lane.b32.xlu1 %v11342_v37, %s19484_s25  ;;  %v10141_v25 = vpop.f32.mrb[99].mxu1  ;;  %v23841_v41 = vpop.xlane.xlu1 %9863 }
 0x924   :  { %v19178_v4 = vpop.eup %19177 }
 0x925   :  { %v11344_v60 = vmul.f32 %v19178_v4, %v17126_v12  ;;  %v23777_v42 = vpop.xlane.xlu0 %9809 }
 0x926   :  { %v23779_v28 = vpop.f32.mrb[100].mxu1 }
 0x927   :  { %11413 = vrot.lane.b32.xlu1 %v11344_v60, %s19484_s25  ;;  %v23782_v23 = vpop.f32.mrb[101].mxu1 }
 0x928   :  { %v19180_v34 = vpop.eup %19179 }
 0x929   :  { %v11341_v43 = vmul.f32 %v19180_v34, %v10052_v18  ;;  %v23784_v32 = vpop.xlane.xlu0 %9815 }
 0x92a   :  { %v23786_v30 = vpop.f32.mrb[130].mxu0  ;;  %v23788_v35 = vpop.f32.mrb[102].mxu1 }
 0x92b   :  { %25571 = vst [vmem:[#allocation46_spill] sm:$0xff] %v23788_v35  ;;  %11407 = vrot.lane.b32.xlu1 %v11341_v43, %s19484_s25  ;;  %v23791_v59 = vpop.f32.mrb[131].mxu0  ;;  %v23793_v6 = vpop.f32.mrb[103].mxu1 }
 0x92c   :  { %v19182_v44 = vpop.eup %19181 }
 0x92d   :  { %v11343_v24 = vmul.f32 %v19182_v44, %v10141_v25  ;;  %v23795_v52 = vpop.xlane.xlu0 %9806 }
 0x92e   :  { %v17168_v16 = vpop.f32.mrb[104].mxu1 }
 0x92f   :  { %11411 = vrot.lane.b32.xlu1 %v11343_v24, %s19484_s25  ;;  %v10675_v53 = vpop.f32.mrb[105].mxu1  ;;  %v9855_v24 = vpop.xlane.xlu1 %9854 }
 0x931   :  { %v23798_v46 = vpop.xlane.xlu0 %9812 }
 0x932   :  { %v23800_v17 = vpop.f32.mrb[132].mxu0  ;;  %v17182_v55 = vpop.f32.mrb[106].mxu1 }
 0x933   :  { %v23802_v31 = vpop.f32.mrb[133].mxu0  ;;  %v23804_v22 = vpop.f32.mrb[107].mxu1 }
 0x935   :  { %v23806_v56 = vpop.xlane.xlu0 %9821 }
 0x936   :  { %v23808_v3 = vpop.f32.mrb[108].mxu1 }
 0x937   :  { %v23810_v7 = vpop.f32.mrb[109].mxu1 }
 0x939   :  { %v23812_v26 = vpop.xlane.xlu0 %9827 }
 0x93a   :  { %25572 = vst [vmem:[#allocation71_spill] sm:$0xff] %v23812_v26  ;;  %v17161_v15 = vpop.f32.mrb[134].mxu0 }
 0x93b   :  { %v10586_v5 = vpop.f32.mrb[135].mxu0 }
 0x93d   :  { %v23814_v62 = vpop.xlane.xlu0 %9818 }
 0x941   :  { %v23816_v8 = vpop.xlane.xlu0 %9824 }
 0x942   :  { %v17175_v33 = vpop.f32.mrb[136].mxu0 }
 0x943   :  { %v10764_v1 = vpop.f32.mrb[137].mxu0 }
 0x945   :  { %v9834_v2 = vpop.xlane.xlu0 %9833 }
 0x946   :  { %19183 = vrcp.f32 %v9834_v2  ;;  %v23818_v14 = vpop.f32.mrb[138].mxu0 }
 0x947   :  { %v23820_v40 = vpop.f32.mrb[139].mxu0  ;;  %19185 = vrcp.f32 %v9840_v11 }
 0x949   :  { %v9831_v51 = vpop.xlane.xlu0 %9830 }
 0x94a   :  { %19187 = vrcp.f32 %v9831_v51  ;;  %v23822_v38 = vpop.f32.mrb[140].mxu0  ;;  %v23824_v39 = vpop.f32.mrb[110].mxu1 }
 0x94b   :  { %v23826_v61 = vpop.f32.mrb[141].mxu0  ;;  %v23828_v10 = vpop.f32.mrb[111].mxu1 }
 0x94d   :  { %v9837_v19 = vpop.xlane.xlu0 %9836 }
 0x94e   :  { %19189 = vrcp.f32 %v9837_v19 }
 0x94f   :  { %v23830_v49 = vpop.f32.mrb[142].mxu0  ;;  %19191 = vrcp.f32 %v9846_v0 }
 0x950   :  { %25573 = vst [vmem:[#allocation48_spill] sm:$0xff] %v23830_v49  ;;  %v19184_v63 = vpop.eup %19183  ;;  %v23832_v36 = vpop.f32.mrb[143].mxu0  ;;  %19193 = vrcp.f32 %v9852_v57 }
 0x951   :  { %25574 = vst [vmem:[#allocation73_spill] sm:$0xff] %v23832_v36  ;;  %v11354_v47 = vmul.f32 %v19184_v63, %v17161_v15  ;;  %v19186_v21 = vpop.eup %19185  ;;  %19195 = vrcp.f32 %v9843_v58  ;;  %v23856_v57 = vpop.xlane.xlu1 %9860 }
 0x952   :  { %v23834_v29 = vpop.f32.mrb[112].mxu1  ;;  %v11356_v18 = vmul.f32 %v19186_v21, %v17168_v16  ;;  %19197 = vrcp.f32 %v9849_v45 }
 0x953   :  { %v23836_v27 = vpop.f32.mrb[113].mxu1  ;;  %11433 = vrot.lane.b32.xlu1 %v11354_v47, %s19484_s25  ;;  %19199 = vrcp.f32 %v9858_v9 }
 0x954   :  { %v19188_v13 = vpop.eup %19187  ;;  %19201 = vrcp.f32 %v9855_v24 }
 0x955   :  { %v11353_v54 = vmul.f32 %v19188_v13, %v10586_v5  ;;  %v23862_v45 = vpop.xlane.xlu1 %9869 }
 0x957   :  { %11437 = vrot.lane.b32.xlu1 %v11356_v18, %s19484_s25  ;;  %11431 = vrot.lane.b32.xlu0 %v11353_v54, %s19484_s25 }
 0x958   :  { %v19190_v37 = vpop.eup %19189 }
 0x959   :  { %v11355_v12 = vmul.f32 %v19190_v37, %v10675_v53  ;;  %v19192_v60 = vpop.eup %19191  ;;  %v23869_v13 = vpop.xlane.xlu1 %9875 }
 0x95a   :  { %v23843_v25 = vpop.f32.mrb[114].mxu1  ;;  %v11358_v43 = vmul.f32 %v19192_v60, %v17175_v33  ;;  %v19194_v16 = vpop.eup %19193 }
 0x95b   :  { %v23845_v4 = vpop.f32.mrb[115].mxu1  ;;  %11435 = vrot.lane.b32.xlu0 %v11355_v12, %s19484_s25  ;;  %v11360_v11 = vmul.f32 %v19194_v16, %v17182_v55  ;;  %v19196_v0 = vpop.eup %19195  ;;  %v23878_v12 = vld [vmem:[%s24805_s1 + $0x30] sm:$0xff] }
 0x95c   :  { %v23848_v34 = vpop.f32.mrb[144].mxu0  ;;  %v11357_v2 = vmul.f32 %v19196_v0, %v10764_v1  ;;  %v19198_v58 = vpop.eup %19197 }
 0x95d   :  { %v11776_v44 = vpop.f32.mrb[145].mxu0  ;;  %v11359_v51 = vmul.f32 %v19198_v58, %v23804_v22  ;;  %v19200_v63 = vpop.eup %19199 }
 0x95e   :  { %v11362_v21 = vmul.f32 %v19200_v63, %v23818_v14  ;;  %v19202_v9 = vpop.eup %19201  ;;  %v23881_v60 = vadd.f32 %v23878_v12, %v11776_v44 }
 0x95f   :  { %11441 = vrot.lane.b32.xlu0 %v11358_v43, %s19484_s25  ;;  %v11361_v22 = vmul.f32 %v19202_v9, %v23820_v40  ;;  %v23883_v43 = vpop.xlane.xlu1 %9866  ;;  %v23888_v40 = vld [vmem:[%s24805_s1 + $0x38] sm:$0xff] }
 0x962   :  { %v23851_v53 = vpop.f32.mrb[116].mxu1 }
 0x963   :  { %v23853_v15 = vpop.f32.mrb[117].mxu1  ;;  %11445 = vrot.lane.b32.xlu0 %v11360_v11, %s19484_s25  ;;  %v13093_v11 = vsel %vm1449_vm1, %v23881_v60, -inf }
 0x964   :  { %v17245_v5 = vpop.f32.mrb[146].mxu0 }
 0x965   :  { %v11962_v33 = vpop.f32.mrb[147].mxu0  ;;  %v23891_v24 = vadd.f32 %v17245_v5, %v23888_v40 }
 0x966   :  { %v23900_v58 = vadd.f32 %v23878_v12, %v11962_v33 }
 0x967   :  { %11439 = vrot.lane.b32.xlu0 %v11357_v2, %s19484_s25  ;;  %25575 = vst [vmem:[#allocation44_spill] sm:$0xff] %v23891_v24  ;;  %v23897_v2 = vpop.xlane.xlu1 %9872  ;;  %v13108_v63 = vsel %vm1449_vm1, %v23891_v24, -inf }
 0x968   :  { %v13105_v9 = vsel %vm1449_vm1, %v23900_v58, -inf }
 0x96a   :  { %v23860_v55 = vpop.f32.mrb[118].mxu1 }
 0x96b   :  { %v23864_v19 = vpop.f32.mrb[119].mxu1  ;;  %11443 = vrot.lane.b32.xlu0 %v11359_v51, %s19484_s25 }
 0x96c   :  { %v17259_v47 = vpop.f32.mrb[148].mxu0 }
 0x96d   :  { %v12148_v1 = vpop.f32.mrb[149].mxu0  ;;  %v23907_v5 = vadd.f32 %v17259_v47, %v23888_v40 }
 0x96e   :  { %v23918_v49 = vadd.f32 %v23878_v12, %v12148_v1  ;;  %v23937_v1 = vadd.f32 %v23834_v29, %v23888_v40 }
 0x96f   :  { %11449 = vrot.lane.b32.xlu0 %v11362_v21, %s19484_s25  ;;  %25576 = vst [vmem:[#allocation74_spill] sm:$0xff] %v23907_v5  ;;  %v13120_v47 = vsel %vm1449_vm1, %v23907_v5, -inf }
 0x970   :  { %25578 = vst [vmem:[#allocation86_spill] sm:$0xff] %v23918_v49  ;;  %v13090_v29 = vsel %vm1449_vm1, %v23937_v1, -inf }
 0x972   :  { %v17280_v18 = vpop.f32.mrb[120].mxu1 }
 0x973   :  { %v23872_v54 = vpop.f32.mrb[121].mxu1  ;;  %11447 = vrot.lane.b32.xlu0 %v11361_v22, %s19484_s25  ;;  %v23913_v22 = vpop.xlane.xlu1 %9881 }
 0x974   :  { %v17273_v37 = vpop.f32.mrb[150].mxu0  ;;  %25577 = vst [vmem:[#allocation49_spill] sm:$0xff] %v23913_v22 }
 0x975   :  { %v12334_v14 = vpop.f32.mrb[151].mxu0  ;;  %v23927_v35 = vadd.f32 %v17273_v37, %v23888_v40 }
 0x977   :  { %25580 = vst [vmem:[#allocation82_spill] sm:$0xff] %v23927_v35  ;;  %v13132_v20 = vsel %vm1449_vm1, %v23927_v35, -inf }
 0x97a   :  { %v17294_v16 = vpop.f32.mrb[122].mxu1 }
 0x97b   :  { %v23895_v0 = vpop.f32.mrb[123].mxu1  ;;  %13094 = vmax.xlane.f32.xlu1 %v13093_v11 }
 0x97d   :  { %v17287_v44 = vpop.f32.mrb[152].mxu0 }
 0x97e   :  { %v23902_v51 = vpop.f32.mrb[153].mxu0  ;;  %v23966_v24 = vadd.f32 %v17287_v44, %v23888_v40  ;;  %v23980_v44 = vadd.f32 %v17294_v16, %v23888_v40 }
 0x97f   :  { %13109 = vmax.xlane.f32.xlu1 %v13108_v63  ;;  %v23924_v63 = vpop.xlane.xlu1 %9878 }
 0x980   :  { %25579 = vst [vmem:[#allocation54_spill] sm:$0xff] %v23924_v63  ;;  %v23940_v63 = vadd.f32 %v17280_v18, %v23888_v40  ;;  %25582 = vst [vmem:[#allocation81_spill] sm:$0xff] %v23966_v24  ;;  %v13150_v16 = vsel %vm1449_vm1, %v23980_v44, -inf }
 0x982   :  { %v23909_v21 = vpop.f32.mrb[124].mxu1  ;;  %v13138_v18 = vsel %vm1449_vm1, %v23940_v63, -inf }
 0x983   :  { %v23915_v11 = vpop.f32.mrb[125].mxu1  ;;  %13106 = vmax.xlane.f32.xlu1 %v13105_v9  ;;  %v13117_v9 = vsel %vm1449_vm1, %v23918_v49, -inf  ;;  %v23954_v49 = vadd.f32 %v23878_v12, %v12334_v14 }
 0x985   :  { %v17301_v33 = vpop.f32.mrb[154].mxu0  ;;  %25581 = vst [vmem:[#allocation47_spill] sm:$0xff] %v23954_v49 }
 0x986   :  { %v23920_v36 = vpop.f32.mrb[155].mxu0 }
 0x987   :  { %13121 = vmax.xlane.f32.xlu1 %v13120_v47 }
 0x98a   :  { %v23929_v50 = vpop.f32.mrb[126].mxu1 }
 0x98b   :  { %v23933_v22 = vpop.f32.mrb[127].mxu1  ;;  %13118 = vmax.xlane.f32.xlu1 %v13117_v9  ;;  %v23949_v9 = vadd.f32 %v23878_v12, %v23836_v27 }
 0x98d   :  { %v17315_v26 = vpop.f32.mrb[156].mxu0  ;;  %v11406_v47 = vpop.permute.xlu1 %11405  ;;  %v13087_v35 = vsel %vm1449_vm1, %v23949_v9, -inf }
 0x98e   :  { %v23942_v37 = vpop.f32.mrb[157].mxu0  ;;  %11501 = vst.msk [vmem:[#allocation4 + $0x8] sm:$0xff] %vm11499_vm5, %v11406_v47 }
 0x98f   :  { %13133 = vmax.xlane.f32.xlu1 %v13132_v20  ;;  %v23961_v20 = vadd.f32 %v23848_v34, %v23888_v40  ;;  %v23975_v34 = vadd.f32 %v23843_v25, %v23888_v40 }
 0x991   :  { %v11404_v5 = vpop.permute.xlu1 %11403 }
 0x992   :  { %11500 = vst.msk [vmem:[#allocation4] sm:$0xff] %vm11499_vm5, %v11404_v5  ;;  %13091 = vmax.xlane.f32.xlu0 %v13090_v29  ;;  %v13129_v5 = vsel %vm1449_vm1, %v23954_v49, -inf  ;;  %v23992_v49 = vadd.f32 %v17301_v33, %v23888_v40  ;;  %v24007_v33 = vadd.f32 %v23909_v21, %v23888_v40 }
 0x993   :  { %13139 = vmax.xlane.f32.xlu1 %v13138_v18  ;;  %v13096_v18 = vsel %vm1449_vm1, %v23961_v20, -inf }
 0x994   :  { %v13162_v21 = vsel %vm1449_vm1, %v24007_v33, -inf }
 0x995   :  { %v17329_v27 = vpop.f32.mrb[158].mxu0  ;;  %v11410_v47 = vpop.permute.xlu1 %11409 }
 0x996   :  { %v23968_v14 = vpop.f32.mrb[159].mxu0  ;;  %11503 = vst.msk [vmem:[#allocation4 + $0x18] sm:$0xff] %vm11499_vm5, %v11410_v47  ;;  %13088 = vmax.xlane.f32.xlu0 %v13087_v35  ;;  %v13144_v35 = vsel %vm1449_vm1, %v23966_v24, -inf  ;;  %v23987_v47 = vadd.f32 %v23878_v12, %v23845_v4  ;;  %v24001_v4 = vadd.f32 %v23851_v53, %v23888_v40  ;;  %v24014_v53 = vadd.f32 %v23878_v12, %v23853_v15 }
 0x997   :  { %13130 = vmax.xlane.f32.xlu1 %v13129_v5  ;;  %v13102_v5 = vsel %vm1449_vm1, %v23975_v34, -inf }
 0x998   :  { %v13099_v24 = vsel %vm1449_vm1, %v23987_v47, -inf  ;;  %v13111_v15 = vsel %vm1449_vm1, %v24014_v53, -inf }
 0x999   :  { %v11414_v29 = vpop.permute.xlu1 %11413 }
 0x99a   :  { %11505 = vst.msk [vmem:[#allocation4 + $0x28] sm:$0xff] %vm11499_vm5, %v11414_v29  ;;  %13097 = vmax.xlane.f32.xlu0 %v13096_v18  ;;  %v25583_v29 = vld [vmem:[#allocation14_spill] sm:$0xff] }
 0x99b   :  { %13145 = vmax.xlane.f32.xlu1 %v13144_v35  ;;  %v999_v18 = vadd.f32 %v22785_v48, %v25583_v29  ;;  %v24019_v29 = vadd.f32 %v17315_v26, %v23888_v40 }
 0x99d   :  { %v11408_v25 = vpop.permute.xlu1 %11407  ;;  %v13168_v26 = vsel %vm1449_vm1, %v24019_v29, -inf }
 0x99e   :  { %11502 = vst.msk [vmem:[#allocation4 + $0x10] sm:$0xff] %vm11499_vm5, %v11408_v25  ;;  %13103 = vmax.xlane.f32.xlu0 %v13102_v5  ;;  %v13156_v25 = vsel %vm1449_vm1, %v23992_v49, -inf  ;;  %v15545_v5 = vmul.f32 -1.442695, %v999_v18  ;;  %v24027_v18 = vadd.f32 %v23860_v55, %v23888_v40 }
 0x99f   :  { %13151 = vmax.xlane.f32.xlu1 %v13150_v16  ;;  %v13114_v16 = vsel %vm1449_vm1, %v24001_v4, -inf }
 0x9a0   :  { %19203 = vpow2.f32 %v15545_v5  ;;  %v24038_v5 = vadd.f32 %v23878_v12, %v23864_v19  ;;  %v13126_v55 = vsel %vm1449_vm1, %v24027_v18, -inf }
 0x9a1   :  { %v11412_v35 = vpop.permute.xlu1 %11411 }
 0x9a2   :  { %11504 = vst.msk [vmem:[#allocation4 + $0x20] sm:$0xff] %vm11499_vm5, %v11412_v35  ;;  %13100 = vmax.xlane.f32.xlu0 %v13099_v24  ;;  %v25584_v24 = vld [vmem:[#allocation15_spill] sm:$0xff]  ;;  %v13123_v19 = vsel %vm1449_vm1, %v24038_v5, -inf }
 0x9a3   :  { %13157 = vmax.xlane.f32.xlu1 %v13156_v25  ;;  %v1000_v35 = vadd.f32 %v22785_v48, %v25584_v24  ;;  %v24032_v25 = vadd.f32 %v17329_v27, %v23888_v40  ;;  %v24047_v24 = vadd.f32 %v23878_v12, %v23872_v54  ;;  %v24062_v54 = vadd.f32 %v23878_v12, %v23895_v0  ;;  %v25586_v0 = vld [vmem:[#allocation17_spill] sm:$0xff] }
 0x9a6   :  { %13115 = vmax.xlane.f32.xlu0 %v13114_v16  ;;  %v15546_v16 = vmul.f32 -1.442695, %v1000_v35 }
 0x9a7   :  { %13163 = vmax.xlane.f32.xlu1 %v13162_v21  ;;  %v13180_v21 = vsel %vm1449_vm1, %v24032_v25, -inf }
 0x9a8   :  { %19205 = vpow2.f32 %v15546_v16  ;;  %v25585_v16 = vld [vmem:[#allocation16_spill] sm:$0xff] }
 0x9a9   :  { %19207 = vrcp.f32 %v23795_v52  ;;  %v1001_v52 = vadd.f32 %v22785_v48, %v25585_v16  ;;  %v1002_v16 = vadd.f32 %v22785_v48, %v25586_v0 }
 0x9aa   :  { %13112 = vmax.xlane.f32.xlu0 %v13111_v15  ;;  %v19204_v27 = vpop.eup %19203  ;;  %v24053_v15 = vadd.f32 %v23878_v12, %v23902_v51 }
 0x9ab   :  { %13169 = vmax.xlane.f32.xlu1 %v13168_v26  ;;  %v1127_v35 = vadd.f32 1.0, %v19204_v27  ;;  %v13135_v26 = vsel %vm1449_vm1, %v24047_v24, -inf  ;;  %v15547_v27 = vmul.f32 -1.442695, %v1001_v52  ;;  %v24079_v52 = vadd.f32 %v23878_v12, %v23915_v11 }
 0x9ad   :  { %19209 = vrcp.f32 %v1127_v35  ;;  %v13147_v35 = vsel %vm1449_vm1, %v24062_v54, -inf  ;;  %v13159_v11 = vsel %vm1449_vm1, %v24079_v52, -inf }
 0x9ae   :  { %13127 = vmax.xlane.f32.xlu0 %v13126_v55  ;;  %19211 = vrcp.f32 %v23777_v42 }
 0x9af   :  { %13181 = vmax.xlane.f32.xlu1 %v13180_v21  ;;  %v13141_v21 = vsel %vm1449_vm1, %v24053_v15, -inf  ;;  %19213 = vpow2.f32 %v15547_v27  ;;  %v24087_v27 = vadd.f32 %v23929_v50, %v23888_v40 }
 0x9b2   :  { %13124 = vmax.xlane.f32.xlu0 %v13123_v19  ;;  %v19206_v55 = vpop.eup %19205 }
 0x9b3   :  { %v19208_v51 = vpop.eup %19207  ;;  %v1128_v19 = vadd.f32 1.0, %v19206_v55 }
 0x9b4   :  { %v11345_v42 = vmul.f32 %v19208_v51, %v23791_v59  ;;  %v15548_v59 = vmul.f32 -1.442695, %v1002_v16  ;;  %v25588_v51 = vld [vmem:[#allocation119_spill] sm:$0xff]  ;;  %v24097_v16 = vadd.f32 %v23878_v12, %v23942_v37 }
 0x9b5   :  { %19215 = vrcp.f32 %v1128_v19 }
 0x9b6   :  { %13136 = vmax.xlane.f32.xlu0 %v13135_v26  ;;  %v24068_v26 = vadd.f32 %v23878_v12, %v23920_v36 }
 0x9b7   :  { %v19210_v55 = vpop.eup %19209 }
 0x9b8   :  { %v13153_v36 = vsel %vm1449_vm1, %v24068_v26, -inf }
 0x9ba   :  { %13142 = vmax.xlane.f32.xlu0 %v13141_v21  ;;  %v25587_v21 = vld [vmem:[#allocation124_spill] sm:$0xff] }
 0x9bb   :  { %19217 = vrcp.f32 %v25587_v21  ;;  %v13174_v21 = vsel %vm1449_vm1, %v24087_v27, -inf }
 0x9bc   :  { %19219 = vrcp.f32 %v25588_v51 }
 0x9bd   :  { %19221 = vpow2.f32 %v15548_v59  ;;  %v25589_v59 = vld [vmem:[#allocation83_spill] sm:$0xff] }
 0x9be   :  { %13148 = vmax.xlane.f32.xlu0 %v13147_v35  ;;  %v19212_v35 = vpop.eup %19211  ;;  %19223 = vrcp.f32 %v23798_v46  ;;  %v24106_v46 = vadd.f32 %v23878_v12, %v23933_v22 }
 0x9bf   :  { %v19214_v0 = vpop.eup %19213 }
 0x9c0   :  { %11415 = vrot.lane.b32.xlu1 %v11345_v42, %s19484_s25  ;;  %v11346_v42 = vmul.f32 %v19212_v35, %v23786_v30  ;;  %v13165_v35 = vsel %vm1449_vm1, %v24097_v16, -inf }
 0x9c2   :  { %13154 = vmax.xlane.f32.xlu0 %v13153_v36  ;;  %v19216_v36 = vpop.eup %19215 }
 0x9c4   :  { %1261 = vrot.lane.b32.xlu1 %v19210_v55, %s19481_s2  ;;  %v1129_v55 = vadd.f32 1.0, %v19214_v0 }
 0x9c5   :  { %v11434_v19 = vpop.permute.xlu1 %11433  ;;  %v19218_v30 = vpop.eup %19217 }
 0x9c6   :  { %11515 = vst.msk [vmem:[#allocation4 + $0x78] sm:$0xff] %vm11499_vm5, %v11434_v19  ;;  %13160 = vmax.xlane.f32.xlu0 %v13159_v11  ;;  %v7855_v51 = vmul.f32 %v19218_v30, %v25589_v59  ;;  %v25590_v19 = vld [vmem:[#allocation18_spill] sm:$0xff]  ;;  %19225 = vrcp.f32 %v1129_v55  ;;  %v25592_v30 = vld [vmem:[#allocation79_spill] sm:$0xff] }
 0x9c7   :  { %v1003_v11 = vadd.f32 %v22785_v48, %v25590_v19  ;;  %19227 = vrcp.f32 %v23784_v32  ;;  %v25593_v55 = vld [vmem:[#allocation19_spill] sm:$0xff] }
 0x9c8   :  { %11417 = vrot.lane.b32.xlu1 %v11346_v42, %s19484_s25  ;;  %v19220_v42 = vpop.eup %19219  ;;  %v1004_v19 = vadd.f32 %v22785_v48, %v25593_v55  ;;  %v25596_v55 = vld [vmem:[#allocation140_spill] sm:$0xff] }
 0x9c9   :  { %v11438_v50 = vpop.permute.xlu1 %11437  ;;  %v11432_v40 = vpop.permute.xlu0 %11431 }
 0x9ca   :  { %11517 = vst.msk [vmem:[#allocation4 + $0x88] sm:$0xff] %vm11499_vm5, %v11438_v50  ;;  %11514 = vst.msk [vmem:[#allocation4 + $0x70] sm:$0xff] %vm11499_vm5, %v11432_v40  ;;  %13175 = vmax.xlane.f32.xlu0 %v13174_v21  ;;  %v25591_v50 = vld [vmem:[#allocation32_spill] sm:$0xff]  ;;  %v19222_v22 = vpop.eup %19221  ;;  %v24120_v40 = vadd.f32 %v23878_v12, %v23968_v14 }
 0x9cb   :  { %v1017_v0 = vadd.f32 %v22785_v48, %v25591_v50  ;;  %v19224_v59 = vpop.eup %19223  ;;  %v1130_v32 = vadd.f32 1.0, %v19222_v22 }
 0x9cc   :  { %1263 = vrot.lane.b32.xlu1 %v19216_v36, %s19481_s2  ;;  %v13171_v36 = vsel %vm1449_vm1, %v24106_v46, -inf  ;;  %v13177_v14 = vsel %vm1449_vm1, %v24120_v40, -inf  ;;  %v11347_v50 = vmul.f32 %v19224_v59, %v23782_v23  ;;  %v25597_v23 = vld [vmem:[#allocation120_spill] sm:$0xff] }
 0x9cd   :  { %v11436_v37 = vpop.permute.xlu0 %11435 }
 0x9ce   :  { %11516 = vst.msk [vmem:[#allocation4 + $0x80] sm:$0xff] %vm11499_vm5, %v11436_v37  ;;  %13166 = vmax.xlane.f32.xlu0 %v13165_v35  ;;  %v7856_v37 = vmul.f32 %v19220_v42, %v25592_v30  ;;  %v15549_v35 = vmul.f32 -1.442695, %v1003_v11  ;;  %v25594_v42 = vld [vmem:[#allocation33_spill] sm:$0xff] }
 0x9cf   :  { %v1018_v11 = vadd.f32 %v22785_v48, %v25594_v42 }
 0x9d0   :  { %7927 = vrot.lane.b32.xlu1 %v7855_v51, %s19486_s27  ;;  %v15563_v51 = vmul.f32 -1.442695, %v1017_v0  ;;  %19229 = vpow2.f32 %v15549_v35  ;;  %v15550_v0 = vmul.f32 -1.442695, %v1004_v19 }
 0x9d1   :  { %v11442_v21 = vpop.permute.xlu0 %11441  ;;  %v15564_v30 = vmul.f32 -1.442695, %v1018_v11 }
 0x9d2   :  { %11519 = vst.msk [vmem:[#allocation4 + $0x98] sm:$0xff] %vm11499_vm5, %v11442_v21  ;;  %13172 = vmax.xlane.f32.xlu0 %v13171_v36  ;;  %19231 = vpow2.f32 %v15563_v51  ;;  %v25595_v21 = vld [vmem:[#allocation126_spill] sm:$0xff]  ;;  %v19226_v36 = vpop.eup %19225 }
 0x9d3   :  { %19233 = vrcp.f32 %v1130_v32 }
 0x9d4   :  { %7929 = vrot.lane.b32.xlu1 %v7856_v37, %s19486_s27  ;;  %19235 = vrcp.f32 %v25595_v21  ;;  %v19228_v37 = vpop.eup %19227 }
 0x9d5   :  { %v11446_v12 = vpop.permute.xlu0 %11445  ;;  %19237 = vpow2.f32 %v15550_v0  ;;  %v11348_v59 = vmul.f32 %v19228_v37, %v23779_v28  ;;  %v25598_v0 = vld [vmem:[#allocation34_spill] sm:$0xff] }
 0x9d6   :  { %11521 = vst.msk [vmem:[#allocation4 + $0xa8] sm:$0xff] %vm11499_vm5, %v11446_v12  ;;  %13178 = vmax.xlane.f32.xlu0 %v13177_v14  ;;  %19239 = vrcp.f32 %v25596_v55  ;;  %v1019_v21 = vadd.f32 %v22785_v48, %v25598_v0  ;;  %v25600_v55 = vld [vmem:[#allocation127_spill] sm:$0xff] }
 0x9d7   :  { %19241 = vrcp.f32 %v25597_v23 }
 0x9d8   :  { %11419 = vrot.lane.b32.xlu1 %v11347_v50, %s19484_s25  ;;  %19243 = vpow2.f32 %v15564_v30 }
 0x9d9   :  { %v11440_v22 = vpop.permute.xlu0 %11439  ;;  %19245 = vrcp.f32 %v23814_v62  ;;  %v25599_v62 = vld [vmem:[#allocation75_spill] sm:$0xff] }
 0x9da   :  { %11518 = vst.msk [vmem:[#allocation4 + $0x90] sm:$0xff] %vm11499_vm5, %v11440_v22  ;;  %v19230_v51 = vpop.eup %19229  ;;  %19247 = vrcp.f32 %v23856_v57  ;;  %v15565_v57 = vmul.f32 -1.442695, %v1019_v21 }
 0x9db   :  { %v1131_v50 = vadd.f32 1.0, %v19230_v51 }
 0x9dc   :  { %1265 = vrot.lane.b32.xlu1 %v19226_v36, %s19481_s2  ;;  %v19232_v19 = vpop.eup %19231 }
 0x9dd   :  { %v11444_v35 = vpop.permute.xlu0 %11443  ;;  %v19234_v12 = vpop.eup %19233  ;;  %v1145_v42 = vadd.f32 1.0, %v19232_v19  ;;  %19249 = vrcp.f32 %v1131_v50  ;;  %v25602_v50 = vld [vmem:[#allocation35_spill] sm:$0xff] }
 0x9de   :  { %11520 = vst.msk [vmem:[#allocation4 + $0xa0] sm:$0xff] %vm11499_vm5, %v11444_v35  ;;  %v19236_v14 = vpop.eup %19235  ;;  %v25601_v35 = vld [vmem:[#allocation76_spill] sm:$0xff] }
 0x9df   :  { %v19238_v11 = vpop.eup %19237  ;;  %v7857_v36 = vmul.f32 %v19236_v14, %v25599_v62  ;;  %19251 = vrcp.f32 %v1145_v42  ;;  %v1020_v42 = vadd.f32 %v22785_v48, %v25602_v50  ;;  %v25606_v62 = vld [vmem:[#allocation146_spill] sm:$0xff] }
 0x9e0   :  { %11421 = vrot.lane.b32.xlu1 %v11348_v59, %s19484_s25  ;;  %v19240_v22 = vpop.eup %19239  ;;  %19253 = vrcp.f32 %v23806_v56  ;;  %v1132_v51 = vadd.f32 1.0, %v19238_v11  ;;  %v25603_v11 = vld [vmem:[#allocation143_spill] sm:$0xff] }
 0x9e1   :  { %v11450_v32 = vpop.permute.xlu0 %11449  ;;  %v19242_v30 = vpop.eup %19241  ;;  %v7872_v23 = vmul.f32 %v19240_v22, %v25600_v55  ;;  %19255 = vrcp.f32 %v23841_v41  ;;  %v15566_v21 = vmul.f32 -1.442695, %v1020_v42  ;;  %v25611_v42 = vld [vmem:[#allocation128_spill] sm:$0xff] }
 0x9e2   :  { %11523 = vst.msk [vmem:[#allocation4 + $0xb8] sm:$0xff] %vm11499_vm5, %v11450_v32  ;;  %v19244_v37 = vpop.eup %19243  ;;  %v7858_v59 = vmul.f32 %v19242_v30, %v25601_v35  ;;  %19257 = vpow2.f32 %v15565_v57 }
 0x9e3   :  { %v19246_v19 = vpop.eup %19245  ;;  %v1146_v32 = vadd.f32 1.0, %v19244_v37  ;;  %19259 = vrcp.f32 %v1132_v51 }
 0x9e4   :  { %1267 = vrot.lane.b32.xlu1 %v19234_v12, %s19481_s2  ;;  %v19248_v12 = vpop.eup %19247  ;;  %v11349_v56 = vmul.f32 %v19246_v19, %v23802_v31  ;;  %v25608_v19 = vld [vmem:[#allocation138_spill] sm:$0xff] }
 0x9e5   :  { %v11448_v28 = vpop.permute.xlu0 %11447  ;;  %v11363_v14 = vmul.f32 %v19248_v12, %v23810_v7  ;;  %19261 = vrcp.f32 %v1146_v32  ;;  %v25605_v7 = vld [vmem:[#allocation130_spill] sm:$0xff] }
 0x9e6   :  { %11522 = vst.msk [vmem:[#allocation4 + $0xb0] sm:$0xff] %vm11499_vm5, %v11448_v28  ;;  %19263 = vrcp.f32 %v25603_v11  ;;  %v25604_v28 = vld [vmem:[#allocation151_spill] sm:$0xff] }
 0x9e7   :  { %v19250_v41 = vpop.eup %19249  ;;  %19265 = vrcp.f32 %v25604_v28 }
 0x9e8   :  { %7931 = vrot.lane.b32.xlu1 %v7857_v36, %s19486_s27  ;;  %19267 = vrcp.f32 %v25605_v7 }
 0x9e9   :  { %v19252_v0 = vpop.eup %19251  ;;  %19269 = vrcp.f32 %v25606_v62 }
 0x9ea   :  { %v19254_v22 = vpop.eup %19253  ;;  %19271 = vpow2.f32 %v15566_v21 }
 0x9eb   :  { %v19256_v31 = vpop.eup %19255  ;;  %v11350_v30 = vmul.f32 %v19254_v22, %v23800_v17  ;;  %19273 = vrcp.f32 %v23816_v8  ;;  %v25609_v8 = vld [vmem:[#allocation36_spill] sm:$0xff] }
 0x9ec   :  { %7933 = vrot.lane.b32.xlu1 %v7858_v59, %s19486_s27  ;;  %7961 = vrot.lane.b32.xlu0 %v7872_v23, %s19486_s27  ;;  %v11364_v36 = vmul.f32 %v19256_v31, %v23808_v3  ;;  %v19258_v37 = vpop.eup %19257  ;;  %19275 = vrcp.f32 %v23883_v43  ;;  %v25607_v59 = vld [vmem:[#allocation121_spill] sm:$0xff]  ;;  %v25610_v43 = vld [vmem:[#allocation123_spill] sm:$0xff] }
 0x9ed   :  { %v19260_v57 = vpop.eup %19259  ;;  %v1147_v3 = vadd.f32 1.0, %v19258_v37  ;;  %v25612_v31 = vld [vmem:[#allocation37_spill] sm:$0xff] }
 0x9ee   :  { %v1022_v62 = vadd.f32 %v22785_v48, %v25612_v31  ;;  %v25618_v31 = vld [vmem:[#allocation72_spill] sm:$0xff] }
 0x9ef   :  { %v19262_v55 = vpop.eup %19261  ;;  %19277 = vrcp.f32 %v1147_v3 }
 0x9f0   :  { %11423 = vrot.lane.b32.xlu1 %v11349_v56, %s19484_s25  ;;  %11451 = vrot.lane.b32.xlu0 %v11363_v14, %s19484_s25  ;;  %v19264_v23 = vpop.eup %19263  ;;  %v1021_v56 = vadd.f32 %v22785_v48, %v25609_v8  ;;  %19279 = vrcp.f32 %v23862_v45  ;;  %v25613_v45 = vld [vmem:[#allocation64_spill] sm:$0xff] }
 0x9f1   :  { %v19266_v35 = vpop.eup %19265  ;;  %v7859_v51 = vmul.f32 %v19264_v23, %v25607_v59 }
 0x9f2   :  { %v19268_v17 = vpop.eup %19267  ;;  %v7873_v32 = vmul.f32 %v19266_v35, %v25608_v19 }
 0x9f3   :  { %v19270_v12 = vpop.eup %19269  ;;  %v7860_v50 = vmul.f32 %v19268_v17, %v25610_v43 }
 0x9f4   :  { %1269 = vrot.lane.b32.xlu1 %v19250_v41, %s19481_s2  ;;  %1297 = vrot.lane.b32.xlu0 %v19252_v0, %s19481_s2  ;;  %v19272_v14 = vpop.eup %19271  ;;  %v7874_v11 = vmul.f32 %v19270_v12, %v25611_v42  ;;  %v15567_v0 = vmul.f32 -1.442695, %v1021_v56  ;;  %v25615_v12 = vld [vmem:[#allocation131_spill] sm:$0xff] }
 0x9f5   :  { %v19274_v41 = vpop.eup %19273  ;;  %v1148_v28 = vadd.f32 1.0, %v19272_v14 }
 0x9f6   :  { %v19276_v21 = vpop.eup %19275  ;;  %v11351_v7 = vmul.f32 %v19274_v41, %v23793_v6 }
 0x9f7   :  { %v11365_v22 = vmul.f32 %v19276_v21, %v23826_v61  ;;  %19281 = vrcp.f32 %v1148_v28  ;;  %v25614_v61 = vld [vmem:[#allocation148_spill] sm:$0xff] }
 0x9f8   :  { %11425 = vrot.lane.b32.xlu1 %v11350_v30, %s19484_s25  ;;  %11453 = vrot.lane.b32.xlu0 %v11364_v36, %s19484_s25  ;;  %19283 = vpow2.f32 %v15567_v0 }
 0x9f9   :  { %19285 = vrcp.f32 %v25613_v45  ;;  %v19278_v37 = vpop.eup %19277 }
 0x9fa   :  { %19287 = vrcp.f32 %v25614_v61  ;;  %v19280_v23 = vpop.eup %19279 }
 0x9fb   :  { %v11366_v35 = vmul.f32 %v19280_v23, %v23822_v38  ;;  %v25616_v38 = vld [vmem:[#allocation20_spill] sm:$0xff] }
 0x9fc   :  { %1271 = vrot.lane.b32.xlu1 %v19260_v57, %s19481_s2  ;;  %1299 = vrot.lane.b32.xlu0 %v19262_v55, %s19481_s2  ;;  %v15568_v55 = vmul.f32 -1.442695, %v1022_v62  ;;  %v1005_v56 = vadd.f32 %v22785_v48, %v25616_v38 }
 0xa00   :  { %7935 = vrot.lane.b32.xlu1 %v7859_v51, %s19486_s27  ;;  %7963 = vrot.lane.b32.xlu0 %v7873_v32, %s19486_s27 }
 0xa01   :  { %v19282_v17 = vpop.eup %19281 }
 0xa02   :  { %v19284_v59 = vpop.eup %19283 }
 0xa03   :  { %v1149_v19 = vadd.f32 1.0, %v19284_v59 }
 0xa04   :  { %7937 = vrot.lane.b32.xlu1 %v7860_v50, %s19486_s27  ;;  %7965 = vrot.lane.b32.xlu0 %v7874_v11, %s19486_s27  ;;  %v25617_v50 = vld [vmem:[#allocation133_spill] sm:$0xff]  ;;  %v15551_v11 = vmul.f32 -1.442695, %v1005_v56 }
 0xa08   :  { %11427 = vrot.lane.b32.xlu1 %v11351_v7, %s19484_s25  ;;  %v13095_v36 = vpop.xlane.xlu1 %13094  ;;  %11455 = vrot.lane.b32.xlu0 %v11365_v22, %s19484_s25 }
 0xa09   :  { %v13185_v30 = vsub.f32 %v23881_v60, %v13095_v36  ;;  %v19286_v60 = vpop.eup %19285 }
 0xa0a   :  { %v19288_v32 = vpop.eup %19287  ;;  %v7875_v14 = vmul.f32 %v19286_v60, %v25615_v12  ;;  %v25621_v60 = vld [vmem:[#allocation44_spill] sm:$0xff]  ;;  %v25622_v12 = vld [vmem:[#allocation86_spill] sm:$0xff] }
 0xa0b   :  { %v13219_v57 = vmul.f32 1.442695, %v13185_v30  ;;  %v7876_v42 = vmul.f32 %v19288_v32, %v25617_v50 }
 0xa0c   :  { %v24199_v6 = vpop.xlane.xlu1 %13109  ;;  %1301 = vrot.lane.b32.xlu0 %v19278_v37, %s19481_s2  ;;  %v25619_v37 = vld [vmem:[#allocation42_spill] sm:$0xff] }
 0xa0d   :  { %19289 = vpow2.f32 %v13219_v57 }
 0xa0e   :  { %19291 = vpow2.f32 %v15568_v55 }
 0xa0f   :  { %19293 = vrcp.f32 %v23897_v2 }
 0xa10   :  { %v13107_v3 = vpop.xlane.xlu1 %13106  ;;  %11457 = vrot.lane.b32.xlu0 %v11366_v35, %s19484_s25  ;;  %19295 = vrcp.f32 %v1149_v19  ;;  %v13190_v19 = vsub.f32 %v25621_v60, %v24199_v6 }
 0xa11   :  { %19297 = vrcp.f32 %v23869_v13  ;;  %v13189_v61 = vsub.f32 %v23900_v58, %v13107_v3 }
 0xa12   :  { %19299 = vpow2.f32 %v15551_v11  ;;  %v13229_v11 = vmul.f32 1.442695, %v13190_v19 }
 0xa13   :  { %v13227_v3 = vmul.f32 1.442695, %v13189_v61 }
 0xa14   :  { %v24205_v51 = vpop.xlane.xlu1 %13121  ;;  %1303 = vrot.lane.b32.xlu0 %v19282_v17, %s19481_s2 }
 0xa17   :  { %v24209_v8 = vpop.eup %19289 }
 0xa18   :  { %17341 = vmatprep.mubr.msk.f32.mxu0 %vm1449_vm1, %v24209_v8  ;;  %v13119_v43 = vpop.xlane.xlu1 %13118  ;;  %7967 = vrot.lane.b32.xlu0 %v7875_v14, %s19486_s27  ;;  %v19292_v2 = vpop.eup %19291 }
 0xa19   :  { %v1150_v28 = vadd.f32 1.0, %v19292_v2  ;;  %v19294_v0 = vpop.eup %19293  ;;  %v13193_v14 = vsub.f32 %v25622_v12, %v13119_v43  ;;  %v25623_v2 = vld [vmem:[#allocation74_spill] sm:$0xff] }
 0xa1a   :  { %v11367_v21 = vmul.f32 %v19294_v0, %v23828_v10  ;;  %v19296_v36 = vpop.eup %19295  ;;  %v13194_v50 = vsub.f32 %v25623_v2, %v24205_v51  ;;  %v25626_v51 = vld [vmem:[#allocation77_spill] sm:$0xff]  ;;  %v25631_v2 = vld [vmem:[#allocation59_spill] sm:$0xff] }
 0xa1b   :  { %19301 = vrcp.f32 %v1150_v28  ;;  %v19298_v55 = vpop.eup %19297  ;;  %v13235_v28 = vmul.f32 1.442695, %v13193_v14 }
 0xa1c   :  { %v24218_v41 = vpop.xlane.xlu1 %13133  ;;  %7969 = vrot.lane.b32.xlu0 %v7876_v42, %s19486_s27  ;;  %19303 = vrcp.f32 %v25618_v31  ;;  %v11368_v35 = vmul.f32 %v19298_v55, %v23824_v39  ;;  %v19300_v58 = vpop.eup %19299 }
 0xa1d   :  { %19305 = vrcp.f32 %v25619_v37 }
 0xa1f   :  { %v13092_v22 = vpop.xlane.xlu0 %13091 }
 0xa20   :  { %v13140_v7 = vpop.xlane.xlu1 %13139  ;;  %11459 = vrot.lane.b32.xlu0 %v11367_v21, %s19484_s25  ;;  %v13184_v62 = vsub.f32 %v23937_v1, %v13092_v22  ;;  %v25624_v21 = vld [vmem:[#allocation47_spill] sm:$0xff] }
 0xa21   :  { %v13200_v13 = vsub.f32 %v23940_v63, %v13140_v7  ;;  %v25620_v63 = vld [vmem:[#allocation21_spill] sm:$0xff]  ;;  %v25625_v7 = vld [vmem:[#allocation144_spill] sm:$0xff] }
 0xa22   :  { %v13217_v23 = vmul.f32 1.442695, %v13184_v62  ;;  %v1006_v59 = vadd.f32 %v22785_v48, %v25620_v63  ;;  %v1133_v62 = vadd.f32 1.0, %v19300_v58  ;;  %v25628_v63 = vld [vmem:[#allocation134_spill] sm:$0xff] }
 0xa23   :  { %v13249_v45 = vmul.f32 1.442695, %v13200_v13  ;;  %v13089_v30 = vpop.xlane.xlu0 %13088 }
 0xa24   :  { %v13183_v57 = vsub.f32 %v23949_v9, %v13089_v30  ;;  %v13131_v10 = vpop.xlane.xlu1 %13130  ;;  %1305 = vrot.lane.b32.xlu0 %v19296_v36, %s19481_s2  ;;  %v15552_v6 = vmul.f32 -1.442695, %v1006_v59  ;;  %v18693_v36 = vunpack.i.h.bf16 %v25626_v51  ;;  %v13237_v30 = vmul.f32 1.442695, %v13194_v50 }
 0xa25   :  { %19307 = vpow2.f32 %v13249_v45  ;;  %v19302_v39 = vpop.eup %19301  ;;  %v13197_v22 = vsub.f32 %v25624_v21, %v13131_v10  ;;  %v18692_v45 = vunpack.i.l.bf16 %v25626_v51  ;;  %v18708_v50 = vunpack.i.h.bf16 %v25631_v2  ;;  %v25634_v51 = vld [vmem:[#allocation114_spill] sm:$0xff] }
 0xa26   :  { %v13215_v1 = vmul.f32 1.442695, %v13183_v57  ;;  %v19304_v56 = vpop.eup %19303  ;;  %v25627_v57 = vld [vmem:[#allocation82_spill] sm:$0xff] }
 0xa27   :  { %v13098_v17 = vpop.xlane.xlu0 %13097  ;;  %v19306_v43 = vpop.eup %19305  ;;  %v7877_v31 = vmul.f32 %v19304_v56, %v25625_v7  ;;  %v13198_v55 = vsub.f32 %v25627_v57, %v24218_v41  ;;  %v18106_v12 = vpack.c.bf16 %v18693_v36, %v18692_v45  ;;  %v18718_v36 = vunpack.i.h.bf16 %v25634_v51  ;;  %v25635_v57 = vld [vmem:[#allocation115_spill] sm:$0xff] }
 0xa28   :  { %19309 = vpow2.f32 %v13215_v1  ;;  %v13186_v9 = vsub.f32 %v23961_v20, %v13098_v17  ;;  %v24236_v32 = vpop.xlane.xlu1 %13145  ;;  %11461 = vrot.lane.b32.xlu0 %v11368_v35, %s19484_s25  ;;  %v13243_v1 = vmul.f32 1.442695, %v13197_v22  ;;  %v7878_v59 = vmul.f32 %v19306_v43, %v25628_v63 }
 0xa29   :  { %19311 = vpow2.f32 %v13217_v23  ;;  %v13245_v58 = vmul.f32 1.442695, %v13198_v55  ;;  %v18717_v45 = vunpack.i.l.bf16 %v25634_v51  ;;  %v18703_v55 = vunpack.i.h.bf16 %v25635_v57 }
 0xa2a   :  { %v13221_v38 = vmul.f32 1.442695, %v13186_v9 }
 0xa2b   :  { %v13104_v42 = vpop.xlane.xlu0 %13103 }
 0xa2c   :  { %19313 = vpow2.f32 %v13221_v38  ;;  %v24242_v20 = vpop.xlane.xlu1 %13151  ;;  %1307 = vrot.lane.b32.xlu0 %v19302_v39, %s19481_s2  ;;  %v13188_v0 = vsub.f32 %v23975_v34, %v13104_v42  ;;  %v25630_v39 = vld [vmem:[#allocation43_spill] sm:$0xff]  ;;  %v18707_v42 = vunpack.i.l.bf16 %v25631_v2 }
 0xa2d   :  { %19315 = vpow2.f32 %v13227_v3 }
 0xa2e   :  { %19317 = vpow2.f32 %v15552_v6  ;;  %v13225_v23 = vmul.f32 1.442695, %v13188_v0  ;;  %v25632_v6 = vld [vmem:[#allocation71_spill] sm:$0xff] }
 0xa2f   :  { %v24248_v13 = vpop.eup %19307  ;;  %v13101_v37 = vpop.xlane.xlu0 %13100  ;;  %19319 = vpow2.f32 %v13229_v11 }
 0xa30   :  { %v13187_v34 = vsub.f32 %v23987_v47, %v13101_v37  ;;  %v24255_v61 = vpop.xlane.xlu1 %13157  ;;  %7971 = vrot.lane.b32.xlu0 %v7877_v31, %s19486_s27  ;;  %v13330_v10 = vsel %vm1449_vm1, %v24248_v13, 0.0  ;;  %19321 = vpow2.f32 %v13235_v28  ;;  %v25629_v47 = vld [vmem:[#allocation113_spill] sm:$0xff] }
 0xa31   :  { %13331 = vadd.xlane.f32.xlu1 %v13330_v10  ;;  %19323 = vrcp.f32 %v1133_v62  ;;  %v18698_v60 = vunpack.i.h.bf16 %v25629_v47  ;;  %v18697_v19 = vunpack.i.l.bf16 %v25629_v47  ;;  %v25636_v47 = vld [vmem:[#allocation78_spill] sm:$0xff] }
 0xa32   :  { %v24260_v35 = vpop.eup %19309  ;;  %v13223_v17 = vmul.f32 1.442695, %v13187_v34  ;;  %19325 = vpow2.f32 %v13237_v30  ;;  %v18118_v30 = vpack.c.bf16 %v18708_v50, %v18707_v42  ;;  %v18702_v34 = vunpack.i.l.bf16 %v25635_v57 }
 0xa33   :  { %v24263_v41 = vpop.eup %19311  ;;  %17334 = vmatprep.mubr.msk.f32.mxu1 %vm1449_vm1, %v24260_v35  ;;  %v13116_v9 = vpop.xlane.xlu0 %13115  ;;  %v18110_v28 = vpack.c.bf16 %v18698_v60, %v18697_v19  ;;  %v18728_v60 = vunpack.i.h.bf16 %v25636_v47  ;;  %v18727_v19 = vunpack.i.l.bf16 %v25636_v47 }
 0xa34   :  { %19327 = vpow2.f32 %v13223_v17  ;;  %v24269_v3 = vpop.xlane.xlu1 %13163  ;;  %17335 = vmatmul.mubr.msk.f32.vlgmr.msra.gmra.mrb[128].mxu1 %vm1449_vm1, %v24263_v41  ;;  %7973 = vrot.lane.b32.xlu0 %v7878_v59, %s19486_s27  ;;  %v13192_v14 = vsub.f32 %v24001_v4, %v13116_v9  ;;  %v25633_v4 = vld [vmem:[#allocation65_spill] sm:$0xff]  ;;  %v18114_v2 = vpack.c.bf16 %v18703_v55, %v18702_v34 }
 0xa35   :  { %19329 = vpow2.f32 %v13225_v23  ;;  %18101 = vmatpush3.bf16.msra.mxu1 %v25630_v39  ;;  %v18126_v39 = vpack.c.bf16 %v18718_v36, %v18717_v45  ;;  %v25639_v36 = vld [vmem:[#allocation46_spill] sm:$0xff] }
 0xa36   :  { %v24276_v38 = vpop.eup %19313  ;;  %19331 = vpow2.f32 %v13243_v1  ;;  %18107 = vmatprep.subr.bf16.mxu1 %v18106_v12  ;;  %v13233_v22 = vmul.f32 1.442695, %v13192_v14 }
 0xa37   :  { %v24278_v56 = vpop.eup %19315  ;;  %19333 = vrcp.f32 %v25632_v6  ;;  %17342 = vmatmul.mubr.msk.f32.vlgmr.msra.gmra.mrb[160].mxu0 %vm1449_vm1, %v24276_v38  ;;  %v13113_v11 = vpop.xlane.xlu0 %13112 }
 0xa38   :  { %19335 = vpow2.f32 %v13245_v58  ;;  %18105 = vmatpush3.bf16.msra.mxu0 %v25633_v4  ;;  %v13191_v0 = vsub.f32 %v24014_v53, %v13113_v11  ;;  %v24287_v43 = vpop.xlane.xlu1 %13169  ;;  %17355 = vmatprep.mubr.msk.f32.mxu0 %vm1449_vm1, %v24278_v56  ;;  %v19318_v21 = vpop.eup %19317  ;;  %v25637_v4 = vld [vmem:[#allocation98_spill] sm:$0xff] }
 0xa39   :  { %18111 = vmatprep.subr.bf16.mxu0 %v18110_v28  ;;  %v24291_v7 = vpop.eup %19319  ;;  %v1134_v23 = vadd.f32 1.0, %v19318_v21 }
 0xa3a   :  { %v13231_v31 = vmul.f32 1.442695, %v13191_v0  ;;  %v24293_v62 = vpop.eup %19321  ;;  %v18713_v0 = vunpack.i.h.bf16 %v25637_v4 }
 0xa3b   :  { %17356 = vmatmul.mubr.msk.f32.vlgmr.msra.gmra.mrb[162].mxu0 %vm1449_vm1, %v24291_v7  ;;  %v13128_v53 = vpop.xlane.xlu0 %13127  ;;  %v19324_v37 = vpop.eup %19323 }
 0xa3c   :  { %19337 = vpow2.f32 %v13231_v31  ;;  %18113 = vmatpush3.bf16.msra.mxu0 %v18110_v28  ;;  %v24301_v10 = vpop.xlane.xlu1 %13181  ;;  %17369 = vmatprep.mubr.msk.f32.mxu0 %vm1449_vm1, %v24293_v62  ;;  %v24305_v1 = vpop.eup %19325  ;;  %v13196_v17 = vsub.f32 %v24027_v18, %v13128_v53  ;;  %v24331_v28 = vpack.c.bf16 %v18728_v60, %v18727_v19  ;;  %v25638_v31 = vld [vmem:[#allocation81_spill] sm:$0xff] }
 0xa3d   :  { %19339 = vpow2.f32 %v13233_v22  ;;  %18119 = vmatprep.subr.bf16.mxu0 %v18118_v30  ;;  %v13202_v51 = vsub.f32 %v25638_v31, %v24236_v32  ;;  %v25640_v19 = vld [vmem:[#allocation97_spill] sm:$0xff] }
 0xa3e   :  { %v24308_v63 = vpop.eup %19327  ;;  %19341 = vrcp.f32 %v1134_v23  ;;  %v13241_v42 = vmul.f32 1.442695, %v13196_v17  ;;  %v13204_v23 = vsub.f32 %v23980_v44, %v24242_v20  ;;  %v13206_v44 = vsub.f32 %v23992_v49, %v24255_v61 }
 0xa3f   :  { %v24310_v59 = vpop.eup %19329  ;;  %17348 = vmatprep.mubr.msk.f32.mxu1 %vm1449_vm1, %v24308_v63  ;;  %17370 = vmatmul.mubr.msk.f32.vlgmr.msra.gmra.mrb[164].mxu0 %vm1449_vm1, %v24305_v1  ;;  %v13125_v9 = vpop.xlane.xlu0 %13124  ;;  %v13253_v34 = vmul.f32 1.442695, %v13202_v51 }
 0xa40   :  { %v24318_v58 = vpop.eup %19331  ;;  %18121 = vmatpush3.bf16.msra.mxu0 %v18118_v30  ;;  %v13195_v18 = vsub.f32 %v24038_v5, %v13125_v9  ;;  %v11416_v14 = vpop.permute.xlu1 %11415  ;;  %17349 = vmatmul.mubr.msk.f32.vlgmr.msra.gmra.mrb[130].mxu1 %vm1449_vm1, %v24310_v59  ;;  %v18722_v9 = vunpack.i.l.bf16 %v25640_v19  ;;  %v13261_v61 = vmul.f32 1.442695, %v13206_v44 }
 0xa41   :  { %v19334_v50 = vpop.eup %19333  ;;  %11506 = vst.msk [vmem:[#allocation4 + $0x30] sm:$0xff] %vm11499_vm5, %v11416_v14  ;;  %18109 = vmatpush3.bf16.msra.mxu1 %v18106_v12  ;;  %17383 = vmatprep.mubr.msk.f32.mxu0 %vm1449_vm1, %v24318_v58  ;;  %v18712_v12 = vunpack.i.l.bf16 %v25637_v4 }
 0xa42   :  { %v24326_v6 = vpop.eup %19335  ;;  %v13239_v11 = vmul.f32 1.442695, %v13195_v18  ;;  %18127 = vmatprep.subr.bf16.mxu0 %v18126_v39  ;;  %18115 = vmatprep.subr.bf16.mxu1 %v18114_v2  ;;  %v11352_v45 = vmul.f32 %v19334_v50, %v25639_v36  ;;  %v25642_v36 = vld [vmem:[#allocation70_spill] sm:$0xff] }
 0xa43   :  { %1273 = vrot.lane.b32.xlu1 %v19324_v37, %s19481_s2  ;;  %17384 = vmatmul.mubr.msk.f32.vlgmr.msra.gmra.mrb[166].mxu0 %vm1449_vm1, %v24326_v6  ;;  %v13137_v5 = vpop.xlane.xlu0 %13136  ;;  %v18122_v55 = vpack.c.bf16 %v18713_v0, %v18712_v12  ;;  %v13208_v12 = vsub.f32 %v24007_v33, %v24269_v3  ;;  %v18737_v33 = vunpack.i.l.bf16 %v25642_v36 }
 0xa44   :  { %19343 = vpow2.f32 %v13239_v11  ;;  %18129 = vmatpush3.bf16.msra.mxu0 %v18126_v39  ;;  %v13199_v21 = vsub.f32 %v24047_v24, %v13137_v5  ;;  %v1262_v22 = vpop.permute.xlu1 %1261  ;;  %v13257_v39 = vmul.f32 1.442695, %v13204_v23 }
 0xa45   :  { %19345 = vpow2.f32 %v13241_v42  ;;  %1351 = vst.msk [vmem:[#allocation3 + $0x30] sm:$0xff] %vm920_vm2, %v1262_v22  ;;  %18135 = vmatprep.subr.bf16.mxu0 %v24331_v28  ;;  %v25641_v42 = vld [vmem:[#allocation117_spill] sm:$0xff] }
 0xa46   :  { %v24341_v53 = vpop.eup %19337  ;;  %v13247_v30 = vmul.f32 1.442695, %v13199_v21  ;;  %v18733_v11 = vunpack.i.h.bf16 %v25641_v42  ;;  %v18732_v5 = vunpack.i.l.bf16 %v25641_v42 }
 0xa47   :  { %v24343_v37 = vpop.eup %19339  ;;  %11429 = vrot.lane.b32.xlu1 %v11352_v45, %s19484_s25  ;;  %17362 = vmatprep.mubr.msk.f32.mxu1 %vm1449_vm1, %v24341_v53  ;;  %v13143_v24 = vpop.xlane.xlu0 %13142  ;;  %v18738_v45 = vunpack.i.h.bf16 %v25642_v36 }
 0xa48   :  { %19347 = vpow2.f32 %v13247_v30  ;;  %v13201_v32 = vsub.f32 %v24053_v15, %v13143_v24  ;;  %v11418_v57 = vpop.permute.xlu1 %11417  ;;  %17363 = vmatmul.mubr.msk.f32.vlgmr.msra.gmra.mrb[132].mxu1 %vm1449_vm1, %v24343_v37  ;;  %v19342_v17 = vpop.eup %19341  ;;  %v18723_v15 = vunpack.i.h.bf16 %v25640_v19  ;;  %v18138_v51 = vpack.c.bf16 %v18733_v11, %v18732_v5 }
 0xa49   :  { %11507 = vst.msk [vmem:[#allocation4 + $0x38] sm:$0xff] %vm11499_vm5, %v11418_v57  ;;  %18117 = vmatpush3.bf16.msra.mxu1 %v18114_v2  ;;  %v13265_v24 = vmul.f32 1.442695, %v13208_v12  ;;  %v13279_v57 = vsel %vm1449_vm1, %v24260_v35, 0.0  ;;  %v13210_v35 = vsub.f32 %v24019_v29, %v24287_v43  ;;  %v13288_v19 = vsel %vm1449_vm1, %v24276_v38, 0.0 }
 0xa4a   :  { %v13251_v47 = vmul.f32 1.442695, %v13201_v32  ;;  %18123 = vmatprep.subr.bf16.mxu1 %v18122_v55  ;;  %v18130_v49 = vpack.c.bf16 %v18723_v15, %v18722_v9  ;;  %v13294_v11 = vsel %vm1449_vm1, %v24310_v59, 0.0 }
 0xa4b   :  { %1275 = vrot.lane.b32.xlu1 %v19342_v17, %s19481_s2  ;;  %v13149_v60 = vpop.xlane.xlu0 %13148  ;;  %v13269_v44 = vmul.f32 1.442695, %v13210_v35 }
 0xa4c   :  { %19349 = vpow2.f32 %v13251_v47  ;;  %v13203_v18 = vsub.f32 %v24062_v54, %v13149_v60  ;;  %v1264_v14 = vpop.permute.xlu1 %1263  ;;  %v18142_v47 = vpack.c.bf16 %v18738_v45, %v18737_v33  ;;  %v13300_v45 = vsel %vm1449_vm1, %v24291_v7, 0.0 }
 0xa4d   :  { %19351 = vpow2.f32 %v13253_v34  ;;  %1352 = vst.msk [vmem:[#allocation3 + $0x38] sm:$0xff] %vm920_vm2, %v1264_v14 }
 0xa4e   :  { %v24361_v20 = vpop.eup %19343  ;;  %v13255_v2 = vmul.f32 1.442695, %v13203_v18  ;;  %v25644_v18 = vld [vmem:[#allocation84_spill] sm:$0xff] }
 0xa4f   :  { %v24363_v50 = vpop.eup %19345  ;;  %17376 = vmatprep.mubr.msk.f32.mxu1 %vm1449_vm1, %v24361_v20  ;;  %v13155_v54 = vpop.xlane.xlu0 %13154  ;;  %v18748_v14 = vunpack.i.h.bf16 %v25644_v18  ;;  %v18747_v29 = vunpack.i.l.bf16 %v25644_v18  ;;  %v13312_v18 = vsel %vm1449_vm1, %v24305_v1, 0.0 }
 0xa50   :  { %19353 = vpow2.f32 %v13255_v2  ;;  %v13205_v4 = vsub.f32 %v24068_v26, %v13155_v54  ;;  %v7928_v0 = vpop.permute.xlu1 %7927  ;;  %17377 = vmatmul.mubr.msk.f32.vlgmr.msra.gmra.mrb[134].mxu1 %vm1449_vm1, %v24363_v50  ;;  %v13282_v26 = vsel %vm1449_vm1, %v24263_v41, 0.0 }
 0xa51   :  { %19355 = vpow2.f32 %v13257_v39  ;;  %8016 = vst.msk [vmem:[#allocation4 + $0x40] sm:$0xff] %vm8007_vm4, %v7928_v0  ;;  %18125 = vmatpush3.bf16.msra.mxu1 %v18122_v55  ;;  %v13214_v0 = vsub.f32 %v24032_v25, %v24301_v10 }
 0xa52   :  { %v24375_v21 = vpop.eup %19347  ;;  %v13259_v22 = vmul.f32 1.442695, %v13205_v4  ;;  %18131 = vmatprep.subr.bf16.mxu1 %v18130_v49  ;;  %v18150_v4 = vpack.c.bf16 %v18748_v14, %v18747_v29  ;;  %v13318_v29 = vsel %vm1449_vm1, %v24363_v50, 0.0 }
 0xa53   :  { %17390 = vmatprep.mubr.msk.f32.mxu1 %vm1449_vm1, %v24375_v21  ;;  %v13161_v31 = vpop.xlane.xlu0 %13160  ;;  %13283 = vadd.xlane.f32.xlu0 %v13282_v26  ;;  %v13277_v26 = vmul.f32 1.442695, %v13214_v0 }
 0xa54   :  { %19357 = vpow2.f32 %v13259_v22  ;;  %v13207_v3 = vsub.f32 %v24079_v52, %v13161_v31  ;;  %v7930_v30 = vpop.permute.xlu1 %7929  ;;  %17391 = vmatmul.mubr.msk.f32.vlgmr.msra.gmra.mrb[136].mxu1 %vm1449_vm1, %v24248_v13  ;;  %v25643_v13 = vld [vmem:[#allocation87_spill] sm:$0xff]  ;;  %v13291_v31 = vsel %vm1449_vm1, %v24308_v63, 0.0 }
 0xa55   :  { %19359 = vpow2.f32 %v13261_v61  ;;  %8017 = vst.msk [vmem:[#allocation4 + $0x48] sm:$0xff] %vm8007_vm4, %v7930_v30  ;;  %18133 = vmatpush3.bf16.msra.mxu1 %v18130_v49  ;;  %v18743_v34 = vunpack.i.h.bf16 %v25643_v13  ;;  %v18742_v23 = vunpack.i.l.bf16 %v25643_v13 }
 0xa56   :  { %v24387_v41 = vpop.eup %19349  ;;  %v13263_v32 = vmul.f32 1.442695, %v13207_v3  ;;  %18139 = vmatprep.subr.bf16.mxu1 %v18138_v51 }
 0xa57   :  { %v24391_v55 = vpop.eup %19351  ;;  %17397 = vmatprep.mubr.msk.f32.mxu0 %vm1449_vm1, %v24387_v41  ;;  %v13176_v52 = vpop.xlane.xlu0 %13175  ;;  %13280 = vadd.xlane.f32.xlu0 %v13279_v57  ;;  %v18146_v39 = vpack.c.bf16 %v18743_v34, %v18742_v23  ;;  %v13306_v57 = vsel %vm1449_vm1, %v24343_v37, 0.0  ;;  %v13297_v23 = vsel %vm1449_vm1, %v24278_v56, 0.0 }
 0xa58   :  { %19361 = vpow2.f32 %v13263_v32  ;;  %v11420_v17 = vpop.permute.xlu1 %11419  ;;  %17398 = vmatmul.mubr.msk.f32.vlgmr.msra.gmra.mrb[168].mxu0 %vm1449_vm1, %v24391_v55  ;;  %v13212_v38 = vsub.f32 %v24087_v27, %v13176_v52  ;;  %v13336_v7 = vsel %vm1449_vm1, %v24391_v55, 0.0 }
 0xa59   :  { %19363 = vpow2.f32 %v13265_v24  ;;  %11508 = vst.msk [vmem:[#allocation4 + $0x40] sm:$0xff] %vm11499_vm5, %v11420_v17  ;;  %18137 = vmatpush3.bf16.msra.mxu0 %v24331_v28 }
 0xa5a   :  { %v24403_v60 = vpop.eup %19353  ;;  %18143 = vmatprep.subr.bf16.mxu0 %v18142_v47  ;;  %v13273_v59 = vmul.f32 1.442695, %v13212_v38  ;;  %v13315_v38 = vsel %vm1449_vm1, %v24361_v20, 0.0 }
 0xa5b   :  { %v24407_v15 = vpop.eup %19355  ;;  %17404 = vmatprep.mubr.msk.f32.mxu1 %vm1449_vm1, %v24403_v60  ;;  %v13167_v9 = vpop.xlane.xlu0 %13166  ;;  %13289 = vadd.xlane.f32.xlu0 %v13288_v19  ;;  %v13303_v19 = vsel %vm1449_vm1, %v24341_v53, 0.0 }
 0xa5c   :  { %v13209_v43 = vsub.f32 %v24097_v16, %v13167_v9  ;;  %v1266_v28 = vpop.permute.xlu1 %1265  ;;  %17405 = vmatmul.mubr.msk.f32.vlgmr.msra.gmra.mrb[138].mxu1 %vm1449_vm1, %v24407_v15  ;;  %v13342_v13 = vsel %vm1449_vm1, %v24407_v15, 0.0  ;;  %v13339_v15 = vsel %vm1449_vm1, %v24403_v60, 0.0 }
 0xa5d   :  { %1353 = vst.msk [vmem:[#allocation3 + $0x40] sm:$0xff] %vm920_vm2, %v1266_v28  ;;  %18141 = vmatpush3.bf16.msra.mxu1 %v18138_v51  ;;  %v13309_v28 = vsel %vm1449_vm1, %v24293_v62, 0.0 }
 0xa5e   :  { %v24418_v2 = vpop.eup %19357  ;;  %v13267_v42 = vmul.f32 1.442695, %v13209_v43  ;;  %18147 = vmatprep.subr.bf16.mxu1 %v18146_v39 }
 0xa5f   :  { %v24422_v5 = vpop.eup %19359  ;;  %17411 = vmatprep.mubr.msk.f32.mxu0 %vm1449_vm1, %v24418_v2  ;;  %v13173_v16 = vpop.xlane.xlu0 %13172  ;;  %13295 = vadd.xlane.f32.xlu0 %v13294_v11  ;;  %v13345_v50 = vsel %vm1449_vm1, %v24418_v2, 0.0  ;;  %v25645_v11 = vld [vmem:[#allocation38_spill] sm:$0xff]  ;;  %v13324_v2 = vsel %vm1449_vm1, %v24326_v6, 0.0  ;;  %v25646_v6 = vld [vmem:[#allocation40_spill] sm:$0xff] }
 0xa60   :  { %19365 = vpow2.f32 %v13267_v42  ;;  %v13211_v27 = vsub.f32 %v24106_v46, %v13173_v16  ;;  %v11422_v54 = vpop.permute.xlu1 %11421  ;;  %17412 = vmatmul.mubr.msk.f32.vlgmr.msra.gmra.mrb[170].mxu0 %vm1449_vm1, %v24422_v5  ;;  %v13285_v46 = vsel %vm1449_vm1, %v24209_v8, 0.0  ;;  %v13348_v53 = vsel %vm1449_vm1, %v24422_v5, 0.0 }
 0xa61   :  { %19367 = vpow2.f32 %v13269_v44  ;;  %11509 = vst.msk [vmem:[#allocation4 + $0x48] sm:$0xff] %vm11499_vm5, %v11422_v54  ;;  %18145 = vmatpush3.bf16.msra.mxu0 %v18142_v47  ;;  %v13333_v47 = vsel %vm1449_vm1, %v24387_v41, 0.0  ;;  %v1023_v5 = vadd.f32 %v22785_v48, %v25645_v11 }
 0xa62   :  { %v24432_v49 = vpop.eup %19361  ;;  %v13271_v61 = vmul.f32 1.442695, %v13211_v27  ;;  %18151 = vmatprep.subr.bf16.mxu0 %v18150_v4 }
 0xa63   :  { %v24436_v12 = vpop.eup %19363  ;;  %17418 = vmatprep.mubr.msk.f32.mxu1 %vm1449_vm1, %v24432_v49  ;;  %v13179_v22 = vpop.xlane.xlu0 %13178  ;;  %13286 = vadd.xlane.f32.xlu0 %v13285_v46  ;;  %v13351_v62 = vsel %vm1449_vm1, %v24432_v49, 0.0  ;;  %v15569_v27 = vmul.f32 -1.442695, %v1023_v5  ;;  %v13327_v49 = vsel %vm1449_vm1, %v24375_v21, 0.0  ;;  %v25647_v21 = vld [vmem:[#allocation54_spill] sm:$0xff] }
 0xa64   :  { %19369 = vpow2.f32 %v13271_v61  ;;  %v13213_v25 = vsub.f32 %v24120_v40, %v13179_v22  ;;  %v1268_v10 = vpop.permute.xlu1 %1267  ;;  %17419 = vmatmul.mubr.msk.f32.vlgmr.msra.gmra.mrb[140].mxu1 %vm1449_vm1, %v24436_v12  ;;  %v13354_v1 = vsel %vm1449_vm1, %v24436_v12, 0.0 }
 0xa65   :  { %19371 = vpow2.f32 %v13273_v59  ;;  %1354 = vst.msk [vmem:[#allocation3 + $0x48] sm:$0xff] %vm920_vm2, %v1268_v10  ;;  %18149 = vmatpush3.bf16.msra.mxu1 %v18146_v39  ;;  %v1024_v59 = vadd.f32 %v22785_v48, %v25646_v6 }
 0xa66   :  { %v13275_v8 = vmul.f32 1.442695, %v13213_v25 }
 0xa67   :  { %v7962_v51 = vpop.permute.xlu0 %7961  ;;  %13292 = vadd.xlane.f32.xlu0 %v13291_v31  ;;  %v15570_v46 = vmul.f32 -1.442695, %v1024_v59 }
 0xa68   :  { %19373 = vpow2.f32 %v13275_v8  ;;  %8033 = vst.msk [vmem:[#allocation4 + $0xc8] sm:$0xff] %vm8007_vm4, %v7962_v51  ;;  %v7932_v36 = vpop.permute.xlu1 %7931 }
 0xa69   :  { %19375 = vpow2.f32 %v13277_v26  ;;  %8018 = vst.msk [vmem:[#allocation4 + $0x50] sm:$0xff] %vm8007_vm4, %v7932_v36 }
 0xa6a   :  { %v24448_v40 = vpop.eup %19365  ;;  %19377 = vpow2.f32 %v15569_v27 }
 0xa6b   :  { %v24452_v33 = vpop.eup %19367  ;;  %17425 = vmatprep.mubr.msk.f32.mxu0 %vm1449_vm1, %v24448_v40  ;;  %v11452_v63 = vpop.permute.xlu0 %11451  ;;  %13301 = vadd.xlane.f32.xlu0 %v13300_v45  ;;  %19379 = vpow2.f32 %v15570_v46 }
 0xa6c   :  { %11524 = vst.msk [vmem:[#allocation4 + $0xc0] sm:$0xff] %vm11499_vm5, %v11452_v63  ;;  %v7934_v3 = vpop.permute.xlu1 %7933  ;;  %17426 = vmatmul.mubr.msk.f32.vlgmr.msra.gmra.mrb[172].mxu0 %vm1449_vm1, %v24452_v33  ;;  %v13360_v20 = vsel %vm1449_vm1, %v24452_v33, 0.0  ;;  %19381 = vrcp.f32 %v25647_v21 }
 0xa6d   :  { %8019 = vst.msk [vmem:[#allocation4 + $0x58] sm:$0xff] %vm8007_vm4, %v7934_v3  ;;  %18153 = vmatpush3.bf16.msra.mxu0 %v18150_v4  ;;  %v13321_v4 = vsel %vm1449_vm1, %v24318_v58, 0.0  ;;  %v13357_v58 = vsel %vm1449_vm1, %v24448_v40, 0.0  ;;  %v25648_v40 = vld [vmem:[#allocation49_spill] sm:$0xff] }
 0xa6e   :  { %v24460_v30 = vpop.eup %19369  ;;  %v25649_v3 = vld [vmem:[#allocation73_spill] sm:$0xff] }
 0xa6f   :  { %v24464_v24 = vpop.eup %19371  ;;  %13337 = vadd.xlane.f32.xlu1 %v13336_v7  ;;  %17432 = vmatprep.mubr.msk.f32.mxu1 %vm1449_vm1, %v24460_v30  ;;  %v1298_v32 = vpop.permute.xlu0 %1297  ;;  %v13363_v22 = vsel %vm1449_vm1, %v24460_v30, 0.0 }
 0xa70   :  { %1369 = vst.msk [vmem:[#allocation3 + $0xc0] sm:$0xff] %vm920_vm2, %v1298_v32  ;;  %13307 = vadd.xlane.f32.xlu0 %v13306_v57  ;;  %v11424_v52 = vpop.permute.xlu1 %11423  ;;  %17433 = vmatmul.mubr.msk.f32.vlgmr.msra.gmra.mrb[142].mxu1 %vm1449_vm1, %v24464_v24  ;;  %v13366_v0 = vsel %vm1449_vm1, %v24464_v24, 0.0 }
 0xa71   :  { %11510 = vst.msk [vmem:[#allocation4 + $0x50] sm:$0xff] %vm11499_vm5, %v11424_v52  ;;  %v25650_v52 = vld [vmem:[#allocation48_spill] sm:$0xff] }
 0xa72   :  { %v24474_v55 = vpop.eup %19373 }
 0xa73   :  { %v24478_v34 = vpop.eup %19375  ;;  %13343 = vadd.xlane.f32.xlu1 %v13342_v13  ;;  %17439 = vmatprep.mubr.msk.f32.mxu0 %vm1449_vm1, %v24474_v55  ;;  %v11454_v37 = vpop.permute.xlu0 %11453  ;;  %v13369_v31 = vsel %vm1449_vm1, %v24474_v55, 0.0 }
 0xa74   :  { %11525 = vst.msk [vmem:[#allocation4 + $0xc8] sm:$0xff] %vm11499_vm5, %v11454_v37  ;;  %13298 = vadd.xlane.f32.xlu0 %v13297_v23  ;;  %v1270_v17 = vpop.permute.xlu1 %1269  ;;  %17440 = vmatmul.mubr.msk.f32.vlgmr.msra.gmra.mrb[174].mxu0 %vm1449_vm1, %v24478_v34  ;;  %v19378_v25 = vpop.eup %19377  ;;  %v13372_v10 = vsel %vm1449_vm1, %v24478_v34, 0.0 }
 0xa75   :  { %1355 = vst.msk [vmem:[#allocation3 + $0x50] sm:$0xff] %vm920_vm2, %v1270_v17  ;;  %v1151_v8 = vadd.f32 1.0, %v19378_v25  ;;  %v19380_v36 = vpop.eup %19379 }
 0xa76   :  { %v19382_v45 = vpop.eup %19381  ;;  %v1152_v63 = vadd.f32 1.0, %v19380_v36 }
 0xa77   :  { %13334 = vadd.xlane.f32.xlu1 %v13333_v47  ;;  %v1300_v35 = vpop.permute.xlu0 %1299  ;;  %19383 = vrcp.f32 %v1151_v8  ;;  %v11369_v30 = vmul.f32 %v19382_v45, %v25649_v3 }
 0xa78   :  { %1370 = vst.msk [vmem:[#allocation3 + $0xc8] sm:$0xff] %vm920_vm2, %v1300_v35  ;;  %13304 = vadd.xlane.f32.xlu0 %v13303_v19  ;;  %v11426_v56 = vpop.permute.xlu1 %11425  ;;  %19385 = vrcp.f32 %v25648_v40 }
 0xa79   :  { %11511 = vst.msk [vmem:[#allocation4 + $0x58] sm:$0xff] %vm11499_vm5, %v11426_v56  ;;  %19387 = vrcp.f32 %v1152_v63  ;;  %v15120_v56 = vld [vmem:[%s24810_s6] sm:$0xff] }
 0xa7b   :  { %13340 = vadd.xlane.f32.xlu1 %v13339_v15  ;;  %v7964_v9 = vpop.permute.xlu0 %7963  ;;  %v15121_v15 = vld [vmem:[%s24810_s6 + $0x8] sm:$0xff] }
 0xa7c   :  { %8034 = vst.msk [vmem:[#allocation4 + $0xd0] sm:$0xff] %vm8007_vm4, %v7964_v9  ;;  %13313 = vadd.xlane.f32.xlu0 %v13312_v18  ;;  %v1272_v41 = vpop.permute.xlu1 %1271  ;;  %v18154_v18 = vpack.c.bf16 %v15121_v15, %v15120_v56 }
 0xa7d   :  { %1356 = vst.msk [vmem:[#allocation3 + $0x58] sm:$0xff] %vm920_vm2, %v1272_v41 }
 0xa7e   :  { %18155 = vmatprep.subr.bf16.mxu0 %v18154_v18  ;;  %18170 = vmatprep.subr.bf16.mxu1 %v18154_v18 }
 0xa7f   :  { %13349 = vadd.xlane.f32.xlu1 %v13348_v53  ;;  %v7966_v14 = vpop.permute.xlu0 %7965  ;;  %18157 = vmatpush3.bf16.msra.mxu0 %v18154_v18 }
 0xa80   :  { %8035 = vst.msk [vmem:[#allocation4 + $0xd8] sm:$0xff] %vm8007_vm4, %v7966_v14  ;;  %13319 = vadd.xlane.f32.xlu0 %v13318_v29  ;;  %v7936_v60 = vpop.permute.xlu1 %7935  ;;  %18174 = vmatpush3.bf16.msra.mxu1 %v18154_v18 }
 0xa81   :  { %8020 = vst.msk [vmem:[#allocation4 + $0x60] sm:$0xff] %vm8007_vm4, %v7936_v60  ;;  %v19384_v24 = vpop.eup %19383  ;;  %v15122_v60 = vld [vmem:[%s24810_s6 + $0x10] sm:$0xff] }
 0xa82   :  { %v19386_v32 = vpop.eup %19385 }
 0xa83   :  { %13355 = vadd.xlane.f32.xlu1 %v13354_v1  ;;  %v11456_v43 = vpop.permute.xlu0 %11455  ;;  %v11370_v55 = vmul.f32 %v19386_v32, %v25650_v52  ;;  %v19388_v13 = vpop.eup %19387  ;;  %v15123_v1 = vld [vmem:[%s24810_s6 + $0x18] sm:$0xff] }
 0xa84   :  { %11526 = vst.msk [vmem:[#allocation4 + $0xd0] sm:$0xff] %vm11499_vm5, %v11456_v43  ;;  %13310 = vadd.xlane.f32.xlu0 %v13309_v28  ;;  %v7938_v39 = vpop.permute.xlu1 %7937  ;;  %v18158_v43 = vpack.c.bf16 %v15123_v1, %v15122_v60 }
 0xa85   :  { %8021 = vst.msk [vmem:[#allocation4 + $0x68] sm:$0xff] %vm8007_vm4, %v7938_v39  ;;  %v15124_v39 = vld [vmem:[%s24810_s6 + $0x20] sm:$0xff] }
 0xa86   :  { %18159 = vmatprep.subr.bf16.mxu0 %v18158_v43  ;;  %18171 = vmatprep.subr.bf16.mxu1 %v18158_v43 }
 0xa87   :  { %13346 = vadd.xlane.f32.xlu1 %v13345_v50  ;;  %v1302_v44 = vpop.permute.xlu0 %1301  ;;  %18161 = vmatpush3.bf16.msra.mxu0 %v18158_v43  ;;  %v15125_v50 = vld [vmem:[%s24810_s6 + $0x28] sm:$0xff] }
 0xa88   :  { %1371 = vst.msk [vmem:[#allocation3 + $0xd0] sm:$0xff] %vm920_vm2, %v1302_v44  ;;  %13316 = vadd.xlane.f32.xlu0 %v13315_v38  ;;  %v11428_v42 = vpop.permute.xlu1 %11427  ;;  %18175 = vmatpush3.bf16.msra.mxu1 %v18158_v43  ;;  %v18162_v44 = vpack.c.bf16 %v15125_v50, %v15124_v39 }
 0xa89   :  { %11512 = vst.msk [vmem:[#allocation4 + $0x60] sm:$0xff] %vm11499_vm5, %v11428_v42  ;;  %v15126_v42 = vld [vmem:[%s24810_s6 + $0x30] sm:$0xff] }
 0xa8a   :  { %18163 = vmatprep.subr.bf16.mxu0 %v18162_v44  ;;  %18172 = vmatprep.subr.bf16.mxu1 %v18162_v44 }
 0xa8b   :  { %13352 = vadd.xlane.f32.xlu1 %v13351_v62  ;;  %v11458_v16 = vpop.permute.xlu0 %11457  ;;  %18165 = vmatpush3.bf16.msra.mxu0 %v18162_v44  ;;  %v15127_v62 = vld [vmem:[%s24810_s6 + $0x38] sm:$0xff] }
 0xa8c   :  { %11527 = vst.msk [vmem:[#allocation4 + $0xd8] sm:$0xff] %vm11499_vm5, %v11458_v16  ;;  %13325 = vadd.xlane.f32.xlu0 %v13324_v2  ;;  %18176 = vmatpush3.bf16.msra.mxu1 %v18162_v44  ;;  %v18166_v11 = vpack.c.bf16 %v15127_v62, %v15126_v42 }
 0xa8e   :  { %18167 = vmatprep.subr.bf16.mxu0 %v18166_v11  ;;  %18173 = vmatprep.subr.bf16.mxu1 %v18166_v11 }
 0xa8f   :  { %13361 = vadd.xlane.f32.xlu1 %v13360_v20  ;;  %v1304_v54 = vpop.permute.xlu0 %1303  ;;  %18169 = vmatpush3.bf16.msra.mxu0 %v18166_v11 }
 0xa90   :  { %1372 = vst.msk [vmem:[#allocation3 + $0xd8] sm:$0xff] %vm920_vm2, %v1304_v54  ;;  %13322 = vadd.xlane.f32.xlu0 %v13321_v4  ;;  %18177 = vmatpush3.bf16.msra.mxu1 %v18166_v11 }
 0xa93   :  { %13367 = vadd.xlane.f32.xlu1 %v13366_v0  ;;  %v7968_v61 = vpop.permute.xlu0 %7967 }
 0xa94   :  { %13328 = vadd.xlane.f32.xlu0 %v13327_v49  ;;  %8036 = vst.msk [vmem:[#allocation4 + $0xe0] sm:$0xff] %vm8007_vm4, %v7968_v61 }
 0xa97   :  { %13358 = vadd.xlane.f32.xlu1 %v13357_v58  ;;  %v7970_v12 = vpop.permute.xlu0 %7969 }
 0xa98   :  { %8037 = vst.msk [vmem:[#allocation4 + $0xe8] sm:$0xff] %vm8007_vm4, %v7970_v12 }
 0xa9b   :  { %13364 = vadd.xlane.f32.xlu1 %v13363_v22  ;;  %v11460_v48 = vpop.permute.xlu0 %11459 }
 0xa9c   :  { %11528 = vst.msk [vmem:[#allocation4 + $0xe0] sm:$0xff] %vm11499_vm5, %v11460_v48 }
 0xa9f   :  { %13373 = vadd.xlane.f32.xlu1 %v13372_v10  ;;  %v1306_v26 = vpop.permute.xlu0 %1305 }
 0xaa0   :  { %1373 = vst.msk [vmem:[#allocation3 + $0xe0] sm:$0xff] %vm920_vm2, %v1306_v26 }
 0xaa3   :  { %13370 = vadd.xlane.f32.xlu1 %v13369_v31  ;;  %v11462_v51 = vpop.permute.xlu0 %11461 }
 0xaa4   :  { %11529 = vst.msk [vmem:[#allocation4 + $0xe8] sm:$0xff] %vm11499_vm5, %v11462_v51 }
 0xaa7   :  { %v1308_v33 = vpop.permute.xlu0 %1307 }
 0xaa8   :  { %1374 = vst.msk [vmem:[#allocation3 + $0xe8] sm:$0xff] %vm920_vm2, %v1308_v33 }
 0xaaa   :  { %11463 = vrot.lane.b32.xlu0 %v11369_v30, %s19484_s25 }
 0xaab   :  { %v7972_v7 = vpop.permute.xlu0 %7971 }
 0xaac   :  { %8038 = vst.msk [vmem:[#allocation4 + $0xf0] sm:$0xff] %vm8007_vm4, %v7972_v7 }
 0xaae   :  { %1309 = vrot.lane.b32.xlu0 %v19384_v24, %s19481_s2 }
 0xaaf   :  { %v7974_v57 = vpop.permute.xlu0 %7973 }
 0xab0   :  { %8039 = vst.msk [vmem:[#allocation4 + $0xf8] sm:$0xff] %vm8007_vm4, %v7974_v57 }
 0xab2   :  { %11465 = vrot.lane.b32.xlu0 %v11370_v55, %s19484_s25 }
 0xab6   :  { %1311 = vrot.lane.b32.xlu0 %v19388_v13, %s19481_s2 }
 0xabe   :  { %v24560_v34 = vpop.xlane.xlu1 %13331 }
 0xac2   :  { %v1274_v37 = vpop.permute.xlu1 %1273 }
 0xac3   :  { %1357 = vst.msk [vmem:[#allocation3 + $0x60] sm:$0xff] %vm920_vm2, %v1274_v37 }
 0xac6   :  { %v11430_v23 = vpop.permute.xlu1 %11429 }
 0xac7   :  { %11513 = vst.msk [vmem:[#allocation4 + $0x68] sm:$0xff] %vm11499_vm5, %v11430_v23 }
 0xaca   :  { %v1276_v17 = vpop.permute.xlu1 %1275 }
 0xacb   :  { %1358 = vst.msk [vmem:[#allocation3 + $0x68] sm:$0xff] %vm920_vm2, %v1276_v17 }
 0xae0   :  { %v13284_v47 = vpop.xlane.xlu0 %13283 }
 0xae1   :  { %19389 = vrcp.f32 %v13284_v47 }
 0xae4   :  { %v13281_v35 = vpop.xlane.xlu0 %13280 }
 0xae5   :  { %19391 = vrcp.f32 %v13281_v35 }
 0xae8   :  { %v13290_v19 = vpop.xlane.xlu0 %13289 }
 0xae9   :  { %19393 = vrcp.f32 %v13290_v19 }
 0xaeb   :  { %v19390_v5 = vpop.eup %19389 }
 0xaec   :  { %v13296_v9 = vpop.xlane.xlu0 %13295 }
 0xaed   :  { %19395 = vrcp.f32 %v13296_v9 }
 0xaef   :  { %v19392_v0 = vpop.eup %19391 }
 0xaf0   :  { %v13287_v41 = vpop.xlane.xlu0 %13286 }
 0xaf1   :  { %19397 = vrcp.f32 %v13287_v41 }
 0xaf3   :  { %v19394_v58 = vpop.eup %19393 }
 0xaf4   :  { %v13293_v53 = vpop.xlane.xlu0 %13292 }
 0xaf5   :  { %19399 = vrcp.f32 %v13293_v53 }
 0xaf7   :  { %v19396_v21 = vpop.eup %19395 }
 0xaf8   :  { %v13302_v14 = vpop.xlane.xlu0 %13301 }
 0xaf9   :  { %19401 = vrcp.f32 %v13302_v14 }
 0xafb   :  { %v19398_v45 = vpop.eup %19397 }
 0xafc   :  { %v24593_v27 = vpop.xlane.xlu1 %13337 }
 0xafd   :  { %v24571_v29 = vpop.xlane.xlu0 %13307 }
 0xafe   :  { %19403 = vrcp.f32 %v24571_v29 }
 0xaff   :  { %v19400_v30 = vpop.eup %19399 }
 0xb00   :  { %v24599_v46 = vpop.xlane.xlu1 %13343 }
 0xb01   :  { %v24579_v28 = vpop.xlane.xlu0 %13298 }
 0xb03   :  { %v19402_v55 = vpop.eup %19401 }
 0xb04   :  { %v24606_v51 = vpop.xlane.xlu1 %13334 }
 0xb05   :  { %v13305_v38 = vpop.xlane.xlu0 %13304 }
 0xb07   :  { %v17336_v16 = vpop.f32.mrb[128].mxu1 }
 0xb08   :  { %v14832_v2 = vmul.f32 %v19390_v5, %v17336_v16  ;;  %v13455_v20 = vpop.f32.mrb[129].mxu1  ;;  %v24611_v7 = vpop.xlane.xlu1 %13340 }
 0xb09   :  { %v13314_v54 = vpop.xlane.xlu0 %13313  ;;  %v14831_v59 = vmul.f32 %v19392_v0, %v13455_v20  ;;  %v19404_v17 = vpop.eup %19403 }
 0xb0a   :  { %v17343_v4 = vpop.f32.mrb[160].mxu0  ;;  %14897 = vrot.lane.b32.xlu1 %v14832_v2, %s19482_s3 }
 0xb0b   :  { %v13544_v6 = vpop.f32.mrb[161].mxu0  ;;  %v14834_v22 = vmul.f32 %v19394_v58, %v17343_v4 }
 0xb0c   :  { %v14833_v63 = vmul.f32 %v19398_v45, %v13544_v6  ;;  %v24616_v37 = vpop.xlane.xlu1 %13349 }
 0xb0d   :  { %v24596_v49 = vpop.xlane.xlu0 %13319 }
 0xb0e   :  { %v17357_v61 = vpop.f32.mrb[162].mxu0  ;;  %14895 = vrot.lane.b32.xlu1 %v14831_v59, %s19482_s3 }
 0xb0f   :  { %v13722_v12 = vpop.f32.mrb[163].mxu0  ;;  %v14838_v13 = vmul.f32 %v19402_v55, %v17357_v61 }
 0xb10   :  { %v13356_v41 = vpop.xlane.xlu1 %13355 }
 0xb11   :  { %v13311_v48 = vpop.xlane.xlu0 %13310 }
 0xb12   :  { %v24601_v25 = vpop.f32.mrb[164].mxu0  ;;  %14901 = vrot.lane.b32.xlu1 %v14834_v22, %s19482_s3 }
 0xb13   :  { %v17350_v10 = vpop.f32.mrb[130].mxu1  ;;  %v24604_v26 = vpop.f32.mrb[165].mxu0 }
 0xb14   :  { %v14836_v8 = vmul.f32 %v19396_v21, %v17350_v10  ;;  %v13633_v31 = vpop.f32.mrb[131].mxu1  ;;  %v13347_v42 = vpop.xlane.xlu1 %13346 }
 0xb15   :  { %v13317_v36 = vpop.xlane.xlu0 %13316  ;;  %v14835_v32 = vmul.f32 %v19400_v30, %v13633_v31 }
 0xb16   :  { %v17385_v40 = vpop.f32.mrb[166].mxu0  ;;  %14905 = vrot.lane.b32.xlu1 %v14836_v8, %s19482_s3 }
 0xb17   :  { %v14078_v33 = vpop.f32.mrb[167].mxu0 }
 0xb18   :  { %v13353_v0 = vpop.xlane.xlu1 %13352 }
 0xb19   :  { %v13326_v3 = vpop.xlane.xlu0 %13325 }
 0xb1a   :  { %19405 = vrcp.f32 %v13326_v3  ;;  %14899 = vrot.lane.b32.xlu1 %v14833_v63, %s19482_s3 }
 0xb1b   :  { %v17364_v24 = vpop.f32.mrb[132].mxu1  ;;  %19407 = vrcp.f32 %v24560_v34 }
 0xb1c   :  { %v13811_v57 = vpop.f32.mrb[133].mxu1  ;;  %19409 = vrcp.f32 %v24579_v28  ;;  %v14840_v35 = vmul.f32 %v19404_v17, %v17364_v24  ;;  %v13362_v21 = vpop.xlane.xlu1 %13361 }
 0xb1d   :  { %v13323_v52 = vpop.xlane.xlu0 %13322 }
 0xb1e   :  { %14903 = vrot.lane.b32.xlu1 %v14835_v32, %s19482_s3  ;;  %19411 = vrcp.f32 %v13323_v52 }
 0xb1f   :  { %19413 = vrcp.f32 %v13305_v38 }
 0xb20   :  { %19415 = vrcp.f32 %v13314_v54 }
 0xb21   :  { %v13329_v23 = vpop.xlane.xlu0 %13328 }
 0xb22   :  { %14909 = vrot.lane.b32.xlu1 %v14838_v13, %s19482_s3  ;;  %19417 = vrcp.f32 %v13329_v23 }
 0xb23   :  { %v24619_v47 = vpop.f32.mrb[134].mxu1  ;;  %19419 = vrcp.f32 %v13311_v48 }
 0xb24   :  { %v19406_v34 = vpop.eup %19405  ;;  %v13989_v19 = vpop.f32.mrb[135].mxu1  ;;  %19421 = vrcp.f32 %v24593_v27 }
 0xb25   :  { %v11464_v56 = vpop.permute.xlu0 %11463  ;;  %v14846_v15 = vmul.f32 %v19406_v34, %v17385_v40  ;;  %v19408_v9 = vpop.eup %19407  ;;  %19423 = vrcp.f32 %v13317_v36 }
 0xb26   :  { %11530 = vst.msk [vmem:[#allocation4 + $0xf0] sm:$0xff] %vm11499_vm5, %v11464_v56  ;;  %14913 = vrot.lane.b32.xlu1 %v14840_v35, %s19482_s3  ;;  %v19410_v18 = vpop.eup %19409  ;;  %19425 = vrcp.f32 %v24599_v46  ;;  %v13368_v36 = vpop.xlane.xlu1 %13367 }
 0xb27   :  { %14925 = vrot.lane.b32.xlu0 %v14846_v15, %s19482_s3  ;;  %v17392_v53 = vpop.f32.mrb[136].mxu1  ;;  %v14837_v14 = vmul.f32 %v19410_v18, %v13722_v12  ;;  %19427 = vrcp.f32 %v24596_v49 }
 0xb28   :  { %v14848_v29 = vmul.f32 %v19408_v9, %v17392_v53  ;;  %v14167_v60 = vpop.f32.mrb[137].mxu1  ;;  %v19412_v43 = vpop.eup %19411  ;;  %19429 = vrcp.f32 %v24606_v51 }
 0xb29   :  { %v1310_v1 = vpop.permute.xlu0 %1309  ;;  %v19414_v28 = vpop.eup %19413  ;;  %v14845_v11 = vmul.f32 %v19412_v43, %v14078_v33  ;;  %19431 = vrcp.f32 %v24611_v7 }
 0xb2a   :  { %1375 = vst.msk [vmem:[#allocation3 + $0xf0] sm:$0xff] %vm920_vm2, %v1310_v1  ;;  %14907 = vrot.lane.b32.xlu1 %v14837_v14, %s19482_s3  ;;  %v14839_v50 = vmul.f32 %v19414_v28, %v13811_v57  ;;  %v19416_v38 = vpop.eup %19415  ;;  %19433 = vrcp.f32 %v24616_v37  ;;  %v13359_v24 = vpop.xlane.xlu1 %13358 }
 0xb2b   :  { %14929 = vrot.lane.b32.xlu0 %v14848_v29, %s19482_s3  ;;  %v17399_v39 = vpop.f32.mrb[168].mxu0  ;;  %v14842_v2 = vmul.f32 %v19416_v38, %v24601_v25  ;;  %19435 = vrcp.f32 %v13356_v41 }
 0xb2c   :  { %v14256_v44 = vpop.f32.mrb[169].mxu0  ;;  %v19418_v5 = vpop.eup %19417  ;;  %19437 = vrcp.f32 %v13347_v42 }
 0xb2d   :  { %v11466_v62 = vpop.permute.xlu0 %11465  ;;  %v19420_v27 = vpop.eup %19419  ;;  %v14847_v54 = vmul.f32 %v19418_v5, %v14167_v60  ;;  %19439 = vrcp.f32 %v13353_v0 }
 0xb2e   :  { %11531 = vst.msk [vmem:[#allocation4 + $0xf8] sm:$0xff] %vm11499_vm5, %v11466_v62  ;;  %14911 = vrot.lane.b32.xlu1 %v14839_v50, %s19482_s3  ;;  %v19422_v59 = vpop.eup %19421  ;;  %v14841_v61 = vmul.f32 %v19420_v27, %v24604_v26  ;;  %19441 = vrcp.f32 %v13362_v21  ;;  %v13365_v37 = vpop.xlane.xlu1 %13364  ;;  %v15061_v21 = vld [vmem:[#allocation3 + $0x28] sm:$0xff] }
 0xb2f   :  { %14923 = vrot.lane.b32.xlu0 %v14845_v11, %s19482_s3  ;;  %v17406_v16 = vpop.f32.mrb[138].mxu1  ;;  %v14850_v46 = vmul.f32 %v19422_v59, %v17399_v39  ;;  %v19424_v49 = vpop.eup %19423  ;;  %19443 = vrcp.f32 %v13368_v36  ;;  %v15056_v11 = vld [vmem:[#allocation3] sm:$0xff] }
 0xb30   :  { %v14345_v20 = vpop.f32.mrb[139].mxu1  ;;  %v19426_v22 = vpop.eup %19425  ;;  %v14843_v48 = vmul.f32 %v19424_v49, %v13989_v19  ;;  %19445 = vrcp.f32 %v13359_v24 }
 0xb31   :  { %v1312_v4 = vpop.permute.xlu0 %1311  ;;  %v14852_v10 = vmul.f32 %v19426_v22, %v17406_v16  ;;  %v19428_v26 = vpop.eup %19427  ;;  %19447 = vrcp.f32 %v13365_v37  ;;  %v15057_v16 = vld [vmem:[#allocation3 + $0x8] sm:$0xff]  ;;  %v15060_v22 = vld [vmem:[#allocation3 + $0x20] sm:$0xff] }
 0xb32   :  { %1376 = vst.msk [vmem:[#allocation3 + $0xf8] sm:$0xff] %vm920_vm2, %v1312_v4  ;;  %14917 = vrot.lane.b32.xlu1 %v14842_v2, %s19482_s3  ;;  %v19430_v8 = vpop.eup %19429  ;;  %v14844_v31 = vmul.f32 %v19428_v26, %v24619_v47  ;;  %v13374_v34 = vpop.xlane.xlu1 %13373 }
 0xb33   :  { %14927 = vrot.lane.b32.xlu0 %v14847_v54, %s19482_s3  ;;  %v17413_v6 = vpop.f32.mrb[170].mxu0  ;;  %v14849_v51 = vmul.f32 %v19430_v8, %v14256_v44  ;;  %v19432_v45 = vpop.eup %19431 }
 0xb34   :  { %v14434_v58 = vpop.f32.mrb[171].mxu0  ;;  %v14851_v63 = vmul.f32 %v19432_v45, %v14345_v20  ;;  %v19434_v30 = vpop.eup %19433 }
 0xb35   :  { %v14854_v32 = vmul.f32 %v19434_v30, %v17413_v6  ;;  %v19436_v52 = vpop.eup %19435  ;;  %v15058_v6 = vld [vmem:[#allocation3 + $0x10] sm:$0xff]  ;;  %v15063_v30 = vld [vmem:[#allocation3 + $0x38] sm:$0xff] }
 0xb36   :  { %14915 = vrot.lane.b32.xlu1 %v14841_v61, %s19482_s3  ;;  %v19438_v23 = vpop.eup %19437  ;;  %v13371_v15 = vpop.xlane.xlu1 %13370  ;;  %v15059_v61 = vld [vmem:[#allocation3 + $0x18] sm:$0xff] }
 0xb37   :  { %14933 = vrot.lane.b32.xlu0 %v14850_v46, %s19482_s3  ;;  %v17420_v12 = vpop.f32.mrb[140].mxu1  ;;  %v14853_v17 = vmul.f32 %v19438_v23, %v14434_v58  ;;  %v19440_v47 = vpop.eup %19439  ;;  %19449 = vrcp.f32 %v13371_v15 }
 0xb38   :  { %v14523_v25 = vpop.f32.mrb[141].mxu1  ;;  %v14856_v13 = vmul.f32 %v19436_v52, %v17420_v12  ;;  %v19442_v19 = vpop.eup %19441  ;;  %19451 = vrcp.f32 %v13374_v34  ;;  %v15064_v52 = vld [vmem:[#allocation3 + $0x40] sm:$0xff] }
 0xb39   :  { %v14855_v35 = vmul.f32 %v19440_v47, %v14523_v25  ;;  %v19444_v9 = vpop.eup %19443  ;;  %v15065_v47 = vld [vmem:[#allocation3 + $0x48] sm:$0xff] }
 0xb3a   :  { %14919 = vrot.lane.b32.xlu1 %v14843_v48, %s19482_s3  ;;  %v19446_v41 = vpop.eup %19445 }
 0xb3b   :  { %14937 = vrot.lane.b32.xlu0 %v14852_v10, %s19482_s3  ;;  %v19448_v14 = vpop.eup %19447 }
 0xb3e   :  { %14921 = vrot.lane.b32.xlu1 %v14844_v31, %s19482_s3 }
 0xb3f   :  { %14931 = vrot.lane.b32.xlu0 %v14849_v51, %s19482_s3  ;;  %v17427_v40 = vpop.f32.mrb[172].mxu0 }
 0xb40   :  { %v14612_v33 = vpop.f32.mrb[173].mxu0  ;;  %v14858_v56 = vmul.f32 %v19442_v19, %v17427_v40  ;;  %v15071_v19 = vld [vmem:[#allocation3 + $0x78] sm:$0xff] }
 0xb41   :  { %v14857_v53 = vmul.f32 %v19446_v41, %v14612_v33  ;;  %v19450_v60 = vpop.eup %19449  ;;  %v15062_v33 = vld [vmem:[#allocation3 + $0x30] sm:$0xff] }
 0xb42   :  { %v19452_v43 = vpop.eup %19451 }
 0xb43   :  { %14935 = vrot.lane.b32.xlu0 %v14851_v63, %s19482_s3  ;;  %v17434_v3 = vpop.f32.mrb[142].mxu1 }
 0xb44   :  { %v14701_v7 = vpop.f32.mrb[143].mxu1  ;;  %v14860_v18 = vmul.f32 %v19444_v9, %v17434_v3 }
 0xb45   :  { %v14859_v29 = vmul.f32 %v19448_v14, %v14701_v7 }
 0xb47   :  { %14941 = vrot.lane.b32.xlu0 %v14854_v32, %s19482_s3  ;;  %v17441_v57 = vpop.f32.mrb[174].mxu0 }
 0xb48   :  { %v14790_v55 = vpop.f32.mrb[175].mxu0  ;;  %v14862_v28 = vmul.f32 %v19452_v43, %v17441_v57 }
 0xb49   :  { %v14861_v1 = vmul.f32 %v19450_v60, %v14790_v55 }
 0xb4b   :  { %14945 = vrot.lane.b32.xlu0 %v14856_v13, %s19482_s3 }
 0xb4f   :  { %14939 = vrot.lane.b32.xlu0 %v14853_v17, %s19482_s3  ;;  %v15070_v17 = vld [vmem:[#allocation3 + $0x70] sm:$0xff] }
 0xb53   :  { %14943 = vrot.lane.b32.xlu0 %v14855_v35, %s19482_s3 }
 0xb57   :  { %14949 = vrot.lane.b32.xlu0 %v14858_v56, %s19482_s3 }
 0xb5b   :  { %14953 = vrot.lane.b32.xlu0 %v14860_v18, %s19482_s3 }
 0xb5f   :  { %14947 = vrot.lane.b32.xlu0 %v14857_v53, %s19482_s3  ;;  %v15072_v53 = vld [vmem:[#allocation3 + $0x80] sm:$0xff] }
 0xb63   :  { %14951 = vrot.lane.b32.xlu0 %v14859_v29, %s19482_s3  ;;  %v15073_v29 = vld [vmem:[#allocation3 + $0x88] sm:$0xff] }
 0xb67   :  { %14955 = vrot.lane.b32.xlu0 %v14861_v1, %s19482_s3 }
 0xb6b   :  { %14957 = vrot.lane.b32.xlu0 %v14862_v28, %s19482_s3 }
 0xb7c   :  { %v14898_v39 = vpop.permute.xlu1 %14897 }
 0xb7d   :  { %14993 = vst.msk [vmem:[#allocation4 + $0x8] sm:$0xff] %vm14991_vm6, %v14898_v39  ;;  %v15066_v39 = vld [vmem:[#allocation3 + $0x50] sm:$0xff] }
 0xb80   :  { %v14896_v50 = vpop.permute.xlu1 %14895 }
 0xb81   :  { %14992 = vst.msk [vmem:[#allocation4] sm:$0xff] %vm14991_vm6, %v14896_v50 }
 0xb84   :  { %v14902_v44 = vpop.permute.xlu1 %14901  ;;  %v15025_v38 = vld [vmem:[#allocation4 + $0x8] sm:$0xff] }
 0xb85   :  { %14995 = vst.msk [vmem:[#allocation4 + $0x18] sm:$0xff] %vm14991_vm6, %v14902_v44  ;;  %v15089_v2 = vmul.f32 %v15057_v16, %v15025_v38  ;;  %v15067_v38 = vld [vmem:[#allocation3 + $0x58] sm:$0xff] }
 0xb88   :  { %v14906_v42 = vpop.permute.xlu1 %14905  ;;  %v15024_v62 = vld [vmem:[#allocation4] sm:$0xff] }
 0xb89   :  { %14997 = vst.msk [vmem:[#allocation4 + $0x28] sm:$0xff] %vm14991_vm6, %v14906_v42  ;;  %v15088_v5 = vmul.f32 %v15056_v11, %v15024_v62  ;;  %v15068_v11 = vld [vmem:[#allocation3 + $0x60] sm:$0xff] }
 0xb8b   :  { %17458 = vmatprep.mubr.msk.f32.mxu0 %vm920_vm2, %v15088_v5 }
 0xb8c   :  { %17459 = vmatmul.mubr.msk.f32.vlgmr.msra.gmra.mrb[176].mxu0 %vm920_vm2, %v15089_v2  ;;  %v14900_v20 = vpop.permute.xlu1 %14899  ;;  %v15027_v54 = vld [vmem:[#allocation4 + $0x18] sm:$0xff] }
 0xb8d   :  { %14994 = vst.msk [vmem:[#allocation4 + $0x10] sm:$0xff] %vm14991_vm6, %v14900_v20  ;;  %v15091_v58 = vmul.f32 %v15059_v61, %v15027_v54  ;;  %v15069_v20 = vld [vmem:[#allocation3 + $0x68] sm:$0xff]  ;;  %v15075_v61 = vld [vmem:[#allocation3 + $0x98] sm:$0xff] }
 0xb90   :  { %v14904_v27 = vpop.permute.xlu1 %14903  ;;  %v15029_v46 = vld [vmem:[#allocation4 + $0x28] sm:$0xff] }
 0xb91   :  { %14996 = vst.msk [vmem:[#allocation4 + $0x20] sm:$0xff] %vm14991_vm6, %v14904_v27  ;;  %v15093_v10 = vmul.f32 %v15061_v21, %v15029_v46 }
 0xb94   :  { %v14910_v4 = vpop.permute.xlu1 %14909  ;;  %v15026_v0 = vld [vmem:[#allocation4 + $0x10] sm:$0xff] }
 0xb95   :  { %14999 = vst.msk [vmem:[#allocation4 + $0x38] sm:$0xff] %vm14991_vm6, %v14910_v4  ;;  %v15090_v59 = vmul.f32 %v15058_v6, %v15026_v0  ;;  %v15074_v6 = vld [vmem:[#allocation3 + $0x90] sm:$0xff] }
 0xb97   :  { %17461 = vmatprep.mubr.msk.f32.mxu0 %vm920_vm2, %v15090_v59 }
 0xb98   :  { %17462 = vmatmul.mubr.msk.f32.gmra.mrb[178].mxu0 %vm920_vm2, %v15091_v58  ;;  %v14914_v49 = vpop.permute.xlu1 %14913  ;;  %v15028_v12 = vld [vmem:[#allocation4 + $0x20] sm:$0xff] }
 0xb99   :  { %15001 = vst.msk [vmem:[#allocation4 + $0x48] sm:$0xff] %vm14991_vm6, %v14914_v49  ;;  %v14926_v48 = vpop.permute.xlu0 %14925  ;;  %v15092_v25 = vmul.f32 %v15060_v22, %v15028_v12  ;;  %v15076_v22 = vld [vmem:[#allocation3 + $0xa0] sm:$0xff] }
 0xb9a   :  { %15007 = vst.msk [vmem:[#allocation4 + $0x78] sm:$0xff] %vm14991_vm6, %v14926_v48 }
 0xb9b   :  { %17464 = vmatprep.mubr.msk.f32.mxu0 %vm920_vm2, %v15092_v25  ;;  %v15077_v25 = vld [vmem:[#allocation3 + $0xa8] sm:$0xff] }
 0xb9c   :  { %17465 = vmatmul.mubr.msk.f32.gmra.mrb[180].mxu0 %vm920_vm2, %v15093_v10  ;;  %v14908_v26 = vpop.permute.xlu1 %14907  ;;  %v15031_v36 = vld [vmem:[#allocation4 + $0x38] sm:$0xff] }
 0xb9d   :  { %14998 = vst.msk [vmem:[#allocation4 + $0x30] sm:$0xff] %vm14991_vm6, %v14908_v26  ;;  %v14930_v8 = vpop.permute.xlu0 %14929  ;;  %v15095_v7 = vmul.f32 %v15063_v30, %v15031_v36  ;;  %v15078_v36 = vld [vmem:[#allocation3 + $0xb0] sm:$0xff] }
 0xb9e   :  { %15009 = vst.msk [vmem:[#allocation4 + $0x88] sm:$0xff] %vm14991_vm6, %v14930_v8 }
 0xba0   :  { %v14912_v31 = vpop.permute.xlu1 %14911  ;;  %v15033_v24 = vld [vmem:[#allocation4 + $0x48] sm:$0xff] }
 0xba1   :  { %15000 = vst.msk [vmem:[#allocation4 + $0x40] sm:$0xff] %vm14991_vm6, %v14912_v31  ;;  %v14924_v51 = vpop.permute.xlu0 %14923  ;;  %v15039_v55 = vld [vmem:[#allocation4 + $0x78] sm:$0xff]  ;;  %v15097_v35 = vmul.f32 %v15065_v47, %v15033_v24 }
 0xba2   :  { %15006 = vst.msk [vmem:[#allocation4 + $0x70] sm:$0xff] %vm14991_vm6, %v14924_v51  ;;  %v15103_v56 = vmul.f32 %v15071_v19, %v15039_v55 }
 0xba4   :  { %v14918_v40 = vpop.permute.xlu1 %14917  ;;  %v15030_v45 = vld [vmem:[#allocation4 + $0x30] sm:$0xff] }
 0xba5   :  { %15003 = vst.msk [vmem:[#allocation4 + $0x58] sm:$0xff] %vm14991_vm6, %v14918_v40  ;;  %v14928_v63 = vpop.permute.xlu0 %14927  ;;  %v15094_v3 = vmul.f32 %v15062_v33, %v15030_v45  ;;  %v15041_v9 = vld [vmem:[#allocation4 + $0x88] sm:$0xff]  ;;  %v15079_v45 = vld [vmem:[#allocation3 + $0xb8] sm:$0xff] }
 0xba6   :  { %15008 = vst.msk [vmem:[#allocation4 + $0x80] sm:$0xff] %vm14991_vm6, %v14928_v63  ;;  %v15105_v60 = vmul.f32 %v15073_v29, %v15041_v9  ;;  %v15084_v9 = vld [vmem:[#allocation3 + $0xe0] sm:$0xff]  ;;  %v15086_v29 = vld [vmem:[#allocation3 + $0xf0] sm:$0xff] }
 0xba7   :  { %17467 = vmatprep.mubr.msk.f32.mxu0 %vm920_vm2, %v15094_v3 }
 0xba8   :  { %17468 = vmatmul.mubr.msk.f32.gmra.mrb[182].mxu0 %vm920_vm2, %v15095_v7  ;;  %v14916_v32 = vpop.permute.xlu1 %14915  ;;  %v15032_v57 = vld [vmem:[#allocation4 + $0x40] sm:$0xff] }
 0xba9   :  { %15002 = vst.msk [vmem:[#allocation4 + $0x50] sm:$0xff] %vm14991_vm6, %v14916_v32  ;;  %v14934_v13 = vpop.permute.xlu0 %14933  ;;  %v15096_v37 = vmul.f32 %v15064_v52, %v15032_v57  ;;  %v15038_v23 = vld [vmem:[#allocation4 + $0x70] sm:$0xff]  ;;  %v15080_v7 = vld [vmem:[#allocation3 + $0xc0] sm:$0xff]  ;;  %v15081_v32 = vld [vmem:[#allocation3 + $0xc8] sm:$0xff] }
 0xbaa   :  { %15011 = vst.msk [vmem:[#allocation4 + $0x98] sm:$0xff] %vm14991_vm6, %v14934_v13  ;;  %v15102_v34 = vmul.f32 %v15070_v17, %v15038_v23  ;;  %v15082_v17 = vld [vmem:[#allocation3 + $0xd0] sm:$0xff] }
 0xbab   :  { %17470 = vmatprep.mubr.msk.f32.mxu0 %vm920_vm2, %v15096_v37 }
 0xbac   :  { %17479 = vmatprep.mubr.msk.f32.mxu1 %vm920_vm2, %v15102_v34  ;;  %17471 = vmatmul.mubr.msk.f32.gmra.mrb[184].mxu0 %vm920_vm2, %v15097_v35  ;;  %v14920_v15 = vpop.permute.xlu1 %14919  ;;  %v15035_v1 = vld [vmem:[#allocation4 + $0x58] sm:$0xff] }
 0xbad   :  { %15004 = vst.msk [vmem:[#allocation4 + $0x60] sm:$0xff] %vm14991_vm6, %v14920_v15  ;;  %17480 = vmatmul.mubr.msk.f32.vlgmr.msra.gmra.mrb[144].mxu1 %vm920_vm2, %v15103_v56  ;;  %v14938_v18 = vpop.permute.xlu0 %14937  ;;  %v15040_v41 = vld [vmem:[#allocation4 + $0x80] sm:$0xff]  ;;  %v15099_v42 = vmul.f32 %v15067_v38, %v15035_v1  ;;  %v15083_v34 = vld [vmem:[#allocation3 + $0xd8] sm:$0xff] }
 0xbae   :  { %15013 = vst.msk [vmem:[#allocation4 + $0xa8] sm:$0xff] %vm14991_vm6, %v14938_v18  ;;  %v15104_v14 = vmul.f32 %v15072_v53, %v15040_v41  ;;  %v15085_v41 = vld [vmem:[#allocation3 + $0xe8] sm:$0xff] }
 0xbb0   :  { %17482 = vmatprep.mubr.msk.f32.mxu1 %vm920_vm2, %v15104_v14  ;;  %v14922_v43 = vpop.permute.xlu1 %14921  ;;  %v15034_v28 = vld [vmem:[#allocation4 + $0x50] sm:$0xff] }
 0xbb1   :  { %15005 = vst.msk [vmem:[#allocation4 + $0x68] sm:$0xff] %vm14991_vm6, %v14922_v43  ;;  %17483 = vmatmul.mubr.msk.f32.gmra.mrb[146].mxu1 %vm920_vm2, %v15105_v60  ;;  %v14932_v50 = vpop.permute.xlu0 %14931  ;;  %v15098_v44 = vmul.f32 %v15066_v39, %v15034_v28  ;;  %v15043_v27 = vld [vmem:[#allocation4 + $0x98] sm:$0xff]  ;;  %v24726_v39 = vld [vmem:[%s24811_s7] ss:$0 sm:$0xff]  ;;  %s19488_s7 = smov [#allocation5]  }
 0xbb2   :  { %15010 = vst.msk [vmem:[#allocation4 + $0x90] sm:$0xff] %vm14991_vm6, %v14932_v50  ;;  %v15107_v58 = vmul.f32 %v15075_v61, %v15043_v27  ;;  %v15087_v43 = vld [vmem:[#allocation3 + $0xf8] sm:$0xff]  ;;  %s15493_s10 = sshll.u32 %s19488_s7, 4  ;;  %s15494_s10 = int_to_ptr.vmem [resolvable:$true] %s15493_s10 }
 0xbb3   :  { %17473 = vmatprep.mubr.msk.f32.mxu0 %vm920_vm2, %v15098_v44  ;;  %s19456_s11 = scalar_lea.vmem %s15494_s10, 4096  ;;  %p19461_p1 = scmp.lt.s32.totalorder %s15494_s10, %s15494_s10 }
 0xbb4   :  { %17474 = vmatmul.mubr.msk.f32.gmra.mrb[186].mxu0 %vm920_vm2, %v15099_v42  ;;  %v15036_v62 = vld [vmem:[#allocation4 + $0x60] sm:$0xff]  ;;  %p19457_p0 = scmp.ne.s32.totalorder %s15494_s10, %s19456_s11  ;;  %p19462_p2 = scmp.lt.s32.totalorder %s19456_s11, %s19456_s11 }
 0xbb5   :  { %v14936_v5 = vpop.permute.xlu0 %14935  ;;  %v15100_v16 = vmul.f32 %v15068_v11, %v15036_v62  ;;  %v15045_v46 = vld [vmem:[#allocation4 + $0xa8] sm:$0xff] }
 0xbb6   :  { %15012 = vst.msk [vmem:[#allocation4 + $0xa0] sm:$0xff] %vm14991_vm6, %v14936_v5  ;;  %v15109_v21 = vmul.f32 %v15077_v25, %v15045_v46  ;;  %p19463_p3 = por %p19462_p2, %p19461_p1 }
 0xbb7   :  { %17476 = vmatprep.mubr.msk.f32.mxu0 %vm920_vm2, %v15100_v16 }
 0xbb8   :  { %v15037_v2 = vld [vmem:[#allocation4 + $0x68] sm:$0xff]  ;;  %p19464_p4 = pnand %p19463_p3, %p19457_p0 }
 0xbb9   :  { %v14942_v54 = vpop.permute.xlu0 %14941  ;;  %v15101_v4 = vmul.f32 %v15069_v20, %v15037_v2  ;;  %v15042_v0 = vld [vmem:[#allocation4 + $0x90] sm:$0xff] }
 0xbba   :  { %15015 = vst.msk [vmem:[#allocation4 + $0xb8] sm:$0xff] %vm14991_vm6, %v14942_v54  ;;  %v15106_v59 = vmul.f32 %v15074_v6, %v15042_v0 }
 0xbbb   :  { %17477 = vmatmul.mubr.msk.f32.gmra.mrb[188].mxu0 %vm920_vm2, %v15101_v4 }
 0xbbc   :  { %17485 = vmatprep.mubr.msk.f32.mxu1 %vm920_vm2, %v15106_v59 }
 0xbbd   :  { %17486 = vmatmul.mubr.msk.f32.gmra.mrb[148].mxu1 %vm920_vm2, %v15107_v58  ;;  %v14946_v49 = vpop.permute.xlu0 %14945  ;;  %v15044_v12 = vld [vmem:[#allocation4 + $0xa0] sm:$0xff] }
 0xbbe   :  { %15017 = vst.msk [vmem:[#allocation4 + $0xc8] sm:$0xff] %vm14991_vm6, %v14946_v49  ;;  %v15108_v48 = vmul.f32 %v15076_v22, %v15044_v12 }
 0xbc0   :  { %17488 = vmatprep.mubr.msk.f32.mxu1 %vm920_vm2, %v15108_v48 }
 0xbc1   :  { %17489 = vmatmul.mubr.msk.f32.gmra.mrb[150].mxu1 %vm920_vm2, %v15109_v21  ;;  %v14940_v10 = vpop.permute.xlu0 %14939  ;;  %v15047_v8 = vld [vmem:[#allocation4 + $0xb8] sm:$0xff] }
 0xbc2   :  { %15014 = vst.msk [vmem:[#allocation4 + $0xb0] sm:$0xff] %vm14991_vm6, %v14940_v10  ;;  %v15111_v33 = vmul.f32 %v15079_v45, %v15047_v8 }
 0xbc5   :  { %v14944_v26 = vpop.permute.xlu0 %14943  ;;  %v15049_v63 = vld [vmem:[#allocation4 + $0xc8] sm:$0xff] }
 0xbc6   :  { %15016 = vst.msk [vmem:[#allocation4 + $0xc0] sm:$0xff] %vm14991_vm6, %v14944_v26  ;;  %v15113_v57 = vmul.f32 %v15081_v32, %v15049_v63 }
 0xbc9   :  { %v14950_v31 = vpop.permute.xlu0 %14949  ;;  %v15046_v51 = vld [vmem:[#allocation4 + $0xb0] sm:$0xff] }
 0xbca   :  { %15019 = vst.msk [vmem:[#allocation4 + $0xd8] sm:$0xff] %vm14991_vm6, %v14950_v31  ;;  %v15110_v40 = vmul.f32 %v15078_v36, %v15046_v51 }
 0xbcc   :  { %17491 = vmatprep.mubr.msk.f32.mxu1 %vm920_vm2, %v15110_v40 }
 0xbcd   :  { %17492 = vmatmul.mubr.msk.f32.gmra.mrb[152].mxu1 %vm920_vm2, %v15111_v33  ;;  %v14954_v3 = vpop.permute.xlu0 %14953  ;;  %v15048_v30 = vld [vmem:[#allocation4 + $0xc0] sm:$0xff] }
 0xbce   :  { %15021 = vst.msk [vmem:[#allocation4 + $0xe8] sm:$0xff] %vm14991_vm6, %v14954_v3  ;;  %v15112_v24 = vmul.f32 %v15080_v7, %v15048_v30 }
 0xbd0   :  { %17494 = vmatprep.mubr.msk.f32.mxu1 %vm920_vm2, %v15112_v24 }
 0xbd1   :  { %17495 = vmatmul.mubr.msk.f32.gmra.mrb[154].mxu1 %vm920_vm2, %v15113_v57  ;;  %v14948_v52 = vpop.permute.xlu0 %14947  ;;  %v15051_v13 = vld [vmem:[#allocation4 + $0xd8] sm:$0xff] }
 0xbd2   :  { %15018 = vst.msk [vmem:[#allocation4 + $0xd0] sm:$0xff] %vm14991_vm6, %v14948_v52  ;;  %v15115_v35 = vmul.f32 %v15083_v34, %v15051_v13 }
 0xbd5   :  { %v14952_v55 = vpop.permute.xlu0 %14951  ;;  %v15053_v19 = vld [vmem:[#allocation4 + $0xe8] sm:$0xff] }
 0xbd6   :  { %15020 = vst.msk [vmem:[#allocation4 + $0xe0] sm:$0xff] %vm14991_vm6, %v14952_v55  ;;  %v15117_v53 = vmul.f32 %v15085_v41, %v15053_v19 }
 0xbd9   :  { %v14956_v37 = vpop.permute.xlu0 %14955  ;;  %v15050_v23 = vld [vmem:[#allocation4 + $0xd0] sm:$0xff] }
 0xbda   :  { %15022 = vst.msk [vmem:[#allocation4 + $0xf0] sm:$0xff] %vm14991_vm6, %v14956_v37  ;;  %v15114_v47 = vmul.f32 %v15082_v17, %v15050_v23 }
 0xbdc   :  { %17497 = vmatprep.mubr.msk.f32.mxu1 %vm920_vm2, %v15114_v47 }
 0xbdd   :  { %17498 = vmatmul.mubr.msk.f32.gmra.mrb[156].mxu1 %vm920_vm2, %v15115_v35  ;;  %v14958_v56 = vpop.permute.xlu0 %14957  ;;  %v15052_v15 = vld [vmem:[#allocation4 + $0xe0] sm:$0xff] }
 0xbde   :  { %15023 = vst.msk [vmem:[#allocation4 + $0xf8] sm:$0xff] %vm14991_vm6, %v14958_v56  ;;  %v15116_v18 = vmul.f32 %v15084_v9, %v15052_v15 }
 0xbe0   :  { %17500 = vmatprep.mubr.msk.f32.mxu1 %vm920_vm2, %v15116_v18 }
 0xbe1   :  { %17501 = vmatmul.mubr.msk.f32.gmra.mrb[158].mxu1 %vm920_vm2, %v15117_v53  ;;  %v15054_v14 = vld [vmem:[#allocation4 + $0xf0] sm:$0xff] }
 0xbe2   :  { %v15118_v60 = vmul.f32 %v15086_v29, %v15054_v14 }
 0xbe4   :  { %17503 = vmatprep.mubr.msk.f32.mxu1 %vm920_vm2, %v15118_v60 }
 0xbe5   :  { %v15055_v1 = vld [vmem:[#allocation4 + $0xf8] sm:$0xff] }
 0xbe6   :  { %v15119_v28 = vmul.f32 %v15087_v43, %v15055_v1 }
 0xbe8   :  { %17504 = vmatmul.mubr.msk.f32.gmra.mrb[160].mxu1 %vm920_vm2, %v15119_v28 }
 0xc5f   :  { %v17460_v50 = vpop.f32.mrb[176].mxu0 }
 0xc60   :  { %v15303_v44 = vadd.f32 %v17460_v50, %v24726_v39  ;;  %v15297_v38 = vpop.f32.mrb[177].mxu0 }
 0xc61   :  { %v15298_v42 = vadd.f32 %v24726_v39, %v15297_v38 }
 0xc62   :  { %15457 = vst.msk [vmem:[#allocation5 + $0x8] sm:$0xff] %vm62_vm0, %v15303_v44 }
 0xc63   :  { %15456 = vst.msk [vmem:[#allocation5] sm:$0xff] %vm62_vm0, %v15298_v42 }
 0xc6b   :  { %v17463_v62 = vpop.f32.mrb[178].mxu0 }
 0xc6c   :  { %v15313_v11 = vadd.f32 %v17463_v62, %v24726_v39  ;;  %v15307_v5 = vpop.f32.mrb[179].mxu0 }
 0xc6d   :  { %v15308_v16 = vadd.f32 %v24726_v39, %v15307_v5 }
 0xc6e   :  { %15459 = vst.msk [vmem:[#allocation5 + $0x18] sm:$0xff] %vm62_vm0, %v15313_v11 }
 0xc6f   :  { %15458 = vst.msk [vmem:[#allocation5 + $0x10] sm:$0xff] %vm62_vm0, %v15308_v16  ;;  %v17466_v2 = vpop.f32.mrb[180].mxu0 }
 0xc70   :  { %v15323_v20 = vadd.f32 %v17466_v2, %v24726_v39  ;;  %v15317_v27 = vpop.f32.mrb[181].mxu0 }
 0xc71   :  { %v15318_v54 = vadd.f32 %v24726_v39, %v15317_v27 }
 0xc72   :  { %15461 = vst.msk [vmem:[#allocation5 + $0x28] sm:$0xff] %vm62_vm0, %v15323_v20 }
 0xc73   :  { %15460 = vst.msk [vmem:[#allocation5 + $0x20] sm:$0xff] %vm62_vm0, %v15318_v54 }
 0xc7b   :  { %v17469_v4 = vpop.f32.mrb[182].mxu0 }
 0xc7c   :  { %v15333_v0 = vadd.f32 %v17469_v4, %v24726_v39  ;;  %v15327_v6 = vpop.f32.mrb[183].mxu0 }
 0xc7d   :  { %v15328_v59 = vadd.f32 %v24726_v39, %v15327_v6 }
 0xc7e   :  { %15463 = vst.msk [vmem:[#allocation5 + $0x38] sm:$0xff] %vm62_vm0, %v15333_v0 }
 0xc7f   :  { %15462 = vst.msk [vmem:[#allocation5 + $0x30] sm:$0xff] %vm62_vm0, %v15328_v59  ;;  %v17472_v61 = vpop.f32.mrb[184].mxu0 }
 0xc80   :  { %v15343_v58 = vadd.f32 %v17472_v61, %v24726_v39  ;;  %v17481_v46 = vpop.f32.mrb[144].mxu1  ;;  %v15337_v49 = vpop.f32.mrb[185].mxu0 }
 0xc81   :  { %v15373_v12 = vadd.f32 %v17481_v46, %v24726_v39  ;;  %v15338_v22 = vadd.f32 %v24726_v39, %v15337_v49  ;;  %v15367_v48 = vpop.f32.mrb[145].mxu1 }
 0xc82   :  { %15465 = vst.msk [vmem:[#allocation5 + $0x48] sm:$0xff] %vm62_vm0, %v15343_v58  ;;  %v15368_v25 = vadd.f32 %v24726_v39, %v15367_v48 }
 0xc83   :  { %15471 = vst.msk [vmem:[#allocation5 + $0x78] sm:$0xff] %vm62_vm0, %v15373_v12  ;;  %15464 = vst.msk [vmem:[#allocation5 + $0x40] sm:$0xff] %vm62_vm0, %v15338_v22 }
 0xc84   :  { %15470 = vst.msk [vmem:[#allocation5 + $0x70] sm:$0xff] %vm62_vm0, %v15368_v25  ;;  %v17484_v21 = vpop.f32.mrb[146].mxu1 }
 0xc85   :  { %v15383_v10 = vadd.f32 %v17484_v21, %v24726_v39  ;;  %v15377_v26 = vpop.f32.mrb[147].mxu1 }
 0xc86   :  { %v15378_v8 = vadd.f32 %v24726_v39, %v15377_v26 }
 0xc87   :  { %15473 = vst.msk [vmem:[#allocation5 + $0x88] sm:$0xff] %vm62_vm0, %v15383_v10  ;;  %v17475_v31 = vpop.f32.mrb[186].mxu0 }
 0xc88   :  { %15472 = vst.msk [vmem:[#allocation5 + $0x80] sm:$0xff] %vm62_vm0, %v15378_v8  ;;  %v15353_v51 = vadd.f32 %v17475_v31, %v24726_v39  ;;  %v15347_v36 = vpop.f32.mrb[187].mxu0 }
 0xc89   :  { %v15348_v40 = vadd.f32 %v24726_v39, %v15347_v36 }
 0xc8a   :  { %15467 = vst.msk [vmem:[#allocation5 + $0x58] sm:$0xff] %vm62_vm0, %v15353_v51 }
 0xc8b   :  { %15466 = vst.msk [vmem:[#allocation5 + $0x50] sm:$0xff] %vm62_vm0, %v15348_v40 }
 0xc8e   :  { %v17478_v45 = vpop.f32.mrb[188].mxu0 }
 0xc8f   :  { %v15363_v33 = vadd.f32 %v17478_v45, %v24726_v39  ;;  %v15357_v63 = vpop.f32.mrb[189].mxu0 }
 0xc90   :  { %v15358_v3 = vadd.f32 %v24726_v39, %v15357_v63  ;;  %v17487_v30 = vpop.f32.mrb[148].mxu1 }
 0xc91   :  { %15469 = vst.msk [vmem:[#allocation5 + $0x68] sm:$0xff] %vm62_vm0, %v15363_v33  ;;  %v15393_v7 = vadd.f32 %v17487_v30, %v24726_v39  ;;  %v15387_v24 = vpop.f32.mrb[149].mxu1 }
 0xc92   :  { %15468 = vst.msk [vmem:[#allocation5 + $0x60] sm:$0xff] %vm62_vm0, %v15358_v3  ;;  %v15388_v32 = vadd.f32 %v24726_v39, %v15387_v24 }
 0xc93   :  { %15475 = vst.msk [vmem:[#allocation5 + $0x98] sm:$0xff] %vm62_vm0, %v15393_v7 }
 0xc94   :  { %15474 = vst.msk [vmem:[#allocation5 + $0x90] sm:$0xff] %vm62_vm0, %v15388_v32  ;;  %v17490_v57 = vpop.f32.mrb[150].mxu1 }
 0xc95   :  { %v15403_v52 = vadd.f32 %v17490_v57, %v24726_v39  ;;  %v15397_v55 = vpop.f32.mrb[151].mxu1 }
 0xc96   :  { %v15398_v13 = vadd.f32 %v24726_v39, %v15397_v55 }
 0xc97   :  { %15477 = vst.msk [vmem:[#allocation5 + $0xa8] sm:$0xff] %vm62_vm0, %v15403_v52 }
 0xc98   :  { %15476 = vst.msk [vmem:[#allocation5 + $0xa0] sm:$0xff] %vm62_vm0, %v15398_v13 }
 0xca0   :  { %v17493_v37 = vpop.f32.mrb[152].mxu1 }
 0xca1   :  { %v15413_v23 = vadd.f32 %v17493_v37, %v24726_v39  ;;  %v15407_v17 = vpop.f32.mrb[153].mxu1 }
 0xca2   :  { %v15408_v47 = vadd.f32 %v24726_v39, %v15407_v17 }
 0xca3   :  { %15479 = vst.msk [vmem:[#allocation5 + $0xb8] sm:$0xff] %vm62_vm0, %v15413_v23 }
 0xca4   :  { %15478 = vst.msk [vmem:[#allocation5 + $0xb0] sm:$0xff] %vm62_vm0, %v15408_v47  ;;  %v17496_v34 = vpop.f32.mrb[154].mxu1 }
 0xca5   :  { %v15423_v35 = vadd.f32 %v17496_v34, %v24726_v39  ;;  %v15417_v19 = vpop.f32.mrb[155].mxu1 }
 0xca6   :  { %v15418_v56 = vadd.f32 %v24726_v39, %v15417_v19 }
 0xca7   :  { %15481 = vst.msk [vmem:[#allocation5 + $0xc8] sm:$0xff] %vm62_vm0, %v15423_v35 }
 0xca8   :  { %15480 = vst.msk [vmem:[#allocation5 + $0xc0] sm:$0xff] %vm62_vm0, %v15418_v56 }
 0xcb0   :  { %v17499_v15 = vpop.f32.mrb[156].mxu1 }
 0xcb1   :  { %v15433_v9 = vadd.f32 %v17499_v15, %v24726_v39  ;;  %v15427_v18 = vpop.f32.mrb[157].mxu1 }
 0xcb2   :  { %v15428_v41 = vadd.f32 %v24726_v39, %v15427_v18 }
 0xcb3   :  { %15483 = vst.msk [vmem:[#allocation5 + $0xd8] sm:$0xff] %vm62_vm0, %v15433_v9 }
 0xcb4   :  { %15482 = vst.msk [vmem:[#allocation5 + $0xd0] sm:$0xff] %vm62_vm0, %v15428_v41  ;;  %v17502_v53 = vpop.f32.mrb[158].mxu1 }
 0xcb5   :  { %v15443_v14 = vadd.f32 %v17502_v53, %v24726_v39  ;;  %v15437_v29 = vpop.f32.mrb[159].mxu1 }
 0xcb6   :  { %v15438_v60 = vadd.f32 %v24726_v39, %v15437_v29 }
 0xcb7   :  { %15485 = vst.msk [vmem:[#allocation5 + $0xe8] sm:$0xff] %vm62_vm0, %v15443_v14 }
 0xcb8   :  { %15484 = vst.msk [vmem:[#allocation5 + $0xe0] sm:$0xff] %vm62_vm0, %v15438_v60 }
 0xcbb   :  { %v17505_v1 = vpop.f32.mrb[160].mxu1 }
 0xcbc   :  { %v15453_v43 = vadd.f32 %v17505_v1, %v24726_v39  ;;  %v15447_v28 = vpop.f32.mrb[161].mxu1 }
 0xcbd   :  { %v15448_v50 = vadd.f32 %v24726_v39, %v15447_v28 }
 0xcbe   :  { %15487 = vst.msk [vmem:[#allocation5 + $0xf8] sm:$0xff] %vm62_vm0, %v15453_v43 }
 0xcbf   :  { %15486 = vst.msk [vmem:[#allocation5 + $0xf0] sm:$0xff] %vm62_vm0, %v15448_v50 }
 0xcc0   :  { %19467 = shalt.err (!%p19464_p4)
}
 0xcc1   :  { %s19468_s13 = scalar_lea.hbm %s24812_s8, 4096 }
 0xcc2   :  { %p19469_p5 = scmp.ne.s32.totalorder %s24812_s8, %s19468_s13  ;;  %p19472_p6 = scmp.lt.u32.totalorder %s19468_s13, %s24812_s8 }
 0xcc4   :  { %p19474_p7 = pnand %p19472_p6, %p19469_p5 }
 0xcc6   :  { %19477 = shalt.err (!%p19474_p7)
}
 0xcc7   :  { %s19489_s4 = smov 128   ;;  %s19490_s18 = smov 8  }
 0xcc8   :  { %15499 = dma.vmem_to_hbm [thread:$0]  %s15494_s10, 4096, %s24812_s8, [#allocation6], %s19489_s4, %s19489_s4, %s19490_s18  }
 0xcc9   :  { %19478 = dma.done.wait [#allocation6], 4096  }
 0xcca   :  { %19479 = vsyncadd [#allocation6], 4294963200 }
 0xccb   :  { %15503 = vsyncpa [#allocation6], 1 }

</bundles_post_ra>
